<compile_context>
chip_gen: v6e
topology: v6e:2x2x1
jax: 0.10.0
libtpu: 0.0.40
codegen_flags: <defaults>
</compile_context>

<pallas_src>
import jax
import jax.numpy as jnp
from jax.experimental import pallas as pl
from jax.experimental.pallas import tpu as pltpu

KH = KW = 3  # 3x3 kernel, stride 1, padding 1.


def _make_conv3x3_bias_relu_kernel(cin, cout, h, wp):
    """Kernel factory: in-VMEM im2col + one (Cout,9*Cin)@(9*Cin,H*Wp) matmul."""
    m = h * wp  # output columns per image (incl. 2 garbage cols per row)

    def kernel(x_ref, w_ref, b_ref, o_ref, lhs_ref):
        # x_ref  : (1, Cin, (H+3)*(W+2))  flattened zero-padded image (channel-major)
        # w_ref  : (Cout, 9*Cin)          packed weights, col = (ih*3+iw)*Cin + c
        # b_ref  : (Cout, 1)
        # o_ref  : (1, Cout, H*Wp)
        # lhs_ref: (9*Cin, H*Wp)          VMEM scratch (im2col, tap-major rows)
        for tap in range(KH * KW):
            ih, iw = divmod(tap, KW)
            off = ih * wp + iw          # lane shift of this tap in the flat image
            lhs_ref[tap * cin:(tap + 1) * cin, :] = x_ref[0, :, off:off + m]
        acc = jnp.dot(w_ref[...], lhs_ref[...],
                      preferred_element_type=jnp.float32,
                      precision=jax.lax.Precision.HIGHEST)
        o_ref[0, :, :] = jnp.maximum(acc + b_ref[...], 0.0).astype(o_ref.dtype)

    return kernel


def pack_params(w_oihw, bias):
    """One-time parameter prep: (Cout,Cin,3,3) -> (Cout, 9*Cin), bias -> (Cout,1)."""
    cout, cin, kh, kw = w_oihw.shape
    assert (kh, kw) == (KH, KW)
    w_packed = (jnp.transpose(w_oihw, (0, 2, 3, 1))        # (Cout, kh, kw, Cin)
                .reshape(cout, kh * kw * cin)
                .astype(jnp.float32))
    b_packed = bias.reshape(cout, 1).astype(jnp.float32)
    return w_packed, b_packed


@jax.jit
def conv2d_relu(x_nchw, w_packed, b_packed):
    """Conv2d(Cin->Cout, 3x3, stride 1, padding 1) + ReLU; NCHW in, NCHW out."""
    n, cin, h, w = x_nchw.shape
    cout = w_packed.shape[0]
    wp = w + 2                      # padded width (row stride of the flat image)
    hp = h + 3                      # pad H by (1, 2): extra zero row keeps the
                                    # bottom-right tap's shifted window in-bounds
    m = h * wp                      # columns the kernel produces per image

    x_pad = jnp.pad(x_nchw.astype(jnp.float32),
                    ((0, 0), (0, 0), (1, 2), (1, 1)))      # (N, Cin, H+3, W+2)
    x_flat = x_pad.reshape(n, cin, hp * wp)                # contiguous -> free

    kernel = _make_conv3x3_bias_relu_kernel(cin, cout, h, wp)
    out = pl.pallas_call(
        kernel,
        out_shape=jax.ShapeDtypeStruct((n, cout, m), jnp.float32),
        grid_spec=pltpu.PrefetchScalarGridSpec(
            num_scalar_prefetch=0,
            grid=(n,),
            in_specs=[
                pl.BlockSpec((1, cin, hp * wp), lambda nb: (nb, 0, 0)),
                pl.BlockSpec((cout, KH * KW * cin), lambda nb: (0, 0)),
                pl.BlockSpec((cout, 1), lambda nb: (0, 0)),
            ],
            out_specs=pl.BlockSpec((1, cout, m), lambda nb: (nb, 0, 0)),
            scratch_shapes=[pltpu.VMEM((KH * KW * cin, m), jnp.float32)],
        ),
        compiler_params=pltpu.CompilerParams(
            dimension_semantics=("parallel",)),
    )(x_flat, w_packed, b_packed)

    # (N, Cout, H, Wp) -> drop the 2 garbage border columns of each row -> NCHW.
    return out.reshape(n, cout, h, wp)[..., :w]


def _reference(x_nchw, w_oihw, bias):
    """Plain-JAX reference (lax conv) for correctness checking."""
    y = jax.lax.conv_general_dilated(
        x_nchw.astype(jnp.float32), w_oihw.astype(jnp.float32),
        window_strides=(1, 1), padding=((1, 1), (1, 1)),
        dimension_numbers=("NCHW", "OIHW", "NCHW"),
        precision=jax.lax.Precision.HIGHEST)
    y = y + bias.reshape(1, -1, 1, 1)
    return jnp.maximum(y, 0.0)


if __name__ == "__main__":
    key = jax.random.PRNGKey(0)
    k_x, k_w, k_b = jax.random.split(key, 3)

    N, CIN, H, W = 1, 48, 13, 13
    COUT = 192

    # Deterministic synthetic parameters (PyTorch-like uniform init scale).
    fan_in = CIN * KH * KW
    bound = 1.0 / (fan_in ** 0.5)
    x35 = jax.random.normal(k_x, (N, CIN, H, W), dtype=jnp.float32)
    w = jax.random.uniform(k_w, (COUT, CIN, KH, KW), jnp.float32, -bound, bound)
    b = jax.random.uniform(k_b, (COUT,), jnp.float32, -bound, bound)

    # One-time parameter prep (outside the per-call path).
    w_packed, b_packed = pack_params(w, b)

    out = jax.block_until_ready(conv2d_relu(x35, w_packed, b_packed))

    ref = jax.block_until_ready(_reference(x35, w, b))
    assert out.shape == (N, COUT, H, W), out.shape
    assert jnp.allclose(out, ref, atol=1e-4, rtol=1e-4), "mismatch vs reference"

    print("KERNEL_OK")
</pallas_src>

<mosaic_0001>
module attributes {stable_mosaic.version = 11 : i64} {
  func.func @kernel(%arg0: i32, %arg1: memref<1x48x240xf32, #tpu.memory_space<vmem>>, %arg2: memref<192x432xf32, #tpu.memory_space<vmem>>, %arg3: memref<192x1xf32, #tpu.memory_space<vmem>>, %arg4: memref<1x192x195xf32, #tpu.memory_space<vmem>>, %arg5: memref<432x195xf32, #tpu.memory_space<vmem>>) attributes {dimension_semantics = [#tpu.dimension_semantics<parallel>], iteration_bounds = array<i64: 1>, scalar_prefetch = 0 : i64, scratch_operands = 1 : i64, tpu.core_type = #tpu.core_type<tc>, window_params = [{transform_indices = @transform_0, window_bounds = array<i64: 1, 48, 240>}, {pipeline_mode = #tpu.pipeline_mode<synchronous>, transform_indices = @transform_1, window_bounds = array<i64: 192, 432>}, {pipeline_mode = #tpu.pipeline_mode<synchronous>, transform_indices = @transform_2, window_bounds = array<i64: 192, 1>}, {transform_indices = @transform_3, window_bounds = array<i64: 1, 192, 195>}]} {
    %c0 = arith.constant 0 : index
    %c0_0 = arith.constant 0 : index
    %c0_1 = arith.constant 0 : index
    %0 = vector.load %arg1[%c0, %c0_0, %c0_1] : memref<1x48x240xf32, #tpu.memory_space<vmem>>, vector<1x48x195xf32>
    %1 = vector.shape_cast %0 : vector<1x48x195xf32> to vector<48x195xf32>
    %c0_2 = arith.constant 0 : index
    %c0_3 = arith.constant 0 : index
    %2 = vector.load %arg5[%c0_2, %c0_3] : memref<432x195xf32, #tpu.memory_space<vmem>>, vector<48x195xf32>
    tpu.vector_store %arg5[%c0_2, %c0_3], %1 {strides = array<i32>} : memref<432x195xf32, #tpu.memory_space<vmem>>, vector<48x195xf32>,
    %c0_4 = arith.constant 0 : index
    %c0_5 = arith.constant 0 : index
    %c1 = arith.constant 1 : index
    %3 = vector.load %arg1[%c0_4, %c0_5, %c1] : memref<1x48x240xf32, #tpu.memory_space<vmem>>, vector<1x48x195xf32>
    %4 = vector.shape_cast %3 : vector<1x48x195xf32> to vector<48x195xf32>
    %c48 = arith.constant 48 : index
    %c0_6 = arith.constant 0 : index
    %5 = vector.load %arg5[%c48, %c0_6] : memref<432x195xf32, #tpu.memory_space<vmem>>, vector<48x195xf32>
    tpu.vector_store %arg5[%c48, %c0_6], %4 {strides = array<i32>} : memref<432x195xf32, #tpu.memory_space<vmem>>, vector<48x195xf32>,
    %c0_7 = arith.constant 0 : index
    %c0_8 = arith.constant 0 : index
    %c2 = arith.constant 2 : index
    %6 = vector.load %arg1[%c0_7, %c0_8, %c2] : memref<1x48x240xf32, #tpu.memory_space<vmem>>, vector<1x48x195xf32>
    %7 = vector.shape_cast %6 : vector<1x48x195xf32> to vector<48x195xf32>
    %c96 = arith.constant 96 : index
    %c0_9 = arith.constant 0 : index
    %8 = vector.load %arg5[%c96, %c0_9] : memref<432x195xf32, #tpu.memory_space<vmem>>, vector<48x195xf32>
    tpu.vector_store %arg5[%c96, %c0_9], %7 {strides = array<i32>} : memref<432x195xf32, #tpu.memory_space<vmem>>, vector<48x195xf32>,
    %c0_10 = arith.constant 0 : index
    %c0_11 = arith.constant 0 : index
    %c15 = arith.constant 15 : index
    %9 = vector.load %arg1[%c0_10, %c0_11, %c15] : memref<1x48x240xf32, #tpu.memory_space<vmem>>, vector<1x48x195xf32>
    %10 = vector.shape_cast %9 : vector<1x48x195xf32> to vector<48x195xf32>
    %c144 = arith.constant 144 : index
    %c0_12 = arith.constant 0 : index
    %11 = vector.load %arg5[%c144, %c0_12] : memref<432x195xf32, #tpu.memory_space<vmem>>, vector<48x195xf32>
    tpu.vector_store %arg5[%c144, %c0_12], %10 {strides = array<i32>} : memref<432x195xf32, #tpu.memory_space<vmem>>, vector<48x195xf32>,
    %c0_13 = arith.constant 0 : index
    %c0_14 = arith.constant 0 : index
    %c16 = arith.constant 16 : index
    %12 = vector.load %arg1[%c0_13, %c0_14, %c16] : memref<1x48x240xf32, #tpu.memory_space<vmem>>, vector<1x48x195xf32>
    %13 = vector.shape_cast %12 : vector<1x48x195xf32> to vector<48x195xf32>
    %c192 = arith.constant 192 : index
    %c0_15 = arith.constant 0 : index
    %14 = vector.load %arg5[%c192, %c0_15] : memref<432x195xf32, #tpu.memory_space<vmem>>, vector<48x195xf32>
    tpu.vector_store %arg5[%c192, %c0_15], %13 {strides = array<i32>} : memref<432x195xf32, #tpu.memory_space<vmem>>, vector<48x195xf32>,
    %c0_16 = arith.constant 0 : index
    %c0_17 = arith.constant 0 : index
    %c17 = arith.constant 17 : index
    %15 = vector.load %arg1[%c0_16, %c0_17, %c17] : memref<1x48x240xf32, #tpu.memory_space<vmem>>, vector<1x48x195xf32>
    %16 = vector.shape_cast %15 : vector<1x48x195xf32> to vector<48x195xf32>
    %c240 = arith.constant 240 : index
    %c0_18 = arith.constant 0 : index
    %17 = vector.load %arg5[%c240, %c0_18] : memref<432x195xf32, #tpu.memory_space<vmem>>, vector<48x195xf32>
    tpu.vector_store %arg5[%c240, %c0_18], %16 {strides = array<i32>} : memref<432x195xf32, #tpu.memory_space<vmem>>, vector<48x195xf32>,
    %c0_19 = arith.constant 0 : index
    %c0_20 = arith.constant 0 : index
    %c30 = arith.constant 30 : index
    %18 = vector.load %arg1[%c0_19, %c0_20, %c30] : memref<1x48x240xf32, #tpu.memory_space<vmem>>, vector<1x48x195xf32>
    %19 = vector.shape_cast %18 : vector<1x48x195xf32> to vector<48x195xf32>
    %c288 = arith.constant 288 : index
    %c0_21 = arith.constant 0 : index
    %20 = vector.load %arg5[%c288, %c0_21] : memref<432x195xf32, #tpu.memory_space<vmem>>, vector<48x195xf32>
    tpu.vector_store %arg5[%c288, %c0_21], %19 {strides = array<i32>} : memref<432x195xf32, #tpu.memory_space<vmem>>, vector<48x195xf32>,
    %c0_22 = arith.constant 0 : index
    %c0_23 = arith.constant 0 : index
    %c31 = arith.constant 31 : index
    %21 = vector.load %arg1[%c0_22, %c0_23, %c31] : memref<1x48x240xf32, #tpu.memory_space<vmem>>, vector<1x48x195xf32>
    %22 = vector.shape_cast %21 : vector<1x48x195xf32> to vector<48x195xf32>
    %c336 = arith.constant 336 : index
    %c0_24 = arith.constant 0 : index
    %23 = vector.load %arg5[%c336, %c0_24] : memref<432x195xf32, #tpu.memory_space<vmem>>, vector<48x195xf32>
    tpu.vector_store %arg5[%c336, %c0_24], %22 {strides = array<i32>} : memref<432x195xf32, #tpu.memory_space<vmem>>, vector<48x195xf32>,
    %c0_25 = arith.constant 0 : index
    %c0_26 = arith.constant 0 : index
    %c32 = arith.constant 32 : index
    %24 = vector.load %arg1[%c0_25, %c0_26, %c32] : memref<1x48x240xf32, #tpu.memory_space<vmem>>, vector<1x48x195xf32>
    %25 = vector.shape_cast %24 : vector<1x48x195xf32> to vector<48x195xf32>
    %c384 = arith.constant 384 : index
    %c0_27 = arith.constant 0 : index
    %26 = vector.load %arg5[%c384, %c0_27] : memref<432x195xf32, #tpu.memory_space<vmem>>, vector<48x195xf32>
    tpu.vector_store %arg5[%c384, %c0_27], %25 {strides = array<i32>} : memref<432x195xf32, #tpu.memory_space<vmem>>, vector<48x195xf32>,
    %c0_28 = arith.constant 0 : index
    %c0_29 = arith.constant 0 : index
    %27 = vector.load %arg2[%c0_28, %c0_29] : memref<192x432xf32, #tpu.memory_space<vmem>>, vector<192x432xf32>
    %c0_30 = arith.constant 0 : index
    %c0_31 = arith.constant 0 : index
    %28 = vector.load %arg5[%c0_30, %c0_31] : memref<432x195xf32, #tpu.memory_space<vmem>>, vector<432x195xf32>
    %cst = arith.constant dense<0.000000e+00> : vector<192x195xf32>
    %29 = tpu.matmul %27, %28, %cst {dimension_numbers = #tpu.dot_dimension_numbers<[1], [0], [0], [1], [0, 0, 1, 1], [], []>, precision = #tpu.contract_precision<fp32>} : vector<192x432xf32>, vector<432x195xf32>, vector<192x195xf32> -> vector<192x195xf32>
    %c0_32 = arith.constant 0 : index
    %c0_33 = arith.constant 0 : index
    %30 = vector.load %arg3[%c0_32, %c0_33] : memref<192x1xf32, #tpu.memory_space<vmem>>, vector<192x1xf32>
    %31 = vector.broadcast %30 : vector<192x1xf32> to vector<192x195xf32>
    %32 = arith.addf %29, %31 : vector<192x195xf32>
    %cst_34 = arith.constant 0.000000e+00 : f32
    %33 = vector.broadcast %cst_34 : f32 to vector<192x195xf32>
    %34 = arith.maximumf %32, %33 : vector<192x195xf32>
    %c0_35 = arith.constant 0 : index
    %c0_36 = arith.constant 0 : index
    %c0_37 = arith.constant 0 : index
    %35 = vector.load %arg4[%c0_35, %c0_36, %c0_37] : memref<1x192x195xf32, #tpu.memory_space<vmem>>, vector<1x192x195xf32>
    %36 = vector.shape_cast %35 : vector<1x192x195xf32> to vector<192x195xf32>
    %37 = vector.shape_cast %34 : vector<192x195xf32> to vector<1x192x195xf32>
    tpu.vector_store %arg4[%c0_35, %c0_36, %c0_37], %37 {strides = array<i32>} : memref<1x192x195xf32, #tpu.memory_space<vmem>>, vector<1x192x195xf32>,
    return
  }
  func.func @transform_0(%arg0: i32) -> (i32, i32, i32) {
    %c0_i32 = arith.constant 0 : i32
    %c0_i32_0 = arith.constant 0 : i32
    %c0_i32_1 = arith.constant 0 : i32
    return %arg0, %c0_i32, %c0_i32_0 : i32, i32, i32
  }
  func.func @transform_1(%arg0: i32) -> (i32, i32) {
    %c0_i32 = arith.constant 0 : i32
    %c0_i32_0 = arith.constant 0 : i32
    %c0_i32_1 = arith.constant 0 : i32
    return %c0_i32, %c0_i32_0 : i32, i32
  }
  func.func @transform_2(%arg0: i32) -> (i32, i32) {
    %c0_i32 = arith.constant 0 : i32
    %c0_i32_0 = arith.constant 0 : i32
    %c0_i32_1 = arith.constant 0 : i32
    return %c0_i32, %c0_i32_0 : i32, i32
  }
  func.func @transform_3(%arg0: i32) -> (i32, i32, i32) {
    %c0_i32 = arith.constant 0 : i32
    %c0_i32_0 = arith.constant 0 : i32
    %c0_i32_1 = arith.constant 0 : i32
    return %arg0, %c0_i32, %c0_i32_0 : i32, i32, i32
  }
}

</mosaic_0001>

<bundles_post_ra>
// kernel: conv2d_relu.1
= control target key start
LH: loop header
LB: loop body
LE: loop exit
PB: predicated region body
PF: predicated region fallthrough
CT: control target
= control target key end

     0   :  { %vm27_vm0 = vcmask 547840   ;;  %s6392_s18 = smov 126   ;;  %s6393_s10 = smov 127   ;;  %vm166_vm1 = vcmask 1031168   ;;  %vm87_vm2 = vcmask 1039360   ;;  %vm403_vm3 = vcmask 908288   ;;  %s11629_s0 = inlined_call_operand.vmem [shape: f32[1,48,240], index: 0, kind: input, shape index: {}]   ;;  %s11630_s1 = inlined_call_operand.vmem [shape: f32[192,432], index: 1, kind: input, shape index: {}]   ;;  %s11631_s2 = inlined_call_operand.vmem [shape: f32[192,1], index: 2, kind: input, shape index: {}]   ;;  %s11632_s3 = inlined_call_operand.vmem [shape: f32[1,192,195], index: 3, kind: output, shape index: {}]  }
   0x1   :  { %v6424_v0 = vld [vmem:[%s11629_s0 + $0x30] sm:$0xff]  ;;  %v6429_v1 = vld [vmem:[%s11629_s0 + $0x20] sm:$0xff]  ;;  %v125_v2 = vld [vmem:[%s11629_s0 + $0x38] sm:$0xff]  ;;  %s6394_s11 = smov 111   ;;  %s6395_s12 = smov 112   ;;  %vm324_vm4 = vcmask 916480  }
   0x2   :  { %154 = vrot.lane.b32.xlu0 %v6424_v0, %s6392_s18  ;;  %150 = vrot.lane.b32.xlu1 %v6429_v1, %s6392_s18  ;;  %v123_v3 = vld [vmem:[%s11629_s0 + $0x28] sm:$0xff]  ;;  %v121_v4 = vld [vmem:[%s11629_s0 + $0x18] sm:$0xff]  ;;  %34 = vst.msk [vmem:[#allocation2 + $0x38] sm:$0xff] %vm27_vm0, %v125_v2  ;;  %s6396_s13 = smov 113   ;;  %s6397_s21 = smov 97   ;;  %vm245_vm5 = vcmask 924672  }
   0x3   :  { %v6448_v5 = vld [vmem:[%s11629_s0 + $0x10] sm:$0xff]  ;;  %v6453_v6 = vld [vmem:[%s11629_s0 + $0x8] sm:$0xff]  ;;  %v6458_v7 = vld [vmem:[%s11629_s0] sm:$0xff]  ;;  %32 = vst.msk [vmem:[#allocation2 + $0x28] sm:$0xff] %vm27_vm0, %v123_v3  ;;  %s6398_s15 = smov 98   ;;  %vm561_vm6 = vcmask 793600  }
   0x4   :  { %30 = vst.msk [vmem:[#allocation2 + $0x18] sm:$0xff] %vm27_vm0, %v121_v4  ;;  %v6465_v8 = vld [vmem:[%s11629_s0 + $0x58] sm:$0xff]  ;;  %v6470_v9 = vld [vmem:[%s11629_s0 + $0x50] sm:$0xff]  ;;  %v6475_v10 = vld [vmem:[%s11629_s0 + $0x48] sm:$0xff]  ;;  %vm482_vm7 = vcmask 801792   ;;  %vm640_vm8 = vcmask 785408  }
   0x5   :  { %28 = vst.msk [vmem:[#allocation2 + $0x8] sm:$0xff] %vm27_vm0, %v6453_v6  ;;  %v6482_v11 = vld [vmem:[%s11629_s0 + $0x40] sm:$0xff]  ;;  %38 = vst.msk [vmem:[#allocation2 + $0x58] sm:$0xff] %vm27_vm0, %v6465_v8  ;;  %v672_v12 = vld [vmem:[%s11630_s1 + $0x8] sm:$0xff]  ;;  %vm1019_vm9 = vcmask 392192  }
   0x6   :  { %36 = vst.msk [vmem:[#allocation2 + $0x48] sm:$0xff] %vm27_vm0, %v6475_v10  ;;  %156 = vrot.lane.b32.xlu0 %v125_v2, %s6392_s18  ;;  %152 = vrot.lane.b32.xlu1 %v123_v3, %s6392_s18  ;;  %v6532_v13 = vand.u32 4294901760, %v672_v12  ;;  %v6555_v18 = vld [vmem:[%s11629_s0 + $0x50] sm:$0xff]  ;;  %v6560_v19 = vld [vmem:[%s11629_s0 + $0x58] sm:$0xff] }
   0x7   :  { %v6569_v20 = vld [vmem:[%s11629_s0 + $0x40] sm:$0xff]  ;;  %v6574_v21 = vld [vmem:[%s11629_s0 + $0x48] sm:$0xff]  ;;  %v6583_v22 = vld [vmem:[%s11629_s0 + $0x30] sm:$0xff] }
   0x8   :  { %12387 = vst [vmem:[#allocation3_spill] sm:$0xff] %v6532_v13  ;;  %v6535_v14 = vsub.f32 %v672_v12, %v6532_v13  ;;  %1990 = vmatprep.mubr.f32.mxu1 %v6532_v13  ;;  %v6588_v23 = vld [vmem:[%s11629_s0 + $0x38] sm:$0xff]  ;;  %v6597_v24 = vld [vmem:[%s11629_s0 + $0x20] sm:$0xff]  ;;  %v6602_v25 = vld [vmem:[%s11629_s0 + $0x28] sm:$0xff] }
   0x9   :  { %v6611_v28 = vld [vmem:[%s11629_s0 + $0x10] sm:$0xff]  ;;  %v6616_v29 = vld [vmem:[%s11629_s0 + $0x18] sm:$0xff]  ;;  %v6631_v35 = vld [vmem:[%s11629_s0] sm:$0xff] }
   0xa   :  { %148 = vrot.lane.b32.xlu1 %v121_v4, %s6392_s18  ;;  %146 = vrot.lane.b32.xlu0 %v6448_v5, %s6392_s18  ;;  %12388 = vst [vmem:[#allocation4_spill] sm:$0xff] %v6535_v14  ;;  %v11633_v15 = vand.u32 4294901760, %v6535_v14  ;;  %v6636_v36 = vld [vmem:[%s11629_s0 + $0x8] sm:$0xff] }
   0xc   :  { %v1223_v16 = vsub.f32 %v6535_v14, %v11633_v15  ;;  %v6756_v15 = vld [vmem:[#allocation2 + $0x38] sm:$0xff] }
   0xe   :  { %144 = vrot.lane.b32.xlu1 %v6453_v6, %s6392_s18  ;;  %142 = vrot.lane.b32.xlu0 %v6458_v7, %s6392_s18  ;;  %v1224_v17 = vand.u32 4294901760, %v1223_v16 }
  0x10   :  { %1225 = vmatprep.mubr.f32.mxu0 %v1224_v17 }
  0x12   :  { %85 = vrot.lane.b32.xlu1 %v6465_v8, %s6393_s10  ;;  %83 = vrot.lane.b32.xlu0 %v6470_v9, %s6393_s10 }
  0x16   :  { %81 = vrot.lane.b32.xlu1 %v6475_v10, %s6393_s10  ;;  %79 = vrot.lane.b32.xlu0 %v6482_v11, %s6393_s10 }
  0x1a   :  { %77 = vrot.lane.b32.xlu1 %v125_v2, %s6393_s10  ;;  %75 = vrot.lane.b32.xlu0 %v6424_v0, %s6393_s10 }
  0x1e   :  { %73 = vrot.lane.b32.xlu1 %v123_v3, %s6393_s10  ;;  %71 = vrot.lane.b32.xlu0 %v6429_v1, %s6393_s10 }
  0x22   :  { %69 = vrot.lane.b32.xlu1 %v121_v4, %s6393_s10  ;;  %67 = vrot.lane.b32.xlu0 %v6448_v5, %s6393_s10 }
  0x26   :  { %65 = vrot.lane.b32.xlu1 %v6453_v6, %s6393_s10  ;;  %63 = vrot.lane.b32.xlu0 %v6458_v7, %s6393_s10 }
  0x2a   :  { %385 = vrot.lane.b32.xlu1 %v121_v4, %s6394_s11  ;;  %383 = vrot.lane.b32.xlu0 %v6448_v5, %s6394_s11 }
  0x2e   :  { %381 = vrot.lane.b32.xlu1 %v6453_v6, %s6394_s11  ;;  %379 = vrot.lane.b32.xlu0 %v6458_v7, %s6394_s11 }
  0x32   :  { %322 = vrot.lane.b32.xlu1 %v6465_v8, %s6395_s12  ;;  %320 = vrot.lane.b32.xlu0 %v6470_v9, %s6395_s12 }
  0x36   :  { %318 = vrot.lane.b32.xlu1 %v6475_v10, %s6395_s12  ;;  %316 = vrot.lane.b32.xlu0 %v6482_v11, %s6395_s12 }
  0x3a   :  { %314 = vrot.lane.b32.xlu1 %v125_v2, %s6395_s12  ;;  %312 = vrot.lane.b32.xlu0 %v6424_v0, %s6395_s12 }
  0x3e   :  { %310 = vrot.lane.b32.xlu1 %v123_v3, %s6395_s12  ;;  %308 = vrot.lane.b32.xlu0 %v6429_v1, %s6395_s12 }
  0x42   :  { %306 = vrot.lane.b32.xlu1 %v121_v4, %s6395_s12  ;;  %304 = vrot.lane.b32.xlu0 %v6448_v5, %s6395_s12 }
  0x46   :  { %302 = vrot.lane.b32.xlu1 %v6453_v6, %s6395_s12  ;;  %300 = vrot.lane.b32.xlu0 %v6458_v7, %s6395_s12 }
  0x4a   :  { %243 = vrot.lane.b32.xlu1 %v6465_v8, %s6396_s13  ;;  %241 = vrot.lane.b32.xlu0 %v6470_v9, %s6396_s13 }
  0x4e   :  { %239 = vrot.lane.b32.xlu1 %v6475_v10, %s6396_s13  ;;  %237 = vrot.lane.b32.xlu0 %v6482_v11, %s6396_s13 }
  0x52   :  { %235 = vrot.lane.b32.xlu1 %v125_v2, %s6396_s13  ;;  %233 = vrot.lane.b32.xlu0 %v6424_v0, %s6396_s13 }
  0x56   :  { %231 = vrot.lane.b32.xlu1 %v123_v3, %s6396_s13  ;;  %229 = vrot.lane.b32.xlu0 %v6429_v1, %s6396_s13 }
  0x5a   :  { %227 = vrot.lane.b32.xlu1 %v121_v4, %s6396_s13  ;;  %225 = vrot.lane.b32.xlu0 %v6448_v5, %s6396_s13 }
  0x5e   :  { %223 = vrot.lane.b32.xlu1 %v6453_v6, %s6396_s13  ;;  %221 = vrot.lane.b32.xlu0 %v6458_v7, %s6396_s13 }
  0x62   :  { %164 = vrot.lane.b32.xlu1 %v6465_v8, %s6392_s18  ;;  %162 = vrot.lane.b32.xlu0 %v6470_v9, %s6392_s18 }
  0x66   :  { %160 = vrot.lane.b32.xlu1 %v6475_v10, %s6392_s18  ;;  %158 = vrot.lane.b32.xlu0 %v6482_v11, %s6392_s18 }
  0x6a   :  { %557 = vrot.lane.b32.xlu0 %v6555_v18, %s6397_s21  ;;  %559 = vrot.lane.b32.xlu1 %v6560_v19, %s6397_s21 }
  0x6e   :  { %553 = vrot.lane.b32.xlu0 %v6569_v20, %s6397_s21  ;;  %555 = vrot.lane.b32.xlu1 %v6574_v21, %s6397_s21 }
  0x72   :  { %549 = vrot.lane.b32.xlu0 %v6583_v22, %s6397_s21  ;;  %551 = vrot.lane.b32.xlu1 %v6588_v23, %s6397_s21 }
  0x74   :  { %v155_v26 = vpop.permute.xlu0 %154  ;;  %v151_v27 = vpop.permute.xlu1 %150 }
  0x76   :  { %545 = vrot.lane.b32.xlu0 %v6597_v24, %s6397_s21  ;;  %547 = vrot.lane.b32.xlu1 %v6602_v25, %s6397_s21 }
  0x78   :  { %v157_v30 = vpop.permute.xlu0 %156  ;;  %v153_v31 = vpop.permute.xlu1 %152 }
  0x79   :  { %v170_v32 = vsel %vm166_vm1, %v155_v26, %v157_v30  ;;  %192 = vst.msk [vmem:[#allocation2 + $0xf8] sm:$0xff] %vm27_vm0, %v157_v30  ;;  %v169_v33 = vsel %vm166_vm1, %v151_v27, %v153_v31  ;;  %190 = vst.msk [vmem:[#allocation2 + $0xe8] sm:$0xff] %vm27_vm0, %v153_v31  ;;  %v778_v30 = vld [vmem:[#allocation2 + $0x58] sm:$0xff] }
  0x7a   :  { %v6622_v34 = vand.u32 4294901760, %v170_v32  ;;  %541 = vrot.lane.b32.xlu0 %v6611_v28, %s6397_s21  ;;  %543 = vrot.lane.b32.xlu1 %v6616_v29, %s6397_s21  ;;  %v6638_v39 = vand.u32 4294901760, %v169_v33 }
  0x7c   :  { %v149_v37 = vpop.permute.xlu1 %148  ;;  %v147_v38 = vpop.permute.xlu0 %146  ;;  %12389 = vst [vmem:[#allocation5_spill] sm:$0xff] %v6638_v39  ;;  %v6641_v40 = vsub.f32 %v170_v32, %v6622_v34  ;;  %v6653_v48 = vsub.f32 %v169_v33, %v6638_v39 }
  0x7d   :  { %188 = vst.msk [vmem:[#allocation2 + $0xd8] sm:$0xff] %vm27_vm0, %v149_v37  ;;  %v168_v41 = vsel %vm166_vm1, %v147_v38, %v149_v37 }
  0x7e   :  { %537 = vrot.lane.b32.xlu0 %v6631_v35, %s6397_s21  ;;  %539 = vrot.lane.b32.xlu1 %v6636_v36, %s6397_s21  ;;  %v6649_v42 = vand.u32 4294901760, %v168_v41  ;;  %v11639_v47 = vand.u32 4294901760, %v6641_v40  ;;  %v11637_v60 = vand.u32 4294901760, %v6653_v48 }
  0x80   :  { %12390 = vst [vmem:[#allocation6_spill] sm:$0xff] %v6649_v42  ;;  %v145_v43 = vpop.permute.xlu1 %144  ;;  %v143_v44 = vpop.permute.xlu0 %142  ;;  %v798_v45 = vld [vmem:[#allocation2 + $0xf8] sm:$0xff]  ;;  %v796_v46 = vld [vmem:[#allocation2 + $0xe8] sm:$0xff]  ;;  %v6675_v55 = vsub.f32 %v168_v41, %v6649_v42  ;;  %v1614_v59 = vsub.f32 %v6641_v40, %v11639_v47  ;;  %v1626_v27 = vsub.f32 %v6653_v48, %v11637_v60 }
  0x81   :  { %186 = vst.msk [vmem:[#allocation2 + $0xc8] sm:$0xff] %vm27_vm0, %v145_v43  ;;  %v167_v49 = vsel %vm166_vm1, %v143_v44, %v145_v43  ;;  %v6657_v50 = vand.u32 4294901760, %v798_v45  ;;  %v6659_v51 = vand.u32 4294901760, %v796_v46 }
  0x82   :  { %v6661_v52 = vand.u32 4294901760, %v167_v49  ;;  %478 = vrot.lane.b32.xlu0 %v6555_v18, %s6398_s15  ;;  %480 = vrot.lane.b32.xlu1 %v6560_v19, %s6398_s15  ;;  %v11634_v12 = vand.u32 4294901760, %v6675_v55  ;;  %v1615_v37 = vand.u32 4294901760, %v1614_v59 }
  0x83   :  { %12391 = vst [vmem:[#allocation7_spill] sm:$0xff] %v6659_v51  ;;  %1093 = vmatprep.subr.mxu0 %v6657_v50  ;;  %v6669_v53 = vsub.f32 %v798_v45, %v6657_v50  ;;  %v6672_v54 = vsub.f32 %v796_v46, %v6659_v51  ;;  %v6725_v45 = vld [vmem:[#allocation2 + $0x48] sm:$0xff] }
  0x84   :  { %12392 = vst [vmem:[#allocation8_spill] sm:$0xff] %v6661_v52  ;;  %1095 = vmatpush1.msra.mxu0 %v6622_v34  ;;  %v86_v56 = vpop.permute.xlu1 %85  ;;  %v84_v57 = vpop.permute.xlu0 %83  ;;  %v794_v58 = vld [vmem:[#allocation2 + $0xd8] sm:$0xff]  ;;  %v6693_v4 = vsub.f32 %v167_v49, %v6661_v52  ;;  %v1638_v49 = vsub.f32 %v6675_v55, %v11634_v12 }
  0x85   :  { %117 = vst.msk [vmem:[#allocation2 + $0xb8] sm:$0xff] %vm27_vm0, %v86_v56  ;;  %v93_v61 = vsel %vm87_vm2, %v84_v57, %v86_v56  ;;  %1097 = vmatprep.subr.mxu0 %v6659_v51  ;;  %v6685_v62 = vand.u32 4294901760, %v794_v58  ;;  %v11640_v63 = vand.u32 4294901760, %v6669_v53  ;;  %v11638_v2 = vand.u32 4294901760, %v6672_v54 }
  0x86   :  { %1099 = vmatpush1.msra.mxu0 %v6638_v39  ;;  %v6690_v3 = vand.u32 4294901760, %v93_v61  ;;  %474 = vrot.lane.b32.xlu0 %v6569_v20, %s6398_s15  ;;  %v11636_v43 = vand.u32 4294901760, %v6693_v4  ;;  %v6736_v57 = vand.u32 4294901760, %v778_v30 }
  0x87   :  { %12393 = vst [vmem:[#allocation9_spill] sm:$0xff] %v6685_v62  ;;  %1101 = vmatprep.subr.mxu0 %v6685_v62  ;;  %v1608_v6 = vsub.f32 %v6669_v53, %v11640_v63  ;;  %v1620_v8 = vsub.f32 %v6672_v54, %v11638_v2  ;;  %v6705_v10 = vsub.f32 %v794_v58, %v6685_v62  ;;  %v6784_v63 = vand.u32 4294901760, %v6756_v15 }
  0x88   :  { %12394 = vst [vmem:[#allocation10_spill] sm:$0xff] %v6690_v3  ;;  %476 = vrot.lane.b32.xlu1 %v6574_v21, %s6398_s15  ;;  %1103 = vmatpush1.msra.mxu0 %v6649_v42  ;;  %v82_v16 = vpop.permute.xlu1 %81  ;;  %v80_v17 = vpop.permute.xlu0 %79  ;;  %v792_v26 = vld [vmem:[#allocation2 + $0xc8] sm:$0xff]  ;;  %v6723_v44 = vsub.f32 %v93_v61, %v6690_v3  ;;  %12397 = vst [vmem:[#allocation13_spill] sm:$0xff] %v6736_v57  ;;  %v1627_v61 = vand.u32 4294901760, %v1626_v27  ;;  %v1650_v12 = vsub.f32 %v6693_v4, %v11636_v43 }
  0x89   :  { %115 = vst.msk [vmem:[#allocation2 + $0xa8] sm:$0xff] %vm27_vm0, %v82_v16  ;;  %v92_v31 = vsel %vm87_vm2, %v80_v17, %v82_v16  ;;  %v6716_v32 = vand.u32 4294901760, %v792_v26  ;;  %v1609_v33 = vand.u32 4294901760, %v1608_v6  ;;  %v11635_v38 = vand.u32 4294901760, %v6705_v10  ;;  %12405 = vst [vmem:[#allocation21_spill] sm:$0xff] %v6784_v63 }
  0x8a   :  { %v6719_v41 = vand.u32 4294901760, %v92_v31  ;;  %470 = vrot.lane.b32.xlu0 %v6583_v22, %s6398_s15  ;;  %v1621_v46 = vand.u32 4294901760, %v1620_v8  ;;  %v6746_v17 = vand.u32 4294901760, %v6470_v9  ;;  %v12408_v13 = vand.u32 4294901760, %v6723_v44 }
  0x8b   :  { %12395 = vst [vmem:[#allocation11_spill] sm:$0xff] %v6716_v32  ;;  %1105 = vmatprep.subr.mxu0 %v6716_v32  ;;  %1610 = vmatprep.subr.mxu1 %v1609_v33  ;;  %v6734_v56 = vsub.f32 %v792_v26, %v6716_v32  ;;  %v1632_v8 = vsub.f32 %v6705_v10, %v11635_v38  ;;  %v6877_v32 = vld [vmem:[#allocation2 + $0x18] sm:$0xff] }
  0x8c   :  { %12396 = vst [vmem:[#allocation12_spill] sm:$0xff] %v6719_v41  ;;  %1107 = vmatpush1.msra.mxu0 %v6661_v52  ;;  %1616 = vmatpush1.msra.mxu1 %v1615_v37  ;;  %v78_v58 = vpop.permute.xlu1 %77  ;;  %v76_v59 = vpop.permute.xlu0 %75  ;;  %v790_v6 = vld [vmem:[#allocation2 + $0xb8] sm:$0xff]  ;;  %v6743_v16 = vsub.f32 %v92_v31, %v6719_v41  ;;  %12399 = vst [vmem:[#allocation15_spill] sm:$0xff] %v6746_v17  ;;  %v6754_v37 = vand.u32 4294901760, %v6725_v45  ;;  %v1662_v14 = vsub.f32 %v6723_v44, %v12408_v13 }
  0x8d   :  { %113 = vst.msk [vmem:[#allocation2 + $0x98] sm:$0xff] %vm27_vm0, %v78_v58  ;;  %v91_v26 = vsel %vm87_vm2, %v76_v59, %v78_v58  ;;  %1622 = vmatprep.subr.mxu1 %v1621_v46  ;;  %v6750_v33 = vand.u32 4294901760, %v790_v6  ;;  %v11641_v27 = vand.u32 4294901760, %v6734_v56  ;;  %472 = vrot.lane.b32.xlu1 %v6588_v23, %s6398_s15  ;;  %v1633_v31 = vand.u32 4294901760, %v1632_v8 }
  0x8e   :  { %12398 = vst [vmem:[#allocation14_spill] sm:$0xff] %v6743_v16  ;;  %12401 = vst [vmem:[#allocation17_spill] sm:$0xff] %v6754_v37  ;;  %1628 = vmatpush1.msra.mxu1 %v1627_v61  ;;  %v6763_v58 = vand.u32 4294901760, %v91_v26  ;;  %466 = vrot.lane.b32.xlu0 %v6597_v24, %s6398_s15  ;;  %v1639_v59 = vand.u32 4294901760, %v1638_v49  ;;  %v6776_v8 = vsub.f32 %v778_v30, %v6736_v57  ;;  %v6781_v49 = vand.u32 4294901760, %v6482_v11 }
  0x8f   :  { %12400 = vst [vmem:[#allocation16_spill] sm:$0xff] %v6750_v33  ;;  %1109 = vmatprep.subr.mxu0 %v6750_v33  ;;  %v1644_v38 = vsub.f32 %v6734_v56, %v11641_v27  ;;  %v6773_v61 = vsub.f32 %v790_v6, %v6750_v33  ;;  %1634 = vmatprep.subr.mxu1 %v1633_v31  ;;  %v1651_v46 = vand.u32 4294901760, %v1650_v12  ;;  %v1663_v33 = vand.u32 4294901760, %v1662_v14 }
  0x90   :  { %12402 = vst [vmem:[#allocation18_spill] sm:$0xff] %v6763_v58  ;;  %12403 = vst [vmem:[#allocation19_spill] sm:$0xff] %v6776_v8  ;;  %1111 = vmatpush1.msra.mxu0 %v6690_v3  ;;  %v74_v43 = vpop.permute.xlu1 %73  ;;  %v72_v60 = vpop.permute.xlu0 %71  ;;  %v788_v2 = vld [vmem:[#allocation2 + $0xa8] sm:$0xff]  ;;  %v6788_v6 = vsub.f32 %v6470_v9, %v6746_v17  ;;  %1640 = vmatpush1.msra.mxu1 %v1639_v59  ;;  %v6803_v59 = vsub.f32 %v91_v26, %v6763_v58  ;;  %v6907_v62 = vand.u32 4294901760, %v6877_v32 }
  0x91   :  { %12404 = vst [vmem:[#allocation20_spill] sm:$0xff] %v6781_v49  ;;  %111 = vst.msk [vmem:[#allocation2 + $0x88] sm:$0xff] %vm27_vm0, %v74_v43  ;;  %v90_v30 = vsel %vm87_vm2, %v72_v60, %v74_v43  ;;  %v6792_v31 = vand.u32 4294901760, %v788_v2  ;;  %v1645_v27 = vand.u32 4294901760, %v1644_v38  ;;  %v11648_v47 = vand.u32 4294901760, %v6773_v61  ;;  %468 = vrot.lane.b32.xlu1 %v6602_v25, %s6398_s15 }
  0x92   :  { %12406 = vst [vmem:[#allocation22_spill] sm:$0xff] %v6788_v6  ;;  %v6800_v9 = vand.u32 4294901760, %v90_v30  ;;  %12410 = vst [vmem:[#allocation25_spill] sm:$0xff] %v6803_v59  ;;  %462 = vrot.lane.b32.xlu0 %v6611_v28, %s6398_s15  ;;  %v6817_v38 = vsub.f32 %v6725_v45, %v6754_v37  ;;  %v6831_v45 = vsub.f32 %v6482_v11, %v6781_v49 }
  0x93   :  { %12407 = vst [vmem:[#allocation23_spill] sm:$0xff] %v6792_v31  ;;  %1113 = vmatprep.subr.mxu0 %v6792_v31  ;;  %1646 = vmatprep.subr.mxu1 %v1645_v27  ;;  %v1656_v60 = vsub.f32 %v6773_v61, %v11648_v47  ;;  %v6812_v12 = vsub.f32 %v788_v2, %v6792_v31  ;;  %v12412_v27 = vand.u32 4294901760, %v6743_v16  ;;  %v6824_v47 = vand.u32 4294901760, %v6424_v0  ;;  %v6826_v2 = vld [vmem:[#allocation2 + $0x28] sm:$0xff] }
  0x94   :  { %12409 = vst [vmem:[#allocation24_spill] sm:$0xff] %v6800_v9  ;;  %12411 = vst [vmem:[#allocation26_spill] sm:$0xff] %v6817_v38  ;;  %1115 = vmatpush1.msra.mxu0 %v6719_v41  ;;  %1652 = vmatpush1.msra.mxu1 %v1651_v46  ;;  %v70_v28 = vpop.permute.xlu1 %69  ;;  %v68_v43 = vpop.permute.xlu0 %67  ;;  %v786_v26 = vld [vmem:[#allocation2 + $0x98] sm:$0xff]  ;;  %v6844_v11 = vsub.f32 %v90_v30, %v6800_v9  ;;  %v6856_v14 = vand.u32 4294901760, %v6826_v2 }
  0x95   :  { %v1674_v3 = vsub.f32 %v6743_v16, %v12412_v27  ;;  %12413 = vst [vmem:[#allocation27_spill] sm:$0xff] %v6824_v47  ;;  %12414 = vst [vmem:[#allocation28_spill] sm:$0xff] %v6831_v45  ;;  %v89_v46 = vsel %vm87_vm2, %v68_v43, %v70_v28  ;;  %v6835_v41 = vand.u32 4294901760, %v786_v26  ;;  %v1657_v31 = vand.u32 4294901760, %v1656_v60  ;;  %464 = vrot.lane.b32.xlu1 %v6616_v29, %s6398_s15 }
  0x96   :  { %109 = vst.msk [vmem:[#allocation2 + $0x78] sm:$0xff] %vm27_vm0, %v70_v28  ;;  %v11657_v27 = vand.u32 4294901760, %v6812_v12  ;;  %v6840_v52 = vand.u32 4294901760, %v89_v46  ;;  %12417 = vst [vmem:[#allocation31_spill] sm:$0xff] %v6844_v11  ;;  %458 = vrot.lane.b32.xlu0 %v6631_v35, %s6398_s15  ;;  %v12420_v28 = vand.u32 4294901760, %v6776_v8  ;;  %v6975_v16 = vand.u32 4294901760, %v6458_v7 }
  0x97   :  { %12415 = vst [vmem:[#allocation29_spill] sm:$0xff] %v6835_v41  ;;  %1117 = vmatprep.subr.mxu0 %v6835_v41  ;;  %1658 = vmatprep.subr.mxu1 %v1657_v31  ;;  %v6853_v29 = vsub.f32 %v786_v26, %v6835_v41  ;;  %12419 = vst [vmem:[#allocation33_spill] sm:$0xff] %v6856_v14  ;;  %v1675_v13 = vand.u32 4294901760, %v1674_v3  ;;  %v6870_v41 = vsub.f32 %v6756_v15, %v6784_v63 }
  0x98   :  { %12416 = vst [vmem:[#allocation30_spill] sm:$0xff] %v6840_v52  ;;  %v1668_v60 = vsub.f32 %v6812_v12, %v11657_v27  ;;  %v6861_v30 = vsub.f32 %v6776_v8, %v12420_v28  ;;  %1119 = vmatpush1.msra.mxu0 %v6763_v58  ;;  %1664 = vmatpush1.msra.mxu1 %v1663_v33  ;;  %v66_v35 = vpop.permute.xlu1 %65  ;;  %v64_v31 = vpop.permute.xlu0 %63  ;;  %v784_v43 = vld [vmem:[#allocation2 + $0x88] sm:$0xff]  ;;  %v6865_v27 = vand.u32 4294901760, %v6429_v1  ;;  %v12423_v3 = vand.u32 4294901760, %v6803_v59 }
  0x99   :  { %12418 = vst [vmem:[#allocation32_spill] sm:$0xff] %v6853_v29  ;;  %107 = vst.msk [vmem:[#allocation2 + $0x68] sm:$0xff] %vm27_vm0, %v66_v35  ;;  %v88_v28 = vsel %vm87_vm2, %v64_v31, %v66_v35  ;;  %v6874_v8 = vand.u32 4294901760, %v784_v43  ;;  %v11672_v58 = vand.u32 4294901760, %v6853_v29  ;;  %460 = vrot.lane.b32.xlu1 %v6636_v36, %s6398_s15  ;;  %v6888_v35 = vsub.f32 %v89_v46, %v6840_v52 }
  0x9a   :  { %12421 = vst [vmem:[#allocation34_spill] sm:$0xff] %v6865_v27  ;;  %v1669_v33 = vand.u32 4294901760, %v1668_v60  ;;  %v1686_v26 = vsub.f32 %v6803_v59, %v12423_v3  ;;  %v6885_v42 = vand.u32 4294901760, %v88_v28  ;;  %399 = vrot.lane.b32.xlu0 %v6555_v18, %s6394_s11  ;;  %v12427_v31 = vand.u32 4294901760, %v6788_v6  ;;  %12428 = vst [vmem:[#allocation39_spill] sm:$0xff] %v6907_v62 }
  0x9b   :  { %12422 = vst [vmem:[#allocation35_spill] sm:$0xff] %v6874_v8  ;;  %12425 = vst [vmem:[#allocation37_spill] sm:$0xff] %v6888_v35  ;;  %1121 = vmatprep.subr.mxu0 %v6874_v8  ;;  %v1680_v36 = vsub.f32 %v6853_v29, %v11672_v58  ;;  %v6897_v60 = vsub.f32 %v784_v43, %v6874_v8  ;;  %v12429_v43 = vand.u32 4294901760, %v6817_v38  ;;  %v768_v58 = vld [vmem:[#allocation2 + $0x8] sm:$0xff]  ;;  %v12442_v51 = vand.u32 4294901760, %v6870_v41 }
  0x9c   :  { %12424 = vst [vmem:[#allocation36_spill] sm:$0xff] %v6885_v42  ;;  %1670 = vmatprep.subr.mxu1 %v1669_v33  ;;  %v6902_v3 = vsub.f32 %v6788_v6, %v12427_v31  ;;  %1123 = vmatpush1.msra.mxu0 %v6800_v9  ;;  %v386_v15 = vpop.permute.xlu1 %385  ;;  %v384_v59 = vpop.permute.xlu0 %383  ;;  %v6917_v31 = vsub.f32 %v6424_v0, %v6824_v47  ;;  %12439 = vst [vmem:[#allocation46_spill] sm:$0xff] %v6975_v16 }
  0x9d   :  { %12426 = vst [vmem:[#allocation38_spill] sm:$0xff] %v6897_v60  ;;  %1676 = vmatpush1.msra.mxu1 %v1675_v13  ;;  %v782_v33 = vld [vmem:[#allocation2 + $0x78] sm:$0xff]  ;;  %v6913_v8 = vsub.f32 %v6817_v38, %v12429_v43  ;;  %425 = vst.msk [vmem:[#allocation2 + $0x1f8] sm:$0xff] %vm27_vm0, %v386_v15  ;;  %v6921_v13 = vsel %vm403_vm3, %v384_v59, %v386_v15  ;;  %v1681_v9 = vand.u32 4294901760, %v1680_v36  ;;  %v11687_v6 = vand.u32 4294901760, %v6897_v60 }
  0x9e   :  { %v6923_v46 = vand.u32 4294901760, %v782_v33  ;;  %401 = vrot.lane.b32.xlu1 %v6560_v19, %s6394_s11  ;;  %v1687_v43 = vand.u32 4294901760, %v1686_v26  ;;  %v12431_v38 = vand.u32 4294901760, %v6844_v11  ;;  %v6933_v39 = vsub.f32 %v88_v28, %v6885_v42  ;;  %395 = vrot.lane.b32.xlu0 %v6569_v20, %s6394_s11 }
  0x9f   :  { %1682 = vmatprep.subr.mxu1 %v1681_v9  ;;  %v1692_v59 = vsub.f32 %v6897_v60, %v11687_v6  ;;  %v12436_v6 = vand.u32 4294901760, %v6831_v45 }
  0xa0   :  { %12430 = vst [vmem:[#allocation40_spill] sm:$0xff] %v6923_v46  ;;  %v1698_v0 = vsub.f32 %v6844_v11, %v12431_v38  ;;  %12432 = vst [vmem:[#allocation41_spill] sm:$0xff] %v6933_v39  ;;  %1125 = vmatprep.subr.mxu0 %v6923_v46  ;;  %v6942_v26 = vsub.f32 %v782_v33, %v6923_v46  ;;  %v6945_v38 = vand.u32 4294901760, %v6448_v5  ;;  %1688 = vmatpush1.msra.mxu1 %v1687_v43  ;;  %v382_v28 = vpop.permute.xlu1 %381  ;;  %v380_v36 = vpop.permute.xlu0 %379  ;;  %v780_v29 = vld [vmem:[#allocation2 + $0x68] sm:$0xff] }
  0xa1   :  { %1127 = vmatpush1.msra.mxu0 %v6840_v52  ;;  %v6950_v11 = vand.u32 4294901760, %v768_v58  ;;  %v6955_v33 = vsub.f32 %v6831_v45, %v12436_v6  ;;  %v6959_v46 = vsub.f32 %v6826_v2, %v6856_v14  ;;  %423 = vst.msk [vmem:[#allocation2 + $0x1e8] sm:$0xff] %vm27_vm0, %v382_v28  ;;  %v6963_v43 = vsel %vm403_vm3, %v380_v36, %v382_v28 }
  0xa2   :  { %12433 = vst [vmem:[#allocation42_spill] sm:$0xff] %v6942_v26  ;;  %12434 = vst [vmem:[#allocation43_spill] sm:$0xff] %v6945_v38  ;;  %v6965_v15 = vand.u32 4294901760, %v780_v29  ;;  %v1693_v52 = vand.u32 4294901760, %v1692_v59  ;;  %v11702_v9 = vand.u32 4294901760, %v6942_v26  ;;  %397 = vrot.lane.b32.xlu1 %v6574_v21, %s6394_s11  ;;  %v1699_v60 = vand.u32 4294901760, %v1698_v0  ;;  %391 = vrot.lane.b32.xlu0 %v6583_v22, %s6394_s11 }
  0xa3   :  { %12435 = vst [vmem:[#allocation44_spill] sm:$0xff] %v6950_v11  ;;  %v12438_v6 = vand.u32 4294901760, %v6888_v35  ;;  %v6989_v36 = vsub.f32 %v6429_v1, %v6865_v27  ;;  %v7001_v28 = vsub.f32 %v6877_v32, %v6907_v62 }
  0xa4   :  { %12437 = vst [vmem:[#allocation45_spill] sm:$0xff] %v6965_v15  ;;  %1129 = vmatprep.subr.mxu0 %v6965_v15  ;;  %1694 = vmatprep.subr.mxu1 %v1693_v52  ;;  %v1704_v59 = vsub.f32 %v6942_v26, %v11702_v9  ;;  %v6984_v0 = vsub.f32 %v780_v29, %v6965_v15  ;;  %v321_v2 = vpop.permute.xlu0 %320  ;;  %v12444_v29 = vand.u32 4294901760, %v6933_v39 }
  0xa5   :  { %v1710_v45 = vsub.f32 %v6888_v35, %v12438_v6  ;;  %12441 = vst [vmem:[#allocation48_spill] sm:$0xff] %v6989_v36  ;;  %1700 = vmatpush1.msra.mxu1 %v1699_v60  ;;  %v323_v6 = vpop.permute.xlu1 %322  ;;  %1131 = vmatpush1.msra.mxu0 %v6885_v42  ;;  %v830_v35 = vld [vmem:[#allocation2 + $0x1f8] sm:$0xff]  ;;  %v6996_v9 = vsub.f32 %v6870_v41, %v12442_v51 }
  0xa6   :  { %12440 = vst [vmem:[#allocation47_spill] sm:$0xff] %v6984_v0  ;;  %354 = vst.msk [vmem:[#allocation2 + $0x1d8] sm:$0xff] %vm27_vm0, %v323_v6  ;;  %v7005_v1 = vsel %vm324_vm4, %v321_v2, %v323_v6  ;;  %1133 = vmatprep.subr.mxu0 %v6736_v57  ;;  %v1705_v60 = vand.u32 4294901760, %v1704_v59  ;;  %v11705_v52 = vand.u32 4294901760, %v6984_v0  ;;  %v7011_v51 = vsub.f32 %v6448_v5, %v6945_v38 }
  0xa7   :  { %393 = vrot.lane.b32.xlu1 %v6588_v23, %s6394_s11  ;;  %1135 = vmatpush1.msra.mxu0 %v6746_v17  ;;  %v1711_v32 = vand.u32 4294901760, %v1710_v45  ;;  %v1722_v2 = vsub.f32 %v6933_v39, %v12444_v29  ;;  %v7020_v6 = vsub.f32 %v768_v58, %v6950_v11  ;;  %v7024_v59 = vsub.f32 %v6458_v7, %v6975_v16 }
  0xa8   :  { %12443 = vst [vmem:[#allocation49_spill] sm:$0xff] %v7011_v51  ;;  %387 = vrot.lane.b32.xlu0 %v6597_v24, %s6394_s11  ;;  %1137 = vmatprep.subr.mxu0 %v6754_v37  ;;  %v1716_v5 = vsub.f32 %v6984_v0, %v11705_v52  ;;  %v7032_v23 = vand.u32 4294901760, %v830_v35  ;;  %v7035_v45 = vand.u32 4294901760, %v6921_v13  ;;  %v317_v29 = vpop.permute.xlu0 %316  ;;  %v1747_v24 = vand.u32 4294901760, %v6955_v33  ;;  %v828_v52 = vld [vmem:[#allocation2 + $0x1e8] sm:$0xff] }
  0xa9   :  { %12445 = vst [vmem:[#allocation50_spill] sm:$0xff] %v7020_v6  ;;  %12446 = vst [vmem:[#allocation51_spill] sm:$0xff] %v7024_v59  ;;  %1706 = vmatprep.subr.mxu1 %v1705_v60  ;;  %v319_v7 = vpop.permute.xlu1 %318  ;;  %1139 = vmatpush1.msra.mxu0 %v6781_v49  ;;  %v12449_v60 = vand.u32 4294901760, %v6917_v31  ;;  %v7046_v17 = vand.u32 4294901760, %v6963_v43  ;;  %v7054_v33 = vand.u32 4294901760, %v828_v52  ;;  %v12452_v57 = vand.u32 4294901760, %v6959_v46 }
  0xaa   :  { %12447 = vst [vmem:[#allocation52_spill] sm:$0xff] %v7032_v23  ;;  %12448 = vst [vmem:[#allocation53_spill] sm:$0xff] %v7035_v45  ;;  %1712 = vmatpush1.msra.mxu1 %v1711_v32  ;;  %v7051_v32 = vsel %vm324_vm4, %v317_v29, %v319_v7  ;;  %1141 = vmatprep.subr.mxu0 %v6784_v63  ;;  %v1717_v58 = vand.u32 4294901760, %v1716_v5  ;;  %v1753_v5 = vand.u32 4294901760, %v6996_v9  ;;  %v12453_v49 = vand.u32 4294901760, %v6989_v36 }
  0xab   :  { %v7043_v37 = vsub.f32 %v6917_v31, %v12449_v60  ;;  %12450 = vst [vmem:[#allocation54_spill] sm:$0xff] %v7046_v17  ;;  %352 = vst.msk [vmem:[#allocation2 + $0x1c8] sm:$0xff] %vm27_vm0, %v319_v7  ;;  %389 = vrot.lane.b32.xlu1 %v6602_v25, %s6394_s11  ;;  %1143 = vmatpush1.msra.mxu0 %v6824_v47  ;;  %v1723_v60 = vand.u32 4294901760, %v1722_v2  ;;  %v1764_v42 = vsub.f32 %v6959_v46, %v12452_v57  ;;  %s6399_s11 = smov 96  }
  0xac   :  { %12451 = vst [vmem:[#allocation55_spill] sm:$0xff] %v7054_v33  ;;  %1145 = vmatprep.subr.mxu0 %v6856_v14  ;;  %1718 = vmatprep.subr.mxu1 %v1717_v58  ;;  %v1770_v25 = vsub.f32 %v6989_v36, %v12453_v49  ;;  %v7071_v47 = vsub.f32 %v830_v35, %v7032_v23  ;;  %v313_v7 = vpop.permute.xlu0 %312  ;;  %v7080_v9 = vand.u32 4294901760, %v7005_v1  ;;  %v12462_v14 = vand.u32 4294901760, %v7011_v51 }
  0xad   :  { %v7075_v2 = vsub.f32 %v6921_v13, %v7035_v45  ;;  %v315_v57 = vpop.permute.xlu1 %314  ;;  %1724 = vmatpush1.msra.mxu1 %v1723_v60  ;;  %1147 = vmatpush1.msra.mxu0 %v6865_v27  ;;  %v1759_v58 = vand.u32 4294901760, %v7043_v37  ;;  %v826_v29 = vld [vmem:[#allocation2 + $0x1d8] sm:$0xff]  ;;  %v7083_v49 = vsub.f32 %v828_v52, %v7054_v33  ;;  %v7087_v35 = vsub.f32 %v6963_v43, %v7046_v17 }
  0xae   :  { %12454 = vst [vmem:[#allocation56_spill] sm:$0xff] %v7071_v47  ;;  %12456 = vst [vmem:[#allocation58_spill] sm:$0xff] %v7080_v9  ;;  %v328_v13 = vsel %vm324_vm4, %v313_v7, %v315_v57  ;;  %1149 = vmatprep.subr.mxu0 %v6907_v62  ;;  %v12459_v60 = vand.u32 4294901760, %v6861_v30  ;;  %v7094_v37 = vand.u32 4294901760, %v826_v29  ;;  %v12461_v27 = vand.u32 4294901760, %v7001_v28  ;;  %636 = vrot.lane.b32.xlu0 %v6555_v18, %s6399_s11 }
  0xaf   :  { %12455 = vst [vmem:[#allocation57_spill] sm:$0xff] %v7075_v2  ;;  %12457 = vst [vmem:[#allocation59_spill] sm:$0xff] %v7083_v49  ;;  %v1782_v43 = vsub.f32 %v7011_v51, %v12462_v14  ;;  %1151 = vmatpush1.msra.mxu0 %v6945_v38  ;;  %v12463_v63 = vand.u32 4294901760, %v6902_v3  ;;  %v1765_v7 = vand.u32 4294901760, %v1764_v42  ;;  %v12466_v62 = vand.u32 4294901760, %v7024_v59  ;;  %638 = vrot.lane.b32.xlu1 %v6560_v19, %s6399_s11 }
  0xb0   :  { %12458 = vst [vmem:[#allocation60_spill] sm:$0xff] %v7087_v35  ;;  %350 = vst.msk [vmem:[#allocation2 + $0x1b8] sm:$0xff] %vm27_vm0, %v315_v57  ;;  %1730 = vmatprep.subr.mxu1 %v12459_v60  ;;  %v1776_v52 = vsub.f32 %v7001_v28, %v12461_v27  ;;  %v12464_v57 = vand.u32 4294901760, %v7020_v6  ;;  %v7109_v60 = vand.u32 4294901760, %v7051_v32  ;;  %1153 = vmatprep.subr.mxu0 %v6950_v11  ;;  %v12467_v14 = vand.u32 4294901760, %v6913_v8 }
  0xb1   :  { %12460 = vst [vmem:[#allocation61_spill] sm:$0xff] %v7094_v37  ;;  %1736 = vmatpush1.msra.mxu1 %v12463_v63  ;;  %v7114_v27 = vsub.f32 %v7024_v59, %v12466_v62  ;;  %v1771_v3 = vand.u32 4294901760, %v1770_v25  ;;  %v311_v38 = vpop.permute.xlu1 %310  ;;  %1155 = vmatpush1.msra.mxu0 %v6975_v16  ;;  %v7125_v59 = vand.u32 4294901760, %v328_v13  ;;  %v7131_v25 = vsub.f32 %v7005_v1, %v7080_v9 }
  0xb2   :  { %v1788_v30 = vsub.f32 %v7020_v6, %v12464_v57  ;;  %12465 = vst [vmem:[#allocation62_spill] sm:$0xff] %v7109_v60  ;;  %1742 = vmatprep.subr.mxu1 %v12467_v14  ;;  %v7122_v57 = vsub.f32 %v826_v29, %v7094_v37  ;;  %v309_v6 = vpop.permute.xlu0 %308  ;;  %v824_v62 = vld [vmem:[#allocation2 + $0x1c8] sm:$0xff]  ;;  %348 = vst.msk [vmem:[#allocation2 + $0x1a8] sm:$0xff] %vm27_vm0, %v311_v38  ;;  %1157 = vmatprep.subr.mxu0 %v7032_v23  ;;  %v1777_v14 = vand.u32 4294901760, %v1776_v52 }
  0xb3   :  { %1748 = vmatpush1.msra.mxu1 %v1747_v24  ;;  %12469 = vst [vmem:[#allocation64_spill] sm:$0xff] %v7125_v59  ;;  %12470 = vst [vmem:[#allocation65_spill] sm:$0xff] %v7131_v25  ;;  %v327_v29 = vsel %vm324_vm4, %v309_v6, %v311_v38  ;;  %v1783_v24 = vand.u32 4294901760, %v1782_v43  ;;  %v7136_v63 = vand.u32 4294901760, %v824_v62  ;;  %1159 = vmatpush2.msra.mxu0 %v7035_v45  ;;  %v1795_v8 = vand.u32 4294901760, %v7114_v27 }
  0xb4   :  { %12468 = vst [vmem:[#allocation63_spill] sm:$0xff] %v7122_v57  ;;  %1754 = vmatprep.subr.mxu1 %v1753_v5  ;;  %v1789_v11 = vand.u32 4294901760, %v1788_v30  ;;  %v7140_v42 = vand.u32 4294901760, %v327_v29  ;;  %v7144_v1 = vsub.f32 %v7051_v32, %v7109_v60  ;;  %1161 = vmatprep.subr.mxu0 %v7054_v33  ;;  %v12474_v38 = vand.u32 4294901760, %v7071_v47 }
  0xb5   :  { %12471 = vst [vmem:[#allocation66_spill] sm:$0xff] %v7136_v63  ;;  %1760 = vmatpush1.msra.mxu1 %v1759_v58  ;;  %v12475_v5 = vand.u32 4294901760, %v7075_v2  ;;  %v7155_v43 = vsub.f32 %v824_v62, %v7136_v63  ;;  %v307_v30 = vpop.permute.xlu1 %306  ;;  %1163 = vmatpush2.msra.mxu0 %v7046_v17  ;;  %v7166_v52 = vsub.f32 %v328_v13, %v7125_v59 }
  0xb6   :  { %12472 = vst [vmem:[#allocation67_spill] sm:$0xff] %v7140_v42  ;;  %12473 = vst [vmem:[#allocation68_spill] sm:$0xff] %v7144_v1  ;;  %1766 = vmatprep.subr.mxu1 %v1765_v7  ;;  %v1800_v6 = vsub.f32 %v7071_v47, %v12474_v38  ;;  %v305_v27 = vpop.permute.xlu0 %304  ;;  %v12477_v7 = vand.u32 4294901760, %v7083_v49  ;;  %v12478_v38 = vand.u32 4294901760, %v7087_v35  ;;  %1165 = vmatprep.subr.mxu0 %v7094_v37 }
  0xb7   :  { %v1806_v58 = vsub.f32 %v7075_v2, %v12475_v5  ;;  %12476 = vst [vmem:[#allocation69_spill] sm:$0xff] %v7155_v43  ;;  %1772 = vmatpush1.msra.mxu1 %v1771_v3  ;;  %v822_v32 = vld [vmem:[#allocation2 + $0x1b8] sm:$0xff]  ;;  %12479 = vst [vmem:[#allocation70_spill] sm:$0xff] %v7166_v52  ;;  %v326_v62 = vsel %vm324_vm4, %v305_v27, %v307_v30  ;;  %1167 = vmatpush2.msra.mxu0 %v7080_v9  ;;  %v12483_v27 = vand.u32 4294901760, %v7122_v57 }
  0xb8   :  { %v1812_v33 = vsub.f32 %v7083_v49, %v12477_v7  ;;  %v1818_v45 = vsub.f32 %v7087_v35, %v12478_v38  ;;  %346 = vst.msk [vmem:[#allocation2 + $0x198] sm:$0xff] %vm27_vm0, %v307_v30  ;;  %1778 = vmatprep.subr.mxu1 %v1777_v14  ;;  %v7171_v3 = vand.u32 4294901760, %v822_v32  ;;  %v7175_v38 = vand.u32 4294901760, %v326_v62  ;;  %1169 = vmatprep.subr.mxu0 %v7136_v63 }
  0xb9   :  { %1784 = vmatpush1.msra.mxu1 %v1783_v24  ;;  %v7179_v5 = vsub.f32 %v327_v29, %v7140_v42  ;;  %v1801_v30 = vand.u32 4294901760, %v1800_v6  ;;  %v1807_v14 = vand.u32 4294901760, %v1806_v58  ;;  %v1824_v7 = vsub.f32 %v7122_v57, %v12483_v27  ;;  %v303_v24 = vpop.permute.xlu1 %302  ;;  %1171 = vmatpush2.msra.mxu0 %v7109_v60  ;;  %v820_v13 = vld [vmem:[#allocation2 + $0x1a8] sm:$0xff] }
  0xba   :  { %12480 = vst [vmem:[#allocation71_spill] sm:$0xff] %v7171_v3  ;;  %12481 = vst [vmem:[#allocation72_spill] sm:$0xff] %v7175_v38  ;;  %1790 = vmatprep.subr.mxu1 %v1789_v11  ;;  %v7186_v9 = vsub.f32 %v822_v32, %v7171_v3  ;;  %v301_v37 = vpop.permute.xlu0 %300  ;;  %v1813_v29 = vand.u32 4294901760, %v1812_v33  ;;  %v1819_v17 = vand.u32 4294901760, %v1818_v45  ;;  %v12485_v63 = vand.u32 4294901760, %v7131_v25  ;;  %1173 = vmatprep.subr.mxu0 %v7171_v3 }
  0xbb   :  { %12482 = vst [vmem:[#allocation73_spill] sm:$0xff] %v7179_v5  ;;  %1796 = vmatpush1.msra.mxu1 %v1795_v8  ;;  %344 = vst.msk [vmem:[#allocation2 + $0x188] sm:$0xff] %vm27_vm0, %v303_v24  ;;  %v325_v58 = vsel %vm324_vm4, %v301_v37, %v303_v24  ;;  %v7196_v32 = vand.u32 4294901760, %v820_v13  ;;  %v12487_v8 = vand.u32 4294901760, %v7155_v43  ;;  %1175 = vmatpush2.msra.mxu0 %v7125_v59  ;;  %v1825_v24 = vand.u32 4294901760, %v1824_v7 }
  0xbc   :  { %12484 = vst [vmem:[#allocation74_spill] sm:$0xff] %v7186_v9  ;;  %v1830_v11 = vsub.f32 %v7131_v25, %v12485_v63  ;;  %1802 = vmatprep.subr.mxu1 %v1801_v30  ;;  %v11750_v45 = vand.u32 4294901760, %v7186_v9  ;;  %v12488_v63 = vand.u32 4294901760, %v7144_v1  ;;  %v7206_v6 = vand.u32 4294901760, %v325_v58  ;;  %632 = vrot.lane.b32.xlu0 %v6569_v20, %s6399_s11 }
  0xbd   :  { %12486 = vst [vmem:[#allocation75_spill] sm:$0xff] %v7196_v32  ;;  %v1836_v33 = vsub.f32 %v7155_v43, %v12487_v8  ;;  %1808 = vmatpush2.msra.mxu1 %v1807_v14  ;;  %v7210_v30 = vsub.f32 %v326_v62, %v7175_v38  ;;  %1177 = vmatprep.subr.mxu0 %v7196_v32  ;;  %v244_v59 = vpop.permute.xlu1 %243  ;;  %v12492_v62 = vand.u32 4294901760, %v7166_v52 }
  0xbe   :  { %v1842_v27 = vsub.f32 %v7144_v1, %v12488_v63  ;;  %12489 = vst [vmem:[#allocation76_spill] sm:$0xff] %v7206_v6  ;;  %1814 = vmatprep.subr.mxu1 %v1813_v29  ;;  %v1848_v8 = vsub.f32 %v7186_v9, %v11750_v45  ;;  %v7217_v14 = vsub.f32 %v820_v13, %v7196_v32  ;;  %v242_v63 = vpop.permute.xlu0 %241  ;;  %v1831_v37 = vand.u32 4294901760, %v1830_v11 }
  0xbf   :  { %12490 = vst [vmem:[#allocation77_spill] sm:$0xff] %v7210_v30  ;;  %1179 = vmatpush2.msra.mxu0 %v7140_v42  ;;  %1820 = vmatpush2.msra.mxu1 %v1819_v17  ;;  %v818_v3 = vld [vmem:[#allocation2 + $0x198] sm:$0xff]  ;;  %v1854_v60 = vsub.f32 %v7166_v52, %v12492_v62  ;;  %v7224_v7 = vsub.f32 %v325_v58, %v7206_v6  ;;  %275 = vst.msk [vmem:[#allocation2 + $0x178] sm:$0xff] %vm27_vm0, %v244_v59  ;;  %v1837_v45 = vand.u32 4294901760, %v1836_v33 }
  0xc0   :  { %12491 = vst [vmem:[#allocation78_spill] sm:$0xff] %v7217_v14  ;;  %v251_v29 = vsel %vm245_vm5, %v242_v63, %v244_v59  ;;  %1826 = vmatprep.subr.mxu1 %v1825_v24  ;;  %v7228_v13 = vand.u32 4294901760, %v818_v3  ;;  %v11753_v42 = vand.u32 4294901760, %v7217_v14  ;;  %v1843_v17 = vand.u32 4294901760, %v1842_v27  ;;  %634 = vrot.lane.b32.xlu1 %v6574_v21, %s6399_s11 }
  0xc1   :  { %12493 = vst [vmem:[#allocation79_spill] sm:$0xff] %v7224_v7  ;;  %1832 = vmatpush2.msra.mxu1 %v1831_v37  ;;  %v12495_v11 = vand.u32 4294901760, %v7179_v5  ;;  %v7236_v62 = vand.u32 4294901760, %v251_v29  ;;  %v1849_v33 = vand.u32 4294901760, %v1848_v8  ;;  %v240_v37 = vpop.permute.xlu1 %239  ;;  %v1855_v63 = vand.u32 4294901760, %v1854_v60  ;;  %628 = vrot.lane.b32.xlu0 %v6583_v22, %s6399_s11 }
  0xc2   :  { %12494 = vst [vmem:[#allocation80_spill] sm:$0xff] %v7228_v13  ;;  %1181 = vmatprep.subr.mxu0 %v7228_v13  ;;  %1838 = vmatprep.subr.mxu1 %v1837_v45  ;;  %v1860_v18 = vsub.f32 %v7217_v14, %v11753_v42  ;;  %v7246_v27 = vsub.f32 %v818_v3, %v7228_v13  ;;  %v238_v24 = vpop.permute.xlu0 %237  ;;  %273 = vst.msk [vmem:[#allocation2 + $0x168] sm:$0xff] %vm27_vm0, %v240_v37  ;;  %v12499_v60 = vand.u32 4294901760, %v7210_v30 }
  0xc3   :  { %v1866_v58 = vsub.f32 %v7179_v5, %v12495_v11  ;;  %12496 = vst [vmem:[#allocation81_spill] sm:$0xff] %v7236_v62  ;;  %1183 = vmatpush2.msra.mxu0 %v7175_v38  ;;  %1844 = vmatpush2.msra.mxu1 %v1843_v17  ;;  %v816_v11 = vld [vmem:[#allocation2 + $0x188] sm:$0xff]  ;;  %v250_v45 = vsel %vm245_vm5, %v238_v24, %v240_v37  ;;  %v12503_v37 = vand.u32 4294901760, %v7224_v7 }
  0xc4   :  { %12497 = vst [vmem:[#allocation82_spill] sm:$0xff] %v7246_v27  ;;  %1850 = vmatprep.subr.mxu1 %v1849_v33  ;;  %v7252_v8 = vand.u32 4294901760, %v816_v11  ;;  %v1861_v42 = vand.u32 4294901760, %v1860_v18  ;;  %v11756_v3 = vand.u32 4294901760, %v7246_v27  ;;  %v1878_v17 = vsub.f32 %v7210_v30, %v12499_v60 }
  0xc5   :  { %1856 = vmatpush2.msra.mxu1 %v1855_v63  ;;  %v1867_v59 = vand.u32 4294901760, %v1866_v58  ;;  %v7260_v19 = vand.u32 4294901760, %v250_v45  ;;  %v7263_v38 = vsub.f32 %v251_v29, %v7236_v62  ;;  %v236_v33 = vpop.permute.xlu1 %235  ;;  %v1890_v21 = vsub.f32 %v7224_v7, %v12503_v37 }
  0xc6   :  { %12498 = vst [vmem:[#allocation83_spill] sm:$0xff] %v7252_v8  ;;  %1185 = vmatprep.subr.mxu0 %v7252_v8  ;;  %1862 = vmatprep.subr.mxu1 %v1861_v42  ;;  %v1872_v20 = vsub.f32 %v7246_v27, %v11756_v3  ;;  %v7272_v58 = vsub.f32 %v816_v11, %v7252_v8  ;;  %v234_v18 = vpop.permute.xlu0 %233  ;;  %v814_v29 = vld [vmem:[#allocation2 + $0x178] sm:$0xff]  ;;  %271 = vst.msk [vmem:[#allocation2 + $0x158] sm:$0xff] %vm27_vm0, %v236_v33  ;;  %v1879_v60 = vand.u32 4294901760, %v1878_v17 }
  0xc7   :  { %12500 = vst [vmem:[#allocation84_spill] sm:$0xff] %v7260_v19  ;;  %12501 = vst [vmem:[#allocation85_spill] sm:$0xff] %v7263_v38  ;;  %1187 = vmatpush2.msra.mxu0 %v7206_v6  ;;  %1868 = vmatpush2.msra.mxu1 %v1867_v59  ;;  %v249_v42 = vsel %vm245_vm5, %v234_v18, %v236_v33  ;;  %v7280_v24 = vand.u32 4294901760, %v814_v29  ;;  %v7289_v6 = vsub.f32 %v250_v45, %v7260_v19  ;;  %v6363_v33 = vld [vmem:[%s11629_s0 + $0x38] sm:$0xff] }
  0xc8   :  { %12502 = vst [vmem:[#allocation86_spill] sm:$0xff] %v7272_v58  ;;  %v1873_v63 = vand.u32 4294901760, %v1872_v20  ;;  %v11761_v11 = vand.u32 4294901760, %v7272_v58  ;;  %v7285_v3 = vand.u32 4294901760, %v249_v42  ;;  %630 = vrot.lane.b32.xlu1 %v6363_v33, %s6399_s11  ;;  %v1891_v37 = vand.u32 4294901760, %v1890_v21 }
  0xc9   :  { %12504 = vst [vmem:[#allocation87_spill] sm:$0xff] %v7280_v24  ;;  %12506 = vst [vmem:[#allocation89_spill] sm:$0xff] %v7289_v6  ;;  %1189 = vmatprep.subr.mxu0 %v7280_v24  ;;  %v7300_v17 = vsub.f32 %v814_v29, %v7280_v24  ;;  %v232_v20 = vpop.permute.xlu1 %231  ;;  %v812_v45 = vld [vmem:[#allocation2 + $0x168] sm:$0xff]  ;;  %v6364_v29 = vld [vmem:[%s11629_s0 + $0x20] sm:$0xff]  ;;  %v12515_v13 = vand.u32 4294901760, %v7289_v6 }
  0xca   :  { %12505 = vst [vmem:[#allocation88_spill] sm:$0xff] %v7285_v3  ;;  %1874 = vmatprep.subr.mxu1 %v1873_v63  ;;  %v1884_v22 = vsub.f32 %v7272_v58, %v11761_v11  ;;  %v230_v18 = vpop.permute.xlu0 %229  ;;  %1191 = vmatpush2.msra.mxu0 %v7236_v62  ;;  %269 = vst.msk [vmem:[#allocation2 + $0x148] sm:$0xff] %vm27_vm0, %v232_v20  ;;  %v7305_v59 = vand.u32 4294901760, %v812_v45  ;;  %v12509_v11 = vand.u32 4294901760, %v7263_v38 }
  0xcb   :  { %12507 = vst [vmem:[#allocation90_spill] sm:$0xff] %v7300_v17  ;;  %1880 = vmatpush2.msra.mxu1 %v1879_v60  ;;  %v248_v33 = vsel %vm245_vm5, %v230_v18, %v232_v20  ;;  %v11766_v8 = vand.u32 4294901760, %v7300_v17  ;;  %624 = vrot.lane.b32.xlu0 %v6364_v29, %s6399_s11  ;;  %v7319_v20 = vsub.f32 %v249_v42, %v7285_v3 }
  0xcc   :  { %12508 = vst [vmem:[#allocation91_spill] sm:$0xff] %v7305_v59  ;;  %v1885_v63 = vand.u32 4294901760, %v1884_v22  ;;  %v1902_v60 = vsub.f32 %v7263_v38, %v12509_v11  ;;  %v7315_v21 = vand.u32 4294901760, %v248_v33  ;;  %v6365_v22 = vld [vmem:[%s11629_s0 + $0x28] sm:$0xff]  ;;  %1193 = vmatprep.subr.mxu0 %v7305_v59  ;;  %v7330_v18 = vsub.f32 %v812_v45, %v7305_v59  ;;  %v6367_v59 = vld [vmem:[%s11629_s0 + $0x18] sm:$0xff] }
  0xcd   :  { %12511 = vst [vmem:[#allocation93_spill] sm:$0xff] %v7319_v20  ;;  %626 = vrot.lane.b32.xlu1 %v6365_v22, %s6399_s11  ;;  %v1896_v11 = vsub.f32 %v7300_v17, %v11766_v8  ;;  %v228_v29 = vpop.permute.xlu1 %227  ;;  %1195 = vmatpush2.msra.mxu0 %v7260_v19  ;;  %v810_v42 = vld [vmem:[#allocation2 + $0x158] sm:$0xff]  ;;  %v12522_v7 = vand.u32 4294901760, %v7319_v20 }
  0xce   :  { %12510 = vst [vmem:[#allocation92_spill] sm:$0xff] %v7315_v21  ;;  %1886 = vmatprep.subr.mxu1 %v1885_v63  ;;  %12512 = vst [vmem:[#allocation94_spill] sm:$0xff] %v7330_v18  ;;  %v226_v62 = vpop.permute.xlu0 %225  ;;  %v7334_v24 = vsub.f32 %v248_v33, %v7315_v21  ;;  %v671_v63 = vld [vmem:[%s11630_s1] sm:$0xff]  ;;  %v7341_v8 = vand.u32 4294901760, %v810_v42  ;;  %v6366_v33 = vld [vmem:[%s11629_s0 + $0x10] sm:$0xff]  ;;  %v1903_v19 = vand.u32 4294901760, %v1902_v60 }
  0xcf   :  { %1892 = vmatpush2.msra.mxu1 %v1891_v37  ;;  %267 = vst.msk [vmem:[#allocation2 + $0x138] sm:$0xff] %vm27_vm0, %v228_v29  ;;  %v247_v22 = vsel %vm245_vm5, %v226_v62, %v228_v29  ;;  %v1897_v45 = vand.u32 4294901760, %v1896_v11  ;;  %v676_v37 = vld [vmem:[%s11630_s1 + $0x28] sm:$0xff]  ;;  %620 = vrot.lane.b32.xlu0 %v6366_v33, %s6399_s11  ;;  %v1914_v62 = vsub.f32 %v7289_v6, %v12515_v13  ;;  %v12517_v33 = vand.u32 4294901760, %v7330_v18 }
  0xd0   :  { %12513 = vst [vmem:[#allocation95_spill] sm:$0xff] %v7334_v24  ;;  %12514 = vst [vmem:[#allocation96_spill] sm:$0xff] %v7341_v8  ;;  %v7354_v29 = vand.u32 4294901760, %v247_v22  ;;  %1197 = vmatprep.subr.mxu0 %v7341_v8  ;;  %v7366_v32 = vsub.f32 %v810_v42, %v7341_v8  ;;  %v7368_v13 = vand.u32 4294901760, %v671_v63  ;;  %v7372_v17 = vand.u32 4294901760, %v676_v37 }
  0xd1   :  { %622 = vrot.lane.b32.xlu1 %v6367_v59, %s6399_s11  ;;  %1898 = vmatprep.subr.mxu1 %v1897_v45  ;;  %v1908_v60 = vsub.f32 %v7330_v18, %v12517_v33  ;;  %v224_v6 = vpop.permute.xlu1 %223  ;;  %v808_v38 = vld [vmem:[#allocation2 + $0x148] sm:$0xff]  ;;  %v675_v45 = vld [vmem:[%s11630_s1 + $0x20] sm:$0xff] }
  0xd2   :  { %12516 = vst [vmem:[#allocation97_spill] sm:$0xff] %v7354_v29  ;;  %12518 = vst [vmem:[#allocation98_spill] sm:$0xff] %v7366_v32  ;;  %v222_v11 = vpop.permute.xlu0 %221  ;;  %1199 = vmatpush2.msra.mxu0 %v7285_v3  ;;  %1904 = vmatpush2.msra.mxu1 %v1903_v19  ;;  %v7379_v33 = vand.u32 4294901760, %v808_v38  ;;  %v680_v19 = vld [vmem:[%s11630_s1 + $0x48] sm:$0xff]  ;;  %v6368_v59 = vld [vmem:[%s11629_s0] sm:$0xff]  ;;  %v1915_v3 = vand.u32 4294901760, %v1914_v62 }
  0xd3   :  { %12519 = vst [vmem:[#allocation99_spill] sm:$0xff] %v7368_v13  ;;  %12520 = vst [vmem:[#allocation100_spill] sm:$0xff] %v7372_v17  ;;  %v246_v42 = vsel %vm245_vm5, %v222_v11, %v224_v6  ;;  %v1909_v8 = vand.u32 4294901760, %v1908_v60  ;;  %616 = vrot.lane.b32.xlu0 %v6368_v59, %s6399_s11  ;;  %v7395_v60 = vsub.f32 %v247_v22, %v7354_v29  ;;  %v6369_v18 = vld [vmem:[%s11629_s0 + $0x8] sm:$0xff]  ;;  %v12525_v62 = vand.u32 4294901760, %v7366_v32 }
  0xd4   :  { %265 = vst.msk [vmem:[#allocation2 + $0x128] sm:$0xff] %vm27_vm0, %v224_v6  ;;  %12521 = vst [vmem:[#allocation101_spill] sm:$0xff] %v7379_v33  ;;  %v1926_v6 = vsub.f32 %v7319_v20, %v12522_v7  ;;  %v7392_v11 = vand.u32 4294901760, %v246_v42  ;;  %1201 = vmatprep.subr.mxu0 %v7379_v33  ;;  %v7406_v7 = vsub.f32 %v808_v38, %v7379_v33  ;;  %v7411_v22 = vand.u32 4294901760, %v675_v45 }
  0xd5   :  { %12524 = vst [vmem:[#allocation103_spill] sm:$0xff] %v7395_v60  ;;  %618 = vrot.lane.b32.xlu1 %v6369_v18, %s6399_s11  ;;  %1910 = vmatprep.subr.mxu1 %v1909_v8  ;;  %v1920_v59 = vsub.f32 %v7366_v32, %v12525_v62  ;;  %v7409_v20 = vsub.f32 %v671_v63, %v7368_v13  ;;  %v165_v58 = vpop.permute.xlu1 %164  ;;  %v12529_v8 = vand.u32 4294901760, %v7334_v24  ;;  %v7420_v38 = vand.u32 4294901760, %v680_v19 }
  0xd6   :  { %12523 = vst [vmem:[#allocation102_spill] sm:$0xff] %v7392_v11  ;;  %12526 = vst [vmem:[#allocation104_spill] sm:$0xff] %v7406_v7  ;;  %v163_v30 = vpop.permute.xlu0 %162  ;;  %1203 = vmatpush2.msra.mxu0 %v7315_v21  ;;  %1916 = vmatpush2.msra.mxu1 %v1915_v3  ;;  %v806_v18 = vld [vmem:[#allocation2 + $0x138] sm:$0xff]  ;;  %v7418_v62 = vsub.f32 %v676_v37, %v7372_v17  ;;  %v11813_v21 = vand.u32 4294901760, %v7406_v7  ;;  %v679_v3 = vld [vmem:[%s11630_s1 + $0x40] sm:$0xff]  ;;  %v1927_v5 = vand.u32 4294901760, %v1926_v6 }
  0xd7   :  { %12527 = vst [vmem:[#allocation105_spill] sm:$0xff] %v7409_v20  ;;  %12528 = vst [vmem:[#allocation106_spill] sm:$0xff] %v7411_v22  ;;  %v1938_v27 = vsub.f32 %v7334_v24, %v12529_v8  ;;  %v172_v63 = vsel %vm166_vm1, %v163_v30, %v165_v58  ;;  %v7424_v33 = vand.u32 4294901760, %v806_v18  ;;  %v1921_v32 = vand.u32 4294901760, %v1920_v59 }
  0xd8   :  { %12530 = vst [vmem:[#allocation107_spill] sm:$0xff] %v7418_v62  ;;  %12531 = vst [vmem:[#allocation108_spill] sm:$0xff] %v7420_v38  ;;  %v7430_v8 = vand.u32 4294901760, %v172_v63  ;;  %v7434_v24 = vsub.f32 %v246_v42, %v7392_v11  ;;  %v1932_v30 = vsub.f32 %v7406_v7, %v11813_v21  ;;  %v7445_v6 = vsub.f32 %v675_v45, %v7411_v22 }
  0xd9   :  { %196 = vst.msk [vmem:[#allocation2 + $0x118] sm:$0xff] %vm27_vm0, %v165_v58  ;;  %12532 = vst [vmem:[#allocation109_spill] sm:$0xff] %v7424_v33  ;;  %1205 = vmatprep.subr.mxu0 %v7424_v33  ;;  %1922 = vmatprep.subr.mxu1 %v1921_v32  ;;  %v7441_v58 = vsub.f32 %v806_v18, %v7424_v33  ;;  %v161_v14 = vpop.permute.xlu1 %160  ;;  %v1939_v52 = vand.u32 4294901760, %v1938_v27  ;;  %v7450_v23 = vsub.f32 %v680_v19, %v7420_v38 }
  0xda   :  { %12533 = vst [vmem:[#allocation110_spill] sm:$0xff] %v7430_v8  ;;  %12534 = vst [vmem:[#allocation111_spill] sm:$0xff] %v7434_v24  ;;  %v159_v37 = vpop.permute.xlu0 %158  ;;  %1207 = vmatpush2.msra.mxu0 %v7354_v29  ;;  %1928 = vmatpush2.msra.mxu1 %v1927_v5  ;;  %v7452_v21 = vand.u32 4294901760, %v679_v3  ;;  %v1933_v59 = vand.u32 4294901760, %v1932_v30  ;;  %v12540_v5 = vand.u32 4294901760, %v7395_v60  ;;  %v7466_v32 = vsub.f32 %v172_v63, %v7430_v8 }
  0xdb   :  { %12535 = vst [vmem:[#allocation112_spill] sm:$0xff] %v7441_v58  ;;  %12536 = vst [vmem:[#allocation113_spill] sm:$0xff] %v7445_v6  ;;  %v804_v42 = vld [vmem:[#allocation2 + $0x128] sm:$0xff]  ;;  %v171_v18 = vsel %vm166_vm1, %v159_v37, %v161_v14  ;;  %v11824_v33 = vand.u32 4294901760, %v7441_v58 }
  0xdc   :  { %12537 = vst [vmem:[#allocation114_spill] sm:$0xff] %v7450_v23  ;;  %12538 = vst [vmem:[#allocation115_spill] sm:$0xff] %v7452_v21  ;;  %v7456_v45 = vand.u32 4294901760, %v804_v42  ;;  %v1950_v27 = vsub.f32 %v7395_v60, %v12540_v5  ;;  %v7462_v29 = vand.u32 4294901760, %v171_v18  ;;  %1934 = vmatprep.subr.mxu1 %v1933_v59  ;;  %v12543_v5 = vand.u32 4294901760, %v7409_v20 }
  0xdd   :  { %194 = vst.msk [vmem:[#allocation2 + $0x108] sm:$0xff] %vm27_vm0, %v161_v14  ;;  %12541 = vst [vmem:[#allocation117_spill] sm:$0xff] %v7466_v32  ;;  %v684_v14 = vld [vmem:[%s11630_s1 + $0x68] sm:$0xff]  ;;  %v1944_v37 = vsub.f32 %v7441_v58, %v11824_v33  ;;  %1940 = vmatpush2.msra.mxu1 %v1939_v52  ;;  %v12544_v60 = vand.u32 4294901760, %v7418_v62  ;;  %v7488_v33 = vsub.f32 %v679_v3, %v7452_v21 }
  0xde   :  { %12539 = vst [vmem:[#allocation116_spill] sm:$0xff] %v7456_v45  ;;  %1209 = vmatprep.subr.mxu0 %v7456_v45  ;;  %v7476_v30 = vsub.f32 %v804_v42, %v7456_v45  ;;  %v1229_v19 = vsub.f32 %v7409_v20, %v12543_v5  ;;  %v683_v42 = vld [vmem:[%s11630_s1 + $0x60] sm:$0xff]  ;;  %v1951_v45 = vand.u32 4294901760, %v1950_v27  ;;  %v7503_v3 = vsub.f32 %v171_v18, %v7462_v29  ;;  %v876_v18 = vld [vmem:[%s11631_s2 + $0x8] sm:$0xff] }
  0xdf   :  { %1211 = vmatpush2.msra.mxu0 %v7392_v11  ;;  %v1239_v7 = vsub.f32 %v7418_v62, %v12544_v60  ;;  %v1945_v20 = vand.u32 4294901760, %v1944_v37  ;;  %v7496_v11 = vand.u32 4294901760, %v684_v14  ;;  %v12547_v60 = vand.u32 4294901760, %v7434_v24 }
  0xe0   :  { %12542 = vst [vmem:[#allocation118_spill] sm:$0xff] %v7476_v30  ;;  %v802_v63 = vld [vmem:[#allocation2 + $0x118] sm:$0xff]  ;;  %v11835_v52 = vand.u32 4294901760, %v7476_v30  ;;  %12548 = vst [vmem:[#allocation121_spill] sm:$0xff] %v7503_v3  ;;  %v7512_v27 = vand.u32 4294901760, %v683_v42  ;;  %v1230_v9 = vand.u32 4294901760, %v1229_v19 }
  0xe1   :  { %v7493_v5 = vand.u32 4294901760, %v802_v63  ;;  %12546 = vst [vmem:[#allocation120_spill] sm:$0xff] %v7496_v11  ;;  %v1962_v59 = vsub.f32 %v7434_v24, %v12547_v60  ;;  %1946 = vmatprep.subr.mxu1 %v1945_v20  ;;  %v875_v60 = vld [vmem:[%s11631_s2] sm:$0xff]  ;;  %v1240_v24 = vand.u32 4294901760, %v1239_v7  ;;  %v6400_v19 = vmov 0  }
  0xe2   :  { %v1956_v37 = vsub.f32 %v7476_v30, %v11835_v52  ;;  %12549 = vst [vmem:[#allocation122_spill] sm:$0xff] %v7512_v27  ;;  %1952 = vmatpush2.msra.mxu1 %v1951_v45  ;;  %v12550_v52 = vand.u32 4294901760, %v7445_v6  ;;  %v688_v30 = vld [vmem:[%s11630_s1 + $0x88] sm:$0xff]  ;;  %v7532_v45 = vsub.f32 %v684_v14, %v7496_v11  ;;  %6361 = vset.pattern.permute.xlu0 %v6400_v19 }
  0xe3   :  { %12545 = vst [vmem:[#allocation119_spill] sm:$0xff] %v7493_v5  ;;  %1213 = vmatprep.subr.mxu0 %v7493_v5  ;;  %v7510_v62 = vsub.f32 %v802_v63, %v7493_v5  ;;  %6362 = vset.pattern.permute.xlu1 %v6400_v19  ;;  %v1963_v7 = vand.u32 4294901760, %v1962_v59  ;;  %v7554_v19 = vand.u32 4294901760, %v688_v30 }
  0xe4   :  { %1215 = vmatpush2.msra.mxu0 %v7430_v8  ;;  %v800_v20 = vld [vmem:[#allocation2 + $0x108] sm:$0xff]  ;;  %v1245_v63 = vsub.f32 %v7445_v6, %v12550_v52  ;;  %v1957_v16 = vand.u32 4294901760, %v1956_v37  ;;  %12551 = vst [vmem:[#allocation123_spill] sm:$0xff] %v7532_v45  ;;  %v12552_v52 = vand.u32 4294901760, %v7466_v32  ;;  %v12553_v6 = vand.u32 4294901760, %v7450_v23  ;;  %v687_v37 = vld [vmem:[%s11630_s1 + $0x80] sm:$0xff]  ;;  %901 = vperm.xlu0 %6361, %v875_v60  }
  0xe5   :  { %v7528_v58 = vand.u32 4294901760, %v800_v20  ;;  %v11852_v1 = vand.u32 4294901760, %v7510_v62  ;;  %906 = vperm.xlu1 %6362, %v876_v18   ;;  %12556 = vst [vmem:[#allocation126_spill] sm:$0xff] %v7554_v19  ;;  %v12557_v18 = vand.u32 4294901760, %v7488_v33 }
  0xe6   :  { %v1974_v5 = vsub.f32 %v7466_v32, %v12552_v52  ;;  %v1255_v8 = vsub.f32 %v7450_v23, %v12553_v6  ;;  %1958 = vmatprep.subr.mxu1 %v1957_v16  ;;  %v7552_v6 = vsub.f32 %v683_v42, %v7512_v27  ;;  %v1246_v60 = vand.u32 4294901760, %v1245_v63 }
  0xe7   :  { %1217 = vmatprep.subr.mxu0 %v7528_v58  ;;  %v1968_v14 = vsub.f32 %v7510_v62, %v11852_v1  ;;  %v7549_v59 = vsub.f32 %v800_v20, %v7528_v58  ;;  %1964 = vmatpush2.msra.mxu1 %v1963_v7  ;;  %v1261_v16 = vsub.f32 %v7488_v33, %v12557_v18  ;;  %v11857_v1 = vand.u32 4294901760, %v7532_v45 }
  0xe8   :  { %12555 = vst [vmem:[#allocation125_spill] sm:$0xff] %v7552_v6  ;;  %1219 = vmatpush2.msra.mxu0 %v7462_v29  ;;  %v7563_v42 = vand.u32 4294901760, %v687_v37  ;;  %v1975_v43 = vand.u32 4294901760, %v1974_v5  ;;  %v1256_v7 = vand.u32 4294901760, %v1255_v8  ;;  %v12559_v63 = vand.u32 4294901760, %v7503_v3  ;;  %v691_v5 = vld [vmem:[%s11630_s1 + $0xa0] sm:$0xff] }
  0xe9   :  { %12554 = vst [vmem:[#allocation124_spill] sm:$0xff] %v7549_v59  ;;  %1231 = vmatmul.mubr.f32.vlgmr.msra.gmra.mxu0 %v1230_v9  ;;  %2184 = vmatprep.subr.mxu0 %v6669_v53  ;;  %v1969_v52 = vand.u32 4294901760, %v1968_v14  ;;  %v11855_v20 = vand.u32 4294901760, %v7549_v59  ;;  %v692_v9 = vld [vmem:[%s11630_s1 + $0xa8] sm:$0xff]  ;;  %v11856_v18 = vand.u32 4294901760, %v7552_v6  ;;  %v1262_v8 = vand.u32 4294901760, %v1261_v16 }
  0xea   :  { %12558 = vst [vmem:[#allocation127_spill] sm:$0xff] %v7563_v42  ;;  %2187 = vmatpush1.msra.mxu0 %v6641_v40  ;;  %1241 = vmatprep.mubr.f32.mxu0 %v1240_v24  ;;  %v1986_v23 = vsub.f32 %v7503_v3, %v12559_v63  ;;  %v7578_v24 = vsub.f32 %v688_v30, %v7554_v19  ;;  %v7591_v30 = vand.u32 4294901760, %v692_v9 }
  0xeb   :  { %1970 = vmatprep.subr.mxu1 %v1969_v52  ;;  %2190 = vmatprep.subr.mxu0 %v6672_v54  ;;  %v1980_v14 = vsub.f32 %v7549_v59, %v11855_v20  ;;  %v1271_v63 = vsub.f32 %v7532_v45, %v11857_v1  ;;  %v7589_v20 = vsub.f32 %v687_v37, %v7563_v42  ;;  %v696_v37 = vld [vmem:[%s11630_s1 + $0xc8] sm:$0xff]  ;;  %v12567_v1 = vld [vmem:[#allocation7_spill] sm:$0xff] }
  0xec   :  { %12560 = vst [vmem:[#allocation128_spill] sm:$0xff] %v7578_v24  ;;  %1976 = vmatpush2.msra.mxu1 %v1975_v43  ;;  %2193 = vmatpush1.msra.mxu0 %v6653_v48  ;;  %12562 = vst [vmem:[#allocation130_spill] sm:$0xff] %v7591_v30  ;;  %v1987_v43 = vand.u32 4294901760, %v1986_v23  ;;  %v11862_v16 = vand.u32 4294901760, %v7578_v24  ;;  %v699_v45 = vld [vmem:[%s11630_s1 + $0xe0] sm:$0xff] }
  0xed   :  { %1247 = vmatmul.mubr.f32.gmra.mxu0 %v1246_v60  ;;  %2196 = vmatprep.subr.mxu0 %v6705_v10  ;;  %v1981_v52 = vand.u32 4294901760, %v1980_v14  ;;  %12561 = vst [vmem:[#allocation129_spill] sm:$0xff] %v7589_v20  ;;  %v1277_v60 = vsub.f32 %v7552_v6, %v11856_v18  ;;  %v7599_v14 = vand.u32 4294901760, %v691_v5  ;;  %v1272_v23 = vand.u32 4294901760, %v1271_v63 }
  0xee   :  { %2199 = vmatpush1.msra.mxu0 %v6675_v55  ;;  %1257 = vmatprep.mubr.f32.mxu0 %v1256_v7  ;;  %v11867_v7 = vand.u32 4294901760, %v7589_v20  ;;  %v1287_v63 = vsub.f32 %v7578_v24, %v11862_v16  ;;  %v7623_v18 = vand.u32 4294901760, %v696_v37  ;;  %v12569_v16 = vld [vmem:[#allocation14_spill] sm:$0xff]  ;;  %v700_v24 = vld [vmem:[%s11630_s1 + $0xe8] sm:$0xff] }
  0xef   :  { %1982 = vmatprep.subr.mxu1 %v1981_v52  ;;  %2202 = vmatprep.subr.mxu0 %v6734_v56  ;;  %12563 = vst [vmem:[#allocation131_spill] sm:$0xff] %v7599_v14  ;;  %v7608_v52 = vsub.f32 %v692_v9, %v7591_v30  ;;  %v7621_v9 = vsub.f32 %v691_v5, %v7599_v14  ;;  %v12570_v5 = vld [vmem:[#allocation5_spill] sm:$0xff] }
  0xf0   :  { %1988 = vmatpush2.msra.mxu1 %v1987_v43  ;;  %2205 = vmatpush1.msra.mxu0 %v6693_v4  ;;  %v695_v43 = vld [vmem:[%s11630_s1 + $0xc0] sm:$0xff]  ;;  %12566 = vst [vmem:[#allocation134_spill] sm:$0xff] %v7623_v18 }
  0xf1   :  { %1263 = vmatmul.mubr.f32.gmra.mxu0 %v1262_v8  ;;  %1992 = vmatmul.mubr.f32.vlgmr.msra.gmra.mxu1 %v7368_v13  ;;  %12564 = vst [vmem:[#allocation132_spill] sm:$0xff] %v7608_v52  ;;  %v1278_v8 = vand.u32 4294901760, %v1277_v60  ;;  %12565 = vst [vmem:[#allocation133_spill] sm:$0xff] %v7621_v9  ;;  %v1293_v60 = vsub.f32 %v7589_v20, %v11867_v7  ;;  %v7632_v6 = vand.u32 4294901760, %v695_v43  ;;  %v12572_v13 = vld [vmem:[#allocation32_spill] sm:$0xff]  ;;  %v12573_v20 = vld [vmem:[#allocation9_spill] sm:$0xff] }
  0xf2   :  { %2208 = vmatprep.subr.mxu0 %v6773_v61  ;;  %2616 = vmatprep.subr.mxu1 %v6657_v50  ;;  %v7642_v7 = vsub.f32 %v696_v37, %v7623_v18 }
  0xf3   :  { %2211 = vmatpush1.msra.mxu0 %v6723_v44  ;;  %2618 = vmatpush1.msra.mxu1 %v6622_v34  ;;  %12568 = vst [vmem:[#allocation135_spill] sm:$0xff] %v7632_v6  ;;  %v7655_v37 = vsub.f32 %v695_v43, %v7632_v6  ;;  %v12583_v43 = vld [vmem:[#allocation31_spill] sm:$0xff] }
  0xf4   :  { %2214 = vmatprep.subr.mxu0 %v6812_v12  ;;  %2620 = vmatprep.subr.mxu1 %v12567_v1  ;;  %12571 = vst [vmem:[#allocation136_spill] sm:$0xff] %v7642_v7  ;;  %v558_v1 = vpop.permute.xlu0 %557 }
  0xf5   :  { %1273 = vmatprep.mubr.f32.mxu0 %v1272_v23  ;;  %1998 = vmatprep.mubr.f32.mxu1 %v7372_v17  ;;  %v1288_v23 = vand.u32 4294901760, %v1287_v63  ;;  %v12576_v63 = vand.u32 4294901760, %v7608_v52  ;;  %12577 = vst [vmem:[#allocation137_spill] sm:$0xff] %v7655_v37 }
  0xf6   :  { %2217 = vmatpush1.msra.mxu0 %v12569_v16  ;;  %2622 = vmatpush1.msra.mxu1 %v12570_v5  ;;  %v12574_v5 = vld [vmem:[#allocation25_spill] sm:$0xff]  ;;  %v12575_v16 = vld [vmem:[#allocation6_spill] sm:$0xff] }
  0xf7   :  { %1279 = vmatmul.mubr.f32.gmra.mxu0 %v1278_v8  ;;  %2000 = vmatmul.mubr.f32.gmra.mxu1 %v7411_v22  ;;  %v1294_v8 = vand.u32 4294901760, %v1293_v60  ;;  %v1303_v17 = vsub.f32 %v7608_v52, %v12576_v63  ;;  %v7657_v22 = vand.u32 4294901760, %v700_v24  ;;  %v7666_v63 = vand.u32 4294901760, %v699_v45  ;;  %v12584_v52 = vld [vmem:[#allocation8_spill] sm:$0xff] }
  0xf8   :  { %2220 = vmatprep.subr.mxu0 %v12572_v13  ;;  %2624 = vmatprep.subr.mxu1 %v12573_v20  ;;  %v12579_v13 = vld [vmem:[#allocation38_spill] sm:$0xff]  ;;  %v12580_v20 = vld [vmem:[#allocation11_spill] sm:$0xff] }
  0xf9   :  { %2223 = vmatpush1.msra.mxu0 %v12574_v5  ;;  %2626 = vmatpush1.msra.mxu1 %v12575_v16  ;;  %12578 = vst [vmem:[#allocation138_spill] sm:$0xff] %v7657_v22  ;;  %v12581_v16 = vand.u32 4294901760, %v7621_v9  ;;  %12582 = vst [vmem:[#allocation38_spill] sm:$0xff] %v7666_v63  ;;  %v560_v5 = vpop.permute.xlu1 %559 }
  0xfa   :  { %2226 = vmatprep.subr.mxu0 %v12579_v13  ;;  %2628 = vmatprep.subr.mxu1 %v12580_v20  ;;  %v704_v20 = vld [vmem:[%s11630_s1 + $0x108] sm:$0xff]  ;;  %591 = vst.msk [vmem:[#allocation2 + $0x2f8] sm:$0xff] %vm27_vm0, %v560_v5 }
  0xfb   :  { %1289 = vmatprep.mubr.f32.mxu0 %v1288_v23  ;;  %2006 = vmatprep.mubr.f32.mxu1 %v7420_v38  ;;  %v1309_v60 = vsub.f32 %v7621_v9, %v12581_v16  ;;  %v1304_v23 = vand.u32 4294901760, %v1303_v17  ;;  %v7676_v16 = vsub.f32 %v700_v24, %v7657_v22  ;;  %v12586_v9 = vld [vmem:[#allocation16_spill] sm:$0xff]  ;;  %v12587_v17 = vld [vmem:[#allocation37_spill] sm:$0xff]  ;;  %v12588_v38 = vld [vmem:[#allocation10_spill] sm:$0xff] }
  0xfc   :  { %2229 = vmatpush1.msra.mxu0 %v12583_v43  ;;  %2630 = vmatpush1.msra.mxu1 %v12584_v52  ;;  %v703_v52 = vld [vmem:[%s11630_s1 + $0x100] sm:$0xff] }
  0xfd   :  { %1295 = vmatmul.mubr.f32.gmra.mxu0 %v1294_v8  ;;  %2008 = vmatmul.mubr.f32.gmra.mxu1 %v7452_v21  ;;  %12585 = vst [vmem:[#allocation139_spill] sm:$0xff] %v7676_v16  ;;  %v567_v8 = vsel %vm561_vm6, %v558_v1, %v560_v5  ;;  %v1310_v24 = vand.u32 4294901760, %v1309_v60  ;;  %v12589_v21 = vand.u32 4294901760, %v7642_v7  ;;  %v12592_v1 = vld [vmem:[#allocation23_spill] sm:$0xff]  ;;  %v554_v5 = vpop.permute.xlu0 %553  ;;  %v12593_v60 = vand.u32 4294901760, %v7655_v37 }
  0xfe   :  { %2232 = vmatprep.subr.mxu0 %v6942_v26  ;;  %2632 = vmatprep.subr.mxu1 %v12586_v9  ;;  %v7691_v26 = vsub.f32 %v699_v45, %v7666_v63  ;;  %v7693_v9 = vand.u32 4294901760, %v704_v20  ;;  %590 = vst [vmem:[#allocation2 + $0x2f0] sm:$0xff] %v567_v8  ;;  %v12595_v45 = vld [vmem:[#allocation12_spill] sm:$0xff] }
  0xff   :  { %2235 = vmatpush1.msra.mxu0 %v12587_v17  ;;  %2634 = vmatpush1.msra.mxu1 %v12588_v38  ;;  %v1319_v43 = vsub.f32 %v7642_v7, %v12589_v21  ;;  %v1325_v38 = vsub.f32 %v7655_v37, %v12593_v60  ;;  %v7702_v7 = vand.u32 4294901760, %v703_v52  ;;  %v708_v8 = vld [vmem:[%s11630_s1 + $0x128] sm:$0xff]  ;;  %v556_v21 = vpop.permute.xlu1 %555  ;;  %v12597_v37 = vld [vmem:[#allocation19_spill] sm:$0xff] }
 0x100   :  { %12590 = vst [vmem:[#allocation37_spill] sm:$0xff] %v7691_v26  ;;  %12591 = vst [vmem:[#allocation140_spill] sm:$0xff] %v7693_v9  ;;  %2238 = vmatprep.subr.mxu0 %v6984_v0  ;;  %2636 = vmatprep.subr.mxu1 %v12592_v1  ;;  %v7712_v60 = vsub.f32 %v704_v20, %v7693_v9  ;;  %v12598_v1 = vld [vmem:[#allocation29_spill] sm:$0xff]  ;;  %v12601_v20 = vand.u32 4294901760, %v7676_v16  ;;  %v12604_v0 = vld [vmem:[#allocation26_spill] sm:$0xff] }
 0x101   :  { %1305 = vmatprep.mubr.f32.mxu0 %v1304_v23  ;;  %2014 = vmatprep.mubr.f32.mxu1 %v7496_v11  ;;  %12594 = vst [vmem:[#allocation141_spill] sm:$0xff] %v7702_v7  ;;  %v1320_v23 = vand.u32 4294901760, %v1319_v43  ;;  %589 = vst.msk [vmem:[#allocation2 + $0x2e8] sm:$0xff] %vm27_vm0, %v556_v21  ;;  %v12600_v43 = vld [vmem:[#allocation18_spill] sm:$0xff]  ;;  %v1326_v11 = vand.u32 4294901760, %v1325_v38  ;;  %v12606_v38 = vand.u32 4294901760, %v7691_v26 }
 0x102   :  { %2241 = vmatpush1.msra.mxu0 %v6933_v39  ;;  %2638 = vmatpush1.msra.mxu1 %v12595_v45  ;;  %12596 = vst [vmem:[#allocation142_spill] sm:$0xff] %v7712_v60  ;;  %v707_v45 = vld [vmem:[%s11630_s1 + $0x120] sm:$0xff]  ;;  %v566_v39 = vsel %vm561_vm6, %v554_v5, %v556_v21  ;;  %v550_v21 = vpop.permute.xlu0 %549 }
 0x103   :  { %1311 = vmatmul.mubr.f32.gmra.mxu0 %v1310_v24  ;;  %2016 = vmatmul.mubr.f32.gmra.mxu1 %v7512_v27  ;;  %v12599_v24 = vld [vmem:[#allocation22_spill] sm:$0xff]  ;;  %v1335_v27 = vsub.f32 %v7676_v16, %v12601_v20  ;;  %588 = vst [vmem:[#allocation2 + $0x2e0] sm:$0xff] %v566_v39  ;;  %v12605_v5 = vld [vmem:[#allocation35_spill] sm:$0xff]  ;;  %v7738_v16 = vand.u32 4294901760, %v707_v45  ;;  %v712_v39 = vld [vmem:[%s11630_s1 + $0x148] sm:$0xff]  ;;  %v552_v20 = vpop.permute.xlu1 %551 }
 0x104   :  { %2244 = vmatprep.subr.mxu0 %v12597_v37  ;;  %2640 = vmatprep.subr.mxu1 %v12598_v1  ;;  %v7727_v37 = vsub.f32 %v703_v52, %v7702_v7  ;;  %v7729_v1 = vand.u32 4294901760, %v708_v8  ;;  %v12608_v52 = vld [vmem:[#allocation28_spill] sm:$0xff]  ;;  %587 = vst.msk [vmem:[#allocation2 + $0x2d8] sm:$0xff] %vm27_vm0, %v552_v20 }
 0x105   :  { %2247 = vmatpush1.msra.mxu0 %v12599_v24  ;;  %2642 = vmatpush1.msra.mxu1 %v12600_v43  ;;  %v1341_v43 = vsub.f32 %v7691_v26, %v12606_v38  ;;  %12607 = vst [vmem:[#allocation26_spill] sm:$0xff] %v7738_v16  ;;  %v12609_v24 = vld [vmem:[#allocation24_spill] sm:$0xff] }
 0x106   :  { %12602 = vst [vmem:[#allocation143_spill] sm:$0xff] %v7727_v37  ;;  %12603 = vst [vmem:[#allocation144_spill] sm:$0xff] %v7729_v1  ;;  %2250 = vmatprep.subr.mxu0 %v12604_v0  ;;  %2644 = vmatprep.subr.mxu1 %v12605_v5  ;;  %v7748_v38 = vsub.f32 %v708_v8, %v7729_v1  ;;  %v12611_v26 = vld [vmem:[#allocation40_spill] sm:$0xff]  ;;  %v12613_v8 = vand.u32 4294901760, %v7712_v60 }
 0x107   :  { %1321 = vmatprep.mubr.f32.mxu0 %v1320_v23  ;;  %2022 = vmatprep.mubr.f32.mxu1 %v7554_v19  ;;  %v1336_v23 = vand.u32 4294901760, %v1335_v27  ;;  %v1342_v27 = vand.u32 4294901760, %v1341_v43  ;;  %v12616_v43 = vand.u32 4294901760, %v7727_v37 }
 0x108   :  { %2253 = vmatpush1.msra.mxu0 %v12608_v52  ;;  %2646 = vmatpush1.msra.mxu1 %v12609_v24  ;;  %12610 = vst [vmem:[#allocation35_spill] sm:$0xff] %v7748_v38  ;;  %v711_v24 = vld [vmem:[%s11630_s1 + $0x140] sm:$0xff]  ;;  %v565_v52 = vsel %vm561_vm6, %v550_v21, %v552_v20  ;;  %v1351_v19 = vsub.f32 %v7712_v60, %v12613_v8  ;;  %v546_v21 = vpop.permute.xlu0 %545 }
 0x109   :  { %1327 = vmatmul.mubr.f32.gmra.mxu0 %v1326_v11  ;;  %2024 = vmatmul.mubr.f32.gmra.mxu1 %v7563_v42  ;;  %v12612_v11 = vld [vmem:[#allocation30_spill] sm:$0xff]  ;;  %v7763_v42 = vsub.f32 %v707_v45, %v7738_v16  ;;  %586 = vst [vmem:[#allocation2 + $0x2d0] sm:$0xff] %v565_v52  ;;  %v1357_v20 = vsub.f32 %v7727_v37, %v12616_v43  ;;  %v7774_v60 = vand.u32 4294901760, %v711_v24  ;;  %v12618_v45 = vld [vmem:[#allocation36_spill] sm:$0xff]  ;;  %v715_v8 = vld [vmem:[%s11630_s1 + $0x160] sm:$0xff]  ;;  %v548_v37 = vpop.permute.xlu1 %547 }
 0x10a   :  { %2256 = vmatprep.subr.mxu0 %v6870_v41  ;;  %2648 = vmatprep.subr.mxu1 %v12611_v26  ;;  %v7765_v26 = vand.u32 4294901760, %v712_v39  ;;  %v716_v52 = vld [vmem:[%s11630_s1 + $0x168] sm:$0xff]  ;;  %585 = vst.msk [vmem:[#allocation2 + $0x2c8] sm:$0xff] %vm27_vm0, %v548_v37 }
 0x10b   :  { %2259 = vmatpush1.msra.mxu0 %v6917_v31  ;;  %2650 = vmatpush1.msra.mxu1 %v12612_v11  ;;  %12614 = vst [vmem:[#allocation30_spill] sm:$0xff] %v7763_v42  ;;  %12617 = vst [vmem:[#allocation146_spill] sm:$0xff] %v7774_v60 }
 0x10c   :  { %12615 = vst [vmem:[#allocation145_spill] sm:$0xff] %v7765_v26  ;;  %2262 = vmatprep.subr.mxu0 %v6959_v46  ;;  %2652 = vmatprep.subr.mxu1 %v6965_v15  ;;  %v7784_v43 = vsub.f32 %v712_v39, %v7765_v26  ;;  %v12622_v39 = vand.u32 4294901760, %v7748_v38  ;;  %v7801_v15 = vand.u32 4294901760, %v716_v52 }
 0x10d   :  { %1337 = vmatprep.mubr.f32.mxu0 %v1336_v23  ;;  %2030 = vmatprep.mubr.f32.mxu1 %v7591_v30  ;;  %v1352_v23 = vand.u32 4294901760, %v1351_v19  ;;  %v12621_v19 = vld [vmem:[#allocation15_spill] sm:$0xff] }
 0x10e   :  { %2265 = vmatpush1.msra.mxu0 %v6989_v36  ;;  %2654 = vmatpush1.msra.mxu1 %v12618_v45  ;;  %12619 = vst [vmem:[#allocation147_spill] sm:$0xff] %v7784_v43  ;;  %v12620_v45 = vld [vmem:[#allocation13_spill] sm:$0xff]  ;;  %v564_v36 = vsel %vm561_vm6, %v546_v21, %v548_v37  ;;  %v1367_v30 = vsub.f32 %v7748_v38, %v12622_v39  ;;  %12624 = vst [vmem:[#allocation149_spill] sm:$0xff] %v7801_v15  ;;  %v7805_v37 = vand.u32 4294901760, %v715_v8  ;;  %v12629_v38 = vld [vmem:[#allocation51_spill] sm:$0xff] }
 0x10f   :  { %1343 = vmatmul.mubr.f32.gmra.mxu0 %v1342_v27  ;;  %2032 = vmatmul.mubr.f32.gmra.mxu1 %v7599_v14  ;;  %v1358_v27 = vand.u32 4294901760, %v1357_v20  ;;  %v7799_v14 = vsub.f32 %v711_v24, %v7774_v60  ;;  %584 = vst [vmem:[#allocation2 + $0x2c0] sm:$0xff] %v564_v36  ;;  %v12626_v21 = vld [vmem:[#allocation17_spill] sm:$0xff]  ;;  %v12628_v20 = vand.u32 4294901760, %v7763_v42  ;;  %v720_v36 = vld [vmem:[%s11630_s1 + $0x188] sm:$0xff]  ;;  %v544_v24 = vpop.permute.xlu1 %543 }
 0x110   :  { %2268 = vmatprep.subr.mxu0 %v7001_v28  ;;  %2656 = vmatprep.subr.mxu1 %v12620_v45  ;;  %v12625_v45 = vld [vmem:[#allocation50_spill] sm:$0xff]  ;;  %12627 = vst [vmem:[#allocation150_spill] sm:$0xff] %v7805_v37  ;;  %583 = vst.msk [vmem:[#allocation2 + $0x2b8] sm:$0xff] %vm27_vm0, %v544_v24 }
 0x111   :  { %2271 = vmatpush1.msra.mxu0 %v7011_v51  ;;  %2658 = vmatpush1.msra.mxu1 %v12621_v19  ;;  %12623 = vst [vmem:[#allocation148_spill] sm:$0xff] %v7799_v14  ;;  %v542_v51 = vpop.permute.xlu0 %541  ;;  %v1373_v39 = vsub.f32 %v7763_v42, %v12628_v20  ;;  %v12630_v19 = vld [vmem:[#allocation20_spill] sm:$0xff]  ;;  %v719_v20 = vld [vmem:[%s11630_s1 + $0x180] sm:$0xff]  ;;  %v12632_v42 = vld [vmem:[#allocation21_spill] sm:$0xff] }
 0x112   :  { %2274 = vmatprep.subr.mxu0 %v12625_v45  ;;  %2660 = vmatprep.subr.mxu1 %v12626_v21  ;;  %v7820_v21 = vsub.f32 %v716_v52, %v7801_v15  ;;  %v12719_v45 = vld [vmem:[#allocation84_spill] sm:$0xff] }
 0x113   :  { %1353 = vmatprep.mubr.f32.mxu0 %v1352_v23  ;;  %2038 = vmatprep.mubr.f32.mxu1 %v7623_v18  ;;  %v1368_v23 = vand.u32 4294901760, %v1367_v30  ;;  %v12634_v30 = vld [vmem:[#allocation27_spill] sm:$0xff]  ;;  %v1374_v52 = vand.u32 4294901760, %v1373_v39  ;;  %v12635_v18 = vand.u32 4294901760, %v7784_v43 }
 0x114   :  { %2277 = vmatpush1.msra.mxu0 %v12629_v38  ;;  %2662 = vmatpush1.msra.mxu1 %v12630_v19  ;;  %12631 = vst [vmem:[#allocation151_spill] sm:$0xff] %v7820_v21  ;;  %v7828_v19 = vsub.f32 %v715_v8, %v7805_v37  ;;  %v7837_v38 = vand.u32 4294901760, %v720_v36  ;;  %v12637_v8 = vld [vmem:[#allocation33_spill] sm:$0xff] }
 0x115   :  { %1359 = vmatmul.mubr.f32.gmra.mxu0 %v1358_v27  ;;  %2040 = vmatmul.mubr.f32.gmra.mxu1 %v7632_v6  ;;  %v563_v27 = vsel %vm561_vm6, %v542_v51, %v544_v24  ;;  %v1383_v6 = vsub.f32 %v7784_v43, %v12635_v18  ;;  %v538_v51 = vpop.permute.xlu0 %537  ;;  %v12639_v24 = vand.u32 4294901760, %v7799_v14  ;;  %v12640_v18 = vld [vmem:[#allocation34_spill] sm:$0xff]  ;;  %v724_v43 = vld [vmem:[%s11630_s1 + $0x1a8] sm:$0xff] }
 0x116   :  { %2280 = vmatprep.subr.mxu0 %v7071_v47  ;;  %2664 = vmatprep.subr.mxu1 %v12632_v42  ;;  %12633 = vst [vmem:[#allocation152_spill] sm:$0xff] %v7828_v19  ;;  %12636 = vst [vmem:[#allocation153_spill] sm:$0xff] %v7837_v38  ;;  %v7841_v42 = vand.u32 4294901760, %v719_v20 }
 0x117   :  { %2283 = vmatpush2.msra.mxu0 %v7075_v2  ;;  %2666 = vmatpush1.msra.mxu1 %v12634_v30  ;;  %582 = vst [vmem:[#allocation2 + $0x2b0] sm:$0xff] %v563_v27  ;;  %v1389_v39 = vsub.f32 %v7799_v14, %v12639_v24  ;;  %v540_v24 = vpop.permute.xlu1 %539  ;;  %v12642_v30 = vld [vmem:[#allocation39_spill] sm:$0xff]  ;;  %v12706_v2 = vld [vmem:[#allocation76_spill] sm:$0xff] }
 0x118   :  { %2286 = vmatprep.subr.mxu0 %v7083_v49  ;;  %2668 = vmatprep.subr.mxu1 %v12637_v8  ;;  %12638 = vst [vmem:[#allocation154_spill] sm:$0xff] %v7841_v42  ;;  %v7861_v14 = vsub.f32 %v719_v20, %v7841_v42  ;;  %v723_v27 = vld [vmem:[%s11630_s1 + $0x1a0] sm:$0xff]  ;;  %581 = vst.msk [vmem:[#allocation2 + $0x2a8] sm:$0xff] %vm27_vm0, %v540_v24  ;;  %v12647_v20 = vld [vmem:[#allocation69_spill] sm:$0xff] }
 0x119   :  { %1369 = vmatprep.mubr.f32.mxu0 %v1368_v23  ;;  %2046 = vmatprep.mubr.f32.mxu1 %v7657_v22  ;;  %v1384_v23 = vand.u32 4294901760, %v1383_v6  ;;  %v7856_v22 = vsub.f32 %v720_v36, %v7837_v38  ;;  %v12644_v6 = vld [vmem:[#allocation43_spill] sm:$0xff]  ;;  %v1390_v36 = vand.u32 4294901760, %v1389_v39  ;;  %v12654_v39 = vld [vmem:[#allocation74_spill] sm:$0xff]  ;;  %v12701_v8 = vld [vmem:[#allocation104_spill] sm:$0xff] }
 0x11a   :  { %2289 = vmatpush2.msra.mxu0 %v7087_v35  ;;  %2670 = vmatpush1.msra.mxu1 %v12640_v18  ;;  %12643 = vst [vmem:[#allocation156_spill] sm:$0xff] %v7861_v14  ;;  %v12648_v18 = vld [vmem:[#allocation44_spill] sm:$0xff]  ;;  %v479_v35 = vpop.permute.xlu0 %478 }
 0x11b   :  { %1375 = vmatmul.mubr.f32.gmra.mxu0 %v1374_v52  ;;  %2048 = vmatmul.mubr.f32.gmra.mxu1 %v7666_v63  ;;  %12641 = vst [vmem:[#allocation155_spill] sm:$0xff] %v7856_v22  ;;  %v562_v52 = vsel %vm561_vm6, %v538_v51, %v540_v24  ;;  %v12645_v63 = vand.u32 4294901760, %v7820_v21  ;;  %v12649_v51 = vand.u32 4294901760, %v7828_v19 }
 0x11c   :  { %2292 = vmatprep.subr.mxu0 %v7122_v57  ;;  %2672 = vmatprep.subr.mxu1 %v12642_v30  ;;  %v7873_v57 = vand.u32 4294901760, %v724_v43  ;;  %580 = vst [vmem:[#allocation2 + $0x2a0] sm:$0xff] %v562_v52  ;;  %v727_v52 = vld [vmem:[%s11630_s1 + $0x1c0] sm:$0xff] }
 0x11d   :  { %2295 = vmatpush2.msra.mxu0 %v7131_v25  ;;  %2674 = vmatpush1.msra.mxu1 %v12644_v6  ;;  %v1399_v30 = vsub.f32 %v7820_v21, %v12645_v63  ;;  %v1405_v24 = vsub.f32 %v7828_v19, %v12649_v51  ;;  %v7882_v6 = vand.u32 4294901760, %v723_v27  ;;  %v12651_v63 = vld [vmem:[#allocation68_spill] sm:$0xff]  ;;  %v12652_v21 = vld [vmem:[#allocation46_spill] sm:$0xff] }
 0x11e   :  { %12646 = vst [vmem:[#allocation157_spill] sm:$0xff] %v7873_v57  ;;  %2298 = vmatprep.subr.mxu0 %v12647_v20  ;;  %2676 = vmatprep.subr.mxu1 %v12648_v18  ;;  %v728_v18 = vld [vmem:[%s11630_s1 + $0x1c8] sm:$0xff]  ;;  %v7892_v51 = vsub.f32 %v724_v43, %v7873_v57  ;;  %v12662_v20 = vld [vmem:[#allocation55_spill] sm:$0xff]  ;;  %v475_v25 = vpop.permute.xlu0 %474 }
 0x11f   :  { %1385 = vmatprep.mubr.f32.mxu0 %v1384_v23  ;;  %2054 = vmatprep.mubr.f32.mxu1 %v7693_v9  ;;  %12650 = vst [vmem:[#allocation158_spill] sm:$0xff] %v7882_v6  ;;  %v1400_v23 = vand.u32 4294901760, %v1399_v30  ;;  %v12655_v9 = vld [vmem:[#allocation52_spill] sm:$0xff]  ;;  %v1406_v19 = vand.u32 4294901760, %v1405_v24  ;;  %v12658_v30 = vand.u32 4294901760, %v7856_v22 }
 0x120   :  { %2301 = vmatpush2.msra.mxu0 %v12651_v63  ;;  %2678 = vmatpush1.msra.mxu1 %v12652_v21  ;;  %12653 = vst [vmem:[#allocation159_spill] sm:$0xff] %v7892_v51  ;;  %v481_v21 = vpop.permute.xlu1 %480  ;;  %v12656_v63 = vld [vmem:[#allocation70_spill] sm:$0xff] }
 0x121   :  { %1391 = vmatmul.mubr.f32.gmra.mxu0 %v1390_v36  ;;  %2056 = vmatmul.mubr.f32.gmra.mxu1 %v7702_v7  ;;  %v12657_v36 = vld [vmem:[#allocation53_spill] sm:$0xff]  ;;  %v1415_v43 = vsub.f32 %v7856_v22, %v12658_v30  ;;  %v7905_v7 = vsub.f32 %v723_v27, %v7882_v6  ;;  %v488_v24 = vsel %vm482_vm7, %v479_v35, %v481_v21  ;;  %v7918_v30 = vand.u32 4294901760, %v727_v52  ;;  %v732_v22 = vld [vmem:[%s11630_s1 + $0x1e8] sm:$0xff]  ;;  %v731_v27 = vld [vmem:[%s11630_s1 + $0x1e0] sm:$0xff] }
 0x122   :  { %2304 = vmatprep.subr.mxu0 %v12654_v39  ;;  %2680 = vmatprep.subr.mxu1 %v12655_v9  ;;  %v7907_v39 = vand.u32 4294901760, %v728_v18  ;;  %512 = vst.msk [vmem:[#allocation2 + $0x298] sm:$0xff] %vm27_vm0, %v481_v21  ;;  %v12661_v9 = vld [vmem:[#allocation78_spill] sm:$0xff]  ;;  %511 = vst [vmem:[#allocation2 + $0x290] sm:$0xff] %v488_v24  ;;  %v12665_v35 = vld [vmem:[#allocation73_spill] sm:$0xff] }
 0x123   :  { %2307 = vmatpush2.msra.mxu0 %v12656_v63  ;;  %2682 = vmatpush2.msra.mxu1 %v12657_v36  ;;  %12659 = vst [vmem:[#allocation160_spill] sm:$0xff] %v7905_v7  ;;  %v12663_v63 = vand.u32 4294901760, %v7861_v14  ;;  %12664 = vst [vmem:[#allocation162_spill] sm:$0xff] %v7918_v30  ;;  %v12666_v21 = vld [vmem:[#allocation54_spill] sm:$0xff] }
 0x124   :  { %12660 = vst [vmem:[#allocation161_spill] sm:$0xff] %v7907_v39  ;;  %2310 = vmatprep.subr.mxu0 %v12661_v9  ;;  %2684 = vmatprep.subr.mxu1 %v12662_v20  ;;  %v7928_v24 = vsub.f32 %v728_v18, %v7907_v39  ;;  %v12670_v20 = vld [vmem:[#allocation77_spill] sm:$0xff]  ;;  %v7941_v18 = vsub.f32 %v727_v52, %v7918_v30  ;;  %v12678_v52 = vand.u32 4294901760, %v7905_v7 }
 0x125   :  { %v1421_v36 = vsub.f32 %v7861_v14, %v12663_v63  ;;  %1401 = vmatprep.mubr.f32.mxu0 %v1400_v23  ;;  %2062 = vmatprep.mubr.f32.mxu1 %v7729_v1  ;;  %v1416_v63 = vand.u32 4294901760, %v1415_v43  ;;  %v12668_v1 = vld [vmem:[#allocation82_spill] sm:$0xff]  ;;  %v12669_v14 = vld [vmem:[#allocation61_spill] sm:$0xff]  ;;  %v12672_v43 = vand.u32 4294901760, %v7892_v51 }
 0x126   :  { %2313 = vmatpush2.msra.mxu0 %v12665_v35  ;;  %2686 = vmatpush2.msra.mxu1 %v12666_v21  ;;  %12667 = vst [vmem:[#allocation163_spill] sm:$0xff] %v7928_v24  ;;  %v477_v35 = vpop.permute.xlu1 %476  ;;  %12673 = vst [vmem:[#allocation164_spill] sm:$0xff] %v7941_v18 }
 0x127   :  { %1407 = vmatmul.mubr.f32.gmra.mxu0 %v1406_v19  ;;  %2064 = vmatmul.mubr.f32.gmra.mxu1 %v7738_v16  ;;  %v1422_v21 = vand.u32 4294901760, %v1421_v36  ;;  %v12671_v19 = vld [vmem:[#allocation58_spill] sm:$0xff]  ;;  %v1431_v23 = vsub.f32 %v7892_v51, %v12672_v43  ;;  %v7943_v16 = vand.u32 4294901760, %v732_v22  ;;  %v487_v9 = vsel %vm482_vm7, %v475_v25, %v477_v35  ;;  %510 = vst.msk [vmem:[#allocation2 + $0x288] sm:$0xff] %vm27_vm0, %v477_v35  ;;  %v12679_v25 = vld [vmem:[#allocation79_spill] sm:$0xff] }
 0x128   :  { %2316 = vmatprep.subr.mxu0 %v12668_v1  ;;  %2688 = vmatprep.subr.mxu1 %v12669_v14  ;;  %v12675_v14 = vld [vmem:[#allocation86_spill] sm:$0xff]  ;;  %509 = vst [vmem:[#allocation2 + $0x280] sm:$0xff] %v487_v9  ;;  %v1437_v43 = vsub.f32 %v7905_v7, %v12678_v52  ;;  %v12683_v51 = vld [vmem:[#allocation71_spill] sm:$0xff] }
 0x129   :  { %2319 = vmatpush2.msra.mxu0 %v12670_v20  ;;  %2690 = vmatpush2.msra.mxu1 %v12671_v19  ;;  %12674 = vst [vmem:[#allocation165_spill] sm:$0xff] %v7943_v16  ;;  %v12676_v36 = vld [vmem:[#allocation66_spill] sm:$0xff]  ;;  %v7949_v20 = vand.u32 4294901760, %v731_v27  ;;  %v471_v19 = vpop.permute.xlu0 %470  ;;  %v1432_v9 = vand.u32 4294901760, %v1431_v23  ;;  %v12693_v1 = vld [vmem:[#allocation67_spill] sm:$0xff] }
 0x12a   :  { %2322 = vmatprep.subr.mxu0 %v12675_v14  ;;  %2692 = vmatprep.subr.mxu1 %v12676_v36  ;;  %v12680_v35 = vld [vmem:[#allocation62_spill] sm:$0xff]  ;;  %v736_v36 = vld [vmem:[%s11630_s1 + $0x208] sm:$0xff]  ;;  %v1438_v23 = vand.u32 4294901760, %v1437_v43 }
 0x12b   :  { %12677 = vst [vmem:[#allocation166_spill] sm:$0xff] %v7949_v20  ;;  %1417 = vmatprep.mubr.f32.mxu0 %v1416_v63  ;;  %2070 = vmatprep.mubr.f32.mxu1 %v7765_v26  ;;  %v7964_v26 = vsub.f32 %v732_v22, %v7943_v16  ;;  %v12682_v52 = vld [vmem:[#allocation90_spill] sm:$0xff]  ;;  %v7969_v7 = vsub.f32 %v731_v27, %v7949_v20  ;;  %v12687_v63 = vand.u32 4294901760, %v7928_v24  ;;  %v12690_v27 = vld [vmem:[#allocation75_spill] sm:$0xff]  ;;  %v740_v14 = vld [vmem:[%s11630_s1 + $0x228] sm:$0xff] }
 0x12c   :  { %2325 = vmatpush2.msra.mxu0 %v12679_v25  ;;  %2694 = vmatpush2.msra.mxu1 %v12680_v35  ;;  %v735_v35 = vld [vmem:[%s11630_s1 + $0x200] sm:$0xff]  ;;  %v7979_v25 = vand.u32 4294901760, %v736_v36 }
 0x12d   :  { %1423 = vmatmul.mubr.f32.gmra.mxu0 %v1422_v21  ;;  %2072 = vmatmul.mubr.f32.gmra.mxu1 %v7774_v60  ;;  %12681 = vst [vmem:[#allocation167_spill] sm:$0xff] %v7964_v26  ;;  %12684 = vst [vmem:[#allocation168_spill] sm:$0xff] %v7969_v7  ;;  %v12685_v21 = vld [vmem:[#allocation85_spill] sm:$0xff]  ;;  %v12686_v60 = vld [vmem:[#allocation64_spill] sm:$0xff]  ;;  %v1447_v22 = vsub.f32 %v7928_v24, %v12687_v63  ;;  %v467_v43 = vpop.permute.xlu0 %466  ;;  %v12691_v63 = vand.u32 4294901760, %v7941_v18 }
 0x12e   :  { %2328 = vmatprep.subr.mxu0 %v12682_v52  ;;  %2696 = vmatprep.subr.mxu1 %v12683_v51  ;;  %12688 = vst [vmem:[#allocation169_spill] sm:$0xff] %v7979_v25  ;;  %v473_v52 = vpop.permute.xlu1 %472  ;;  %v12689_v51 = vld [vmem:[#allocation94_spill] sm:$0xff] }
 0x12f   :  { %2331 = vmatpush2.msra.mxu0 %v12685_v21  ;;  %2698 = vmatpush2.msra.mxu1 %v12686_v60  ;;  %v486_v21 = vsel %vm482_vm7, %v471_v19, %v473_v52  ;;  %508 = vst.msk [vmem:[#allocation2 + $0x278] sm:$0xff] %vm27_vm0, %v473_v52  ;;  %v1453_v24 = vsub.f32 %v7941_v18, %v12691_v63  ;;  %v7993_v60 = vand.u32 4294901760, %v735_v35  ;;  %v1448_v52 = vand.u32 4294901760, %v1447_v22  ;;  %v744_v19 = vld [vmem:[%s11630_s1 + $0x248] sm:$0xff]  ;;  %v12697_v18 = vld [vmem:[#allocation93_spill] sm:$0xff] }
 0x130   :  { %2334 = vmatprep.subr.mxu0 %v12689_v51  ;;  %2700 = vmatprep.subr.mxu1 %v12690_v27  ;;  %507 = vst [vmem:[#allocation2 + $0x270] sm:$0xff] %v486_v21  ;;  %v12692_v27 = vld [vmem:[#allocation89_spill] sm:$0xff]  ;;  %v8003_v63 = vsub.f32 %v736_v36, %v7979_v25  ;;  %v8005_v51 = vand.u32 4294901760, %v740_v14  ;;  %v12695_v21 = vld [vmem:[#allocation98_spill] sm:$0xff]  ;;  %v12699_v22 = vand.u32 4294901760, %v7964_v26 }
 0x131   :  { %1433 = vmatprep.mubr.f32.mxu0 %v1432_v9  ;;  %2078 = vmatprep.mubr.f32.mxu1 %v7801_v15  ;;  %v739_v9 = vld [vmem:[%s11630_s1 + $0x220] sm:$0xff]  ;;  %v12696_v15 = vld [vmem:[#allocation80_spill] sm:$0xff] }
 0x132   :  { %2337 = vmatpush2.msra.mxu0 %v12692_v27  ;;  %2702 = vmatpush2.msra.mxu1 %v12693_v1  ;;  %12694 = vst [vmem:[#allocation170_spill] sm:$0xff] %v8003_v63  ;;  %v12698_v1 = vld [vmem:[#allocation72_spill] sm:$0xff]  ;;  %v1463_v36 = vsub.f32 %v7964_v26, %v12699_v22  ;;  %v8020_v27 = vand.u32 4294901760, %v739_v9  ;;  %v8035_v49 = vsub.f32 %v740_v14, %v8005_v51 }
 0x133   :  { %1439 = vmatmul.mubr.f32.gmra.mxu0 %v1438_v23  ;;  %2080 = vmatmul.mubr.f32.gmra.mxu1 %v7805_v37  ;;  %v1454_v23 = vand.u32 4294901760, %v1453_v24  ;;  %v8018_v37 = vsub.f32 %v735_v35, %v7993_v60  ;;  %v12703_v24 = vand.u32 4294901760, %v7969_v7  ;;  %v463_v35 = vpop.permute.xlu0 %462  ;;  %v12708_v26 = vld [vmem:[#allocation112_spill] sm:$0xff] }
 0x134   :  { %2340 = vmatprep.subr.mxu0 %v12695_v21  ;;  %2704 = vmatprep.subr.mxu1 %v12696_v15  ;;  %v743_v15 = vld [vmem:[%s11630_s1 + $0x240] sm:$0xff]  ;;  %v469_v21 = vpop.permute.xlu1 %468  ;;  %12704 = vst [vmem:[#allocation172_spill] sm:$0xff] %v8035_v49 }
 0x135   :  { %2343 = vmatpush2.msra.mxu0 %v12697_v18  ;;  %2706 = vmatpush2.msra.mxu1 %v12698_v1  ;;  %12700 = vst [vmem:[#allocation171_spill] sm:$0xff] %v8018_v37  ;;  %v12702_v18 = vld [vmem:[#allocation83_spill] sm:$0xff]  ;;  %v1469_v1 = vsub.f32 %v7969_v7, %v12703_v24  ;;  %v485_v22 = vsel %vm482_vm7, %v467_v43, %v469_v21  ;;  %506 = vst.msk [vmem:[#allocation2 + $0x268] sm:$0xff] %vm27_vm0, %v469_v21  ;;  %v8041_v24 = vand.u32 4294901760, %v743_v15  ;;  %v748_v43 = vld [vmem:[%s11630_s1 + $0x268] sm:$0xff] }
 0x136   :  { %2346 = vmatprep.subr.mxu0 %v12701_v8  ;;  %2708 = vmatprep.subr.mxu1 %v12702_v18  ;;  %v8037_v8 = vand.u32 4294901760, %v744_v19  ;;  %505 = vst [vmem:[#allocation2 + $0x260] sm:$0xff] %v485_v22  ;;  %v12705_v18 = vld [vmem:[#allocation95_spill] sm:$0xff]  ;;  %v8049_v21 = vsub.f32 %v739_v9, %v8020_v27 }
 0x137   :  { %1449 = vmatprep.mubr.f32.mxu0 %v1448_v52  ;;  %2086 = vmatprep.mubr.f32.mxu1 %v7837_v38  ;;  %v1464_v52 = vand.u32 4294901760, %v1463_v36  ;;  %v747_v22 = vld [vmem:[%s11630_s1 + $0x260] sm:$0xff]  ;;  %v1470_v7 = vand.u32 4294901760, %v1469_v1  ;;  %v12712_v36 = vand.u32 4294901760, %v8003_v63  ;;  %v12714_v1 = vld [vmem:[#allocation118_spill] sm:$0xff]  ;;  %v459_v9 = vpop.permute.xlu0 %458 }
 0x138   :  { %2349 = vmatpush2.msra.mxu0 %v12705_v18  ;;  %2710 = vmatpush2.msra.mxu1 %v12706_v2  ;;  %12707 = vst [vmem:[#allocation173_spill] sm:$0xff] %v8049_v21  ;;  %v12709_v38 = vld [vmem:[#allocation87_spill] sm:$0xff]  ;;  %v8065_v18 = vand.u32 4294901760, %v748_v43 }
 0x139   :  { %1455 = vmatmul.mubr.f32.gmra.mxu0 %v1454_v23  ;;  %2088 = vmatmul.mubr.f32.gmra.mxu1 %v7841_v42  ;;  %v12710_v2 = vld [vmem:[#allocation103_spill] sm:$0xff]  ;;  %v12711_v23 = vld [vmem:[#allocation81_spill] sm:$0xff]  ;;  %v1479_v14 = vsub.f32 %v8003_v63, %v12712_v36  ;;  %v8063_v42 = vsub.f32 %v744_v19, %v8037_v8  ;;  %v465_v36 = vpop.permute.xlu1 %464  ;;  %v12717_v19 = vand.u32 4294901760, %v8018_v37 }
 0x13a   :  { %2352 = vmatprep.subr.mxu0 %v12708_v26  ;;  %2712 = vmatprep.subr.mxu1 %v12709_v38  ;;  %v752_v38 = vld [vmem:[%s11630_s1 + $0x288] sm:$0xff]  ;;  %v8075_v26 = vand.u32 4294901760, %v747_v22  ;;  %504 = vst.msk [vmem:[#allocation2 + $0x258] sm:$0xff] %vm27_vm0, %v465_v36 }
 0x13b   :  { %2355 = vmatpush2.msra.mxu0 %v12710_v2  ;;  %2714 = vmatpush2.msra.mxu1 %v12711_v23  ;;  %12713 = vst [vmem:[#allocation174_spill] sm:$0xff] %v8063_v42  ;;  %v12715_v2 = vld [vmem:[#allocation91_spill] sm:$0xff]  ;;  %v8073_v23 = vsub.f32 %v743_v15, %v8041_v24  ;;  %v1485_v63 = vsub.f32 %v8018_v37, %v12717_v19  ;;  %v756_v19 = vld [vmem:[%s11630_s1 + $0x2a8] sm:$0xff]  ;;  %v1480_v47 = vand.u32 4294901760, %v1479_v14 }
 0x13c   :  { %2358 = vmatprep.subr.mxu0 %v12714_v1  ;;  %2716 = vmatprep.subr.mxu1 %v12715_v2  ;;  %v751_v2 = vld [vmem:[%s11630_s1 + $0x280] sm:$0xff]  ;;  %v484_v15 = vsel %vm482_vm7, %v463_v35, %v465_v36  ;;  %v8100_v37 = vsub.f32 %v748_v43, %v8065_v18  ;;  %v12724_v14 = vld [vmem:[#allocation88_spill] sm:$0xff]  ;;  %v12725_v36 = vand.u32 4294901760, %v8049_v21 }
 0x13d   :  { %12716 = vst [vmem:[#allocation175_spill] sm:$0xff] %v8073_v23  ;;  %1465 = vmatprep.mubr.f32.mxu0 %v1464_v52  ;;  %2094 = vmatprep.mubr.f32.mxu1 %v7873_v57  ;;  %v12718_v1 = vld [vmem:[#allocation111_spill] sm:$0xff]  ;;  %v8089_v52 = vand.u32 4294901760, %v752_v38  ;;  %503 = vst [vmem:[#allocation2 + $0x250] sm:$0xff] %v484_v15  ;;  %v12720_v57 = vand.u32 4294901760, %v8035_v49  ;;  %v8108_v15 = vand.u32 4294901760, %v751_v2 }
 0x13e   :  { %2361 = vmatpush2.msra.mxu0 %v12718_v1  ;;  %2718 = vmatpush2.msra.mxu1 %v12719_v45  ;;  %12721 = vst [vmem:[#allocation176_spill] sm:$0xff] %v8100_v37  ;;  %v12722_v45 = vld [vmem:[#allocation96_spill] sm:$0xff]  ;;  %v1501_v43 = vsub.f32 %v8049_v21, %v12725_v36  ;;  %v755_v1 = vld [vmem:[%s11630_s1 + $0x2a0] sm:$0xff]  ;;  %v12728_v36 = vand.u32 4294901760, %v8063_v42 }
 0x13f   :  { %1471 = vmatmul.mubr.f32.gmra.mxu0 %v1470_v7  ;;  %2096 = vmatmul.mubr.f32.gmra.mxu1 %v7882_v6  ;;  %v1495_v35 = vsub.f32 %v8035_v49, %v12720_v57  ;;  %v8106_v7 = vsub.f32 %v747_v22, %v8075_v26  ;;  %v1486_v57 = vand.u32 4294901760, %v1485_v63  ;;  %v8115_v6 = vand.u32 4294901760, %v756_v19  ;;  %v12726_v49 = vld [vmem:[#allocation101_spill] sm:$0xff] }
 0x140   :  { %2364 = vmatprep.subr.mxu0 %v7510_v62  ;;  %2720 = vmatprep.subr.mxu1 %v12722_v45  ;;  %v8120_v22 = vsub.f32 %v752_v38, %v8089_v52  ;;  %v1511_v21 = vsub.f32 %v8063_v42, %v12728_v36  ;;  %v760_v38 = vld [vmem:[%s11630_s1 + $0x2c8] sm:$0xff]  ;;  %v8148_v42 = vand.u32 4294901760, %v755_v1 }
 0x141   :  { %12723 = vst [vmem:[#allocation96_spill] sm:$0xff] %v8106_v7  ;;  %2367 = vmatpush2.msra.mxu0 %v7466_v32  ;;  %2722 = vmatpush2.msra.mxu1 %v12724_v14  ;;  %v461_v32 = vpop.permute.xlu1 %460  ;;  %v400_v14 = vpop.permute.xlu0 %399  ;;  %v1496_v63 = vand.u32 4294901760, %v1495_v35  ;;  %v12730_v35 = vand.u32 4294901760, %v8073_v23  ;;  %v8154_v36 = vand.u32 4294901760, %v760_v38 }
 0x142   :  { %2370 = vmatprep.subr.mxu0 %v7549_v59  ;;  %2724 = vmatprep.subr.mxu1 %v12726_v49  ;;  %12727 = vst [vmem:[#allocation177_spill] sm:$0xff] %v8120_v22  ;;  %v483_v49 = vsel %vm482_vm7, %v459_v9, %v461_v32  ;;  %502 = vst.msk [vmem:[#allocation2 + $0x248] sm:$0xff] %vm27_vm0, %v461_v32  ;;  %v8142_v59 = vsub.f32 %v751_v2, %v8108_v15  ;;  %v1502_v9 = vand.u32 4294901760, %v1501_v43  ;;  %v759_v2 = vld [vmem:[%s11630_s1 + $0x2c0] sm:$0xff] }
 0x143   :  { %1481 = vmatprep.mubr.f32.mxu0 %v1480_v47  ;;  %2102 = vmatprep.mubr.f32.mxu1 %v7907_v39  ;;  %v12729_v47 = vld [vmem:[#allocation92_spill] sm:$0xff]  ;;  %v1517_v39 = vsub.f32 %v8073_v23, %v12730_v35  ;;  %501 = vst [vmem:[#allocation2 + $0x240] sm:$0xff] %v483_v49  ;;  %v8146_v32 = vsub.f32 %v756_v19, %v8115_v6  ;;  %12733 = vst [vmem:[#allocation180_spill] sm:$0xff] %v8148_v42  ;;  %v12737_v49 = vld [vmem:[#allocation97_spill] sm:$0xff]  ;;  %v1512_v19 = vand.u32 4294901760, %v1511_v21 }
 0x144   :  { %2373 = vmatpush2.msra.mxu0 %v7503_v3  ;;  %2726 = vmatpush2.msra.mxu1 %v12729_v47  ;;  %12731 = vst [vmem:[#allocation178_spill] sm:$0xff] %v8142_v59  ;;  %v12734_v47 = vld [vmem:[#allocation109_spill] sm:$0xff]  ;;  %v12735_v3 = vand.u32 4294901760, %v6669_v53  ;;  %12736 = vst [vmem:[#allocation181_spill] sm:$0xff] %v8154_v36  ;;  %v764_v53 = vld [vmem:[%s11630_s1 + $0x2e8] sm:$0xff] }
 0x145   :  { %1487 = vmatmul.mubr.f32.gmra.mxu0 %v1486_v57  ;;  %2104 = vmatmul.mubr.f32.gmra.mxu1 %v7918_v30  ;;  %12732 = vst [vmem:[#allocation179_spill] sm:$0xff] %v8146_v32  ;;  %v12738_v57 = vand.u32 4294901760, %v8100_v37  ;;  %v1518_v35 = vand.u32 4294901760, %v1517_v39  ;;  %v12740_v30 = vand.u32 4294901760, %v8106_v7  ;;  %v402_v21 = vpop.permute.xlu1 %401 }
 0x146   :  { %2728 = vmatprep.subr.mxu1 %v12734_v47  ;;  %3035 = vmatprep.subr.mxu0 %v12735_v3  ;;  %v12739_v3 = vld [vmem:[#allocation116_spill] sm:$0xff]  ;;  %v12741_v47 = vld [vmem:[#allocation102_spill] sm:$0xff]  ;;  %v409_v39 = vsel %vm403_vm3, %v400_v14, %v402_v21  ;;  %433 = vst.msk [vmem:[#allocation2 + $0x238] sm:$0xff] %vm27_vm0, %v402_v21 }
 0x147   :  { %2730 = vmatpush2.msra.mxu1 %v12737_v49  ;;  %1497 = vmatprep.mubr.f32.mxu0 %v1496_v63  ;;  %v1527_v43 = vsub.f32 %v8100_v37, %v12738_v57  ;;  %v1533_v23 = vsub.f32 %v8106_v7, %v12740_v30  ;;  %v396_v49 = vpop.permute.xlu0 %395  ;;  %v8175_v37 = vsub.f32 %v755_v1, %v8148_v42  ;;  %v12743_v30 = vld [vmem:[#allocation119_spill] sm:$0xff]  ;;  %v12744_v63 = vand.u32 4294901760, %v8120_v22  ;;  %v12746_v14 = vld [vmem:[#allocation110_spill] sm:$0xff] }
 0x148   :  { %2732 = vmatprep.subr.mxu1 %v12739_v3  ;;  %2110 = vmatprep.mubr.f32.mxu1 %v7943_v16  ;;  %v8177_v3 = vand.u32 4294901760, %v759_v2  ;;  %v8189_v57 = vand.u32 4294901760, %v764_v53  ;;  %v763_v1 = vld [vmem:[%s11630_s1 + $0x2e0] sm:$0xff]  ;;  %432 = vst [vmem:[#allocation2 + $0x230] sm:$0xff] %v409_v39 }
 0x149   :  { %2734 = vmatpush2.msra.mxu1 %v12741_v47  ;;  %1503 = vmatmul.mubr.f32.gmra.mxu0 %v1502_v9  ;;  %v1543_v16 = vsub.f32 %v8120_v22, %v12744_v63  ;;  %v8187_v9 = vsub.f32 %v760_v38, %v8154_v36  ;;  %v1528_v21 = vand.u32 4294901760, %v1527_v43  ;;  %v12747_v63 = vand.u32 4294901760, %v8142_v59 }
 0x14a   :  { %12742 = vst [vmem:[#allocation102_spill] sm:$0xff] %v8177_v3  ;;  %2112 = vmatmul.mubr.f32.gmra.mxu1 %v7949_v20  ;;  %2736 = vmatprep.subr.mxu1 %v12743_v30  ;;  %12745 = vst [vmem:[#allocation119_spill] sm:$0xff] %v8189_v57  ;;  %v1534_v20 = vand.u32 4294901760, %v1533_v23  ;;  %v12748_v22 = vand.u32 4294901760, %v8146_v32  ;;  %v878_v23 = vld [vmem:[%s11631_s2 + $0x18] sm:$0xff]  ;;  %v8220_v43 = vsub.f32 %v764_v53, %v8189_v57 }
 0x14b   :  { %2738 = vmatpush2.msra.mxu1 %v12746_v14  ;;  %1513 = vmatprep.mubr.f32.mxu0 %v1512_v19  ;;  %v1549_v38 = vsub.f32 %v8142_v59, %v12747_v63  ;;  %v877_v19 = vld [vmem:[%s11631_s2 + $0x10] sm:$0xff]  ;;  %v8214_v63 = vand.u32 4294901760, %v763_v1  ;;  %v392_v59 = vpop.permute.xlu0 %391 }
 0x14c   :  { %2740 = vmatprep.subr.mxu1 %v7528_v58  ;;  %2118 = vmatprep.mubr.f32.mxu1 %v7979_v25  ;;  %v1559_v39 = vsub.f32 %v8146_v32, %v12748_v22  ;;  %v8212_v25 = vsub.f32 %v759_v2, %v8177_v3  ;;  %v1544_v22 = vand.u32 4294901760, %v1543_v16 }
 0x14d   :  { %2742 = vmatpush2.msra.mxu1 %v7462_v29  ;;  %1519 = vmatmul.mubr.f32.gmra.mxu0 %v1518_v35  ;;  %12749 = vst [vmem:[#allocation110_spill] sm:$0xff] %v8214_v63  ;;  %v398_v35 = vpop.permute.xlu1 %397  ;;  %v1550_v2 = vand.u32 4294901760, %v1549_v38  ;;  %v8233_v53 = vsub.f32 %v763_v1, %v8214_v63 }
 0x14e   :  { %2120 = vmatmul.mubr.f32.gmra.mxu1 %v7993_v60  ;;  %3482 = vmatprep.subr.mxu1 %v6657_v50  ;;  %v408_v7 = vsel %vm403_vm3, %v396_v49, %v398_v35  ;;  %431 = vst.msk [vmem:[#allocation2 + $0x228] sm:$0xff] %vm27_vm0, %v398_v35  ;;  %v12750_v50 = vand.u32 4294901760, %v8175_v37  ;;  %v12016_v32 = vand.u32 4294901760, %v8212_v25  ;;  %v879_v49 = vld [vmem:[%s11631_s2 + $0x20] sm:$0xff]  ;;  %v1560_v38 = vand.u32 4294901760, %v1559_v39 }
 0x14f   :  { %1529 = vmatprep.mubr.f32.mxu0 %v1528_v21  ;;  %2126 = vmatprep.mubr.f32.mxu1 %v8005_v51  ;;  %430 = vst [vmem:[#allocation2 + $0x220] sm:$0xff] %v408_v7  ;;  %v880_v7 = vld [vmem:[%s11631_s2 + $0x28] sm:$0xff]  ;;  %v12013_v35 = vand.u32 4294901760, %v8220_v43 }
 0x150   :  { %911 = vperm.xlu1 %6362, %v877_v19   ;;  %916 = vperm.xlu0 %6361, %v878_v23   ;;  %v1565_v16 = vsub.f32 %v8175_v37, %v12750_v50  ;;  %v12751_v19 = vand.u32 4294901760, %v8187_v9  ;;  %v1581_v39 = vsub.f32 %v8212_v25, %v12016_v32 }
 0x151   :  { %1535 = vmatmul.mubr.f32.gmra.mxu0 %v1534_v20  ;;  %v394_v21 = vpop.permute.xlu1 %393  ;;  %v388_v20 = vpop.permute.xlu0 %387 }
 0x152   :  { %2128 = vmatmul.mubr.f32.gmra.mxu1 %v8020_v27  ;;  %1545 = vmatprep.mubr.f32.mxu0 %v1544_v22  ;;  %v1575_v23 = vsub.f32 %v8187_v9, %v12751_v19  ;;  %v407_v50 = vsel %vm403_vm3, %v392_v59, %v394_v21  ;;  %429 = vst.msk [vmem:[#allocation2 + $0x218] sm:$0xff] %vm27_vm0, %v394_v21  ;;  %v1566_v1 = vand.u32 4294901760, %v1565_v16  ;;  %v12015_v22 = vand.u32 4294901760, %v8233_v53  ;;  %v881_v19 = vld [vmem:[%s11631_s2 + $0x30] sm:$0xff]  ;;  %v882_v59 = vld [vmem:[%s11631_s2 + $0x38] sm:$0xff] }
 0x153   :  { %2134 = vmatprep.mubr.f32.mxu1 %v8037_v8  ;;  %428 = vst [vmem:[#allocation2 + $0x210] sm:$0xff] %v407_v50  ;;  %v1591_v16 = vsub.f32 %v8220_v43, %v12013_v35 }
 0x154   :  { %921 = vperm.xlu1 %6362, %v879_v49   ;;  %926 = vperm.xlu0 %6361, %v880_v7   ;;  %v1582_v7 = vand.u32 4294901760, %v1581_v39 }
 0x155   :  { %1551 = vmatmul.mubr.f32.gmra.mxu0 %v1550_v2  ;;  %v390_v21 = vpop.permute.xlu1 %389  ;;  %v637_v50 = vpop.permute.xlu0 %636  ;;  %v1576_v2 = vand.u32 4294901760, %v1575_v23  ;;  %v883_v23 = vld [vmem:[%s11631_s2 + $0x40] sm:$0xff] }
 0x156   :  { %2136 = vmatmul.mubr.f32.gmra.mxu1 %v8041_v24  ;;  %1561 = vmatprep.mubr.f32.mxu0 %v1560_v38  ;;  %v406_v49 = vsel %vm403_vm3, %v388_v20, %v390_v21  ;;  %427 = vst.msk [vmem:[#allocation2 + $0x208] sm:$0xff] %vm27_vm0, %v390_v21  ;;  %v1597_v38 = vsub.f32 %v8233_v53, %v12015_v22  ;;  %v884_v20 = vld [vmem:[%s11631_s2 + $0x48] sm:$0xff] }
 0x157   :  { %2142 = vmatprep.mubr.f32.mxu1 %v8065_v18  ;;  %426 = vst [vmem:[#allocation2 + $0x200] sm:$0xff] %v406_v49 }
 0x158   :  { %931 = vperm.xlu1 %6362, %v881_v19   ;;  %936 = vperm.xlu0 %6361, %v882_v59   ;;  %v1592_v19 = vand.u32 4294901760, %v1591_v16  ;;  %v1598_v39 = vand.u32 4294901760, %v1597_v38  ;;  %v885_v59 = vld [vmem:[%s11631_s2 + $0x50] sm:$0xff]  ;;  %v888_v38 = vld [vmem:[%s11631_s2 + $0x68] sm:$0xff] }
 0x159   :  { %1567 = vmatmul.mubr.f32.gmra.mxu0 %v1566_v1  ;;  %v639_v21 = vpop.permute.xlu1 %638  ;;  %v633_v35 = vpop.permute.xlu0 %632 }
 0x15a   :  { %2144 = vmatmul.mubr.f32.gmra.mxu1 %v8075_v26  ;;  %1577 = vmatprep.mubr.f32.mxu0 %v1576_v2  ;;  %v646_v1 = vsel %vm640_vm8, %v637_v50, %v639_v21  ;;  %670 = vst.msk [vmem:[#allocation2 + $0x358] sm:$0xff] %vm27_vm0, %v639_v21  ;;  %v886_v2 = vld [vmem:[%s11631_s2 + $0x58] sm:$0xff] }
 0x15b   :  { %2150 = vmatprep.mubr.f32.mxu1 %v8089_v52  ;;  %669 = vst [vmem:[#allocation2 + $0x350] sm:$0xff] %v646_v1 }
 0x15c   :  { %941 = vperm.xlu1 %6362, %v883_v23   ;;  %946 = vperm.xlu0 %6361, %v884_v20  }
 0x15d   :  { %1583 = vmatmul.mubr.f32.gmra.mxu0 %v1582_v7  ;;  %v635_v16 = vpop.permute.xlu1 %634  ;;  %v629_v49 = vpop.permute.xlu0 %628  ;;  %v887_v7 = vld [vmem:[%s11631_s2 + $0x60] sm:$0xff] }
 0x15e   :  { %2152 = vmatmul.mubr.f32.gmra.mxu1 %v8108_v15  ;;  %1593 = vmatprep.mubr.f32.mxu0 %v1592_v19  ;;  %v645_v50 = vsel %vm640_vm8, %v633_v35, %v635_v16  ;;  %668 = vst.msk [vmem:[#allocation2 + $0x348] sm:$0xff] %vm27_vm0, %v635_v16  ;;  %v12752_v35 = vld [vmem:[#allocation4_spill] sm:$0xff]  ;;  %v12753_v19 = vld [vmem:[#allocation105_spill] sm:$0xff] }
 0x15f   :  { %2158 = vmatprep.mubr.f32.mxu1 %v8115_v6  ;;  %667 = vst [vmem:[#allocation2 + $0x340] sm:$0xff] %v645_v50  ;;  %v12757_v50 = vld [vmem:[#allocation107_spill] sm:$0xff] }
 0x160   :  { %951 = vperm.xlu1 %6362, %v885_v59   ;;  %956 = vperm.xlu0 %6361, %v886_v2   ;;  %v12755_v2 = vand.u32 4294901760, %v6672_v54  ;;  %v12760_v54 = vand.u32 4294901760, %v6675_v55 }
 0x161   :  { %1599 = vmatmul.mubr.f32.gmra.mxu0 %v1598_v39  ;;  %v631_v23 = vpop.permute.xlu1 %630  ;;  %v625_v20 = vpop.permute.xlu0 %624  ;;  %v12754_v39 = vand.u32 4294901760, %v6641_v40  ;;  %v12759_v40 = vld [vmem:[#allocation113_spill] sm:$0xff] }
 0x162   :  { %2160 = vmatmul.mubr.f32.gmra.mxu1 %v8148_v42  ;;  %2376 = vmatprep.mubr.f32.mxu0 %v12752_v35  ;;  %v644_v21 = vsel %vm640_vm8, %v629_v49, %v631_v23  ;;  %666 = vst.msk [vmem:[#allocation2 + $0x338] sm:$0xff] %vm27_vm0, %v631_v23  ;;  %v12756_v49 = vand.u32 4294901760, %v6653_v48  ;;  %v12761_v48 = vand.u32 4294901760, %v6734_v56  ;;  %v12767_v56 = vand.u32 4294901760, %v6723_v44 }
 0x163   :  { %2166 = vmatprep.mubr.f32.mxu1 %v8154_v36  ;;  %665 = vst [vmem:[#allocation2 + $0x330] sm:$0xff] %v644_v21  ;;  %v12764_v21 = vand.u32 4294901760, %v12752_v35  ;;  %v12770_v35 = vld [vmem:[#allocation14_spill] sm:$0xff]  ;;  %v12774_v44 = vand.u32 4294901760, %v12757_v50 }
 0x164   :  { %961 = vperm.xlu1 %6362, %v887_v7   ;;  %966 = vperm.xlu0 %6361, %v888_v38   ;;  %v12758_v7 = vand.u32 4294901760, %v6705_v10  ;;  %v12763_v10 = vand.u32 4294901760, %v6693_v4  ;;  %v12768_v4 = vand.u32 4294901760, %v6812_v12  ;;  %v12778_v12 = vld [vmem:[#allocation125_spill] sm:$0xff] }
 0x165   :  { %2379 = vmatmul.mubr.f32.vlgmr.msra.gmra.mxu0 %v12753_v19  ;;  %v627_v1 = vpop.permute.xlu1 %626  ;;  %v621_v16 = vpop.permute.xlu0 %620 }
 0x166   :  { %2168 = vmatmul.mubr.f32.gmra.mxu1 %v8177_v3  ;;  %3039 = vmatpush1.msra.mxu0 %v12754_v39  ;;  %v643_v59 = vsel %vm640_vm8, %v625_v20, %v627_v1  ;;  %664 = vst.msk [vmem:[#allocation2 + $0x328] sm:$0xff] %vm27_vm0, %v627_v1  ;;  %v12762_v20 = vld [vmem:[#allocation114_spill] sm:$0xff]  ;;  %v12765_v1 = vand.u32 4294901760, %v6773_v61  ;;  %v12769_v61 = vld [vmem:[#allocation7_spill] sm:$0xff] }
 0x167   :  { %3043 = vmatprep.subr.mxu0 %v12755_v2  ;;  %2174 = vmatprep.mubr.f32.mxu1 %v8189_v57  ;;  %663 = vst [vmem:[#allocation2 + $0x320] sm:$0xff] %v643_v59  ;;  %v12766_v59 = vand.u32 4294901760, %v12753_v19  ;;  %v12772_v19 = vld [vmem:[#allocation5_spill] sm:$0xff] }
 0x168   :  { %3047 = vmatpush1.msra.mxu0 %v12756_v49  ;;  %2386 = vmatprep.mubr.f32.mxu0 %v12757_v50  ;;  %v12773_v49 = vld [vmem:[#allocation123_spill] sm:$0xff] }
 0x169   :  { %3051 = vmatprep.subr.mxu0 %v12758_v7  ;;  %2389 = vmatmul.mubr.f32.gmra.mxu0 %v12759_v40  ;;  %v623_v38 = vpop.permute.xlu1 %622  ;;  %v617_v55 = vpop.permute.xlu0 %616  ;;  %v12775_v7 = vld [vmem:[#allocation32_spill] sm:$0xff]  ;;  %v12784_v50 = vld [vmem:[#allocation11_spill] sm:$0xff] }
 0x16a   :  { %2176 = vmatmul.mubr.f32.gmra.mxu1 %v8214_v63  ;;  %3055 = vmatpush1.msra.mxu0 %v12760_v54  ;;  %v642_v23 = vsel %vm640_vm8, %v621_v16, %v623_v38  ;;  %662 = vst.msk [vmem:[#allocation2 + $0x318] sm:$0xff] %vm27_vm0, %v623_v38  ;;  %v12771_v16 = vand.u32 4294901760, %v12770_v35  ;;  %v12776_v38 = vand.u32 4294901760, %v12775_v7  ;;  %v12779_v54 = vand.u32 4294901760, %v12759_v40  ;;  %v12800_v7 = vld [vmem:[#allocation41_spill] sm:$0xff] }
 0x16b   :  { %3059 = vmatprep.subr.mxu0 %v12761_v48  ;;  %2396 = vmatprep.mubr.f32.mxu0 %v12762_v20  ;;  %661 = vst [vmem:[#allocation2 + $0x310] sm:$0xff] %v642_v23  ;;  %v12780_v23 = vld [vmem:[#allocation25_spill] sm:$0xff]  ;;  %v12789_v40 = vand.u32 4294901760, %v12762_v20  ;;  %v12795_v35 = vand.u32 4294901760, %v12587_v17  ;;  %v12799_v20 = vld [vmem:[#allocation23_spill] sm:$0xff] }
 0x16c   :  { %3063 = vmatpush1.msra.mxu0 %v12763_v10  ;;  %2746 = vmatprep.mubr.f32.mxu1 %v12764_v21  ;;  %v12781_v48 = vand.u32 4294901760, %v12780_v23  ;;  %v12782_v10 = vld [vmem:[#allocation6_spill] sm:$0xff]  ;;  %v12783_v21 = vand.u32 4294901760, %v12579_v13  ;;  %v12794_v13 = vand.u32 4294901760, %v7488_v33  ;;  %v12805_v23 = vld [vmem:[#allocation19_spill] sm:$0xff] }
 0x16d   :  { %3067 = vmatprep.subr.mxu0 %v12765_v1  ;;  %2399 = vmatmul.mubr.f32.gmra.mxu0 %v7488_v33  ;;  %v619_v39 = vpop.permute.xlu1 %618  ;;  %v12785_v1 = vld [vmem:[#allocation31_spill] sm:$0xff]  ;;  %v12804_v33 = vand.u32 4294901760, %v12773_v49  ;;  %v12806_v17 = vand.u32 4294901760, %v12805_v23  ;;  %v12838_v23 = vld [vmem:[#allocation50_spill] sm:$0xff] }
 0x16e   :  { %2750 = vmatmul.mubr.f32.vlgmr.msra.gmra.mxu1 %v12766_v59  ;;  %3071 = vmatpush1.msra.mxu0 %v12767_v56  ;;  %v641_v2 = vsel %vm640_vm8, %v617_v55, %v619_v39  ;;  %660 = vst.msk [vmem:[#allocation2 + $0x308] sm:$0xff] %vm27_vm0, %v619_v39  ;;  %v12786_v55 = vand.u32 4294901760, %v12785_v1  ;;  %v12787_v39 = vld [vmem:[#allocation8_spill] sm:$0xff]  ;;  %v12790_v56 = vld [vmem:[#allocation42_spill] sm:$0xff] }
 0x16f   :  { %3484 = vmatpush1.msra.mxu1 %v6622_v34  ;;  %3075 = vmatprep.subr.mxu0 %v12768_v4  ;;  %659 = vst [vmem:[#allocation2 + $0x300] sm:$0xff] %v641_v2  ;;  %v12777_v34 = vld [vmem:[#allocation9_spill] sm:$0xff]  ;;  %v12788_v59 = vld [vmem:[#allocation128_spill] sm:$0xff]  ;;  %v12791_v2 = vand.u32 4294901760, %v12790_v56 }
 0x170   :  { %3486 = vmatprep.subr.mxu1 %v12769_v61  ;;  %3079 = vmatpush1.msra.mxu0 %v12771_v16  ;;  %v12792_v4 = vld [vmem:[#allocation16_spill] sm:$0xff]  ;;  %v12793_v61 = vld [vmem:[#allocation129_spill] sm:$0xff]  ;;  %v12796_v16 = vld [vmem:[#allocation10_spill] sm:$0xff] }
 0x171   :  { %3488 = vmatpush1.msra.mxu1 %v12772_v19  ;;  %2406 = vmatprep.mubr.f32.mxu0 %v12773_v49  ;;  %v12797_v19 = vld [vmem:[#allocation47_spill] sm:$0xff]  ;;  %v12814_v49 = vld [vmem:[#allocation28_spill] sm:$0xff] }
 0x172   :  { %2758 = vmatprep.mubr.f32.mxu1 %v12774_v44  ;;  %3083 = vmatprep.subr.mxu0 %v12776_v38  ;;  %v12798_v44 = vand.u32 4294901760, %v12797_v19  ;;  %v12801_v38 = vand.u32 4294901760, %v12800_v7  ;;  %v12816_v56 = vld [vmem:[#allocation24_spill] sm:$0xff]  ;;  %v12832_v7 = vld [vmem:[#allocation13_spill] sm:$0xff] }
 0x173   :  { %3490 = vmatprep.subr.mxu1 %v12777_v34  ;;  %2409 = vmatmul.mubr.f32.gmra.mxu0 %v12778_v12  ;;  %v12802_v34 = vld [vmem:[#allocation12_spill] sm:$0xff] }
 0x174   :  { %2762 = vmatmul.mubr.f32.gmra.mxu1 %v12779_v54  ;;  %3087 = vmatpush1.msra.mxu0 %v12781_v48  ;;  %v12803_v54 = vld [vmem:[#allocation132_spill] sm:$0xff]  ;;  %v12807_v48 = vld [vmem:[#allocation29_spill] sm:$0xff] }
 0x175   :  { %3492 = vmatpush1.msra.mxu1 %v12782_v10  ;;  %3091 = vmatprep.subr.mxu0 %v12783_v21  ;;  %v12808_v10 = vld [vmem:[#allocation133_spill] sm:$0xff]  ;;  %v12809_v21 = vand.u32 4294901760, %v12778_v12  ;;  %v12818_v12 = vand.u32 4294901760, %v12788_v59  ;;  %v12826_v19 = vld [vmem:[#allocation48_spill] sm:$0xff] }
 0x176   :  { %3494 = vmatprep.subr.mxu1 %v12784_v50  ;;  %3095 = vmatpush1.msra.mxu0 %v12786_v55  ;;  %v12810_v50 = vld [vmem:[#allocation22_spill] sm:$0xff] }
 0x177   :  { %3496 = vmatpush1.msra.mxu1 %v12787_v39  ;;  %2416 = vmatprep.mubr.f32.mxu0 %v12788_v59  ;;  %v12811_v1 = vand.u32 4294901760, %v12810_v50  ;;  %v12812_v55 = vld [vmem:[#allocation18_spill] sm:$0xff]  ;;  %v12813_v39 = vand.u32 4294901760, %v12604_v0  ;;  %v12822_v0 = vand.u32 4294901760, %v12793_v61  ;;  %v12825_v59 = vld [vmem:[#allocation45_spill] sm:$0xff] }
 0x178   :  { %2770 = vmatprep.mubr.f32.mxu1 %v12789_v40  ;;  %3099 = vmatprep.subr.mxu0 %v12791_v2  ;;  %v12815_v40 = vand.u32 4294901760, %v12814_v49  ;;  %v12817_v2 = vld [vmem:[#allocation136_spill] sm:$0xff]  ;;  %v12844_v50 = vld [vmem:[#allocation142_spill] sm:$0xff]  ;;  %v12849_v49 = vld [vmem:[#allocation143_spill] sm:$0xff] }
 0x179   :  { %3498 = vmatprep.subr.mxu1 %v12792_v4  ;;  %2419 = vmatmul.mubr.f32.gmra.mxu0 %v12793_v61  ;;  %v12819_v4 = vand.u32 4294901760, %v6870_v41  ;;  %v12827_v41 = vand.u32 4294901760, %v12826_v19  ;;  %v12830_v61 = vand.u32 4294901760, %v12803_v54  ;;  %v12859_v19 = vld [vmem:[#allocation34_spill] sm:$0xff] }
 0x17a   :  { %2774 = vmatmul.mubr.f32.gmra.mxu1 %v12794_v13  ;;  %3103 = vmatpush1.msra.mxu0 %v12795_v35  ;;  %v12820_v13 = vld [vmem:[#allocation40_spill] sm:$0xff]  ;;  %v12821_v35 = vld [vmem:[#allocation137_spill] sm:$0xff] }
 0x17b   :  { %3500 = vmatpush1.msra.mxu1 %v12796_v16  ;;  %3107 = vmatprep.subr.mxu0 %v12798_v44  ;;  %v12824_v16 = vand.u32 4294901760, %v6959_v46  ;;  %v12828_v44 = vld [vmem:[#allocation36_spill] sm:$0xff]  ;;  %v12834_v46 = vand.u32 4294901760, %v12808_v10 }
 0x17c   :  { %3502 = vmatprep.subr.mxu1 %v12799_v20  ;;  %3111 = vmatpush1.msra.mxu0 %v12801_v38  ;;  %v12829_v20 = vld [vmem:[#allocation139_spill] sm:$0xff]  ;;  %v12835_v38 = vld [vmem:[#allocation49_spill] sm:$0xff] }
 0x17d   :  { %3504 = vmatpush1.msra.mxu1 %v12802_v34  ;;  %2426 = vmatprep.mubr.f32.mxu0 %v12803_v54  ;;  %v12836_v34 = vand.u32 4294901760, %v12835_v38  ;;  %v12840_v54 = vld [vmem:[#allocation17_spill] sm:$0xff] }
 0x17e   :  { %2782 = vmatprep.mubr.f32.mxu1 %v12804_v33  ;;  %3115 = vmatprep.subr.mxu0 %v12806_v17  ;;  %v12837_v33 = vld [vmem:[#allocation15_spill] sm:$0xff]  ;;  %v12839_v17 = vand.u32 4294901760, %v12838_v23  ;;  %v12867_v38 = vld [vmem:[#allocation65_spill] sm:$0xff] }
 0x17f   :  { %3506 = vmatprep.subr.mxu1 %v12807_v48  ;;  %2429 = vmatmul.mubr.f32.gmra.mxu0 %v12808_v10  ;;  %v12841_v48 = vld [vmem:[#allocation51_spill] sm:$0xff]  ;;  %v12845_v10 = vand.u32 4294901760, %v12817_v2  ;;  %v12870_v23 = vld [vmem:[#allocation69_spill] sm:$0xff] }
 0x180   :  { %2786 = vmatmul.mubr.f32.gmra.mxu1 %v12809_v21  ;;  %3119 = vmatpush1.msra.mxu0 %v12811_v1  ;;  %v12843_v21 = vld [vmem:[#allocation20_spill] sm:$0xff] }
 0x181   :  { %3508 = vmatpush1.msra.mxu1 %v12812_v55  ;;  %3123 = vmatprep.subr.mxu0 %v12813_v39  ;;  %v12846_v1 = vld [vmem:[#allocation56_spill] sm:$0xff]  ;;  %v12848_v39 = vld [vmem:[#allocation21_spill] sm:$0xff] }
 0x182   :  { %3510 = vmatprep.subr.mxu1 %v12605_v5  ;;  %3127 = vmatpush1.msra.mxu0 %v12815_v40  ;;  %v12823_v5 = vand.u32 4294901760, %v6917_v31  ;;  %v12831_v31 = vand.u32 4294901760, %v7001_v28  ;;  %v12842_v28 = vand.u32 4294901760, %v12841_v48  ;;  %v12847_v55 = vand.u32 4294901760, %v12846_v1  ;;  %v12878_v1 = vld [vmem:[#allocation74_spill] sm:$0xff] }
 0x183   :  { %3512 = vmatpush1.msra.mxu1 %v12816_v56  ;;  %2436 = vmatprep.mubr.f32.mxu0 %v12817_v2  ;;  %v12850_v40 = vand.u32 4294901760, %v12821_v35  ;;  %v12851_v56 = vld [vmem:[#allocation57_spill] sm:$0xff] }
 0x184   :  { %2794 = vmatprep.mubr.f32.mxu1 %v12818_v12  ;;  %3131 = vmatprep.subr.mxu0 %v12819_v4  ;;  %v12852_v12 = vand.u32 4294901760, %v12851_v56  ;;  %v12853_v4 = vld [vmem:[#allocation27_spill] sm:$0xff]  ;;  %v12856_v2 = vld [vmem:[#allocation33_spill] sm:$0xff]  ;;  %v12882_v56 = vand.u32 4294901760, %v12849_v49 }
 0x185   :  { %3514 = vmatprep.subr.mxu1 %v12820_v13  ;;  %2439 = vmatmul.mubr.f32.gmra.mxu0 %v12821_v35  ;;  %v12854_v13 = vld [vmem:[#allocation59_spill] sm:$0xff] }
 0x186   :  { %2798 = vmatmul.mubr.f32.gmra.mxu1 %v12822_v0  ;;  %3135 = vmatpush1.msra.mxu0 %v12823_v5  ;;  %v12855_v0 = vand.u32 4294901760, %v12854_v13  ;;  %v12857_v5 = vld [vmem:[#allocation60_spill] sm:$0xff]  ;;  %v12860_v35 = vld [vmem:[#allocation35_spill] sm:$0xff]  ;;  %v12885_v13 = vld [vmem:[#allocation53_spill] sm:$0xff] }
 0x187   :  { %3516 = vmatpush1.msra.mxu1 %v12612_v11  ;;  %3139 = vmatprep.subr.mxu0 %v12824_v16  ;;  %v12833_v11 = vld [vmem:[#allocation37_spill] sm:$0xff]  ;;  %v12858_v16 = vand.u32 4294901760, %v12857_v5 }
 0x188   :  { %3518 = vmatprep.subr.mxu1 %v12825_v59  ;;  %3143 = vmatpush1.msra.mxu0 %v12827_v41  ;;  %v889_v59 = vld [vmem:[%s11631_s2 + $0x70] sm:$0xff]  ;;  %v12861_v41 = vand.u32 4294901760, %v12829_v20 }
 0x189   :  { %3520 = vmatpush1.msra.mxu1 %v12828_v44  ;;  %2446 = vmatprep.mubr.f32.mxu0 %v12829_v20  ;;  %v12862_v44 = vld [vmem:[#allocation63_spill] sm:$0xff]  ;;  %v12872_v20 = vld [vmem:[#allocation44_spill] sm:$0xff]  ;;  %v12889_v5 = vld [vmem:[#allocation73_spill] sm:$0xff] }
 0x18a   :  { %2806 = vmatprep.mubr.f32.mxu1 %v12830_v61  ;;  %3147 = vmatprep.subr.mxu0 %v12831_v31  ;;  %v12863_v61 = vand.u32 4294901760, %v12862_v44  ;;  %v12864_v31 = vld [vmem:[#allocation39_spill] sm:$0xff]  ;;  %v12894_v44 = vld [vmem:[#allocation82_spill] sm:$0xff] }
 0x18b   :  { %3522 = vmatprep.subr.mxu1 %v12832_v7  ;;  %2449 = vmatmul.mubr.f32.gmra.mxu0 %v12833_v11  ;;  %v12865_v7 = vld [vmem:[#allocation30_spill] sm:$0xff] }
 0x18c   :  { %2810 = vmatmul.mubr.f32.gmra.mxu1 %v12834_v46  ;;  %3151 = vmatpush1.msra.mxu0 %v12836_v34  ;;  %v12866_v46 = vand.u32 4294901760, %v12833_v11  ;;  %v12868_v34 = vand.u32 4294901760, %v12867_v38  ;;  %v890_v11 = vld [vmem:[%s11631_s2 + $0x78] sm:$0xff]  ;;  %v12898_v38 = vand.u32 4294901760, %v12865_v7 }
 0x18d   :  { %3524 = vmatpush1.msra.mxu1 %v12837_v33  ;;  %3155 = vmatprep.subr.mxu0 %v12839_v17  ;;  %v12869_v33 = vld [vmem:[#allocation43_spill] sm:$0xff]  ;;  %v12871_v17 = vand.u32 4294901760, %v12870_v23  ;;  %v12901_v23 = vld [vmem:[#allocation58_spill] sm:$0xff] }
 0x18e   :  { %3526 = vmatprep.subr.mxu1 %v12840_v54  ;;  %3159 = vmatpush1.msra.mxu0 %v12842_v28  ;;  %v12873_v54 = vld [vmem:[#allocation68_spill] sm:$0xff]  ;;  %v12875_v28 = vld [vmem:[#allocation46_spill] sm:$0xff] }
 0x18f   :  { %3528 = vmatpush1.msra.mxu1 %v12843_v21  ;;  %2456 = vmatprep.mubr.f32.mxu0 %v12844_v50  ;;  %v12874_v48 = vand.u32 4294901760, %v12873_v54  ;;  %v12876_v21 = vld [vmem:[#allocation147_spill] sm:$0xff] }
 0x190   :  { %2818 = vmatprep.mubr.f32.mxu1 %v12845_v10  ;;  %3163 = vmatprep.subr.mxu0 %v12847_v55  ;;  %v12877_v10 = vand.u32 4294901760, %v12844_v50  ;;  %v12879_v55 = vand.u32 4294901760, %v12878_v1  ;;  %v12888_v50 = vld [vmem:[#allocation55_spill] sm:$0xff] }
 0x191   :  { %3530 = vmatprep.subr.mxu1 %v12848_v39  ;;  %2459 = vmatmul.mubr.f32.gmra.mxu0 %v12849_v49  ;;  %v12880_v39 = vld [vmem:[#allocation52_spill] sm:$0xff]  ;;  %v12892_v49 = vld [vmem:[#allocation151_spill] sm:$0xff] }
 0x192   :  { %2822 = vmatmul.mubr.f32.gmra.mxu1 %v12850_v40  ;;  %3167 = vmatpush2.msra.mxu0 %v12852_v12  ;;  %v12881_v40 = vld [vmem:[#allocation148_spill] sm:$0xff]  ;;  %v12883_v12 = vld [vmem:[#allocation70_spill] sm:$0xff]  ;;  %v12905_v54 = vld [vmem:[#allocation79_spill] sm:$0xff] }
 0x193   :  { %3532 = vmatpush1.msra.mxu1 %v12853_v4  ;;  %3171 = vmatprep.subr.mxu0 %v12855_v0  ;;  %v12884_v4 = vand.u32 4294901760, %v12883_v12  ;;  %v12886_v0 = vld [vmem:[#allocation78_spill] sm:$0xff]  ;;  %v12913_v12 = vld [vmem:[#allocation156_spill] sm:$0xff] }
 0x194   :  { %3534 = vmatprep.subr.mxu1 %v12856_v2  ;;  %3175 = vmatpush2.msra.mxu0 %v12858_v16  ;;  %v12887_v2 = vand.u32 4294901760, %v12886_v0  ;;  %v12890_v16 = vand.u32 4294901760, %v12889_v5  ;;  %v12916_v0 = vand.u32 4294901760, %v12881_v40  ;;  %v12920_v5 = vld [vmem:[#allocation94_spill] sm:$0xff] }
 0x195   :  { %3536 = vmatpush1.msra.mxu1 %v12859_v19  ;;  %2466 = vmatprep.mubr.f32.mxu0 %v12860_v35  ;;  %v12891_v19 = vld [vmem:[#allocation54_spill] sm:$0xff] }
 0x196   :  { %2830 = vmatprep.mubr.f32.mxu1 %v12861_v41  ;;  %3179 = vmatprep.subr.mxu0 %v12863_v61  ;;  %v12893_v41 = vand.u32 4294901760, %v12860_v35  ;;  %v12895_v61 = vand.u32 4294901760, %v12894_v44  ;;  %v12904_v35 = vld [vmem:[#allocation66_spill] sm:$0xff] }
 0x197   :  { %3538 = vmatprep.subr.mxu1 %v12864_v31  ;;  %971 = vperm.xlu1 %6362, %v889_v59   ;;  %v891_v59 = vld [vmem:[%s11631_s2 + $0x80] sm:$0xff]  ;;  %v12896_v31 = vld [vmem:[#allocation61_spill] sm:$0xff] }
 0x198   :  { %2469 = vmatmul.mubr.f32.gmra.mxu0 %v12865_v7  ;;  %2834 = vmatmul.mubr.f32.gmra.mxu1 %v12866_v46  ;;  %v12897_v46 = vld [vmem:[#allocation152_spill] sm:$0xff] }
 0x199   :  { %3183 = vmatpush2.msra.mxu0 %v12868_v34  ;;  %3540 = vmatpush1.msra.mxu1 %v12869_v33  ;;  %v12899_v34 = vld [vmem:[#allocation77_spill] sm:$0xff]  ;;  %v892_v7 = vld [vmem:[%s11631_s2 + $0x88] sm:$0xff] }
 0x19a   :  { %3187 = vmatprep.subr.mxu0 %v12871_v17  ;;  %3542 = vmatprep.subr.mxu1 %v12872_v20  ;;  %v12900_v33 = vand.u32 4294901760, %v12899_v34  ;;  %v12902_v17 = vld [vmem:[#allocation86_spill] sm:$0xff] }
 0x19b   :  { %3191 = vmatpush2.msra.mxu0 %v12874_v48  ;;  %3544 = vmatpush1.msra.mxu1 %v12875_v28  ;;  %v12903_v20 = vand.u32 4294901760, %v12902_v17  ;;  %v12906_v48 = vand.u32 4294901760, %v12905_v54  ;;  %v12907_v28 = vld [vmem:[#allocation62_spill] sm:$0xff] }
 0x19c   :  { %2476 = vmatprep.mubr.f32.mxu0 %v12876_v21  ;;  %2842 = vmatprep.mubr.f32.mxu1 %v12877_v10  ;;  %v12909_v10 = vand.u32 4294901760, %v12876_v21  ;;  %v12919_v21 = vld [vmem:[#allocation64_spill] sm:$0xff] }
 0x19d   :  { %3195 = vmatprep.subr.mxu0 %v12879_v55  ;;  %3546 = vmatprep.subr.mxu1 %v12880_v39  ;;  %v12910_v55 = vld [vmem:[#allocation90_spill] sm:$0xff] }
 0x19e   :  { %976 = vperm.xlu0 %6361, %v890_v11   ;;  %2479 = vmatmul.mubr.f32.gmra.mxu0 %v12881_v40  ;;  %v12908_v11 = vld [vmem:[#allocation155_spill] sm:$0xff]  ;;  %v12911_v39 = vand.u32 4294901760, %v12910_v55  ;;  %v12937_v55 = vld [vmem:[#allocation72_spill] sm:$0xff] }
 0x19f   :  { %2846 = vmatmul.mubr.f32.gmra.mxu1 %v12882_v56  ;;  %3199 = vmatpush2.msra.mxu0 %v12884_v4  ;;  %v12912_v56 = vld [vmem:[#allocation71_spill] sm:$0xff] }
 0x1a0   :  { %3548 = vmatpush2.msra.mxu1 %v12885_v13  ;;  %3203 = vmatprep.subr.mxu0 %v12887_v2  ;;  %v8523_v13 = vpop.permute.xlu0 %901  ;;  %v12917_v2 = vld [vmem:[#allocation85_spill] sm:$0xff] }
 0x1a1   :  { %3550 = vmatprep.subr.mxu1 %v12888_v50  ;;  %3207 = vmatpush2.msra.mxu0 %v12890_v16  ;;  %12915 = vst [vmem:[#allocation105_spill] sm:$0xff] %v8523_v13  ;;  %v12918_v50 = vand.u32 4294901760, %v12917_v2  ;;  %v12921_v16 = vand.u32 4294901760, %v12920_v5 }
 0x1a2   :  { %3552 = vmatpush2.msra.mxu1 %v12891_v19  ;;  %2486 = vmatprep.mubr.f32.mxu0 %v12892_v49  ;;  %v12922_v19 = vld [vmem:[#allocation75_spill] sm:$0xff] }
 0x1a3   :  { %2854 = vmatprep.mubr.f32.mxu1 %v12893_v41  ;;  %3211 = vmatprep.subr.mxu0 %v12895_v61  ;;  %v12923_v41 = vld [vmem:[#allocation89_spill] sm:$0xff] }
 0x1a4   :  { %3554 = vmatprep.subr.mxu1 %v12896_v31  ;;  %981 = vperm.xlu1 %6362, %v891_v59   ;;  %v12924_v44 = vand.u32 4294901760, %v12923_v41  ;;  %v893_v61 = vld [vmem:[%s11631_s2 + $0x90] sm:$0xff]  ;;  %v12925_v31 = vld [vmem:[#allocation67_spill] sm:$0xff] }
 0x1a5   :  { %2489 = vmatmul.mubr.f32.gmra.mxu0 %v12897_v46  ;;  %2858 = vmatmul.mubr.f32.gmra.mxu1 %v12898_v38  ;;  %v12926_v38 = vld [vmem:[#allocation159_spill] sm:$0xff] }
 0x1a6   :  { %3215 = vmatpush2.msra.mxu0 %v12900_v33  ;;  %3556 = vmatpush2.msra.mxu1 %v12901_v23  ;;  %v12928_v33 = vand.u32 4294901760, %v12892_v49  ;;  %v12929_v23 = vld [vmem:[#allocation98_spill] sm:$0xff]  ;;  %v12935_v49 = vld [vmem:[#allocation93_spill] sm:$0xff]  ;;  %v12946_v41 = vld [vmem:[#allocation163_spill] sm:$0xff] }
 0x1a7   :  { %3219 = vmatprep.subr.mxu0 %v12903_v20  ;;  %3558 = vmatprep.subr.mxu1 %v12904_v35  ;;  %v12930_v17 = vand.u32 4294901760, %v12929_v23  ;;  %v8547_v20 = vpop.permute.xlu1 %906  ;;  %v12932_v35 = vld [vmem:[#allocation80_spill] sm:$0xff] }
 0x1a8   :  { %3223 = vmatpush2.msra.mxu0 %v12906_v48  ;;  %3560 = vmatpush2.msra.mxu1 %v12907_v28  ;;  %12931 = vst [vmem:[#allocation113_spill] sm:$0xff] %v8547_v20  ;;  %v12933_v28 = vld [vmem:[#allocation160_spill] sm:$0xff] }
 0x1a9   :  { %2496 = vmatprep.mubr.f32.mxu0 %v12908_v11  ;;  %2866 = vmatprep.mubr.f32.mxu1 %v12909_v10  ;;  %v1232_v1 = vpop.f32.mrf.mxu0  ;;  %v12951_v23 = vld [vmem:[#allocation164_spill] sm:$0xff] }
 0x1aa   :  { %3227 = vmatprep.subr.mxu0 %v12911_v39  ;;  %3562 = vmatprep.subr.mxu1 %v12912_v56  ;;  %v1233_v40 = vadd.f32 %v1232_v1, %v8523_v13  ;;  %v12936_v1 = vand.u32 4294901760, %v12935_v49  ;;  %v858_v13 = vld [vmem:[#allocation2 + $0x2d8] sm:$0xff] }
 0x1ab   :  { %986 = vperm.xlu0 %6361, %v892_v7   ;;  %2499 = vmatmul.mubr.f32.gmra.mxu0 %v12913_v12  ;;  %v8521_v4 = vpop.f32.mrf.mxu0  ;;  %v12934_v7 = vand.u32 4294901760, %v12897_v46  ;;  %v12943_v46 = vld [vmem:[#allocation95_spill] sm:$0xff] }
 0x1ac   :  { %12914 = vst [vmem:[#allocation4_spill] sm:$0xff] %v8521_v4  ;;  %2870 = vmatmul.mubr.f32.gmra.mxu1 %v12916_v0  ;;  %3231 = vmatpush2.msra.mxu0 %v12918_v50  ;;  %v12940_v0 = vld [vmem:[#allocation104_spill] sm:$0xff]  ;;  %v12942_v50 = vld [vmem:[#allocation83_spill] sm:$0xff]  ;;  %v12944_v5 = vand.u32 4294901760, %v12943_v46 }
 0x1ad   :  { %3564 = vmatpush2.msra.mxu1 %v12919_v21  ;;  %3235 = vmatprep.subr.mxu0 %v12921_v16  ;;  %v1248_v59 = vpop.f32.mrf.mxu0  ;;  %v12941_v2 = vand.u32 4294901760, %v12940_v0  ;;  %v12945_v16 = vld [vmem:[#allocation76_spill] sm:$0xff]  ;;  %v12958_v0 = vld [vmem:[#allocation118_spill] sm:$0xff] }
 0x1ae   :  { %3566 = vmatprep.subr.mxu1 %v12922_v19  ;;  %3239 = vmatpush2.msra.mxu0 %v12924_v44  ;;  %v1249_v21 = vadd.f32 %v1248_v59, %v8547_v20  ;;  %v894_v19 = vld [vmem:[%s11631_s2 + $0x98] sm:$0xff]  ;;  %v12947_v44 = vand.u32 4294901760, %v12908_v11 }
 0x1af   :  { %3568 = vmatpush2.msra.mxu1 %v12925_v31  ;;  %2506 = vmatprep.mubr.f32.mxu0 %v12926_v38  ;;  %v8541_v34 = vpop.f32.mrf.mxu0  ;;  %v12950_v31 = vld [vmem:[#allocation87_spill] sm:$0xff]  ;;  %v862_v11 = vld [vmem:[#allocation2 + $0x2f8] sm:$0xff] }
 0x1b0   :  { %12927 = vst [vmem:[#allocation107_spill] sm:$0xff] %v8541_v34  ;;  %2878 = vmatprep.mubr.f32.mxu1 %v12928_v33  ;;  %3243 = vmatprep.subr.mxu0 %v12930_v17 }
 0x1b1   :  { %3570 = vmatprep.subr.mxu1 %v12932_v35  ;;  %991 = vperm.xlu1 %6362, %v893_v61   ;;  %v8550_v54 = vpop.f32.mrf.mxu0  ;;  %v1993_v48 = vpop.f32.mrf.mxu1  ;;  %v12948_v61 = vld [vmem:[#allocation112_spill] sm:$0xff]  ;;  %v12952_v35 = vand.u32 4294901760, %v12913_v12  ;;  %v895_v12 = vld [vmem:[%s11631_s2 + $0xa0] sm:$0xff] }
 0x1b2   :  { %2509 = vmatmul.mubr.f32.gmra.mxu0 %v12933_v28  ;;  %2882 = vmatmul.mubr.f32.gmra.mxu1 %v12934_v7  ;;  %v8555_v10 = vadd.f32 %v1993_v48, %v1233_v40  ;;  %v12949_v40 = vand.u32 4294901760, %v12948_v61  ;;  %v12953_v48 = vld [vmem:[#allocation103_spill] sm:$0xff]  ;;  %v12966_v61 = vand.u32 4294901760, %v7510_v62  ;;  %v12973_v62 = vld [vmem:[#allocation88_spill] sm:$0xff] }
 0x1b3   :  { %3247 = vmatpush2.msra.mxu0 %v12936_v1  ;;  %3572 = vmatpush2.msra.mxu1 %v12937_v55  ;;  %v8560_v39 = vpop.f32.mrf.mxu0  ;;  %v8562_v56 = vpop.f32.mrf.mxu1  ;;  %v12954_v7 = vand.u32 4294901760, %v12953_v48  ;;  %v12957_v55 = vld [vmem:[#allocation81_spill] sm:$0xff] }
 0x1b4   :  { %12938 = vst [vmem:[#allocation114_spill] sm:$0xff] %v8560_v39  ;;  %12939 = vst [vmem:[#allocation7_spill] sm:$0xff] %v8562_v56  ;;  %3251 = vmatprep.subr.mxu0 %v12941_v2  ;;  %3574 = vmatprep.subr.mxu1 %v12942_v50  ;;  %v12959_v2 = vand.u32 4294901760, %v12958_v0  ;;  %v12960_v50 = vld [vmem:[#allocation91_spill] sm:$0xff] }
 0x1b5   :  { %3255 = vmatpush2.msra.mxu0 %v12944_v5  ;;  %3576 = vmatpush2.msra.mxu1 %v12945_v16  ;;  %v12963_v5 = vld [vmem:[#allocation84_spill] sm:$0xff]  ;;  %v12964_v16 = vld [vmem:[#allocation167_spill] sm:$0xff] }
 0x1b6   :  { %2516 = vmatprep.mubr.f32.mxu0 %v12946_v41  ;;  %2890 = vmatprep.mubr.f32.mxu1 %v12947_v44  ;;  %v12965_v44 = vand.u32 4294901760, %v12926_v38  ;;  %v12971_v38 = vld [vmem:[#allocation117_spill] sm:$0xff] }
 0x1b7   :  { %3259 = vmatprep.subr.mxu0 %v12949_v40  ;;  %3578 = vmatprep.subr.mxu1 %v12950_v31  ;;  %v8580_v59 = vpop.f32.mrf.mxu0  ;;  %v2001_v33 = vpop.f32.mrf.mxu1 }
 0x1b8   :  { %996 = vperm.xlu0 %6361, %v894_v19   ;;  %2519 = vmatmul.mubr.f32.gmra.mxu0 %v12951_v23  ;;  %v8583_v17 = vadd.f32 %v2001_v33, %v1249_v21  ;;  %v12961_v21 = vld [vmem:[#allocation111_spill] sm:$0xff]  ;;  %v8604_v19 = vand.u32 4294901760, %v862_v11  ;;  %v12967_v33 = vld [vmem:[#allocation168_spill] sm:$0xff] }
 0x1b9   :  { %2894 = vmatmul.mubr.f32.gmra.mxu1 %v12952_v35  ;;  %3263 = vmatpush2.msra.mxu0 %v12954_v7  ;;  %v8589_v49 = vpop.f32.mrf.mxu0  ;;  %v8591_v1 = vpop.f32.mrf.mxu1  ;;  %v12962_v46 = vand.u32 4294901760, %v12961_v21  ;;  %v12968_v35 = vand.u32 4294901760, %v12933_v28  ;;  %v896_v28 = vld [vmem:[%s11631_s2 + $0xa8] sm:$0xff]  ;;  %v12978_v21 = vld [vmem:[#allocation121_spill] sm:$0xff] }
 0x1ba   :  { %12955 = vst [vmem:[#allocation14_spill] sm:$0xff] %v8589_v49  ;;  %12956 = vst [vmem:[#allocation5_spill] sm:$0xff] %v8591_v1  ;;  %3580 = vmatpush2.msra.mxu1 %v12957_v55  ;;  %3267 = vmatprep.subr.mxu0 %v12959_v2  ;;  %v12972_v55 = vand.u32 4294901760, %v12971_v38  ;;  %v8624_v0 = vsub.f32 %v862_v11, %v8604_v19  ;;  %v12975_v2 = vld [vmem:[#allocation124_spill] sm:$0xff] }
 0x1bb   :  { %3582 = vmatprep.subr.mxu1 %v12960_v50  ;;  %3271 = vmatpush2.msra.mxu0 %v12962_v46  ;;  %v12977_v50 = vld [vmem:[#allocation101_spill] sm:$0xff]  ;;  %v12979_v46 = vand.u32 4294901760, %v12978_v21  ;;  %v12989_v21 = vld [vmem:[#allocation172_spill] sm:$0xff] }
 0x1bc   :  { %3584 = vmatpush2.msra.mxu1 %v12963_v5  ;;  %2526 = vmatprep.mubr.f32.mxu0 %v12964_v16  ;;  %12974 = vst [vmem:[#allocation9_spill] sm:$0xff] %v8624_v0  ;;  %v12981_v5 = vld [vmem:[#allocation170_spill] sm:$0xff]  ;;  %v12014_v38 = vand.u32 4294901760, %v8624_v0 }
 0x1bd   :  { %2902 = vmatprep.mubr.f32.mxu1 %v12965_v44  ;;  %3275 = vmatprep.subr.mxu0 %v12966_v61  ;;  %v8610_v40 = vpop.f32.mrf.mxu0  ;;  %v2009_v31 = vpop.f32.mrf.mxu1  ;;  %v12982_v44 = vand.u32 4294901760, %v12946_v41 }
 0x1be   :  { %3586 = vmatprep.subr.mxu1 %v12722_v45  ;;  %1001 = vperm.xlu1 %6362, %v895_v12   ;;  %v12976_v45 = vand.u32 4294901760, %v12975_v2  ;;  %v12980_v12 = vld [vmem:[#allocation92_spill] sm:$0xff]  ;;  %v897_v2 = vld [vmem:[%s11631_s2 + $0xb0] sm:$0xff] }
 0x1bf   :  { %2529 = vmatmul.mubr.f32.gmra.mxu0 %v12967_v33  ;;  %2906 = vmatmul.mubr.f32.gmra.mxu1 %v12968_v35  ;;  %v8616_v48 = vpop.f32.mrf.mxu0  ;;  %v8618_v7 = vpop.f32.mrf.mxu1  ;;  %v12983_v35 = vld [vmem:[#allocation109_spill] sm:$0xff] }
 0x1c0   :  { %12969 = vst [vmem:[#allocation123_spill] sm:$0xff] %v8616_v48  ;;  %12970 = vst [vmem:[#allocation32_spill] sm:$0xff] %v8618_v7  ;;  %3279 = vmatpush2.msra.mxu0 %v12972_v55  ;;  %3588 = vmatpush2.msra.mxu1 %v12973_v62  ;;  %v12984_v55 = vld [vmem:[#allocation171_spill] sm:$0xff]  ;;  %v12985_v62 = vand.u32 4294901760, %v12951_v23  ;;  %v4298_v23 = vsub.f32 %v8624_v0, %v12014_v38 }
 0x1c1   :  { %3283 = vmatprep.subr.mxu0 %v12976_v45  ;;  %3590 = vmatprep.subr.mxu1 %v12977_v50  ;;  %v12988_v50 = vld [vmem:[#allocation97_spill] sm:$0xff] }
 0x1c2   :  { %3287 = vmatpush2.msra.mxu0 %v12979_v46  ;;  %3592 = vmatpush2.msra.mxu1 %v12980_v12  ;;  %v12991_v46 = vand.u32 4294901760, %v12964_v16  ;;  %v12992_v12 = vld [vmem:[#allocation173_spill] sm:$0xff]  ;;  %v12993_v16 = vand.u32 4294901760, %v12967_v33 }
 0x1c3   :  { %2536 = vmatprep.mubr.f32.mxu0 %v12981_v5  ;;  %2914 = vmatprep.mubr.f32.mxu1 %v12982_v44  ;;  %v1312_v11 = vpop.f32.mrf.mxu0  ;;  %v2017_v61 = vpop.f32.mrf.mxu1  ;;  %v898_v44 = vld [vmem:[%s11631_s2 + $0xb8] sm:$0xff] }
 0x1c4   :  { %3594 = vmatprep.subr.mxu1 %v12983_v35  ;;  %1006 = vperm.xlu0 %6361, %v896_v28   ;;  %v12990_v28 = vld [vmem:[#allocation116_spill] sm:$0xff] }
 0x1c5   :  { %2539 = vmatmul.mubr.f32.gmra.mxu0 %v12984_v55  ;;  %2918 = vmatmul.mubr.f32.gmra.mxu1 %v12985_v62  ;;  %v8646_v45 = vpop.f32.mrf.mxu0  ;;  %v8648_v41 = vpop.f32.mrf.mxu1 }
 0x1c6   :  { %12986 = vst [vmem:[#allocation125_spill] sm:$0xff] %v8646_v45  ;;  %12987 = vst [vmem:[#allocation25_spill] sm:$0xff] %v8648_v41  ;;  %3596 = vmatpush2.msra.mxu1 %v12988_v50  ;;  %2546 = vmatprep.mubr.f32.mxu0 %v12989_v21  ;;  %v12994_v50 = vld [vmem:[#allocation174_spill] sm:$0xff] }
 0x1c7   :  { %3598 = vmatprep.subr.mxu1 %v12990_v28  ;;  %2926 = vmatprep.mubr.f32.mxu1 %v12991_v46  ;;  %v4299_v28 = vand.u32 4294901760, %v4298_v23  ;;  %v850_v41 = vld [vmem:[#allocation2 + $0x298] sm:$0xff] }
 0x1c8   :  { %3600 = vmatpush2.msra.mxu1 %v12741_v47  ;;  %1011 = vperm.xlu1 %6362, %v897_v2   ;;  %v12995_v47 = vand.u32 4294901760, %v12981_v5  ;;  %v13000_v5 = vld [vmem:[#allocation175_spill] sm:$0xff] }
 0x1c9   :  { %3602 = vmatprep.subr.mxu1 %v12743_v30  ;;  %2549 = vmatmul.mubr.f32.gmra.mxu0 %v12992_v12  ;;  %v1328_v35 = vpop.f32.mrf.mxu0  ;;  %v2025_v62 = vpop.f32.mrf.mxu1 }
 0x1ca   :  { %2930 = vmatmul.mubr.f32.gmra.mxu1 %v12993_v16  ;;  %2556 = vmatprep.mubr.f32.mxu0 %v12994_v50 }
 0x1cb   :  { %3604 = vmatpush2.msra.mxu1 %v12746_v14  ;;  %2938 = vmatprep.mubr.f32.mxu1 %v12995_v47  ;;  %v8670_v2 = vpop.permute.xlu1 %911  ;;  %v8672_v30 = vpop.permute.xlu0 %916  ;;  %v13001_v47 = vand.u32 4294901760, %v12984_v55 }
 0x1cc   :  { %12996 = vst [vmem:[#allocation6_spill] sm:$0xff] %v8670_v2  ;;  %12997 = vst [vmem:[#allocation11_spill] sm:$0xff] %v8672_v30  ;;  %3606 = vmatprep.subr.mxu1 %v7528_v58  ;;  %1016 = vperm.xlu0 %6361, %v898_v44   ;;  %v1265_v46 = vadd.f32 %v8550_v54, %v8670_v2  ;;  %v1281_v33 = vadd.f32 %v8580_v59, %v8672_v30  ;;  %v8679_v16 = vpop.f32.mrf.mxu0  ;;  %v8681_v14 = vpop.f32.mrf.mxu1  ;;  %v13002_v58 = vld [vmem:[#allocation176_spill] sm:$0xff]  ;;  %v13003_v54 = vand.u32 4294901760, %v12989_v21  ;;  %v13008_v21 = vld [vmem:[#allocation177_spill] sm:$0xff] }
 0x1cd   :  { %12998 = vst [vmem:[#allocation31_spill] sm:$0xff] %v8679_v16  ;;  %12999 = vst [vmem:[#allocation8_spill] sm:$0xff] %v8681_v14  ;;  %3608 = vmatpush2.msra.mxu1 %v7462_v29  ;;  %2559 = vmatmul.mubr.f32.gmra.mxu0 %v13000_v5  ;;  %v860_v2 = vld [vmem:[#allocation2 + $0x2e8] sm:$0xff]  ;;  %v6373_v16 = vld [vmem:[#allocation2 + $0x2c0] sm:$0xff] }
 0x1ce   :  { %2942 = vmatmul.mubr.f32.gmra.mxu1 %v13001_v47  ;;  %2566 = vmatprep.mubr.f32.mxu0 %v13002_v58  ;;  %v8688_v23 = vadd.f32 %v2009_v31, %v1265_v46  ;;  %v8690_v44 = vadd.f32 %v2017_v61, %v1281_v33  ;;  %v13006_v46 = vld [vmem:[#allocation96_spill] sm:$0xff]  ;;  %v13007_v61 = vand.u32 4294901760, %v12992_v12  ;;  %v13014_v12 = vld [vmem:[#allocation178_spill] sm:$0xff]  ;;  %v8744_v1 = vand.u32 4294901760, %v860_v2  ;;  %v6375_v30 = vld [vmem:[#allocation2 + $0x2a0] sm:$0xff] }
 0x1cf   :  { %2950 = vmatprep.mubr.f32.mxu1 %v13003_v54  ;;  %3803 = vmatprep.subr.mxu0 %v8604_v19  ;;  %v8695_v59 = vpop.permute.xlu1 %921  ;;  %v8697_v38 = vpop.permute.xlu0 %926  ;;  %v13020_v56 = vand.u32 4294901760, %v13006_v46  ;;  %v13029_v20 = vand.u32 4294901760, %v13014_v12 }
 0x1d0   :  { %13004 = vst [vmem:[#allocation128_spill] sm:$0xff] %v8695_v59  ;;  %13005 = vst [vmem:[#allocation42_spill] sm:$0xff] %v8697_v38  ;;  %4300 = vmatprep.subr.mxu1 %v4299_v28  ;;  %v1297_v29 = vadd.f32 %v8610_v40, %v8695_v59  ;;  %v1313_v55 = vadd.f32 %v1312_v11, %v8697_v38  ;;  %v1344_v47 = vpop.f32.mrf.mxu0  ;;  %v2033_v31 = vpop.f32.mrf.mxu1  ;;  %v13011_v40 = vand.u32 4294901760, %v12994_v50  ;;  %v13017_v50 = vand.u32 4294901760, %v13002_v58 }
 0x1d1   :  { %2569 = vmatmul.mubr.f32.gmra.mxu0 %v13006_v46  ;;  %v13023_v58 = vand.u32 4294901760, %v13008_v21  ;;  %13024 = vst [vmem:[#allocation19_spill] sm:$0xff] %v8744_v1 }
 0x1d2   :  { %2954 = vmatmul.mubr.f32.gmra.mxu1 %v13007_v61  ;;  %2576 = vmatprep.mubr.f32.mxu0 %v13008_v21  ;;  %v8706_v33 = vadd.f32 %v2025_v62, %v1297_v29  ;;  %v8708_v54 = vadd.f32 %v2033_v31, %v1313_v55  ;;  %v8710_v22 = vpop.f32.mrf.mxu0  ;;  %v8712_v28 = vpop.f32.mrf.mxu1  ;;  %v13015_v29 = vand.u32 4294901760, %v13000_v5  ;;  %v13016_v55 = vld [vmem:[#allocation179_spill] sm:$0xff]  ;;  %v6370_v5 = vld [vmem:[#allocation2 + $0x2f0] sm:$0xff] }
 0x1d3   :  { %13009 = vst [vmem:[#allocation16_spill] sm:$0xff] %v8710_v22  ;;  %13010 = vst [vmem:[#allocation129_spill] sm:$0xff] %v8712_v28  ;;  %2962 = vmatprep.mubr.f32.mxu1 %v13011_v40  ;;  %v8716_v11 = vpop.permute.xlu1 %931  ;;  %v8719_v7 = vpop.permute.xlu0 %936 }
 0x1d4   :  { %13012 = vst [vmem:[#allocation10_spill] sm:$0xff] %v8716_v11  ;;  %v1329_v32 = vadd.f32 %v1328_v35, %v8716_v11  ;;  %13013 = vst [vmem:[#allocation47_spill] sm:$0xff] %v8719_v7  ;;  %v1345_v35 = vadd.f32 %v1344_v47, %v8719_v7  ;;  %v6371_v47 = vld [vmem:[#allocation2 + $0x2e0] sm:$0xff]  ;;  %v8787_v11 = vand.u32 4294901760, %v6373_v16 }
 0x1d5   :  { %2579 = vmatmul.mubr.f32.gmra.mxu0 %v13014_v12  ;;  %v1360_v61 = vpop.f32.mrf.mxu0  ;;  %v2041_v62 = vpop.f32.mrf.mxu1  ;;  %v8746_v4 = vand.u32 4294901760, %v6371_v47  ;;  %v6372_v12 = vld [vmem:[#allocation2 + $0x2d0] sm:$0xff] }
 0x1d6   :  { %2966 = vmatmul.mubr.f32.gmra.mxu1 %v13015_v29  ;;  %2586 = vmatprep.mubr.f32.mxu0 %v13016_v55  ;;  %v8725_v31 = vadd.f32 %v2041_v62, %v1329_v32  ;;  %v8738_v32 = vand.u32 4294901760, %v6370_v5  ;;  %13042 = vst [vmem:[#allocation139_spill] sm:$0xff] %v8787_v11 }
 0x1d7   :  { %2974 = vmatprep.mubr.f32.mxu1 %v13017_v50  ;;  %v8729_v40 = vpop.f32.mrf.mxu0  ;;  %v8731_v39 = vpop.f32.mrf.mxu1  ;;  %13025 = vst [vmem:[#allocation29_spill] sm:$0xff] %v8746_v4 }
 0x1d8   :  { %13018 = vst [vmem:[#allocation23_spill] sm:$0xff] %v8729_v40  ;;  %13019 = vst [vmem:[#allocation41_spill] sm:$0xff] %v8731_v39  ;;  %v8740_v62 = vpop.permute.xlu1 %941  ;;  %v8759_v21 = vsub.f32 %v6370_v5, %v8738_v32  ;;  %v13031_v40 = vand.u32 4294901760, %v13016_v55  ;;  %v8775_v5 = vand.u32 4294901760, %v6372_v12  ;;  %v13037_v55 = vand.u32 4294901760, %v8175_v37 }
 0x1d9   :  { %2589 = vmatmul.mubr.f32.gmra.mxu0 %v8175_v37  ;;  %13021 = vst [vmem:[#allocation12_spill] sm:$0xff] %v8738_v32  ;;  %13022 = vst [vmem:[#allocation132_spill] sm:$0xff] %v8740_v62  ;;  %v13041_v39 = vand.u32 4294901760, %v8187_v9 }
 0x1da   :  { %2978 = vmatmul.mubr.f32.gmra.mxu1 %v13020_v56  ;;  %2596 = vmatprep.mubr.f32.mxu0 %v8187_v9  ;;  %13030 = vst [vmem:[#allocation28_spill] sm:$0xff] %v8759_v21  ;;  %13036 = vst [vmem:[#allocation45_spill] sm:$0xff] %v8775_v5  ;;  %v8801_v9 = vsub.f32 %v6372_v12, %v8775_v5  ;;  %v13053_v12 = vand.u32 4294901760, %v8220_v43 }
 0x1db   :  { %2986 = vmatprep.mubr.f32.mxu1 %v13023_v58  ;;  %v1376_v29 = vpop.f32.mrf.mxu0  ;;  %v2049_v50 = vpop.f32.mrf.mxu1  ;;  %v1361_v58 = vadd.f32 %v1360_v61, %v8740_v62 }
 0x1dc   :  { %v8748_v46 = vadd.f32 %v2049_v50, %v1345_v35  ;;  %v8764_v35 = vand.u32 4294901760, %v858_v13  ;;  %v856_v50 = vld [vmem:[#allocation2 + $0x2c8] sm:$0xff]  ;;  %13047 = vst [vmem:[#allocation15_spill] sm:$0xff] %v8801_v9 }
 0x1dd   :  { %2599 = vmatmul.mubr.f32.gmra.mxu0 %v8212_v25  ;;  %v8751_v56 = vpop.f32.mrf.mxu0  ;;  %v8753_v34 = vpop.f32.mrf.mxu1  ;;  %v8780_v22 = vand.u32 4294901760, %v856_v50 }
 0x1de   :  { %13026 = vst [vmem:[#allocation133_spill] sm:$0xff] %v8748_v46  ;;  %13027 = vst [vmem:[#allocation22_spill] sm:$0xff] %v8751_v56  ;;  %2990 = vmatmul.mubr.f32.gmra.mxu1 %v13029_v20  ;;  %2606 = vmatprep.mubr.f32.mxu0 %v8220_v43  ;;  %v8767_v56 = vsub.f32 %v6371_v47, %v8746_v4  ;;  %v8772_v20 = vpop.permute.xlu0 %946  ;;  %v854_v47 = vld [vmem:[#allocation2 + $0x2b8] sm:$0xff]  ;;  %v8790_v28 = vsub.f32 %v858_v13, %v8764_v35  ;;  %v13049_v13 = vand.u32 4294901760, %v8212_v25  ;;  %v6374_v25 = vld [vmem:[#allocation2 + $0x2b0] sm:$0xff] }
 0x1df   :  { %13028 = vst [vmem:[#allocation18_spill] sm:$0xff] %v8753_v34  ;;  %2998 = vmatprep.mubr.f32.mxu1 %v13031_v40  ;;  %13032 = vst [vmem:[#allocation24_spill] sm:$0xff] %v8764_v35  ;;  %v8770_v34 = vsub.f32 %v860_v2, %v8744_v1  ;;  %v13038_v40 = vld [vmem:[#allocation3_spill] sm:$0xff]  ;;  %v852_v2 = vld [vmem:[#allocation2 + $0x2a8] sm:$0xff]  ;;  %v8812_v38 = vsub.f32 %v856_v50, %v8780_v22 }
 0x1e0   :  { %13033 = vst [vmem:[#allocation136_spill] sm:$0xff] %v8767_v56  ;;  %13035 = vst [vmem:[#allocation137_spill] sm:$0xff] %v8772_v20  ;;  %v13056_v50 = vld [vmem:[#allocation100_spill] sm:$0xff]  ;;  %v8829_v48 = vand.u32 4294901760, %v852_v2 }
 0x1e1   :  { %13034 = vst [vmem:[#allocation40_spill] sm:$0xff] %v8770_v34  ;;  %2609 = vmatmul.mubr.f32.gmra.mxu0 %v8233_v53  ;;  %v1392_v61 = vpop.f32.mrf.mxu0  ;;  %v2057_v62 = vpop.f32.mrf.mxu1  ;;  %13039 = vst [vmem:[#allocation48_spill] sm:$0xff] %v8780_v22  ;;  %v13058_v43 = vand.u32 4294901760, %v8770_v34  ;;  %v13191_v46 = vld [vmem:[#allocation144_spill] sm:$0xff] }
 0x1e2   :  { %3002 = vmatmul.mubr.f32.gmra.mxu1 %v13037_v55  ;;  %3289 = vmatprep.mubr.f32.mxu0 %v13038_v40  ;;  %v8783_v7 = vadd.f32 %v2057_v62, %v1361_v58  ;;  %13043 = vst [vmem:[#allocation13_spill] sm:$0xff] %v8790_v28  ;;  %v1377_v62 = vadd.f32 %v1376_v29, %v8772_v20  ;;  %v13046_v58 = vld [vmem:[#allocation99_spill] sm:$0xff]  ;;  %13051 = vst [vmem:[#allocation17_spill] sm:$0xff] %v8812_v38  ;;  %v8814_v29 = vpop.permute.xlu1 %951 }
 0x1e3   :  { %3010 = vmatprep.mubr.f32.mxu1 %v13041_v39  ;;  %v8792_v37 = vpop.f32.mrf.mxu0  ;;  %v8794_v55 = vpop.f32.mrf.mxu1  ;;  %v8803_v39 = vand.u32 4294901760, %v854_v47  ;;  %13052 = vst [vmem:[#allocation51_spill] sm:$0xff] %v8814_v29  ;;  %v8820_v20 = vsub.f32 %v6373_v16, %v8787_v11  ;;  %13057 = vst [vmem:[#allocation56_spill] sm:$0xff] %v8829_v48  ;;  %v13059_v16 = vand.u32 4294901760, %v8767_v56 }
 0x1e4   :  { %13040 = vst [vmem:[#allocation36_spill] sm:$0xff] %v8783_v7  ;;  %13044 = vst [vmem:[#allocation37_spill] sm:$0xff] %v8792_v37  ;;  %v13050_v37 = vand.u32 4294901760, %v8759_v21 }
 0x1e5   :  { %13045 = vst [vmem:[#allocation49_spill] sm:$0xff] %v8794_v55  ;;  %3291 = vmatmul.mubr.f32.vlgmr.msra.gmra.mxu0 %v13046_v58  ;;  %13048 = vst [vmem:[#allocation50_spill] sm:$0xff] %v8803_v39  ;;  %v4316_v59 = vsub.f32 %v8767_v56, %v13059_v16  ;;  %v13061_v55 = vld [vmem:[#allocation106_spill] sm:$0xff]  ;;  %v13066_v16 = vand.u32 4294901760, %v8233_v53 }
 0x1e6   :  { %3014 = vmatmul.mubr.f32.gmra.mxu1 %v13049_v13  ;;  %3805 = vmatpush1.msra.mxu0 %v8738_v32  ;;  %v4304_v45 = vsub.f32 %v8759_v21, %v13050_v37  ;;  %13054 = vst [vmem:[#allocation20_spill] sm:$0xff] %v8820_v20  ;;  %v8822_v13 = vand.u32 4294901760, %v6374_v25  ;;  %v8845_v32 = vsub.f32 %v854_v47, %v8803_v39 }
 0x1e7   :  { %3807 = vmatprep.subr.mxu0 %v8744_v1  ;;  %3022 = vmatprep.mubr.f32.mxu1 %v13053_v12  ;;  %v8825_v14 = vpop.f32.mrf.mxu0  ;;  %v2065_v37 = vpop.f32.mrf.mxu1  ;;  %v4310_v12 = vsub.f32 %v8770_v34, %v13058_v43  ;;  %v13067_v1 = vld [vmem:[#allocation108_spill] sm:$0xff] }
 0x1e8   :  { %13055 = vst [vmem:[#allocation142_spill] sm:$0xff] %v8822_v13  ;;  %3809 = vmatpush1.msra.mxu0 %v8746_v4  ;;  %3297 = vmatprep.mubr.f32.mxu0 %v13056_v50  ;;  %v8837_v49 = vadd.f32 %v2065_v37, %v1377_v62  ;;  %v8841_v4 = vand.u32 4294901760, %v6375_v30  ;;  %13063 = vst [vmem:[#allocation57_spill] sm:$0xff] %v8845_v32  ;;  %v4305_v62 = vand.u32 4294901760, %v4304_v45  ;;  %v4317_v37 = vand.u32 4294901760, %v4316_v59  ;;  %v846_v59 = vld [vmem:[#allocation2 + $0x278] sm:$0xff] }
 0x1e9   :  { %3811 = vmatprep.subr.mxu0 %v8764_v35  ;;  %3299 = vmatmul.mubr.f32.gmra.mxu0 %v13061_v55  ;;  %v8847_v43 = vpop.f32.mrf.mxu0  ;;  %v8849_v34 = vpop.f32.mrf.mxu1  ;;  %v1393_v35 = vadd.f32 %v1392_v61, %v8814_v29  ;;  %v8859_v47 = vsub.f32 %v6374_v25, %v8822_v13  ;;  %v4311_v61 = vand.u32 4294901760, %v4310_v12  ;;  %v8870_v29 = vsub.f32 %v852_v2, %v8829_v48 }
 0x1ea   :  { %13060 = vst [vmem:[#allocation21_spill] sm:$0xff] %v8837_v49  ;;  %13062 = vst [vmem:[#allocation143_spill] sm:$0xff] %v8841_v4  ;;  %3026 = vmatmul.mubr.f32.gmra.mxu1 %v13066_v16  ;;  %3813 = vmatpush1.msra.mxu0 %v8775_v5  ;;  %v848_v16 = vld [vmem:[#allocation2 + $0x288] sm:$0xff]  ;;  %v8872_v25 = vpop.permute.xlu0 %956  ;;  %v6376_v5 = vld [vmem:[#allocation2 + $0x290] sm:$0xff] }
 0x1eb   :  { %13064 = vst [vmem:[#allocation27_spill] sm:$0xff] %v8847_v43  ;;  %13065 = vst [vmem:[#allocation59_spill] sm:$0xff] %v8849_v34  ;;  %3815 = vmatprep.subr.mxu0 %v8780_v22  ;;  %3305 = vmatprep.mubr.f32.mxu0 %v13067_v1  ;;  %v8861_v43 = vand.u32 4294901760, %v850_v41  ;;  %v13070_v34 = vand.u32 4294901760, %v8790_v28  ;;  %v13073_v22 = vld [vmem:[#allocation115_spill] sm:$0xff]  ;;  %v8879_v45 = vand.u32 4294901760, %v6376_v5 }
 0x1ec   :  { %13068 = vst [vmem:[#allocation33_spill] sm:$0xff] %v8859_v47  ;;  %3817 = vmatpush1.msra.mxu0 %v8787_v11  ;;  %3610 = vmatprep.mubr.f32.mxu1 %v13038_v40  ;;  %13071 = vst [vmem:[#allocation34_spill] sm:$0xff] %v8870_v29  ;;  %v13076_v11 = vand.u32 4294901760, %v8801_v9  ;;  %v6377_v49 = vld [vmem:[#allocation2 + $0x280] sm:$0xff] }
 0x1ed   :  { %13069 = vst [vmem:[#allocation60_spill] sm:$0xff] %v8861_v43  ;;  %v4322_v53 = vsub.f32 %v8790_v28, %v13070_v34  ;;  %13072 = vst [vmem:[#allocation35_spill] sm:$0xff] %v8872_v25  ;;  %3819 = vmatprep.subr.mxu0 %v8803_v39  ;;  %3307 = vmatmul.mubr.f32.gmra.mxu0 %v13073_v22  ;;  %v8877_v34 = vsub.f32 %v6375_v30, %v8841_v4  ;;  %v8885_v12 = vpop.f32.mrf.mxu0  ;;  %v2073_v28 = vpop.f32.mrf.mxu1  ;;  %v8889_v39 = vand.u32 4294901760, %v848_v16 }
 0x1ee   :  { %13075 = vst [vmem:[#allocation39_spill] sm:$0xff] %v8879_v45  ;;  %v4328_v40 = vsub.f32 %v8801_v9, %v13076_v11  ;;  %3612 = vmatmul.mubr.f32.vlgmr.msra.gmra.mxu1 %v13046_v58  ;;  %3821 = vmatpush1.msra.mxu0 %v8822_v13  ;;  %v13078_v30 = vand.u32 4294901760, %v8812_v38  ;;  %v8894_v21 = vand.u32 4294901760, %v6377_v49  ;;  %v8896_v11 = vadd.f32 %v2073_v28, %v1393_v35 }
 0x1ef   :  { %13074 = vst [vmem:[#allocation63_spill] sm:$0xff] %v8877_v34  ;;  %13077 = vst [vmem:[#allocation30_spill] sm:$0xff] %v8889_v39  ;;  %4306 = vmatpush1.msra.mxu1 %v4305_v62  ;;  %3823 = vmatprep.subr.mxu0 %v8829_v48  ;;  %v4323_v2 = vand.u32 4294901760, %v4322_v53  ;;  %v13081_v9 = vand.u32 4294901760, %v8820_v20  ;;  %v8904_v63 = vsub.f32 %v850_v41, %v8861_v43  ;;  %v8906_v7 = vpop.f32.mrf.mxu0  ;;  %v8911_v28 = vand.u32 4294901760, %v846_v59  ;;  %v842_v48 = vld [vmem:[#allocation2 + $0x258] sm:$0xff] }
 0x1f0   :  { %v4334_v56 = vsub.f32 %v8812_v38, %v13078_v30  ;;  %13079 = vst [vmem:[#allocation65_spill] sm:$0xff] %v8894_v21  ;;  %13080 = vst [vmem:[#allocation43_spill] sm:$0xff] %v8896_v11  ;;  %v8908_v30 = vpop.f32.mrf.mxu1  ;;  %4312 = vmatprep.subr.mxu1 %v4311_v61  ;;  %3825 = vmatpush1.msra.mxu0 %v8841_v4  ;;  %v1409_v62 = vadd.f32 %v8825_v14, %v8872_v25  ;;  %v4329_v53 = vand.u32 4294901760, %v4328_v40  ;;  %v13092_v40 = vld [vmem:[#allocation122_spill] sm:$0xff]  ;;  %v6378_v25 = vld [vmem:[#allocation2 + $0x270] sm:$0xff] }
 0x1f1   :  { %v4340_v58 = vsub.f32 %v8820_v20, %v13081_v9  ;;  %13082 = vst [vmem:[#allocation69_spill] sm:$0xff] %v8904_v63  ;;  %13083 = vst [vmem:[#allocation44_spill] sm:$0xff] %v8906_v7  ;;  %4318 = vmatpush1.msra.mxu1 %v4317_v37  ;;  %v13086_v9 = vld [vmem:[#allocation120_spill] sm:$0xff]  ;;  %v8918_v41 = vsub.f32 %v6376_v5, %v8879_v45  ;;  %v13088_v13 = vand.u32 4294901760, %v8845_v32  ;;  %3618 = vmatprep.mubr.f32.mxu1 %v13056_v50  ;;  %v8932_v5 = vpop.permute.xlu1 %961 }
 0x1f2   :  { %13084 = vst [vmem:[#allocation68_spill] sm:$0xff] %v8908_v30  ;;  %13085 = vst [vmem:[#allocation46_spill] sm:$0xff] %v8911_v28  ;;  %3313 = vmatprep.mubr.f32.mxu0 %v13086_v9  ;;  %v844_v7 = vld [vmem:[#allocation2 + $0x268] sm:$0xff]  ;;  %3827 = vmatprep.subr.mxu0 %v8861_v43  ;;  %v4335_v35 = vand.u32 4294901760, %v4334_v56  ;;  %v8927_v14 = vsub.f32 %v6377_v49, %v8894_v21  ;;  %v8930_v37 = vsub.f32 %v848_v16, %v8889_v39 }
 0x1f3   :  { %13087 = vst [vmem:[#allocation147_spill] sm:$0xff] %v8918_v41  ;;  %v4346_v61 = vsub.f32 %v8845_v32, %v13088_v13  ;;  %13091 = vst [vmem:[#allocation148_spill] sm:$0xff] %v8932_v5  ;;  %4324 = vmatprep.subr.mxu1 %v4323_v2  ;;  %3315 = vmatmul.mubr.f32.gmra.mxu0 %v13092_v40  ;;  %v4341_v13 = vand.u32 4294901760, %v4340_v58  ;;  %v8935_v4 = vand.u32 4294901760, %v6378_v25  ;;  %v13094_v50 = vand.u32 4294901760, %v8859_v47  ;;  %v8941_v49 = vpop.f32.mrf.mxu0  ;;  %v2081_v43 = vpop.f32.mrf.mxu1 }
 0x1f4   :  { %13089 = vst [vmem:[#allocation74_spill] sm:$0xff] %v8927_v14  ;;  %13090 = vst [vmem:[#allocation52_spill] sm:$0xff] %v8930_v37  ;;  %3620 = vmatmul.mubr.f32.gmra.mxu1 %v13061_v55  ;;  %3829 = vmatpush1.msra.mxu0 %v8879_v45  ;;  %v8945_v16 = vand.u32 4294901760, %v844_v7  ;;  %v13096_v2 = vand.u32 4294901760, %v8870_v29  ;;  %v8951_v11 = vsub.f32 %v846_v59, %v8911_v28  ;;  %v13100_v45 = vand.u32 4294901760, %v8877_v34 }
 0x1f5   :  { %13093 = vst [vmem:[#allocation70_spill] sm:$0xff] %v8935_v4  ;;  %v4352_v30 = vsub.f32 %v8859_v47, %v13094_v50  ;;  %v8953_v50 = vadd.f32 %v2081_v43, %v1409_v62  ;;  %4330 = vmatpush1.msra.mxu1 %v4329_v53  ;;  %3831 = vmatprep.subr.mxu0 %v8889_v39  ;;  %v4347_v56 = vand.u32 4294901760, %v4346_v61  ;;  %v6379_v47 = vld [vmem:[#allocation2 + $0x260] sm:$0xff]  ;;  %v13103_v53 = vld [vmem:[#allocation126_spill] sm:$0xff]  ;;  %v8975_v20 = vand.u32 4294901760, %v842_v48 }
 0x1f6   :  { %13095 = vst [vmem:[#allocation53_spill] sm:$0xff] %v8945_v16  ;;  %v4358_v58 = vsub.f32 %v8870_v29, %v13096_v2  ;;  %13097 = vst [vmem:[#allocation78_spill] sm:$0xff] %v8951_v11  ;;  %v8956_v55 = vand.u32 4294901760, %v6379_v47  ;;  %v4364_v32 = vsub.f32 %v8877_v34, %v13100_v45  ;;  %v8962_v2 = vpop.f32.mrf.mxu0  ;;  %v8964_v29 = vpop.f32.mrf.mxu1  ;;  %4336 = vmatprep.subr.mxu1 %v4335_v35  ;;  %3833 = vmatpush1.msra.mxu0 %v8894_v21 }
 0x1f7   :  { %13098 = vst [vmem:[#allocation55_spill] sm:$0xff] %v8953_v50  ;;  %13101 = vst [vmem:[#allocation54_spill] sm:$0xff] %v8962_v2  ;;  %v1425_v62 = vadd.f32 %v8885_v12, %v8932_v5  ;;  %4342 = vmatpush1.msra.mxu1 %v4341_v13  ;;  %3321 = vmatprep.mubr.f32.mxu0 %v13103_v53  ;;  %v8973_v45 = vsub.f32 %v6378_v25, %v8935_v4  ;;  %v4353_v61 = vand.u32 4294901760, %v4352_v30  ;;  %v8986_v25 = vpop.permute.xlu0 %966  ;;  %v13109_v30 = vld [vmem:[#allocation127_spill] sm:$0xff]  ;;  %v6380_v5 = vld [vmem:[#allocation2 + $0x250] sm:$0xff] }
 0x1f8   :  { %13099 = vst [vmem:[#allocation73_spill] sm:$0xff] %v8956_v55  ;;  %13102 = vst [vmem:[#allocation151_spill] sm:$0xff] %v8964_v29  ;;  %v13106_v35 = vand.u32 4294901760, %v8904_v63  ;;  %v840_v29 = vld [vmem:[#allocation2 + $0x248] sm:$0xff]  ;;  %3626 = vmatprep.mubr.f32.mxu1 %v13067_v1  ;;  %3835 = vmatprep.subr.mxu0 %v8911_v28  ;;  %v4359_v59 = vand.u32 4294901760, %v4358_v58  ;;  %v8984_v13 = vsub.f32 %v844_v7, %v8945_v16  ;;  %v8992_v21 = vand.u32 4294901760, %v6380_v5 }
 0x1f9   :  { %13104 = vst [vmem:[#allocation82_spill] sm:$0xff] %v8973_v45  ;;  %13105 = vst [vmem:[#allocation61_spill] sm:$0xff] %v8975_v20  ;;  %4348 = vmatprep.subr.mxu1 %v4347_v56  ;;  %3323 = vmatmul.mubr.f32.gmra.mxu0 %v13109_v30  ;;  %v8990_v43 = vsub.f32 %v6379_v47, %v8956_v55  ;;  %v13112_v1 = vand.u32 4294901760, %v8918_v41  ;;  %v8997_v12 = vpop.f32.mrf.mxu0  ;;  %v2089_v7 = vpop.f32.mrf.mxu1  ;;  %v9001_v56 = vand.u32 4294901760, %v840_v29  ;;  %v13114_v47 = vand.u32 4294901760, %v8930_v37  ;;  %v838_v50 = vld [vmem:[#allocation2 + $0x238] sm:$0xff] }
 0x1fa   :  { %v4370_v2 = vsub.f32 %v8904_v63, %v13106_v35  ;;  %13107 = vst [vmem:[#allocation152_spill] sm:$0xff] %v8984_v13  ;;  %13108 = vst [vmem:[#allocation77_spill] sm:$0xff] %v8986_v25  ;;  %v4365_v35 = vand.u32 4294901760, %v4364_v32  ;;  %3628 = vmatmul.mubr.f32.gmra.mxu1 %v13073_v22  ;;  %3837 = vmatpush1.msra.mxu0 %v8935_v4  ;;  %v13115_v28 = vand.u32 4294901760, %v8927_v14  ;;  %v6381_v22 = vld [vmem:[#allocation2 + $0x240] sm:$0xff] }
 0x1fb   :  { %13110 = vst [vmem:[#allocation58_spill] sm:$0xff] %v8990_v43  ;;  %13111 = vst [vmem:[#allocation86_spill] sm:$0xff] %v8992_v21  ;;  %v4376_v58 = vsub.f32 %v8918_v41, %v13112_v1  ;;  %v4382_v32 = vsub.f32 %v8930_v37, %v13114_v47  ;;  %v9009_v63 = vadd.f32 %v2089_v7, %v1425_v62  ;;  %4354 = vmatpush1.msra.mxu1 %v4353_v61  ;;  %v9018_v47 = vpop.f32.mrf.mxu0  ;;  %v9020_v37 = vpop.f32.mrf.mxu1  ;;  %v13122_v7 = vld [vmem:[#allocation130_spill] sm:$0xff] }
 0x1fc   :  { %13113 = vst [vmem:[#allocation66_spill] sm:$0xff] %v9001_v56  ;;  %v4388_v39 = vsub.f32 %v8927_v14, %v13115_v28  ;;  %3839 = vmatprep.subr.mxu0 %v8945_v16  ;;  %v4371_v1 = vand.u32 4294901760, %v4370_v2  ;;  %v9012_v41 = vand.u32 4294901760, %v6381_v22  ;;  %v9016_v34 = vsub.f32 %v842_v48, %v8975_v20  ;;  %13119 = vst [vmem:[#allocation90_spill] sm:$0xff] %v9018_v47 }
 0x1fd   :  { %13116 = vst [vmem:[#allocation79_spill] sm:$0xff] %v9009_v63  ;;  %13120 = vst [vmem:[#allocation71_spill] sm:$0xff] %v9020_v37  ;;  %4360 = vmatprep.subr.mxu1 %v4359_v59  ;;  %3841 = vmatpush1.msra.mxu0 %v8956_v55  ;;  %v13121_v28 = vand.u32 4294901760, %v8951_v11  ;;  %v1441_v61 = vadd.f32 %v8941_v49, %v8986_v25  ;;  %v9031_v48 = vsub.f32 %v6380_v5, %v8992_v21  ;;  %v836_v59 = vld [vmem:[#allocation2 + $0x228] sm:$0xff]  ;;  %v834_v55 = vld [vmem:[#allocation2 + $0x218] sm:$0xff] }
 0x1fe   :  { %13117 = vst [vmem:[#allocation62_spill] sm:$0xff] %v9012_v41  ;;  %13118 = vst [vmem:[#allocation155_spill] sm:$0xff] %v9016_v34  ;;  %4366 = vmatpush1.msra.mxu1 %v4365_v35  ;;  %3329 = vmatprep.mubr.f32.mxu0 %v13122_v7  ;;  %v4377_v4 = vand.u32 4294901760, %v4376_v58  ;;  %v9033_v47 = vand.u32 4294901760, %v838_v50  ;;  %v4389_v2 = vand.u32 4294901760, %v4388_v39  ;;  %v9039_v49 = vsub.f32 %v840_v29, %v9001_v56  ;;  %v13126_v35 = vld [vmem:[#allocation131_spill] sm:$0xff] }
 0x1ff   :  { %v4394_v62 = vsub.f32 %v8951_v11, %v13121_v28  ;;  %13123 = vst [vmem:[#allocation156_spill] sm:$0xff] %v9031_v48  ;;  %3634 = vmatprep.mubr.f32.mxu1 %v13086_v9  ;;  %3843 = vmatprep.subr.mxu0 %v8975_v20  ;;  %v4383_v28 = vand.u32 4294901760, %v4382_v32  ;;  %v9043_v5 = vsub.f32 %v6381_v22, %v9012_v41  ;;  %v6382_v58 = vld [vmem:[#allocation2 + $0x230] sm:$0xff]  ;;  %v13129_v37 = vand.u32 4294901760, %v8973_v45  ;;  %v9051_v39 = vpop.f32.mrf.mxu0  ;;  %v2097_v29 = vpop.f32.mrf.mxu1 }
 0x200   :  { %13124 = vst [vmem:[#allocation85_spill] sm:$0xff] %v9033_v47  ;;  %13125 = vst [vmem:[#allocation64_spill] sm:$0xff] %v9039_v49  ;;  %4372 = vmatprep.subr.mxu1 %v4371_v1  ;;  %3331 = vmatmul.mubr.f32.gmra.mxu0 %v13126_v35  ;;  %v9045_v25 = vand.u32 4294901760, %v6382_v58  ;;  %v9055_v22 = vand.u32 4294901760, %v836_v59  ;;  %v13131_v20 = vand.u32 4294901760, %v8984_v13  ;;  %v9060_v63 = vadd.f32 %v2097_v29, %v1441_v61  ;;  %v13139_v29 = vld [vmem:[#allocation134_spill] sm:$0xff] }
 0x201   :  { %13127 = vst [vmem:[#allocation94_spill] sm:$0xff] %v9043_v5  ;;  %v4400_v9 = vsub.f32 %v8973_v45, %v13129_v37  ;;  %3636 = vmatmul.mubr.f32.gmra.mxu1 %v13092_v40  ;;  %3845 = vmatpush1.msra.mxu0 %v8992_v21  ;;  %v4395_v1 = vand.u32 4294901760, %v4394_v62  ;;  %v6383_v37 = vld [vmem:[#allocation2 + $0x220] sm:$0xff]  ;;  %v13134_v45 = vand.u32 4294901760, %v8990_v43  ;;  %v9070_v21 = vsub.f32 %v838_v50, %v9033_v47  ;;  %v9072_v11 = vpop.f32.mrf.mxu0  ;;  %v6384_v61 = vld [vmem:[#allocation2 + $0x210] sm:$0xff] }
 0x202   :  { %13128 = vst [vmem:[#allocation75_spill] sm:$0xff] %v9045_v25  ;;  %13130 = vst [vmem:[#allocation89_spill] sm:$0xff] %v9055_v22  ;;  %v4406_v16 = vsub.f32 %v8984_v13, %v13131_v20  ;;  %4378 = vmatpush1.msra.mxu1 %v4377_v4  ;;  %3847 = vmatprep.subr.mxu0 %v9001_v56  ;;  %v9063_v32 = vand.u32 4294901760, %v6383_v37  ;;  %v9074_v20 = vpop.f32.mrf.mxu1  ;;  %v9077_v4 = vand.u32 4294901760, %v834_v55  ;;  %v13141_v50 = vand.u32 4294901760, %v9016_v34  ;;  %v832_v56 = vld [vmem:[#allocation2 + $0x208] sm:$0xff] }
 0x203   :  { %13132 = vst [vmem:[#allocation67_spill] sm:$0xff] %v9060_v63  ;;  %v4412_v40 = vsub.f32 %v8990_v43, %v13134_v45  ;;  %13135 = vst [vmem:[#allocation98_spill] sm:$0xff] %v9070_v21  ;;  %4384 = vmatprep.subr.mxu1 %v4383_v28  ;;  %3849 = vmatpush1.msra.mxu0 %v9012_v41  ;;  %v9082_v45 = vsub.f32 %v6382_v58, %v9045_v25  ;;  %v4401_v62 = vand.u32 4294901760, %v4400_v9  ;;  %v13144_v58 = vld [vmem:[#allocation135_spill] sm:$0xff] }
 0x204   :  { %13133 = vst [vmem:[#allocation159_spill] sm:$0xff] %v9063_v32  ;;  %13136 = vst [vmem:[#allocation80_spill] sm:$0xff] %v9072_v11  ;;  %4390 = vmatpush1.msra.mxu1 %v4389_v2  ;;  %3337 = vmatprep.mubr.f32.mxu0 %v13139_v29  ;;  %v4418_v11 = vsub.f32 %v9016_v34, %v13141_v50  ;;  %v9090_v2 = vand.u32 4294901760, %v6384_v61  ;;  %v9093_v41 = vsub.f32 %v836_v59, %v9055_v22 }
 0x205   :  { %13137 = vst [vmem:[#allocation160_spill] sm:$0xff] %v9074_v20  ;;  %13138 = vst [vmem:[#allocation93_spill] sm:$0xff] %v9077_v4  ;;  %3642 = vmatprep.mubr.f32.mxu1 %v13103_v53  ;;  %3851 = vmatprep.subr.mxu0 %v9033_v47  ;;  %v4407_v20 = vand.u32 4294901760, %v4406_v16  ;;  %v9097_v9 = vsub.f32 %v6383_v37, %v9063_v32  ;;  %v4413_v50 = vand.u32 4294901760, %v4412_v40  ;;  %v13146_v28 = vand.u32 4294901760, %v9031_v48  ;;  %v9103_v16 = vpop.f32.mrf.mxu0  ;;  %v9105_v63 = vpop.f32.mrf.mxu1  ;;  %v874_v40 = vld [vmem:[#allocation2 + $0x358] sm:$0xff] }
 0x206   :  { %13140 = vst [vmem:[#allocation72_spill] sm:$0xff] %v9082_v45  ;;  %13142 = vst [vmem:[#allocation104_spill] sm:$0xff] %v9090_v2  ;;  %4396 = vmatprep.subr.mxu1 %v4395_v1  ;;  %3339 = vmatmul.mubr.f32.gmra.mxu0 %v13144_v58  ;;  %v9109_v59 = vand.u32 4294901760, %v832_v56  ;;  %v13148_v1 = vand.u32 4294901760, %v9039_v49  ;;  %v9115_v34 = vsub.f32 %v834_v55, %v9077_v4  ;;  %v6385_v47 = vld [vmem:[#allocation2 + $0x200] sm:$0xff] }
 0x207   :  { %13143 = vst [vmem:[#allocation83_spill] sm:$0xff] %v9093_v41  ;;  %13145 = vst [vmem:[#allocation95_spill] sm:$0xff] %v9097_v9  ;;  %v4424_v53 = vsub.f32 %v9031_v48, %v13146_v28  ;;  %3644 = vmatmul.mubr.f32.gmra.mxu1 %v13109_v30  ;;  %3853 = vmatpush1.msra.mxu0 %v9045_v25  ;;  %v4419_v28 = vand.u32 4294901760, %v4418_v11  ;;  %v9118_v48 = vand.u32 4294901760, %v6385_v47  ;;  %v13151_v30 = vand.u32 4294901760, %v9043_v5  ;;  %v9124_v13 = vpop.f32.mrf.mxu0 }
 0x208   :  { %13147 = vst [vmem:[#allocation76_spill] sm:$0xff] %v9109_v59  ;;  %v4430_v37 = vsub.f32 %v9039_v49, %v13148_v1  ;;  %13149 = vst [vmem:[#allocation163_spill] sm:$0xff] %v9115_v34  ;;  %4402 = vmatpush1.msra.mxu1 %v4401_v62  ;;  %3855 = vmatprep.subr.mxu0 %v9055_v22  ;;  %v9126_v1 = vpop.f32.mrf.mxu1  ;;  %v9130_v55 = vsub.f32 %v6384_v61, %v9090_v2  ;;  %v13155_v62 = vld [vmem:[#allocation138_spill] sm:$0xff]  ;;  %v9134_v49 = vand.u32 4294901760, %v874_v40 }
 0x209   :  { %13150 = vst [vmem:[#allocation112_spill] sm:$0xff] %v9118_v48  ;;  %v4436_v25 = vsub.f32 %v9043_v5, %v13151_v30  ;;  %13152 = vst [vmem:[#allocation87_spill] sm:$0xff] %v9124_v13  ;;  %4408 = vmatprep.subr.mxu1 %v4407_v20  ;;  %3857 = vmatpush1.msra.mxu0 %v9063_v32  ;;  %v4425_v22 = vand.u32 4294901760, %v4424_v53  ;;  %v13157_v30 = vand.u32 4294901760, %v9070_v21  ;;  %v872_v13 = vld [vmem:[#allocation2 + $0x348] sm:$0xff]  ;;  %v13159_v32 = vld [vmem:[#allocation38_spill] sm:$0xff] }
 0x20a   :  { %13153 = vst [vmem:[#allocation164_spill] sm:$0xff] %v9126_v1  ;;  %13154 = vst [vmem:[#allocation103_spill] sm:$0xff] %v9130_v55  ;;  %4414 = vmatpush1.msra.mxu1 %v4413_v50  ;;  %3345 = vmatprep.mubr.f32.mxu0 %v13155_v62  ;;  %v9140_v1 = vpop.f32.mrf.mxu0  ;;  %v4431_v61 = vand.u32 4294901760, %v4430_v37  ;;  %v9146_v53 = vsub.f32 %v832_v56, %v9109_v59  ;;  %v9148_v11 = vpop.f32.mrf.mxu1  ;;  %v870_v50 = vld [vmem:[#allocation2 + $0x338] sm:$0xff]  ;;  %v9163_v56 = vand.u32 4294901760, %v872_v13 }
 0x20b   :  { %13156 = vst [vmem:[#allocation81_spill] sm:$0xff] %v9134_v49  ;;  %v4442_v43 = vsub.f32 %v9070_v21, %v13157_v30  ;;  %3650 = vmatprep.mubr.f32.mxu1 %v13122_v7  ;;  %3859 = vmatprep.subr.mxu0 %v9077_v4  ;;  %v9152_v30 = vsub.f32 %v6385_v47, %v9118_v48  ;;  %v4437_v20 = vand.u32 4294901760, %v4436_v25  ;;  %v6386_v21 = vld [vmem:[#allocation2 + $0x350] sm:$0xff]  ;;  %v13162_v7 = vand.u32 4294901760, %v9082_v45 }
 0x20c   :  { %13158 = vst [vmem:[#allocation118_spill] sm:$0xff] %v9146_v53  ;;  %4420 = vmatprep.subr.mxu1 %v4419_v28  ;;  %3347 = vmatmul.mubr.f32.gmra.mxu0 %v13159_v32  ;;  %v9154_v5 = vand.u32 4294901760, %v6386_v21  ;;  %v9159_v4 = vpop.f32.mrf.mxu0  ;;  %13164 = vst [vmem:[#allocation167_spill] sm:$0xff] %v9163_v56  ;;  %v13165_v47 = vand.u32 4294901760, %v9093_v41  ;;  %v9169_v14 = vpop.f32.mrf.mxu1  ;;  %v9178_v38 = vsub.f32 %v874_v40, %v9134_v49  ;;  %v6388_v28 = vld [vmem:[#allocation2 + $0x330] sm:$0xff] }
 0x20d   :  { %13160 = vst [vmem:[#allocation91_spill] sm:$0xff] %v9152_v30  ;;  %v4448_v37 = vsub.f32 %v9082_v45, %v13162_v7  ;;  %13163 = vst [vmem:[#allocation84_spill] sm:$0xff] %v9159_v4  ;;  %3652 = vmatmul.mubr.f32.gmra.mxu1 %v13126_v35  ;;  %3861 = vmatpush1.msra.mxu0 %v9090_v2  ;;  %v4443_v7 = vand.u32 4294901760, %v4442_v43  ;;  %v6387_v45 = vld [vmem:[#allocation2 + $0x340] sm:$0xff]  ;;  %v13168_v35 = vand.u32 4294901760, %v9097_v9 }
 0x20e   :  { %13161 = vst [vmem:[#allocation111_spill] sm:$0xff] %v9154_v5  ;;  %v4454_v25 = vsub.f32 %v9093_v41, %v13165_v47  ;;  %13166 = vst [vmem:[#allocation168_spill] sm:$0xff] %v9169_v14  ;;  %4426 = vmatpush1.msra.mxu1 %v4425_v22  ;;  %3863 = vmatprep.subr.mxu0 %v9109_v59  ;;  %v9172_v4 = vand.u32 4294901760, %v6387_v45  ;;  %v9180_v57 = vpop.f32.mrf.mxu0  ;;  %v9183_v47 = vand.u32 4294901760, %v870_v50  ;;  %v13171_v22 = vand.u32 4294901760, %v9115_v34  ;;  %v9191_v14 = vpop.f32.mrf.mxu1  ;;  %v868_v59 = vld [vmem:[#allocation2 + $0x328] sm:$0xff] }
 0x20f   :  { %v4460_v2 = vsub.f32 %v9097_v9, %v13168_v35  ;;  %13169 = vst [vmem:[#allocation88_spill] sm:$0xff] %v9178_v38  ;;  %4432 = vmatprep.subr.mxu1 %v4431_v61  ;;  %3865 = vmatpush1.msra.mxu0 %v9118_v48  ;;  %v13172_v35 = vld [vmem:[#allocation140_spill] sm:$0xff]  ;;  %v9195_v40 = vsub.f32 %v6386_v21, %v9154_v5  ;;  %v4449_v61 = vand.u32 4294901760, %v4448_v37  ;;  %v13179_v48 = vld [vmem:[#allocation141_spill] sm:$0xff] }
 0x210   :  { %13167 = vst [vmem:[#allocation117_spill] sm:$0xff] %v9172_v4  ;;  %13170 = vst [vmem:[#allocation124_spill] sm:$0xff] %v9183_v47  ;;  %v9188_v43 = vsub.f32 %v9115_v34, %v13171_v22  ;;  %4438 = vmatpush1.msra.mxu1 %v4437_v20  ;;  %3353 = vmatprep.mubr.f32.mxu0 %v13172_v35  ;;  %v9198_v9 = vpop.f32.mrf.mxu0  ;;  %v4455_v22 = vand.u32 4294901760, %v4454_v25  ;;  %v9202_v34 = vand.u32 4294901760, %v6388_v28  ;;  %v13176_v20 = vand.u32 4294901760, %v9130_v55  ;;  %v9210_v37 = vpop.f32.mrf.mxu1  ;;  %v866_v25 = vld [vmem:[#allocation2 + $0x318] sm:$0xff] }
 0x211   :  { %13173 = vst [vmem:[#allocation101_spill] sm:$0xff] %v9195_v40  ;;  %13174 = vst [vmem:[#allocation121_spill] sm:$0xff] %v9198_v9  ;;  %3658 = vmatprep.mubr.f32.mxu1 %v13139_v29  ;;  %3887 = vmatprep.subr.mxu0 %v9134_v49  ;;  %v9208_v21 = vsub.f32 %v872_v13, %v9163_v56  ;;  %v9214_v29 = vsub.f32 %v6387_v45, %v9172_v4  ;;  %v4461_v9 = vand.u32 4294901760, %v4460_v2 }
 0x212   :  { %13175 = vst [vmem:[#allocation92_spill] sm:$0xff] %v9202_v34  ;;  %v4472_v41 = vsub.f32 %v9130_v55, %v13176_v20  ;;  %13178 = vst [vmem:[#allocation109_spill] sm:$0xff] %v9210_v37  ;;  %4444 = vmatprep.subr.mxu1 %v4443_v7  ;;  %3355 = vmatmul.mubr.f32.gmra.mxu0 %v13179_v48  ;;  %v9217_v3 = vpop.f32.mrf.mxu0  ;;  %v4467_v13 = vand.u32 4294901760, %v9188_v43  ;;  %v9222_v20 = vand.u32 4294901760, %v868_v59  ;;  %v13182_v7 = vand.u32 4294901760, %v9146_v53  ;;  %v9230_v2 = vpop.permute.xlu1 %971 }
 0x213   :  { %13177 = vst [vmem:[#allocation170_spill] sm:$0xff] %v9208_v21  ;;  %13180 = vst [vmem:[#allocation171_spill] sm:$0xff] %v9214_v29  ;;  %3660 = vmatmul.mubr.f32.gmra.mxu1 %v13144_v58  ;;  %3889 = vmatpush2.msra.mxu0 %v9154_v5  ;;  %v9228_v45 = vsub.f32 %v870_v50, %v9183_v47  ;;  %v9232_v49 = vpop.f32.mrf.mxu1  ;;  %v6389_v58 = vld [vmem:[#allocation2 + $0x320] sm:$0xff]  ;;  %v13186_v43 = vand.u32 4294901760, %v9152_v30  ;;  %v1457_v50 = vadd.f32 %v8997_v12, %v9230_v2 }
 0x214   :  { %13181 = vst [vmem:[#allocation97_spill] sm:$0xff] %v9222_v20  ;;  %v4478_v37 = vsub.f32 %v9146_v53, %v13182_v7  ;;  %13184 = vst [vmem:[#allocation116_spill] sm:$0xff] %v9230_v2  ;;  %4450 = vmatpush1.msra.mxu1 %v4449_v61  ;;  %3891 = vmatprep.subr.mxu0 %v9163_v56  ;;  %v9235_v5 = vand.u32 4294901760, %v6389_v58  ;;  %v864_v7 = vld [vmem:[#allocation2 + $0x308] sm:$0xff]  ;;  %v9243_v53 = vpop.f32.mrf.mxu0  ;;  %v9247_v61 = vsub.f32 %v6388_v28, %v9202_v34  ;;  %v13197_v28 = vld [vmem:[#allocation26_spill] sm:$0xff] }
 0x215   :  { %13183 = vst [vmem:[#allocation172_spill] sm:$0xff] %v9228_v45  ;;  %v4484_v55 = vsub.f32 %v9152_v30, %v13186_v43  ;;  %13187 = vst [vmem:[#allocation174_spill] sm:$0xff] %v9243_v53  ;;  %4456 = vmatprep.subr.mxu1 %v4455_v22  ;;  %3893 = vmatpush2.msra.mxu0 %v9172_v4  ;;  %v4473_v56 = vand.u32 4294901760, %v4472_v41  ;;  %v9249_v36 = vand.u32 4294901760, %v866_v25  ;;  %v9252_v43 = vpop.f32.mrf.mxu1  ;;  %v13192_v12 = vand.u32 4294901760, %v9178_v38  ;;  %v6390_v22 = vld [vmem:[#allocation2 + $0x310] sm:$0xff] }
 0x216   :  { %13185 = vst [vmem:[#allocation173_spill] sm:$0xff] %v9235_v5  ;;  %13188 = vst [vmem:[#allocation175_spill] sm:$0xff] %v9247_v61  ;;  %4462 = vmatpush1.msra.mxu1 %v4461_v9  ;;  %3361 = vmatprep.mubr.f32.mxu0 %v13191_v46  ;;  %v9258_v2 = vand.u32 4294901760, %v6390_v22  ;;  %v9262_v41 = vadd.f32 %v9105_v63, %v1457_v50  ;;  %v9264_v4 = vpop.f32.mrf.mxu0  ;;  %v4479_v9 = vand.u32 4294901760, %v4478_v37  ;;  %v9268_v42 = vand.u32 4294901760, %v864_v7 }
 0x217   :  { %13189 = vst [vmem:[#allocation176_spill] sm:$0xff] %v9249_v36  ;;  %13190 = vst [vmem:[#allocation96_spill] sm:$0xff] %v9252_v43  ;;  %v4510_v53 = vsub.f32 %v9178_v38, %v13192_v12  ;;  %3666 = vmatprep.mubr.f32.mxu1 %v13155_v62  ;;  %3895 = vmatprep.subr.mxu0 %v9183_v47  ;;  %v9272_v12 = vsub.f32 %v868_v59, %v9222_v20  ;;  %v9274_v38 = vpop.f32.mrf.mxu1  ;;  %v4485_v50 = vand.u32 4294901760, %v4484_v55  ;;  %v6391_v47 = vld [vmem:[#allocation2 + $0x300] sm:$0xff] }
 0x218   :  { %13193 = vst [vmem:[#allocation177_spill] sm:$0xff] %v9258_v2  ;;  %13194 = vst [vmem:[#allocation178_spill] sm:$0xff] %v9262_v41  ;;  %4468 = vmatprep.subr.mxu1 %v4467_v13  ;;  %3363 = vmatmul.mubr.f32.gmra.mxu0 %v13197_v28  ;;  %v9278_v63 = vsub.f32 %v6389_v58, %v9235_v5  ;;  %v13199_v62 = vand.u32 4294901760, %v9195_v40  ;;  %v9283_v30 = vand.u32 4294901760, %v6391_v47  ;;  %v9285_v43 = vpop.f32.mrf.mxu0  ;;  %v13202_v59 = vand.u32 4294901760, %v9208_v21 }
 0x219   :  { %13195 = vst [vmem:[#allocation179_spill] sm:$0xff] %v9268_v42  ;;  %13196 = vst [vmem:[#allocation3_spill] sm:$0xff] %v9272_v12  ;;  %3668 = vmatmul.mubr.f32.gmra.mxu1 %v13159_v32  ;;  %3897 = vmatpush2.msra.mxu0 %v9202_v34  ;;  %v9293_v58 = vsub.f32 %v866_v25, %v9249_v36  ;;  %v9295_v55 = vpop.f32.mrf.mxu1  ;;  %v13206_v32 = vand.u32 4294901760, %v9214_v29  ;;  %v9305_v41 = vpop.permute.xlu0 %976 }
 0x21a   :  { %13198 = vst [vmem:[#allocation99_spill] sm:$0xff] %v9278_v63  ;;  %v4516_v37 = vsub.f32 %v9195_v40, %v13199_v62  ;;  %13200 = vst [vmem:[#allocation100_spill] sm:$0xff] %v9283_v30  ;;  %v4522_v13 = vsub.f32 %v9208_v21, %v13202_v59  ;;  %4474 = vmatpush1.msra.mxu1 %v4473_v56  ;;  %3899 = vmatprep.subr.mxu0 %v9222_v20  ;;  %v4511_v62 = vand.u32 4294901760, %v4510_v53  ;;  %v9307_v59 = vpop.f32.mrf.mxu0 }
 0x21b   :  { %13201 = vst [vmem:[#allocation106_spill] sm:$0xff] %v9285_v43  ;;  %13203 = vst [vmem:[#allocation108_spill] sm:$0xff] %v9293_v58  ;;  %v9299_v40 = vsub.f32 %v6390_v22, %v9258_v2  ;;  %v4528_v43 = vsub.f32 %v9214_v29, %v13206_v32  ;;  %4480 = vmatprep.subr.mxu1 %v4479_v9  ;;  %3901 = vmatpush2.msra.mxu0 %v9235_v5  ;;  %v13208_v56 = vand.u32 4294901760, %v9228_v45  ;;  %v9319_v34 = vpop.f32.mrf.mxu1 }
 0x21c   :  { %13204 = vst [vmem:[#allocation115_spill] sm:$0xff] %v9295_v55  ;;  %13207 = vst [vmem:[#allocation122_spill] sm:$0xff] %v9305_v41  ;;  %v9315_v22 = vsub.f32 %v864_v7, %v9268_v42  ;;  %v1473_v32 = vadd.f32 %v9051_v39, %v9305_v41  ;;  %4486 = vmatpush1.msra.mxu1 %v4485_v50  ;;  %v13210_v55 = vld [vmem:[#allocation145_spill] sm:$0xff]  ;;  %v4517_v9 = vand.u32 4294901760, %v4516_v37  ;;  %3674 = vmatprep.mubr.f32.mxu1 %v13172_v35  ;;  %v13214_v37 = vld [vmem:[#allocation146_spill] sm:$0xff] }
 0x21d   :  { %13205 = vst [vmem:[#allocation120_spill] sm:$0xff] %v9299_v40  ;;  %v4534_v53 = vsub.f32 %v9228_v45, %v13208_v56  ;;  %3369 = vmatprep.mubr.f32.mxu0 %v13210_v55  ;;  %v9323_v5 = vsub.f32 %v6391_v47, %v9283_v30  ;;  %v9326_v56 = vpop.f32.mrf.mxu0  ;;  %3903 = vmatprep.subr.mxu0 %v9249_v36  ;;  %v4523_v7 = vand.u32 4294901760, %v4522_v13  ;;  %v9334_v50 = vpop.f32.mrf.mxu1  ;;  %v4529_v47 = vand.u32 4294901760, %v4528_v43 }
 0x21e   :  { %13209 = vst [vmem:[#allocation126_spill] sm:$0xff] %v9315_v22  ;;  %13212 = vst [vmem:[#allocation130_spill] sm:$0xff] %v9326_v56  ;;  %v9332_v25 = vadd.f32 %v9148_v11, %v1473_v32  ;;  %4512 = vmatprep.subr.mxu1 %v4511_v62  ;;  %3371 = vmatmul.mubr.f32.gmra.mxu0 %v13214_v37  ;;  %v13215_v20 = vand.u32 4294901760, %v9247_v61  ;;  %v13216_v13 = vand.u32 4294901760, %v9272_v12 }
 0x21f   :  { %13211 = vst [vmem:[#allocation127_spill] sm:$0xff] %v9323_v5  ;;  %13213 = vst [vmem:[#allocation131_spill] sm:$0xff] %v9334_v50  ;;  %v9341_v41 = vpop.f32.mrf.mxu0  ;;  %3676 = vmatmul.mubr.f32.gmra.mxu1 %v13179_v48  ;;  %3905 = vmatpush2.msra.mxu0 %v9258_v2  ;;  %v4535_v11 = vand.u32 4294901760, %v4534_v53  ;;  %v9349_v43 = vpop.f32.mrf.mxu1 }
 0x220   :  { %v4540_v56 = vsub.f32 %v9247_v61, %v13215_v20  ;;  %v4546_v62 = vsub.f32 %v9272_v12, %v13216_v13  ;;  %4518 = vmatpush2.msra.mxu1 %v4517_v9  ;;  %3907 = vmatprep.subr.mxu0 %v9268_v42  ;;  %v13217_v20 = vand.u32 4294901760, %v9278_v63  ;;  %v9356_v39 = vpop.permute.xlu1 %981  ;;  %v13220_v13 = vand.u32 4294901760, %v9293_v58 }
 0x221   :  { %13218 = vst [vmem:[#allocation134_spill] sm:$0xff] %v9356_v39  ;;  %v9358_v53 = vpop.f32.mrf.mxu0  ;;  %4524 = vmatprep.subr.mxu1 %v4523_v7  ;;  %3909 = vmatpush2.msra.mxu0 %v9283_v30  ;;  %v1489_v9 = vadd.f32 %v9103_v16, %v9356_v39  ;;  %v9366_v50 = vpop.f32.mrf.mxu1  ;;  %v13223_v42 = vand.u32 4294901760, %v9299_v40  ;;  %v13226_v39 = vand.u32 4294901760, %v9323_v5 }
 0x222   :  { %v4552_v35 = vsub.f32 %v9278_v63, %v13217_v20  ;;  %13219 = vst [vmem:[#allocation135_spill] sm:$0xff] %v9358_v53  ;;  %v4558_v32 = vsub.f32 %v9293_v58, %v13220_v13  ;;  %13221 = vst [vmem:[#allocation138_spill] sm:$0xff] %v9366_v50  ;;  %4530 = vmatpush2.msra.mxu1 %v4529_v47  ;;  %v13222_v20 = vld [vmem:[#allocation149_spill] sm:$0xff]  ;;  %v4541_v48 = vand.u32 4294901760, %v4540_v56  ;;  %3682 = vmatprep.mubr.f32.mxu1 %v13191_v46  ;;  %v13225_v56 = vld [vmem:[#allocation150_spill] sm:$0xff] }
 0x223   :  { %3377 = vmatprep.mubr.f32.mxu0 %v13222_v20  ;;  %v4564_v53 = vsub.f32 %v9299_v40, %v13223_v42  ;;  %v9372_v7 = vpop.f32.mrf.mxu0  ;;  %4536 = vmatprep.subr.mxu1 %v4535_v11  ;;  %v4547_v30 = vand.u32 4294901760, %v4546_v62  ;;  %v13224_v13 = vand.u32 4294901760, %v9315_v22  ;;  %v9379_v50 = vadd.f32 %v9191_v14, %v1489_v9  ;;  %v9381_v47 = vpop.f32.mrf.mxu1  ;;  %v13228_v62 = vld [vmem:[#allocation153_spill] sm:$0xff] }
 0x224   :  { %4774 = vmatprep.subr.mxu0 %v8624_v0  ;;  %3379 = vmatmul.mubr.f32.gmra.mxu0 %v13225_v56  ;;  %v4553_v42 = vand.u32 4294901760, %v4552_v35  ;;  %v4576_v46 = vsub.f32 %v9323_v5, %v13226_v39 }
 0x225   :  { %v4570_v16 = vsub.f32 %v9315_v22, %v13224_v13  ;;  %v9388_v11 = vpop.f32.mrf.mxu0  ;;  %3684 = vmatmul.mubr.f32.gmra.mxu1 %v13197_v28  ;;  %3385 = vmatprep.mubr.f32.mxu0 %v13228_v62  ;;  %v4559_v13 = vand.u32 4294901760, %v4558_v32  ;;  %v9392_v14 = vpop.f32.mrf.mxu1  ;;  %v4565_v9 = vand.u32 4294901760, %v4564_v53  ;;  %v13231_v28 = vld [vmem:[#allocation154_spill] sm:$0xff] }
 0x226   :  { %13227 = vst [vmem:[#allocation38_spill] sm:$0xff] %v9388_v11  ;;  %13229 = vst [vmem:[#allocation140_spill] sm:$0xff] %v9392_v14  ;;  %4542 = vmatpush2.msra.mxu1 %v4541_v48  ;;  %3690 = vmatprep.mubr.f32.mxu1 %v13210_v55  ;;  %v9395_v36 = vpop.permute.xlu0 %986  ;;  %v4577_v11 = vand.u32 4294901760, %v4576_v46  ;;  %v13234_v55 = vld [vmem:[#allocation157_spill] sm:$0xff] }
 0x227   :  { %v2380_v2 = vpop.f32.mrf.mxu0  ;;  %4548 = vmatprep.subr.mxu1 %v4547_v30  ;;  %v4571_v35 = vand.u32 4294901760, %v4570_v16  ;;  %13230 = vst [vmem:[#allocation141_spill] sm:$0xff] %v9395_v36  ;;  %v9397_v0 = vpop.f32.mrf.mxu1  ;;  %v1505_v32 = vadd.f32 %v9140_v1, %v9395_v36  ;;  %v13235_v16 = vld [vmem:[#allocation158_spill] sm:$0xff]  ;;  %v13239_v46 = vld [vmem:[#allocation161_spill] sm:$0xff] }
 0x228   :  { %v2381_v39 = vadd.f32 %v2380_v2, %v8555_v10  ;;  %4554 = vmatpush2.msra.mxu1 %v4553_v42  ;;  %3387 = vmatmul.mubr.f32.gmra.mxu0 %v13231_v28 }
 0x229   :  { %v9403_v48 = vpop.f32.mrf.mxu0  ;;  %4560 = vmatprep.subr.mxu1 %v4559_v13  ;;  %3692 = vmatmul.mubr.f32.gmra.mxu1 %v13214_v37  ;;  %v9406_v30 = vpop.f32.mrf.mxu1  ;;  %v9410_v53 = vadd.f32 %v9232_v49, %v1505_v32 }
 0x22a   :  { %13232 = vst [vmem:[#allocation144_spill] sm:$0xff] %v9403_v48  ;;  %13233 = vst [vmem:[#allocation26_spill] sm:$0xff] %v9406_v30  ;;  %4566 = vmatpush2.msra.mxu1 %v4565_v9  ;;  %3393 = vmatprep.mubr.f32.mxu0 %v13234_v55  ;;  %v13240_v9 = vld [vmem:[#allocation162_spill] sm:$0xff] }
 0x22b   :  { %v2390_v10 = vpop.f32.mrf.mxu0  ;;  %4572 = vmatprep.subr.mxu1 %v4571_v35  ;;  %3698 = vmatprep.mubr.f32.mxu1 %v13222_v20  ;;  %v9413_v2 = vpop.f32.mrf.mxu1 }
 0x22c   :  { %v2391_v1 = vadd.f32 %v2390_v10, %v8583_v17  ;;  %4578 = vmatpush2.msra.mxu1 %v4577_v11  ;;  %3395 = vmatmul.mubr.f32.gmra.mxu0 %v13235_v16  ;;  %v9421_v42 = vpop.permute.xlu1 %991  ;;  %v13242_v10 = vld [vmem:[#allocation165_spill] sm:$0xff] }
 0x22d   :  { %v9417_v37 = vpop.f32.mrf.mxu0  ;;  %5166 = vmatprep.subr.mxu1 %v8604_v19  ;;  %3700 = vmatmul.mubr.f32.gmra.mxu1 %v13225_v56  ;;  %13237 = vst [vmem:[#allocation146_spill] sm:$0xff] %v9421_v42  ;;  %v9423_v49 = vpop.f32.mrf.mxu1  ;;  %v1521_v17 = vadd.f32 %v9180_v57, %v9421_v42  ;;  %v13244_v57 = vld [vmem:[#allocation166_spill] sm:$0xff] }
 0x22e   :  { %13236 = vst [vmem:[#allocation145_spill] sm:$0xff] %v9417_v37  ;;  %13238 = vst [vmem:[#allocation149_spill] sm:$0xff] %v9423_v49  ;;  %3401 = vmatprep.mubr.f32.mxu0 %v13239_v46  ;;  %3706 = vmatprep.mubr.f32.mxu1 %v13228_v62 }
 0x22f   :  { %v2400_v20 = vpop.f32.mrf.mxu0  ;;  %v2751_v13 = vpop.f32.mrf.mxu1  ;;  %v9432_v35 = vadd.f32 %v9274_v38, %v1521_v17  ;;  %v13246_v38 = vld [vmem:[#allocation169_spill] sm:$0xff] }
 0x230   :  { %v2401_v11 = vadd.f32 %v2400_v20, %v8688_v23  ;;  %3403 = vmatmul.mubr.f32.gmra.mxu0 %v13240_v9  ;;  %v9434_v56 = vadd.f32 %v2751_v13, %v2381_v39 }
 0x231   :  { %v9436_v32 = vpop.f32.mrf.mxu0  ;;  %3708 = vmatmul.mubr.f32.gmra.mxu1 %v13231_v28  ;;  %3409 = vmatprep.mubr.f32.mxu0 %v13242_v10  ;;  %v9440_v62 = vpop.f32.mrf.mxu1 }
 0x232   :  { %13241 = vst [vmem:[#allocation150_spill] sm:$0xff] %v9436_v32  ;;  %13243 = vst [vmem:[#allocation153_spill] sm:$0xff] %v9440_v62  ;;  %3714 = vmatprep.mubr.f32.mxu1 %v13234_v55 }
 0x233   :  { %v9444_v23 = vpop.permute.xlu0 %996  ;;  %v2410_v20 = vpop.f32.mrf.mxu0 }
 0x234   :  { %3411 = vmatmul.mubr.f32.gmra.mxu0 %v13244_v57  ;;  %13245 = vst [vmem:[#allocation154_spill] sm:$0xff] %v9444_v23  ;;  %v1537_v39 = vadd.f32 %v9217_v3, %v9444_v23  ;;  %v2411_v28 = vadd.f32 %v2410_v20, %v8690_v44  ;;  %v2763_v17 = vpop.f32.mrf.mxu1 }
 0x235   :  { %3716 = vmatmul.mubr.f32.gmra.mxu1 %v13235_v16  ;;  %3417 = vmatprep.mubr.f32.mxu0 %v13246_v38  ;;  %v9452_v13 = vadd.f32 %v2763_v17, %v2391_v1  ;;  %v9454_v55 = vpop.f32.mrf.mxu0 }
 0x236   :  { %3722 = vmatprep.mubr.f32.mxu1 %v13239_v46  ;;  %13247 = vst [vmem:[#allocation157_spill] sm:$0xff] %v9454_v55  ;;  %v9457_v62 = vadd.f32 %v9319_v34, %v1537_v39  ;;  %v9459_v32 = vpop.f32.mrf.mxu1  ;;  %v674_v34 = vld [vmem:[%s11630_s1 + $0x18] sm:$0xff] }
 0x237   :  { %13248 = vst [vmem:[#allocation158_spill] sm:$0xff] %v9459_v32 }
 0x238   :  { %3419 = vmatmul.mubr.f32.gmra.mxu0 %v7993_v60 }
 0x239   :  { %3724 = vmatmul.mubr.f32.gmra.mxu1 %v13240_v9  ;;  %3425 = vmatprep.mubr.f32.mxu0 %v8005_v51  ;;  %v9465_v3 = vpop.permute.xlu1 %1001  ;;  %v2420_v44 = vpop.f32.mrf.mxu0 }
 0x23a   :  { %3730 = vmatprep.mubr.f32.mxu1 %v13242_v10  ;;  %13249 = vst [vmem:[#allocation161_spill] sm:$0xff] %v9465_v3  ;;  %v1553_v1 = vadd.f32 %v9264_v4, %v9465_v3  ;;  %v2421_v16 = vadd.f32 %v2420_v44, %v8706_v33  ;;  %v2775_v46 = vpop.f32.mrf.mxu1  ;;  %v1021_v33 = vsel %vm1019_vm9, %v674_v34, 0 }
 0x23b   :  { %v9474_v9 = vadd.f32 %v2775_v46, %v2401_v11  ;;  %v9476_v20 = vpop.f32.mrf.mxu0  ;;  %v673_v11 = vld [vmem:[%s11630_s1 + $0x10] sm:$0xff]  ;;  %v9497_v17 = vand.u32 4294901760, %v1021_v33 }
 0x23c   :  { %3427 = vmatmul.mubr.f32.gmra.mxu0 %v8020_v27  ;;  %13250 = vst [vmem:[#allocation162_spill] sm:$0xff] %v9476_v20  ;;  %v9481_v4 = vadd.f32 %v9349_v43, %v1553_v1  ;;  %v9483_v10 = vpop.f32.mrf.mxu1 }
 0x23d   :  { %3732 = vmatmul.mubr.f32.gmra.mxu1 %v13244_v57  ;;  %3433 = vmatprep.mubr.f32.mxu0 %v8037_v8  ;;  %13251 = vst [vmem:[#allocation165_spill] sm:$0xff] %v9483_v10  ;;  %13253 = vst [vmem:[#allocation169_spill] sm:$0xff] %v9497_v17  ;;  %v9511_v10 = vand.u32 4294901760, %v673_v11 }
 0x23e   :  { %3738 = vmatprep.mubr.f32.mxu1 %v13246_v38  ;;  %v678_v38 = vld [vmem:[%s11630_s1 + $0x38] sm:$0xff] }
 0x23f   :  { %v9488_v39 = vpop.permute.xlu0 %1006  ;;  %v2430_v57 = vpop.f32.mrf.mxu0  ;;  %13255 = vst [vmem:[#allocation183_spill] sm:$0xff] %v9511_v10 }
 0x240   :  { %3435 = vmatmul.mubr.f32.gmra.mxu0 %v8041_v24  ;;  %13252 = vst [vmem:[#allocation166_spill] sm:$0xff] %v9488_v39  ;;  %v1569_v43 = vadd.f32 %v9307_v59, %v9488_v39  ;;  %v2431_v44 = vadd.f32 %v2430_v57, %v8708_v54  ;;  %v2787_v1 = vpop.f32.mrf.mxu1  ;;  %v682_v59 = vld [vmem:[%s11630_s1 + $0x58] sm:$0xff]  ;;  %v677_v57 = vld [vmem:[%s11630_s1 + $0x30] sm:$0xff] }
 0x241   :  { %3740 = vmatmul.mubr.f32.gmra.mxu1 %v7993_v60  ;;  %3441 = vmatprep.mubr.f32.mxu0 %v8065_v18  ;;  %v9504_v34 = vadd.f32 %v2787_v1, %v2411_v28  ;;  %v9506_v46 = vpop.f32.mrf.mxu0  ;;  %v9527_v28 = vsub.f32 %v1021_v33, %v9497_v17  ;;  %v9546_v37 = vand.u32 4294901760, %v677_v57 }
 0x242   :  { %3746 = vmatprep.mubr.f32.mxu1 %v8005_v51  ;;  %13254 = vst [vmem:[#allocation182_spill] sm:$0xff] %v9506_v46  ;;  %v9509_v60 = vadd.f32 %v9381_v47, %v1569_v43  ;;  %v9516_v32 = vpop.f32.mrf.mxu1  ;;  %v1024_v51 = vsel %vm1019_vm9, %v678_v38, 0  ;;  %v1027_v43 = vsel %vm1019_vm9, %v682_v59, 0 }
 0x243   :  { %13256 = vst [vmem:[#allocation184_spill] sm:$0xff] %v9516_v32  ;;  %v9519_v54 = vpop.permute.xlu1 %1011  ;;  %v9540_v48 = vand.u32 4294901760, %v1024_v51  ;;  %13260 = vst [vmem:[#allocation188_spill] sm:$0xff] %v9546_v37  ;;  %v13282_v32 = vld [vmem:[#allocation110_spill] sm:$0xff] }
 0x244   :  { %3443 = vmatmul.mubr.f32.gmra.mxu0 %v8075_v26  ;;  %13257 = vst [vmem:[#allocation185_spill] sm:$0xff] %v9519_v54  ;;  %v1585_v47 = vadd.f32 %v9341_v41, %v9519_v54  ;;  %v13268_v54 = vld [vmem:[#allocation181_spill] sm:$0xff] }
 0x245   :  { %3748 = vmatmul.mubr.f32.gmra.mxu1 %v8020_v27  ;;  %3449 = vmatprep.mubr.f32.mxu0 %v8089_v52  ;;  %v2440_v1 = vpop.f32.mrf.mxu0  ;;  %v9538_v27 = vsub.f32 %v673_v11, %v9511_v10  ;;  %13258 = vst [vmem:[#allocation186_spill] sm:$0xff] %v9540_v48  ;;  %v9557_v11 = vand.u32 4294901760, %v1027_v43 }
 0x246   :  { %3754 = vmatprep.mubr.f32.mxu1 %v8037_v8  ;;  %v9535_v38 = vadd.f32 %v9397_v0, %v1585_v47  ;;  %v2441_v41 = vadd.f32 %v2440_v1, %v8725_v31  ;;  %v2799_v33 = vpop.f32.mrf.mxu1  ;;  %v681_v47 = vld [vmem:[%s11630_s1 + $0x50] sm:$0xff]  ;;  %v13265_v0 = vld [vmem:[#allocation180_spill] sm:$0xff] }
 0x247   :  { %v9544_v49 = vpop.permute.xlu0 %1016  ;;  %v9548_v8 = vadd.f32 %v2799_v33, %v2421_v16  ;;  %v9550_v59 = vpop.f32.mrf.mxu0  ;;  %13262 = vst [vmem:[#allocation190_spill] sm:$0xff] %v9557_v11  ;;  %v9570_v33 = vsub.f32 %v1024_v51, %v9540_v48  ;;  %v9579_v30 = vand.u32 4294901760, %v681_v47  ;;  %v13269_v16 = vand.u32 4294901760, %v9527_v28 }
 0x248   :  { %3451 = vmatmul.mubr.f32.gmra.mxu0 %v8108_v15  ;;  %13259 = vst [vmem:[#allocation187_spill] sm:$0xff] %v9544_v49  ;;  %13261 = vst [vmem:[#allocation189_spill] sm:$0xff] %v9550_v59  ;;  %v1601_v31 = vadd.f32 %v9372_v7, %v9544_v49  ;;  %v9562_v1 = vpop.f32.mrf.mxu1  ;;  %v9577_v49 = vsub.f32 %v677_v57, %v9546_v37  ;;  %v9587_v14 = vsub.f32 %v1027_v43, %v9557_v11  ;;  %v685_v43 = vld [vmem:[%s11630_s1 + $0x70] sm:$0xff] }
 0x249   :  { %3756 = vmatmul.mubr.f32.gmra.mxu1 %v8041_v24  ;;  %3457 = vmatprep.mubr.f32.mxu0 %v8115_v6  ;;  %13263 = vst [vmem:[#allocation191_spill] sm:$0xff] %v9562_v1  ;;  %v686_v24 = vld [vmem:[%s11630_s1 + $0x78] sm:$0xff]  ;;  %13264 = vst [vmem:[#allocation192_spill] sm:$0xff] %v9570_v33  ;;  %v3913_v51 = vsub.f32 %v9527_v28, %v13269_v16  ;;  %v13280_v59 = vand.u32 4294901760, %v9570_v33  ;;  %v13281_v1 = vld [vmem:[#allocation36_spill] sm:$0xff] }
 0x24a   :  { %3762 = vmatprep.mubr.f32.mxu1 %v8065_v18  ;;  %v9573_v7 = vadd.f32 %v9413_v2, %v1601_v31  ;;  %13266 = vst [vmem:[#allocation180_spill] sm:$0xff] %v9577_v49  ;;  %13267 = vst [vmem:[#allocation193_spill] sm:$0xff] %v9579_v30  ;;  %v1030_v2 = vsel %vm1019_vm9, %v686_v24, 0  ;;  %v13271_v31 = vld [vmem:[#allocation133_spill] sm:$0xff] }
 0x24b   :  { %v2450_v18 = vpop.f32.mrf.mxu0  ;;  %13270 = vst [vmem:[#allocation181_spill] sm:$0xff] %v9587_v14  ;;  %v3914_v16 = vand.u32 4294901760, %v3913_v51  ;;  %v13283_v51 = vand.u32 4294901760, %v9577_v49 }
 0x24c   :  { %3459 = vmatmul.mubr.f32.gmra.mxu0 %v13265_v0  ;;  %v2451_v39 = vadd.f32 %v2450_v18, %v13271_v31  ;;  %v2811_v57 = vpop.f32.mrf.mxu1  ;;  %v13275_v18 = vld [vmem:[#allocation102_spill] sm:$0xff]  ;;  %v9610_v31 = vand.u32 4294901760, %v1030_v2 }
 0x24d   :  { %3764 = vmatmul.mubr.f32.gmra.mxu1 %v8075_v26  ;;  %3465 = vmatprep.mubr.f32.mxu0 %v13268_v54  ;;  %v9592_v3 = vadd.f32 %v2811_v57, %v2431_v44  ;;  %v9594_v23 = vpop.f32.mrf.mxu0  ;;  %v13273_v26 = vand.u32 4294901760, %v9538_v27  ;;  %v9608_v44 = vsub.f32 %v681_v47, %v9579_v30  ;;  %v690_v57 = vld [vmem:[%s11630_s1 + $0x98] sm:$0xff] }
 0x24e   :  { %3770 = vmatprep.mubr.f32.mxu1 %v8089_v52  ;;  %13272 = vst [vmem:[#allocation133_spill] sm:$0xff] %v9594_v23  ;;  %v9603_v24 = vpop.f32.mrf.mxu1  ;;  %13277 = vst [vmem:[#allocation195_spill] sm:$0xff] %v9610_v31  ;;  %v9619_v23 = vand.u32 4294901760, %v685_v43  ;;  %v1033_v46 = vsel %vm1019_vm9, %v690_v57, 0 }
 0x24f   :  { %v3919_v42 = vsub.f32 %v9538_v27, %v13273_v26  ;;  %13274 = vst [vmem:[#allocation194_spill] sm:$0xff] %v9603_v24  ;;  %13276 = vst [vmem:[#allocation102_spill] sm:$0xff] %v9608_v44  ;;  %v13278_v26 = vld [vmem:[#allocation119_spill] sm:$0xff]  ;;  %v3929_v24 = vsub.f32 %v9570_v33, %v13280_v59  ;;  %v12210_v36 = vand.u32 4294901760, %v9608_v44  ;;  %v13285_v59 = vand.u32 4294901760, %v9587_v14 }
 0x250   :  { %3467 = vmatmul.mubr.f32.gmra.mxu0 %v13275_v18  ;;  %13279 = vst [vmem:[#allocation119_spill] sm:$0xff] %v9619_v23 }
 0x251   :  { %3772 = vmatmul.mubr.f32.gmra.mxu1 %v8108_v15  ;;  %3473 = vmatprep.mubr.f32.mxu0 %v13278_v26  ;;  %v2460_v52 = vpop.f32.mrf.mxu0  ;;  %v3920_v47 = vand.u32 4294901760, %v3919_v42  ;;  %v9634_v42 = vsub.f32 %v1030_v2, %v9610_v31  ;;  %v9653_v2 = vand.u32 4294901760, %v1033_v46 }
 0x252   :  { %3778 = vmatprep.mubr.f32.mxu1 %v8115_v6  ;;  %v9626_v20 = vadd.f32 %v2460_v52, %v13281_v1  ;;  %v2823_v15 = vpop.f32.mrf.mxu1  ;;  %v3935_v6 = vsub.f32 %v9577_v49, %v13283_v51  ;;  %v3945_v1 = vsub.f32 %v9587_v14, %v13285_v59  ;;  %v689_v52 = vld [vmem:[%s11630_s1 + $0x90] sm:$0xff]  ;;  %v3951_v59 = vsub.f32 %v9608_v44, %v12210_v36  ;;  %v13296_v44 = vld [vmem:[#allocation136_spill] sm:$0xff] }
 0x253   :  { %13284 = vst [vmem:[#allocation36_spill] sm:$0xff] %v9634_v42  ;;  %v9636_v55 = vadd.f32 %v2823_v15, %v2441_v41  ;;  %v9645_v57 = vpop.f32.mrf.mxu0  ;;  %v9651_v41 = vsub.f32 %v685_v43, %v9619_v23  ;;  %13289 = vst [vmem:[#allocation198_spill] sm:$0xff] %v9653_v2  ;;  %v13294_v36 = vld [vmem:[#allocation21_spill] sm:$0xff] }
 0x254   :  { %3475 = vmatmul.mubr.f32.gmra.mxu0 %v13282_v32  ;;  %13286 = vst [vmem:[#allocation110_spill] sm:$0xff] %v9645_v57  ;;  %v9647_v51 = vpop.f32.mrf.mxu1  ;;  %v3936_v15 = vand.u32 4294901760, %v3935_v6  ;;  %v3946_v43 = vand.u32 4294901760, %v3945_v1  ;;  %v9671_v6 = vsub.f32 %v1033_v46, %v9653_v2  ;;  %v693_v1 = vld [vmem:[%s11630_s1 + $0xb0] sm:$0xff]  ;;  %v13299_v46 = vand.u32 4294901760, %v9634_v42 }
 0x255   :  { %3780 = vmatmul.mubr.f32.gmra.mxu1 %v13265_v0  ;;  %3915 = vmatprep.mubr.f32.mxu0 %v3914_v16  ;;  %13287 = vst [vmem:[#allocation196_spill] sm:$0xff] %v9647_v51  ;;  %13288 = vst [vmem:[#allocation197_spill] sm:$0xff] %v9651_v41  ;;  %v694_v0 = vld [vmem:[%s11630_s1 + $0xb8] sm:$0xff]  ;;  %v3930_v16 = vand.u32 4294901760, %v3929_v24  ;;  %v9662_v51 = vand.u32 4294901760, %v689_v52  ;;  %v13292_v24 = vld [vmem:[#allocation40_spill] sm:$0xff] }
 0x256   :  { %3786 = vmatprep.mubr.f32.mxu1 %v13268_v54  ;;  %v13291_v54 = vld [vmem:[#allocation28_spill] sm:$0xff]  ;;  %v1036_v14 = vsel %vm1019_vm9, %v694_v0, 0  ;;  %13293 = vst [vmem:[#allocation200_spill] sm:$0xff] %v9671_v6 }
 0x257   :  { %13290 = vst [vmem:[#allocation199_spill] sm:$0xff] %v9662_v51 }
 0x258   :  { %3921 = vmatmul.mubr.f32.vlgmr.msra.gmra.mxu0 %v3920_v47  ;;  %v2470_v49 = vpop.f32.mrf.mxu0  ;;  %v2835_v33 = vpop.f32.mrf.mxu1  ;;  %v3952_v47 = vand.u32 4294901760, %v3951_v59  ;;  %v13305_v59 = vand.u32 4294901760, %v9651_v41 }
 0x259   :  { %3788 = vmatmul.mubr.f32.gmra.mxu1 %v13275_v18  ;;  %4777 = vmatpush1.msra.mxu0 %v13291_v54  ;;  %v9674_v57 = vadd.f32 %v2470_v49, %v13294_v36  ;;  %v9676_v18 = vadd.f32 %v2835_v33, %v2451_v39  ;;  %v3961_v36 = vsub.f32 %v9634_v42, %v13299_v46  ;;  %v9691_v39 = vand.u32 4294901760, %v1036_v14  ;;  %v698_v33 = vld [vmem:[%s11630_s1 + $0xd8] sm:$0xff]  ;;  %v13310_v46 = vld [vmem:[#allocation43_spill] sm:$0xff] }
 0x25a   :  { %4780 = vmatprep.subr.mxu0 %v13292_v24  ;;  %3794 = vmatprep.mubr.f32.mxu1 %v13278_v26  ;;  %v9682_v0 = vpop.f32.mrf.mxu0  ;;  %v13298_v26 = vld [vmem:[#allocation13_spill] sm:$0xff]  ;;  %v9689_v49 = vsub.f32 %v689_v52, %v9662_v51  ;;  %v3967_v52 = vsub.f32 %v9651_v41, %v13305_v59  ;;  %v9705_v42 = vand.u32 4294901760, %v693_v1 }
 0x25b   :  { %13295 = vst [vmem:[#allocation21_spill] sm:$0xff] %v9676_v18  ;;  %4783 = vmatpush1.msra.mxu0 %v13296_v44  ;;  %3931 = vmatprep.mubr.f32.mxu0 %v3930_v16  ;;  %13297 = vst [vmem:[#allocation201_spill] sm:$0xff] %v9682_v0  ;;  %v9696_v16 = vpop.f32.mrf.mxu1  ;;  %v13303_v0 = vld [vmem:[#allocation15_spill] sm:$0xff]  ;;  %v13308_v18 = vld [vmem:[#allocation57_spill] sm:$0xff] }
 0x25c   :  { %4786 = vmatprep.subr.mxu0 %v13298_v26  ;;  %3937 = vmatmul.mubr.f32.gmra.mxu0 %v3936_v15  ;;  %13300 = vst [vmem:[#allocation202_spill] sm:$0xff] %v9689_v49  ;;  %13301 = vst [vmem:[#allocation203_spill] sm:$0xff] %v9691_v39  ;;  %v13304_v15 = vld [vmem:[#allocation17_spill] sm:$0xff]  ;;  %v13307_v26 = vld [vmem:[#allocation20_spill] sm:$0xff] }
 0x25d   :  { %13302 = vst [vmem:[#allocation204_spill] sm:$0xff] %v9696_v16  ;;  %3796 = vmatmul.mubr.f32.gmra.mxu1 %v13282_v32  ;;  %4789 = vmatpush1.msra.mxu0 %v13303_v0  ;;  %13306 = vst [vmem:[#allocation205_spill] sm:$0xff] %v9705_v42  ;;  %v1039_v16 = vsel %vm1019_vm9, %v698_v33, 0  ;;  %v9713_v0 = vsub.f32 %v1036_v14, %v9691_v39  ;;  %v697_v59 = vld [vmem:[%s11630_s1 + $0xd0] sm:$0xff]  ;;  %v13313_v14 = vld [vmem:[#allocation12_spill] sm:$0xff] }
 0x25e   :  { %4792 = vmatprep.subr.mxu0 %v13304_v15  ;;  %3947 = vmatprep.mubr.f32.mxu0 %v3946_v43  ;;  %v2480_v32 = vpop.f32.mrf.mxu0  ;;  %v3962_v15 = vand.u32 4294901760, %v3961_v36  ;;  %v13311_v33 = vld [vmem:[#allocation33_spill] sm:$0xff]  ;;  %v13314_v43 = vld [vmem:[#allocation34_spill] sm:$0xff] }
 0x25f   :  { %4795 = vmatpush1.msra.mxu0 %v13307_v26  ;;  %4580 = vmatprep.mubr.f32.mxu1 %v9497_v17  ;;  %13309 = vst [vmem:[#allocation206_spill] sm:$0xff] %v9713_v0  ;;  %v9719_v41 = vadd.f32 %v2480_v32, %v13310_v46  ;;  %v2847_v17 = vpop.f32.mrf.mxu1  ;;  %v13315_v46 = vand.u32 4294901760, %v9671_v6 }
 0x260   :  { %4798 = vmatprep.subr.mxu0 %v13308_v18  ;;  %3953 = vmatmul.mubr.f32.gmra.mxu0 %v3952_v47  ;;  %v702_v47 = vld [vmem:[%s11630_s1 + $0xf8] sm:$0xff]  ;;  %v9727_v36 = vadd.f32 %v2847_v17, %v9626_v20  ;;  %v3968_v18 = vand.u32 4294901760, %v3967_v52  ;;  %v9739_v26 = vpop.f32.mrf.mxu0  ;;  %v13320_v20 = vld [vmem:[#allocation19_spill] sm:$0xff]  ;;  %v13323_v52 = vld [vmem:[#allocation29_spill] sm:$0xff] }
 0x261   :  { %4582 = vmatmul.mubr.f32.vlgmr.msra.gmra.mxu1 %v9511_v10  ;;  %4801 = vmatpush1.msra.mxu0 %v13311_v33  ;;  %v3977_v32 = vsub.f32 %v9671_v6, %v13315_v46  ;;  %v9735_v10 = vsub.f32 %v693_v1, %v9705_v42  ;;  %v9737_v33 = vand.u32 4294901760, %v1039_v16  ;;  %13318 = vst [vmem:[#allocation209_spill] sm:$0xff] %v9739_v26  ;;  %v9741_v44 = vpop.f32.mrf.mxu1  ;;  %v13321_v17 = vld [vmem:[#allocation63_spill] sm:$0xff]  ;;  %v13324_v46 = vand.u32 4294901760, %v9689_v49  ;;  %v13325_v26 = vld [vmem:[#allocation69_spill] sm:$0xff] }
 0x262   :  { %13312 = vst [vmem:[#allocation43_spill] sm:$0xff] %v9727_v36  ;;  %5168 = vmatpush1.msra.mxu1 %v13313_v14  ;;  %4804 = vmatprep.subr.mxu0 %v13314_v43  ;;  %13319 = vst [vmem:[#allocation210_spill] sm:$0xff] %v9741_v44  ;;  %v9745_v14 = vand.u32 4294901760, %v697_v59  ;;  %v1042_v43 = vsel %vm1019_vm9, %v702_v47, 0  ;;  %v13326_v44 = vld [vmem:[#allocation24_spill] sm:$0xff]  ;;  %v13328_v47 = vld [vmem:[#allocation147_spill] sm:$0xff] }
 0x263   :  { %13316 = vst [vmem:[#allocation207_spill] sm:$0xff] %v9735_v10  ;;  %13317 = vst [vmem:[#allocation208_spill] sm:$0xff] %v9737_v33  ;;  %5170 = vmatprep.subr.mxu1 %v13320_v20  ;;  %4807 = vmatpush1.msra.mxu0 %v13321_v17  ;;  %v3983_v1 = vsub.f32 %v9689_v49, %v13324_v46  ;;  %v3978_v17 = vand.u32 4294901760, %v3977_v32  ;;  %v701_v46 = vld [vmem:[%s11630_s1 + $0xf0] sm:$0xff]  ;;  %v13331_v32 = vld [vmem:[#allocation55_spill] sm:$0xff] }
 0x264   :  { %13322 = vst [vmem:[#allocation211_spill] sm:$0xff] %v9745_v14  ;;  %5172 = vmatpush1.msra.mxu1 %v13323_v52  ;;  %3963 = vmatprep.mubr.f32.mxu0 %v3962_v15  ;;  %v9758_v15 = vsub.f32 %v1039_v16, %v9737_v33 }
 0x265   :  { %4588 = vmatprep.mubr.f32.mxu1 %v9540_v48  ;;  %4810 = vmatprep.subr.mxu0 %v13325_v26  ;;  %v2490_v6 = vpop.f32.mrf.mxu0  ;;  %v2859_v49 = vpop.f32.mrf.mxu1  ;;  %v9766_v48 = vsub.f32 %v697_v59, %v9745_v14  ;;  %v13334_v26 = vld [vmem:[#allocation52_spill] sm:$0xff]  ;;  %v3984_v52 = vand.u32 4294901760, %v3983_v1  ;;  %v706_v59 = vld [vmem:[%s11630_s1 + $0x118] sm:$0xff]  ;;  %v13342_v1 = vand.u32 4294901760, %v9735_v10 }
 0x266   :  { %5174 = vmatprep.subr.mxu1 %v13326_v44  ;;  %3969 = vmatmul.mubr.f32.gmra.mxu0 %v3968_v18  ;;  %13327 = vst [vmem:[#allocation212_spill] sm:$0xff] %v9758_v15  ;;  %v9768_v18 = vand.u32 4294901760, %v1042_v43  ;;  %v9771_v20 = vadd.f32 %v2490_v6, %v13331_v32  ;;  %v9774_v16 = vadd.f32 %v2859_v49, %v9674_v57  ;;  %v13333_v44 = vld [vmem:[#allocation45_spill] sm:$0xff]  ;;  %v13337_v6 = vld [vmem:[#allocation48_spill] sm:$0xff]  ;;  %v13338_v32 = vld [vmem:[#allocation74_spill] sm:$0xff]  ;;  %v9788_v57 = vand.u32 4294901760, %v701_v46 }
 0x267   :  { %4590 = vmatmul.mubr.f32.gmra.mxu1 %v9546_v37  ;;  %4813 = vmatpush1.msra.mxu0 %v13328_v47  ;;  %13329 = vst [vmem:[#allocation213_spill] sm:$0xff] %v9766_v48  ;;  %v13335_v37 = vand.u32 4294901760, %v9713_v0  ;;  %v9784_v36 = vpop.f32.mrf.mxu0  ;;  %v9790_v49 = vpop.f32.mrf.mxu1 }
 0x268   :  { %13330 = vst [vmem:[#allocation214_spill] sm:$0xff] %v9768_v18  ;;  %13332 = vst [vmem:[#allocation55_spill] sm:$0xff] %v9774_v16  ;;  %5176 = vmatpush1.msra.mxu1 %v13333_v44  ;;  %4816 = vmatprep.subr.mxu0 %v13334_v26  ;;  %v13341_v26 = vld [vmem:[#allocation139_spill] sm:$0xff]  ;;  %v13345_v44 = vld [vmem:[#allocation50_spill] sm:$0xff] }
 0x269   :  { %v3993_v47 = vsub.f32 %v9713_v0, %v13335_v37  ;;  %13336 = vst [vmem:[#allocation215_spill] sm:$0xff] %v9784_v36  ;;  %5178 = vmatprep.subr.mxu1 %v13337_v6  ;;  %4819 = vmatpush1.msra.mxu0 %v13338_v32  ;;  %13339 = vst [vmem:[#allocation216_spill] sm:$0xff] %v9788_v57  ;;  %v3999_v37 = vsub.f32 %v9735_v10, %v13342_v1  ;;  %v13343_v36 = vld [vmem:[#allocation78_spill] sm:$0xff]  ;;  %v705_v6 = vld [vmem:[%s11630_s1 + $0x110] sm:$0xff] }
 0x26a   :  { %13340 = vst [vmem:[#allocation217_spill] sm:$0xff] %v9790_v49  ;;  %5180 = vmatpush1.msra.mxu1 %v13341_v26  ;;  %3979 = vmatprep.mubr.f32.mxu0 %v3978_v17  ;;  %v9801_v32 = vsub.f32 %v1042_v43, %v9768_v18  ;;  %v1045_v49 = vsel %vm1019_vm9, %v706_v59, 0  ;;  %v13346_v1 = vld [vmem:[#allocation82_spill] sm:$0xff]  ;;  %v9808_v0 = vsub.f32 %v701_v46, %v9788_v57  ;;  %v13348_v43 = vld [vmem:[#allocation79_spill] sm:$0xff]  ;;  %v9840_v24 = vand.u32 4294901760, %v705_v6 }
 0x26b   :  { %4596 = vmatprep.mubr.f32.mxu1 %v9557_v11  ;;  %4822 = vmatprep.subr.mxu0 %v13343_v36  ;;  %v3994_v17 = vand.u32 4294901760, %v3993_v47  ;;  %v2500_v26 = vpop.f32.mrf.mxu0  ;;  %v13349_v10 = vld [vmem:[#allocation142_spill] sm:$0xff]  ;;  %v4000_v47 = vand.u32 4294901760, %v3999_v37  ;;  %v13359_v16 = vld [vmem:[#allocation143_spill] sm:$0xff] }
 0x26c   :  { %13344 = vst [vmem:[#allocation218_spill] sm:$0xff] %v9801_v32  ;;  %5182 = vmatprep.subr.mxu1 %v13345_v44  ;;  %3985 = vmatmul.mubr.f32.gmra.mxu0 %v3984_v52  ;;  %13347 = vst [vmem:[#allocation219_spill] sm:$0xff] %v9808_v0  ;;  %v9814_v11 = vadd.f32 %v2500_v26, %v13348_v43  ;;  %v2871_v59 = vpop.f32.mrf.mxu1  ;;  %v13350_v52 = vld [vmem:[#allocation152_spill] sm:$0xff]  ;;  %v9821_v44 = vand.u32 4294901760, %v1045_v49  ;;  %v710_v46 = vld [vmem:[%s11630_s1 + $0x138] sm:$0xff] }
 0x26d   :  { %4598 = vmatmul.mubr.f32.gmra.mxu1 %v9579_v30  ;;  %4825 = vmatpush1.msra.mxu0 %v13346_v1  ;;  %v13351_v30 = vand.u32 4294901760, %v9758_v15  ;;  %v9827_v36 = vadd.f32 %v2871_v59, %v9719_v41  ;;  %v13354_v26 = vld [vmem:[#allocation56_spill] sm:$0xff]  ;;  %v13355_v43 = vld [vmem:[#allocation58_spill] sm:$0xff]  ;;  %13360 = vst [vmem:[#allocation223_spill] sm:$0xff] %v9840_v24  ;;  %v13361_v41 = vld [vmem:[#allocation155_spill] sm:$0xff]  ;;  %v13365_v59 = vand.u32 4294901760, %v9801_v32 }
 0x26e   :  { %5184 = vmatpush1.msra.mxu1 %v13349_v10  ;;  %4828 = vmatprep.subr.mxu0 %v13350_v52  ;;  %13352 = vst [vmem:[#allocation79_spill] sm:$0xff] %v9821_v44  ;;  %v13356_v52 = vand.u32 4294901760, %v9766_v48 }
 0x26f   :  { %v4009_v1 = vsub.f32 %v9758_v15, %v13351_v30  ;;  %13353 = vst [vmem:[#allocation220_spill] sm:$0xff] %v9827_v36  ;;  %5186 = vmatprep.subr.mxu1 %v13354_v26  ;;  %4831 = vmatpush1.msra.mxu0 %v13355_v43  ;;  %v9835_v30 = vpop.f32.mrf.mxu0  ;;  %v9837_v15 = vpop.f32.mrf.mxu1  ;;  %v1048_v43 = vsel %vm1019_vm9, %v710_v46, 0  ;;  %v4025_v46 = vsub.f32 %v9801_v32, %v13365_v59  ;;  %v13372_v32 = vld [vmem:[#allocation30_spill] sm:$0xff]  ;;  %v13377_v36 = vld [vmem:[#allocation65_spill] sm:$0xff] }
 0x270   :  { %v4015_v37 = vsub.f32 %v9766_v48, %v13356_v52  ;;  %13357 = vst [vmem:[#allocation221_spill] sm:$0xff] %v9835_v30  ;;  %13358 = vst [vmem:[#allocation222_spill] sm:$0xff] %v9837_v15  ;;  %5188 = vmatpush1.msra.mxu1 %v13359_v16  ;;  %3995 = vmatprep.mubr.f32.mxu0 %v3994_v17  ;;  %v13362_v52 = vld [vmem:[#allocation60_spill] sm:$0xff]  ;;  %v9848_v30 = vsub.f32 %v1045_v49, %v9821_v44  ;;  %v709_v17 = vld [vmem:[%s11630_s1 + $0x130] sm:$0xff] }
 0x271   :  { %4604 = vmatprep.mubr.f32.mxu1 %v9610_v31  ;;  %4834 = vmatprep.subr.mxu0 %v13361_v41  ;;  %v4010_v10 = vand.u32 4294901760, %v4009_v1  ;;  %v13364_v15 = vld [vmem:[#allocation156_spill] sm:$0xff]  ;;  %v9861_v49 = vsub.f32 %v705_v6, %v9840_v24  ;;  %v9863_v41 = vand.u32 4294901760, %v1048_v43  ;;  %v9879_v16 = vand.u32 4294901760, %v709_v17 }
 0x272   :  { %5190 = vmatprep.subr.mxu1 %v13362_v52  ;;  %4001 = vmatmul.mubr.f32.gmra.mxu0 %v4000_v47  ;;  %13363 = vst [vmem:[#allocation224_spill] sm:$0xff] %v9848_v30  ;;  %v4016_v31 = vand.u32 4294901760, %v4015_v37  ;;  %v2510_v48 = vpop.f32.mrf.mxu0  ;;  %v2883_v52 = vpop.f32.mrf.mxu1  ;;  %v13366_v47 = vld [vmem:[#allocation39_spill] sm:$0xff]  ;;  %v13367_v1 = vld [vmem:[#allocation64_spill] sm:$0xff] }
 0x273   :  { %4606 = vmatmul.mubr.f32.gmra.mxu1 %v9619_v23  ;;  %4837 = vmatpush1.msra.mxu0 %v13364_v15  ;;  %13368 = vst [vmem:[#allocation225_spill] sm:$0xff] %v9861_v49  ;;  %13369 = vst [vmem:[#allocation226_spill] sm:$0xff] %v9863_v41  ;;  %v714_v23 = vld [vmem:[%s11630_s1 + $0x158] sm:$0xff]  ;;  %v13370_v37 = vld [vmem:[#allocation67_spill] sm:$0xff]  ;;  %v9872_v59 = vadd.f32 %v2883_v52, %v9771_v20 }
 0x274   :  { %5192 = vmatpush1.msra.mxu1 %v13366_v47  ;;  %4840 = vmatprep.subr.mxu0 %v13367_v1  ;;  %v9869_v15 = vadd.f32 %v2510_v48, %v13370_v37  ;;  %v13373_v47 = vld [vmem:[#allocation94_spill] sm:$0xff]  ;;  %v13374_v1 = vand.u32 4294901760, %v9808_v0  ;;  %13375 = vst [vmem:[#allocation227_spill] sm:$0xff] %v9879_v16  ;;  %v9881_v26 = vpop.f32.mrf.mxu0  ;;  %v9885_v37 = vpop.f32.mrf.mxu1  ;;  %v1051_v52 = vsel %vm1019_vm9, %v714_v23, 0  ;;  %v9896_v48 = vsub.f32 %v1048_v43, %v9863_v41 }
 0x275   :  { %13371 = vst [vmem:[#allocation67_spill] sm:$0xff] %v9872_v59  ;;  %5194 = vmatprep.subr.mxu1 %v13372_v32  ;;  %4843 = vmatpush1.msra.mxu0 %v13373_v47  ;;  %13376 = vst [vmem:[#allocation228_spill] sm:$0xff] %v9881_v26  ;;  %v13379_v20 = vld [vmem:[#allocation98_spill] sm:$0xff]  ;;  %v4026_v26 = vand.u32 4294901760, %v4025_v46  ;;  %v9901_v23 = vsub.f32 %v709_v17, %v9879_v16  ;;  %v13385_v47 = vld [vmem:[#allocation83_spill] sm:$0xff] }
 0x276   :  { %v4031_v6 = vsub.f32 %v9808_v0, %v13374_v1  ;;  %5196 = vmatpush1.msra.mxu1 %v13377_v36  ;;  %4011 = vmatprep.mubr.f32.mxu0 %v4010_v10  ;;  %13378 = vst [vmem:[#allocation229_spill] sm:$0xff] %v9885_v37  ;;  %v713_v1 = vld [vmem:[%s11630_s1 + $0x150] sm:$0xff]  ;;  %v13380_v0 = vld [vmem:[#allocation46_spill] sm:$0xff]  ;;  %13381 = vst [vmem:[#allocation230_spill] sm:$0xff] %v9896_v48  ;;  %v9908_v10 = vand.u32 4294901760, %v1051_v52 }
 0x277   :  { %4612 = vmatprep.mubr.f32.mxu1 %v9653_v2  ;;  %4846 = vmatprep.subr.mxu0 %v13379_v20  ;;  %v13382_v37 = vld [vmem:[#allocation72_spill] sm:$0xff]  ;;  %13383 = vst [vmem:[#allocation231_spill] sm:$0xff] %v9901_v23  ;;  %v13384_v36 = vld [vmem:[#allocation70_spill] sm:$0xff]  ;;  %v9910_v43 = vand.u32 4294901760, %v713_v1 }
 0x278   :  { %5198 = vmatprep.subr.mxu1 %v13380_v0  ;;  %4017 = vmatmul.mubr.f32.gmra.mxu0 %v4016_v31  ;;  %v4032_v2 = vand.u32 4294901760, %v4031_v6  ;;  %v2520_v20 = vpop.f32.mrf.mxu0  ;;  %v13386_v31 = vand.u32 4294901760, %v9848_v30  ;;  %13387 = vst [vmem:[#allocation232_spill] sm:$0xff] %v9908_v10  ;;  %v718_v6 = vld [vmem:[%s11630_s1 + $0x178] sm:$0xff]  ;;  %v13390_v0 = vld [vmem:[#allocation53_spill] sm:$0xff]  ;;  %v9941_v59 = vsub.f32 %v1051_v52, %v9908_v10 }
 0x279   :  { %4614 = vmatmul.mubr.f32.gmra.mxu1 %v9662_v51  ;;  %4849 = vmatpush1.msra.mxu0 %v13382_v37  ;;  %13388 = vst [vmem:[#allocation233_spill] sm:$0xff] %v9910_v43  ;;  %v13389_v51 = vld [vmem:[#allocation178_spill] sm:$0xff]  ;;  %v2895_v37 = vpop.f32.mrf.mxu1 }
 0x27a   :  { %5200 = vmatpush1.msra.mxu1 %v13384_v36  ;;  %4852 = vmatprep.subr.mxu0 %v13385_v47  ;;  %v4041_v46 = vsub.f32 %v9848_v30, %v13386_v31  ;;  %v9916_v17 = vadd.f32 %v2520_v20, %v13389_v51  ;;  %v13391_v36 = vld [vmem:[#allocation95_spill] sm:$0xff]  ;;  %v9921_v47 = vadd.f32 %v2895_v37, %v9814_v11  ;;  %v13392_v31 = vld [vmem:[#allocation73_spill] sm:$0xff]  ;;  %v13393_v30 = vand.u32 4294901760, %v9861_v49  ;;  %v9928_v54 = vpop.f32.mrf.mxu0  ;;  %v13401_v11 = vld [vmem:[#allocation86_spill] sm:$0xff] }
 0x27b   :  { %5202 = vmatprep.subr.mxu1 %v13390_v0  ;;  %4855 = vmatpush1.msra.mxu0 %v13391_v36  ;;  %13394 = vst [vmem:[#allocation178_spill] sm:$0xff] %v9928_v54  ;;  %v9930_v51 = vpop.f32.mrf.mxu1  ;;  %v13396_v20 = vld [vmem:[#allocation163_spill] sm:$0xff]  ;;  %v1054_v37 = vsel %vm1019_vm9, %v718_v6, 0  ;;  %13398 = vst [vmem:[#allocation234_spill] sm:$0xff] %v9941_v59  ;;  %v9944_v54 = vsub.f32 %v713_v1, %v9910_v43  ;;  %v717_v6 = vld [vmem:[%s11630_s1 + $0x170] sm:$0xff]  ;;  %v13407_v36 = vand.u32 4294901760, %v9901_v23 }
 0x27c   :  { %5204 = vmatpush1.msra.mxu1 %v13392_v31  ;;  %4027 = vmatprep.mubr.f32.mxu0 %v4026_v26  ;;  %v4047_v32 = vsub.f32 %v9861_v49, %v13393_v30  ;;  %13395 = vst [vmem:[#allocation53_spill] sm:$0xff] %v9930_v51  ;;  %v722_v26 = vld [vmem:[%s11630_s1 + $0x198] sm:$0xff]  ;;  %v13397_v31 = vld [vmem:[#allocation61_spill] sm:$0xff]  ;;  %v4042_v30 = vand.u32 4294901760, %v4041_v46  ;;  %v13400_v51 = vld [vmem:[#allocation103_spill] sm:$0xff]  ;;  %v13403_v46 = vand.u32 4294901760, %v9896_v48 }
 0x27d   :  { %4620 = vmatprep.mubr.f32.mxu1 %v9691_v39  ;;  %4858 = vmatprep.subr.mxu0 %v13396_v20  ;;  %13399 = vst [vmem:[#allocation235_spill] sm:$0xff] %v9944_v54  ;;  %v13402_v39 = vld [vmem:[#allocation118_spill] sm:$0xff]  ;;  %v9956_v49 = vand.u32 4294901760, %v1054_v37  ;;  %v1057_v1 = vsel %vm1019_vm9, %v722_v26, 0  ;;  %v13406_v20 = vld [vmem:[#allocation91_spill] sm:$0xff] }
 0x27e   :  { %5206 = vmatprep.subr.mxu1 %v13397_v31  ;;  %4033 = vmatmul.mubr.f32.gmra.mxu0 %v4032_v2  ;;  %v4048_v2 = vand.u32 4294901760, %v4047_v32  ;;  %v4057_v52 = vsub.f32 %v9896_v48, %v13403_v46  ;;  %v13409_v46 = vld [vmem:[#allocation62_spill] sm:$0xff] }
 0x27f   :  { %4622 = vmatmul.mubr.f32.gmra.mxu1 %v9705_v42  ;;  %4861 = vmatpush1.msra.mxu0 %v13400_v51  ;;  %13404 = vst [vmem:[#allocation236_spill] sm:$0xff] %v9956_v49  ;;  %v2530_v42 = vpop.f32.mrf.mxu0  ;;  %v2907_v31 = vpop.f32.mrf.mxu1  ;;  %v13405_v51 = vld [vmem:[#allocation66_spill] sm:$0xff]  ;;  %v9991_v26 = vsub.f32 %v1054_v37, %v9956_v49 }
 0x280   :  { %5208 = vmatpush1.msra.mxu1 %v13401_v11  ;;  %4864 = vmatprep.subr.mxu0 %v13402_v39  ;;  %v4063_v11 = vsub.f32 %v9901_v23, %v13407_v36  ;;  %v9965_v32 = vadd.f32 %v2530_v42, %v9332_v25  ;;  %v9968_v39 = vadd.f32 %v2907_v31, %v9869_v15  ;;  %v13413_v42 = vld [vmem:[#allocation88_spill] sm:$0xff]  ;;  %v9984_v15 = vand.u32 4294901760, %v1057_v1  ;;  %v721_v31 = vld [vmem:[%s11630_s1 + $0x190] sm:$0xff]  ;;  %v13418_v23 = vld [vmem:[#allocation75_spill] sm:$0xff] }
 0x281   :  { %5210 = vmatprep.subr.mxu1 %v13405_v51  ;;  %4867 = vmatpush1.msra.mxu0 %v13406_v20  ;;  %v9973_v51 = vand.u32 4294901760, %v717_v6  ;;  %v726_v20 = vld [vmem:[%s11630_s1 + $0x1b8] sm:$0xff]  ;;  %v9978_v36 = vpop.f32.mrf.mxu0  ;;  %v9980_v25 = vpop.f32.mrf.mxu1  ;;  %v4058_v48 = vand.u32 4294901760, %v4057_v52  ;;  %13416 = vst [vmem:[#allocation242_spill] sm:$0xff] %v9991_v26 }
 0x282   :  { %13408 = vst [vmem:[#allocation237_spill] sm:$0xff] %v9968_v39  ;;  %5212 = vmatpush1.msra.mxu1 %v13409_v46  ;;  %4043 = vmatprep.mubr.f32.mxu0 %v4042_v30  ;;  %13411 = vst [vmem:[#allocation239_spill] sm:$0xff] %v9978_v36  ;;  %v13415_v30 = vld [vmem:[#allocation85_spill] sm:$0xff] }
 0x283   :  { %13410 = vst [vmem:[#allocation238_spill] sm:$0xff] %v9973_v51  ;;  %13412 = vst [vmem:[#allocation240_spill] sm:$0xff] %v9980_v25  ;;  %4628 = vmatprep.mubr.f32.mxu1 %v9737_v33  ;;  %4890 = vmatprep.subr.mxu0 %v13413_v42  ;;  %v13417_v36 = vld [vmem:[#allocation101_spill] sm:$0xff]  ;;  %v4064_v25 = vand.u32 4294901760, %v4063_v11  ;;  %v1060_v33 = vsel %vm1019_vm9, %v726_v20, 0  ;;  %v13419_v42 = vand.u32 4294901760, %v9941_v59  ;;  %v10007_v52 = vsub.f32 %v717_v6, %v9973_v51 }
 0x284   :  { %13414 = vst [vmem:[#allocation241_spill] sm:$0xff] %v9984_v15  ;;  %5214 = vmatprep.subr.mxu1 %v13415_v30  ;;  %4049 = vmatmul.mubr.f32.gmra.mxu0 %v4048_v2  ;;  %v13420_v2 = vand.u32 4294901760, %v9944_v54  ;;  %v725_v20 = vld [vmem:[%s11630_s1 + $0x1b0] sm:$0xff]  ;;  %v730_v11 = vld [vmem:[%s11630_s1 + $0x1d8] sm:$0xff] }
 0x285   :  { %4630 = vmatmul.mubr.f32.gmra.mxu1 %v9745_v14  ;;  %4893 = vmatpush2.msra.mxu0 %v13417_v36  ;;  %v4073_v30 = vsub.f32 %v9941_v59, %v13419_v42  ;;  %13421 = vst [vmem:[#allocation243_spill] sm:$0xff] %v10007_v52  ;;  %v10009_v14 = vand.u32 4294901760, %v721_v31  ;;  %v2919_v42 = vpop.f32.mrf.mxu1  ;;  %v13423_v59 = vld [vmem:[#allocation89_spill] sm:$0xff]  ;;  %v734_v6 = vld [vmem:[%s11630_s1 + $0x1f8] sm:$0xff]  ;;  %v13425_v36 = vld [vmem:[#allocation159_spill] sm:$0xff]  ;;  %v10039_v39 = vand.u32 4294901760, %v725_v20 }
 0x286   :  { %5216 = vmatpush1.msra.mxu1 %v13418_v23  ;;  %4896 = vmatprep.subr.mxu0 %v9208_v21  ;;  %v10004_v37 = vsub.f32 %v9944_v54, %v13420_v2  ;;  %v2540_v21 = vpop.f32.mrf.mxu0  ;;  %v10020_v2 = vsub.f32 %v1057_v1, %v9984_v15  ;;  %v10027_v23 = vadd.f32 %v2919_v42, %v9916_v17  ;;  %v729_v46 = vld [vmem:[%s11630_s1 + $0x1d0] sm:$0xff] }
 0x287   :  { %13422 = vst [vmem:[#allocation244_spill] sm:$0xff] %v10009_v14  ;;  %5218 = vmatprep.subr.mxu1 %v13423_v59  ;;  %4899 = vmatpush2.msra.mxu0 %v9214_v29  ;;  %v2541_v54 = vadd.f32 %v2540_v21, %v9379_v50  ;;  %v10031_v59 = vand.u32 4294901760, %v1060_v33  ;;  %v10035_v1 = vpop.f32.mrf.mxu1  ;;  %13429 = vst [vmem:[#allocation248_spill] sm:$0xff] %v10039_v39  ;;  %v1063_v21 = vsel %vm1019_vm9, %v730_v11, 0  ;;  %v13430_v50 = vld [vmem:[#allocation93_spill] sm:$0xff] }
 0x288   :  { %13424 = vst [vmem:[#allocation245_spill] sm:$0xff] %v10020_v2  ;;  %5220 = vmatpush1.msra.mxu1 %v13425_v36  ;;  %4059 = vmatprep.mubr.f32.mxu0 %v4058_v48  ;;  %v10033_v29 = vpop.f32.mrf.mxu0  ;;  %13428 = vst [vmem:[#allocation247_spill] sm:$0xff] %v10035_v1  ;;  %v4074_v48 = vand.u32 4294901760, %v4073_v30  ;;  %v10045_v42 = vsub.f32 %v721_v31, %v10009_v14  ;;  %v4080_v11 = vand.u32 4294901760, %v10004_v37  ;;  %v13432_v31 = vld [vmem:[#allocation104_spill] sm:$0xff]  ;;  %v738_v37 = vld [vmem:[%s11630_s1 + $0x218] sm:$0xff] }
 0x289   :  { %13426 = vst [vmem:[#allocation159_spill] sm:$0xff] %v10031_v59  ;;  %13427 = vst [vmem:[#allocation246_spill] sm:$0xff] %v10033_v29  ;;  %4636 = vmatprep.mubr.f32.mxu1 %v9768_v18  ;;  %4902 = vmatprep.subr.mxu0 %v9228_v45  ;;  %v1066_v29 = vsel %vm1019_vm9, %v734_v6, 0  ;;  %v13433_v18 = vand.u32 4294901760, %v9991_v26 }
 0x28a   :  { %5222 = vmatprep.subr.mxu1 %v13430_v50  ;;  %4065 = vmatmul.mubr.f32.gmra.mxu0 %v4064_v25  ;;  %13431 = vst [vmem:[#allocation249_spill] sm:$0xff] %v10045_v42  ;;  %v2550_v1 = vpop.f32.mrf.mxu0  ;;  %v2931_v17 = vpop.f32.mrf.mxu1  ;;  %v10062_v50 = vsub.f32 %v1060_v33, %v10031_v59  ;;  %v13437_v25 = vld [vmem:[#allocation76_spill] sm:$0xff]  ;;  %v10079_v33 = vand.u32 4294901760, %v729_v46 }
 0x28b   :  { %4638 = vmatmul.mubr.f32.gmra.mxu1 %v9788_v57  ;;  %4905 = vmatpush2.msra.mxu0 %v9247_v61  ;;  %v2551_v30 = vadd.f32 %v2550_v1, %v9410_v53  ;;  %v4089_v6 = vsub.f32 %v9991_v26, %v13433_v18  ;;  %v10064_v57 = vand.u32 4294901760, %v1063_v21  ;;  %v10070_v53 = vadd.f32 %v2931_v17, %v9965_v32  ;;  %v13455_v61 = vld [vmem:[#allocation167_spill] sm:$0xff] }
 0x28c   :  { %5224 = vmatpush1.msra.mxu1 %v13432_v31  ;;  %4908 = vmatprep.subr.mxu0 %v9272_v12  ;;  %13434 = vst [vmem:[#allocation250_spill] sm:$0xff] %v10062_v50  ;;  %v10072_v1 = vpop.f32.mrf.mxu0  ;;  %v10077_v18 = vsub.f32 %v725_v20, %v10039_v39  ;;  %13439 = vst [vmem:[#allocation254_spill] sm:$0xff] %v10079_v33  ;;  %v10081_v26 = vand.u32 4294901760, %v1066_v29  ;;  %v10083_v12 = vpop.f32.mrf.mxu1  ;;  %v13442_v31 = vld [vmem:[#allocation112_spill] sm:$0xff]  ;;  %v13443_v32 = vand.u32 4294901760, %v10007_v52  ;;  %v733_v20 = vld [vmem:[%s11630_s1 + $0x1f0] sm:$0xff] }
 0x28d   :  { %13435 = vst [vmem:[#allocation251_spill] sm:$0xff] %v10064_v57  ;;  %13436 = vst [vmem:[#allocation252_spill] sm:$0xff] %v10072_v1  ;;  %5226 = vmatprep.subr.mxu1 %v13437_v25  ;;  %4911 = vmatpush2.msra.mxu0 %v9278_v63  ;;  %v4090_v1 = vand.u32 4294901760, %v4089_v6  ;;  %v10103_v45 = vsub.f32 %v1063_v21, %v10064_v57  ;;  %v13452_v6 = vld [vmem:[#allocation111_spill] sm:$0xff] }
 0x28e   :  { %13438 = vst [vmem:[#allocation253_spill] sm:$0xff] %v10077_v18  ;;  %13440 = vst [vmem:[#allocation255_spill] sm:$0xff] %v10081_v26  ;;  %5228 = vmatpush1.msra.mxu1 %v13442_v31  ;;  %4075 = vmatprep.mubr.f32.mxu0 %v4074_v48  ;;  %v4095_v17 = vsub.f32 %v10007_v52, %v13443_v32  ;;  %v2560_v63 = vpop.f32.mrf.mxu0  ;;  %v1069_v48 = vsel %vm1019_vm9, %v738_v37, 0  ;;  %v2943_v32 = vpop.f32.mrf.mxu1  ;;  %v13445_v52 = vld [vmem:[#allocation81_spill] sm:$0xff] }
 0x28f   :  { %13441 = vst [vmem:[#allocation256_spill] sm:$0xff] %v10083_v12  ;;  %4644 = vmatprep.mubr.f32.mxu1 %v9821_v44  ;;  %4914 = vmatprep.subr.mxu0 %v9293_v58  ;;  %v13444_v12 = vand.u32 4294901760, %v10020_v2  ;;  %v2561_v25 = vadd.f32 %v2560_v63, %v9432_v35  ;;  %13446 = vst [vmem:[#allocation81_spill] sm:$0xff] %v10103_v45  ;;  %v10105_v44 = vadd.f32 %v2943_v32, %v2541_v54  ;;  %v742_v54 = vld [vmem:[%s11630_s1 + $0x238] sm:$0xff] }
 0x290   :  { %5250 = vmatprep.subr.mxu1 %v13445_v52  ;;  %4081 = vmatmul.mubr.f32.gmra.mxu0 %v4080_v11  ;;  %v10107_v58 = vpop.f32.mrf.mxu0  ;;  %v10113_v63 = vsub.f32 %v729_v46, %v10079_v33  ;;  %v10116_v35 = vsub.f32 %v1066_v29, %v10081_v26  ;;  %v10118_v11 = vand.u32 4294901760, %v733_v20  ;;  %v10123_v21 = vpop.f32.mrf.mxu1  ;;  %v4096_v37 = vand.u32 4294901760, %v4095_v17  ;;  %v13456_v17 = vld [vmem:[#allocation117_spill] sm:$0xff] }
 0x291   :  { %v4105_v31 = vsub.f32 %v10020_v2, %v13444_v12  ;;  %13447 = vst [vmem:[#allocation257_spill] sm:$0xff] %v10107_v58  ;;  %4646 = vmatmul.mubr.f32.gmra.mxu1 %v9840_v24  ;;  %4917 = vmatpush2.msra.mxu0 %v9299_v40  ;;  %13451 = vst [vmem:[#allocation261_spill] sm:$0xff] %v10123_v21  ;;  %v13453_v32 = vand.u32 4294901760, %v10045_v42  ;;  %v10130_v12 = vand.u32 4294901760, %v1069_v48  ;;  %v737_v21 = vld [vmem:[%s11630_s1 + $0x210] sm:$0xff] }
 0x292   :  { %13448 = vst [vmem:[#allocation258_spill] sm:$0xff] %v10113_v63  ;;  %13449 = vst [vmem:[#allocation259_spill] sm:$0xff] %v10116_v35  ;;  %5252 = vmatpush2.msra.mxu1 %v13452_v6  ;;  %4920 = vmatprep.subr.mxu0 %v9315_v22  ;;  %v2570_v29 = vpop.f32.mrf.mxu0  ;;  %v2955_v2 = vpop.f32.mrf.mxu1  ;;  %v13459_v6 = vld [vmem:[#allocation124_spill] sm:$0xff]  ;;  %v10156_v22 = vsub.f32 %v733_v20, %v10118_v11 }
 0x293   :  { %13450 = vst [vmem:[#allocation260_spill] sm:$0xff] %v10118_v11  ;;  %v4111_v46 = vsub.f32 %v10045_v42, %v13453_v32  ;;  %13454 = vst [vmem:[#allocation262_spill] sm:$0xff] %v10130_v12  ;;  %5254 = vmatprep.subr.mxu1 %v13455_v61  ;;  %4923 = vmatpush2.msra.mxu0 %v9323_v5  ;;  %v4106_v58 = vand.u32 4294901760, %v4105_v31  ;;  %v2571_v24 = vadd.f32 %v2570_v29, %v9457_v62 }
 0x294   :  { %5256 = vmatpush2.msra.mxu1 %v13456_v17  ;;  %4091 = vmatprep.mubr.f32.mxu0 %v4090_v1  ;;  %v13457_v32 = vand.u32 4294901760, %v10062_v50  ;;  %v1072_v61 = vsel %vm1019_vm9, %v742_v54, 0  ;;  %v10144_v5 = vadd.f32 %v2955_v2, %v2551_v30  ;;  %v10146_v31 = vpop.f32.mrf.mxu0  ;;  %v13460_v62 = vand.u32 4294901760, %v10077_v18  ;;  %13461 = vst [vmem:[#allocation264_spill] sm:$0xff] %v10156_v22  ;;  %v746_v2 = vld [vmem:[%s11630_s1 + $0x258] sm:$0xff]  ;;  %v10161_v30 = vpop.f32.mrf.mxu1  ;;  %v13463_v54 = vld [vmem:[#allocation9_spill] sm:$0xff] }
 0x295   :  { %13458 = vst [vmem:[#allocation263_spill] sm:$0xff] %v10146_v31  ;;  %4652 = vmatprep.mubr.f32.mxu1 %v9863_v41  ;;  %5258 = vmatprep.subr.mxu1 %v13459_v6  ;;  %13462 = vst [vmem:[#allocation265_spill] sm:$0xff] %v10161_v30  ;;  %v13464_v31 = vand.u32 4294901760, %v13463_v54  ;;  %v4112_v41 = vand.u32 4294901760, %v4111_v46  ;;  %v10168_v29 = vand.u32 4294901760, %v737_v21  ;;  %v10171_v20 = vand.u32 4294901760, %v1072_v61 }
 0x296   :  { %v4121_v42 = vsub.f32 %v10062_v50, %v13457_v32  ;;  %v4127_v1 = vsub.f32 %v10077_v18, %v13460_v62  ;;  %4097 = vmatmul.mubr.f32.gmra.mxu0 %v4096_v37  ;;  %v10166_v62 = vsub.f32 %v1069_v48, %v10130_v12  ;;  %v2580_v32 = vpop.f32.mrf.mxu0  ;;  %4654 = vmatmul.mubr.f32.gmra.mxu1 %v9879_v16  ;;  %v741_v30 = vld [vmem:[%s11630_s1 + $0x230] sm:$0xff]  ;;  %v750_v37 = vld [vmem:[%s11630_s1 + $0x278] sm:$0xff]  ;;  %v2967_v48 = vpop.f32.mrf.mxu1  ;;  %v1075_v18 = vsel %vm1019_vm9, %v746_v2, 0 }
 0x297   :  { %5565 = vmatprep.subr.mxu0 %v13464_v31  ;;  %13466 = vst [vmem:[#allocation266_spill] sm:$0xff] %v10168_v29  ;;  %4107 = vmatprep.mubr.f32.mxu0 %v4106_v58  ;;  %13467 = vst [vmem:[#allocation267_spill] sm:$0xff] %v10171_v20  ;;  %v2581_v46 = vadd.f32 %v2580_v32, %v9481_v4  ;;  %v13468_v31 = vld [vmem:[#allocation92_spill] sm:$0xff]  ;;  %v13469_v58 = vand.u32 4294901760, %v10103_v45  ;;  %v10186_v50 = vadd.f32 %v2967_v48, %v2561_v25  ;;  %v13471_v17 = vld [vmem:[#allocation97_spill] sm:$0xff] }
 0x298   :  { %13465 = vst [vmem:[#allocation9_spill] sm:$0xff] %v10166_v62  ;;  %5260 = vmatpush2.msra.mxu1 %v13468_v31  ;;  %4660 = vmatprep.mubr.f32.mxu1 %v9908_v10  ;;  %v4122_v54 = vand.u32 4294901760, %v4121_v42  ;;  %v10188_v6 = vpop.f32.mrf.mxu0  ;;  %v4128_v40 = vand.u32 4294901760, %v4127_v1  ;;  %v13472_v4 = vand.u32 4294901760, %v10113_v63  ;;  %v13473_v10 = vand.u32 4294901760, %v10116_v35  ;;  %v13475_v2 = vld [vmem:[#allocation173_spill] sm:$0xff] }
 0x299   :  { %v4137_v16 = vsub.f32 %v10103_v45, %v13469_v58  ;;  %13470 = vst [vmem:[#allocation268_spill] sm:$0xff] %v10188_v6  ;;  %5262 = vmatprep.subr.mxu1 %v13471_v17  ;;  %v10198_v58 = vpop.f32.mrf.mxu1  ;;  %v10203_v48 = vsub.f32 %v737_v21, %v10168_v29  ;;  %v10205_v1 = vand.u32 4294901760, %v741_v30  ;;  %v13478_v31 = vld [vmem:[#allocation176_spill] sm:$0xff]  ;;  %v10216_v25 = vand.u32 4294901760, %v1075_v18 }
 0x29a   :  { %v4143_v32 = vsub.f32 %v10113_v63, %v13472_v4  ;;  %v4153_v42 = vsub.f32 %v10116_v35, %v13473_v10  ;;  %13474 = vst [vmem:[#allocation97_spill] sm:$0xff] %v10198_v58  ;;  %5264 = vmatpush2.msra.mxu1 %v13475_v2  ;;  %4113 = vmatmul.mubr.f32.gmra.mxu0 %v4112_v41  ;;  %v745_v4 = vld [vmem:[%s11630_s1 + $0x250] sm:$0xff]  ;;  %v1078_v10 = vsel %vm1019_vm9, %v750_v37, 0  ;;  %v2590_v6 = vpop.f32.mrf.mxu0  ;;  %v754_v37 = vld [vmem:[%s11630_s1 + $0x298] sm:$0xff]  ;;  %v13488_v2 = vld [vmem:[#allocation100_spill] sm:$0xff] }
 0x29b   :  { %13476 = vst [vmem:[#allocation269_spill] sm:$0xff] %v10203_v48  ;;  %13477 = vst [vmem:[#allocation270_spill] sm:$0xff] %v10205_v1  ;;  %5266 = vmatprep.subr.mxu1 %v13478_v31  ;;  %4662 = vmatmul.mubr.f32.gmra.mxu1 %v9910_v43  ;;  %v10214_v41 = vsub.f32 %v1072_v61, %v10171_v20  ;;  %v2591_v21 = vadd.f32 %v2590_v6, %v9509_v60  ;;  %v2979_v58 = vpop.f32.mrf.mxu1  ;;  %v13481_v35 = vld [vmem:[#allocation177_spill] sm:$0xff]  ;;  %v4138_v63 = vand.u32 4294901760, %v4137_v16  ;;  %v13483_v43 = vld [vmem:[#allocation179_spill] sm:$0xff] }
 0x29c   :  { %13480 = vst [vmem:[#allocation272_spill] sm:$0xff] %v10216_v25  ;;  %5268 = vmatpush2.msra.mxu1 %v13481_v35  ;;  %4123 = vmatprep.mubr.f32.mxu0 %v4122_v54  ;;  %v10223_v45 = vadd.f32 %v2979_v58, %v2571_v24  ;;  %v10225_v31 = vpop.f32.mrf.mxu0  ;;  %v4144_v61 = vand.u32 4294901760, %v4143_v32  ;;  %v13484_v60 = vand.u32 4294901760, %v10156_v22  ;;  %v10232_v35 = vand.u32 4294901760, %v745_v4 }
 0x29d   :  { %13479 = vst [vmem:[#allocation271_spill] sm:$0xff] %v10214_v41  ;;  %13482 = vst [vmem:[#allocation273_spill] sm:$0xff] %v10225_v31  ;;  %5270 = vmatprep.subr.mxu1 %v13483_v43  ;;  %4668 = vmatprep.mubr.f32.mxu1 %v9956_v49  ;;  %v10234_v16 = vand.u32 4294901760, %v1078_v10  ;;  %v10236_v54 = vpop.f32.mrf.mxu1  ;;  %v4154_v24 = vand.u32 4294901760, %v4153_v42  ;;  %v13489_v58 = vand.u32 4294901760, %v10166_v62  ;;  %v10244_v49 = vsub.f32 %v741_v30, %v10205_v1 }
 0x29e   :  { %v4159_v6 = vsub.f32 %v10156_v22, %v13484_v60  ;;  %13485 = vst [vmem:[#allocation179_spill] sm:$0xff] %v10232_v35  ;;  %13487 = vst [vmem:[#allocation275_spill] sm:$0xff] %v10236_v54  ;;  %5272 = vmatpush2.msra.mxu1 %v13488_v2  ;;  %4129 = vmatmul.mubr.f32.gmra.mxu0 %v4128_v40  ;;  %v2600_v60 = vpop.f32.mrf.mxu0  ;;  %v10250_v22 = vsub.f32 %v1075_v18, %v10216_v25  ;;  %v749_v40 = vld [vmem:[%s11630_s1 + $0x270] sm:$0xff]  ;;  %v1081_v42 = vsel %vm1019_vm9, %v754_v37, 0  ;;  %v758_v37 = vld [vmem:[%s11630_s1 + $0x2b8] sm:$0xff] }
 0x29f   :  { %13486 = vst [vmem:[#allocation274_spill] sm:$0xff] %v10234_v16  ;;  %v4169_v31 = vsub.f32 %v10166_v62, %v13489_v58  ;;  %13490 = vst [vmem:[#allocation276_spill] sm:$0xff] %v10244_v49  ;;  %5952 = vmatprep.subr.mxu1 %v8604_v19  ;;  %4670 = vmatmul.mubr.f32.gmra.mxu1 %v9973_v51  ;;  %v2601_v58 = vadd.f32 %v2600_v60, %v9535_v38  ;;  %v2991_v30 = vpop.f32.mrf.mxu1 }
 0x2a0   :  { %13491 = vst [vmem:[#allocation277_spill] sm:$0xff] %v10250_v22  ;;  %4139 = vmatprep.mubr.f32.mxu0 %v4138_v63  ;;  %4676 = vmatprep.mubr.f32.mxu1 %v9984_v15  ;;  %v10258_v19 = vadd.f32 %v2991_v30, %v2581_v46  ;;  %v10260_v32 = vpop.f32.mrf.mxu0  ;;  %v4160_v54 = vand.u32 4294901760, %v4159_v6  ;;  %v10263_v18 = vsub.f32 %v745_v4, %v10232_v35  ;;  %v13496_v63 = vand.u32 4294901760, %v10203_v48 }
 0x2a1   :  { %13492 = vst [vmem:[#allocation278_spill] sm:$0xff] %v10260_v32  ;;  %v10266_v51 = vsub.f32 %v1078_v10, %v10234_v16  ;;  %v10271_v38 = vpop.f32.mrf.mxu1  ;;  %v10277_v6 = vand.u32 4294901760, %v749_v40  ;;  %v10279_v4 = vand.u32 4294901760, %v1081_v42  ;;  %v753_v10 = vld [vmem:[%s11630_s1 + $0x290] sm:$0xff]  ;;  %v4170_v32 = vand.u32 4294901760, %v4169_v31 }
 0x2a2   :  { %13493 = vst [vmem:[#allocation279_spill] sm:$0xff] %v10263_v18  ;;  %13495 = vst [vmem:[#allocation281_spill] sm:$0xff] %v10271_v38  ;;  %4145 = vmatmul.mubr.f32.gmra.mxu0 %v4144_v61  ;;  %v4175_v46 = vsub.f32 %v10203_v48, %v13496_v63  ;;  %v2610_v30 = vpop.f32.mrf.mxu0  ;;  %v13499_v61 = vand.u32 4294901760, %v10214_v41  ;;  %v1084_v48 = vsel %vm1019_vm9, %v758_v37, 0  ;;  %v13503_v37 = vand.u32 4294901760, %v10244_v49 }
 0x2a3   :  { %13494 = vst [vmem:[#allocation280_spill] sm:$0xff] %v10266_v51  ;;  %13497 = vst [vmem:[#allocation282_spill] sm:$0xff] %v10277_v6  ;;  %4678 = vmatmul.mubr.f32.gmra.mxu1 %v10009_v14  ;;  %4155 = vmatprep.mubr.f32.mxu0 %v4154_v24  ;;  %v2611_v60 = vadd.f32 %v2610_v30, %v9573_v7  ;;  %v3003_v15 = vpop.f32.mrf.mxu1  ;;  %v10298_v14 = vand.u32 4294901760, %v753_v10  ;;  %v10312_v24 = vsub.f32 %v1081_v42, %v10279_v4 }
 0x2a4   :  { %13498 = vst [vmem:[#allocation283_spill] sm:$0xff] %v10279_v4  ;;  %v4185_v38 = vsub.f32 %v10214_v41, %v13499_v61  ;;  %4684 = vmatprep.mubr.f32.mxu1 %v10031_v59  ;;  %v10292_v62 = vadd.f32 %v3003_v15, %v2591_v21  ;;  %v10294_v2 = vpop.f32.mrf.mxu0  ;;  %v762_v61 = vld [vmem:[%s11630_s1 + $0x2d8] sm:$0xff]  ;;  %v4176_v30 = vand.u32 4294901760, %v4175_v46  ;;  %v4191_v15 = vsub.f32 %v10244_v49, %v13503_v37  ;;  %v757_v37 = vld [vmem:[%s11630_s1 + $0x2b0] sm:$0xff] }
 0x2a5   :  { %13500 = vst [vmem:[#allocation284_spill] sm:$0xff] %v10294_v2  ;;  %13501 = vst [vmem:[#allocation285_spill] sm:$0xff] %v10298_v14  ;;  %v10303_v7 = vpop.f32.mrf.mxu1  ;;  %v10309_v21 = vsub.f32 %v749_v40, %v10277_v6  ;;  %v13504_v2 = vand.u32 4294901760, %v10250_v22  ;;  %v10318_v46 = vand.u32 4294901760, %v1084_v48  ;;  %v1087_v42 = vsel %vm1019_vm9, %v762_v61, 0 }
 0x2a6   :  { %13502 = vst [vmem:[#allocation286_spill] sm:$0xff] %v10303_v7  ;;  %4161 = vmatmul.mubr.f32.gmra.mxu0 %v4160_v54  ;;  %v3292_v31 = vpop.f32.mrf.mxu0  ;;  %v4186_v63 = vand.u32 4294901760, %v4185_v38  ;;  %v13507_v38 = vand.u32 4294901760, %v10263_v18  ;;  %v13508_v59 = vand.u32 4294901760, %v10266_v51  ;;  %v10337_v49 = vsub.f32 %v753_v10, %v10298_v14 }
 0x2a7   :  { %4686 = vmatmul.mubr.f32.gmra.mxu1 %v10039_v39  ;;  %4171 = vmatprep.mubr.f32.mxu0 %v4170_v32  ;;  %v4201_v54 = vsub.f32 %v10250_v22, %v13504_v2  ;;  %13505 = vst [vmem:[#allocation287_spill] sm:$0xff] %v10318_v46  ;;  %v3015_v40 = vpop.f32.mrf.mxu1  ;;  %v3293_v7 = vadd.f32 %v3292_v31, %v9434_v56  ;;  %v766_v56 = vld [vmem:[%s11630_s1 + $0x2f8] sm:$0xff] }
 0x2a8   :  { %4692 = vmatprep.mubr.f32.mxu1 %v10064_v57  ;;  %v10326_v39 = vadd.f32 %v3015_v40, %v2601_v58  ;;  %v10328_v32 = vpop.f32.mrf.mxu0  ;;  %v4207_v2 = vsub.f32 %v10263_v18, %v13507_v38  ;;  %v4217_v22 = vsub.f32 %v10266_v51, %v13508_v59  ;;  %v4192_v58 = vand.u32 4294901760, %v4191_v15 }
 0x2a9   :  { %13506 = vst [vmem:[#allocation288_spill] sm:$0xff] %v10328_v32  ;;  %v10342_v31 = vpop.f32.mrf.mxu1  ;;  %v10346_v38 = vand.u32 4294901760, %v757_v37  ;;  %v4202_v59 = vand.u32 4294901760, %v4201_v54  ;;  %v10350_v10 = vsub.f32 %v1084_v48, %v10318_v46  ;;  %v10352_v57 = vand.u32 4294901760, %v1087_v42 }
 0x2aa   :  { %13509 = vst [vmem:[#allocation289_spill] sm:$0xff] %v10342_v31  ;;  %4177 = vmatmul.mubr.f32.gmra.mxu0 %v4176_v30  ;;  %v3300_v32 = vpop.f32.mrf.mxu0  ;;  %v761_v30 = vld [vmem:[%s11630_s1 + $0x2d0] sm:$0xff]  ;;  %v1090_v40 = vsel %vm1019_vm9, %v766_v56, 0  ;;  %v4208_v54 = vand.u32 4294901760, %v4207_v2  ;;  %v4218_v48 = vand.u32 4294901760, %v4217_v22  ;;  %v13514_v18 = vand.u32 4294901760, %v10309_v21 }
 0x2ab   :  { %13510 = vst [vmem:[#allocation290_spill] sm:$0xff] %v10346_v38  ;;  %4694 = vmatmul.mubr.f32.gmra.mxu1 %v10079_v33  ;;  %4187 = vmatprep.mubr.f32.mxu0 %v4186_v63  ;;  %13511 = vst [vmem:[#allocation291_spill] sm:$0xff] %v10352_v57  ;;  %v3027_v15 = vpop.f32.mrf.mxu1  ;;  %v3301_v61 = vadd.f32 %v3300_v32, %v9452_v13  ;;  %v13515_v13 = vand.u32 4294901760, %v10312_v24  ;;  %v10376_v56 = vand.u32 4294901760, %v761_v30 }
 0x2ac   :  { %4700 = vmatprep.mubr.f32.mxu1 %v10081_v26  ;;  %v10360_v31 = vadd.f32 %v3027_v15, %v2611_v60  ;;  %v10362_v63 = vpop.f32.mrf.mxu0  ;;  %v4223_v41 = vsub.f32 %v10309_v21, %v13514_v18  ;;  %v10374_v60 = vsub.f32 %v757_v37, %v10346_v38  ;;  %v10383_v15 = vand.u32 4294901760, %v1090_v40  ;;  %v765_v18 = vld [vmem:[%s11630_s1 + $0x2f0] sm:$0xff] }
 0x2ad   :  { %13512 = vst [vmem:[#allocation292_spill] sm:$0xff] %v10362_v63  ;;  %v10365_v51 = vpop.f32.mrf.mxu1  ;;  %v4233_v32 = vsub.f32 %v10312_v24, %v13515_v13  ;;  %13516 = vst [vmem:[#allocation294_spill] sm:$0xff] %v10376_v56  ;;  %v10401_v26 = vsub.f32 %v761_v30, %v10376_v56 }
 0x2ae   :  { %13513 = vst [vmem:[#allocation293_spill] sm:$0xff] %v10365_v51  ;;  %4193 = vmatmul.mubr.f32.gmra.mxu0 %v4192_v58  ;;  %v3308_v2 = vpop.f32.mrf.mxu0  ;;  %v10381_v58 = vsub.f32 %v1087_v42, %v10352_v57  ;;  %13517 = vst [vmem:[#allocation295_spill] sm:$0xff] %v10383_v15  ;;  %v4224_v63 = vand.u32 4294901760, %v4223_v41 }
 0x2af   :  { %4702 = vmatmul.mubr.f32.gmra.mxu1 %v10118_v11  ;;  %4203 = vmatprep.mubr.f32.mxu0 %v4202_v59  ;;  %v3309_v37 = vadd.f32 %v3308_v2, %v9474_v9  ;;  %v3613_v13 = vpop.f32.mrf.mxu1  ;;  %v13519_v59 = vand.u32 4294901760, %v10337_v49  ;;  %v10403_v9 = vand.u32 4294901760, %v765_v18  ;;  %v13522_v2 = vand.u32 4294901760, %v10350_v10 }
 0x2b0   :  { %4708 = vmatprep.mubr.f32.mxu1 %v10130_v12  ;;  %v10390_v33 = vadd.f32 %v3613_v13, %v3293_v7  ;;  %v10392_v51 = vpop.f32.mrf.mxu0  ;;  %v4234_v7 = vand.u32 4294901760, %v4233_v32 }
 0x2b1   :  { %13518 = vst [vmem:[#allocation296_spill] sm:$0xff] %v10392_v51  ;;  %v4239_v42 = vsub.f32 %v10337_v49, %v13519_v59  ;;  %v10397_v22 = vpop.f32.mrf.mxu1  ;;  %13521 = vst [vmem:[#allocation298_spill] sm:$0xff] %v10403_v9  ;;  %v4249_v13 = vsub.f32 %v10350_v10, %v13522_v2  ;;  %v12355_v51 = vand.u32 4294901760, %v10401_v26  ;;  %v10420_v2 = vsub.f32 %v765_v18, %v10403_v9 }
 0x2b2   :  { %13520 = vst [vmem:[#allocation297_spill] sm:$0xff] %v10397_v22  ;;  %4209 = vmatmul.mubr.f32.gmra.mxu0 %v4208_v54  ;;  %v10411_v54 = vsub.f32 %v1090_v40, %v10383_v15 }
 0x2b3   :  { %4710 = vmatmul.mubr.f32.gmra.mxu1 %v10168_v29  ;;  %4219 = vmatprep.mubr.f32.mxu0 %v4218_v48  ;;  %v3316_v41 = vpop.f32.mrf.mxu0  ;;  %v4240_v30 = vand.u32 4294901760, %v4239_v42  ;;  %v13523_v48 = vand.u32 4294901760, %v10374_v60  ;;  %v4250_v42 = vand.u32 4294901760, %v4249_v13  ;;  %v13577_v29 = vld [vmem:[#allocation74_spill] sm:$0xff] }
 0x2b4   :  { %4716 = vmatprep.mubr.f32.mxu1 %v10171_v20  ;;  %v3317_v11 = vadd.f32 %v3316_v41, %v9504_v34  ;;  %v3621_v22 = vpop.f32.mrf.mxu1  ;;  %v13524_v34 = vand.u32 4294901760, %v10381_v58  ;;  %v12356_v41 = vand.u32 4294901760, %v10411_v54  ;;  %v13572_v20 = vld [vmem:[#allocation45_spill] sm:$0xff] }
 0x2b5   :  { %v4255_v32 = vsub.f32 %v10374_v60, %v13523_v48  ;;  %v10422_v59 = vadd.f32 %v3621_v22, %v3301_v61  ;;  %v10424_v40 = vpop.f32.mrf.mxu0  ;;  %v4271_v61 = vsub.f32 %v10401_v26, %v12355_v51 }
 0x2b6   :  { %4225 = vmatmul.mubr.f32.gmra.mxu0 %v4224_v63  ;;  %v4265_v63 = vsub.f32 %v10381_v58, %v13524_v34  ;;  %v10431_v48 = vpop.f32.mrf.mxu1  ;;  %v4281_v34 = vsub.f32 %v10411_v54, %v12356_v41 }
 0x2b7   :  { %4718 = vmatmul.mubr.f32.gmra.mxu1 %v10205_v1  ;;  %4235 = vmatprep.mubr.f32.mxu0 %v4234_v7  ;;  %13525 = vst [vmem:[#allocation299_spill] sm:$0xff] %v10431_v48  ;;  %v4256_v18 = vand.u32 4294901760, %v4255_v32  ;;  %v4272_v22 = vand.u32 4294901760, %v4271_v61 }
 0x2b8   :  { %4724 = vmatprep.mubr.f32.mxu1 %v10216_v25  ;;  %v4266_v13 = vand.u32 4294901760, %v4265_v63  ;;  %v4282_v41 = vand.u32 4294901760, %v4281_v34 }
 0x2b9   :  { %v3324_v7 = vpop.f32.mrf.mxu0 }
 0x2ba   :  { %4241 = vmatmul.mubr.f32.gmra.mxu0 %v4240_v30  ;;  %v3325_v48 = vadd.f32 %v3324_v7, %v9548_v8  ;;  %v3629_v25 = vpop.f32.mrf.mxu1 }
 0x2bb   :  { %4726 = vmatmul.mubr.f32.gmra.mxu1 %v10232_v35  ;;  %4251 = vmatprep.mubr.f32.mxu0 %v4250_v42  ;;  %v10444_v30 = vadd.f32 %v3629_v25, %v3309_v37  ;;  %v10446_v32 = vpop.f32.mrf.mxu0  ;;  %v13527_v42 = vand.u32 4294901760, %v10420_v2  ;;  %v13559_v35 = vld [vmem:[#allocation63_spill] sm:$0xff] }
 0x2bc   :  { %4732 = vmatprep.mubr.f32.mxu1 %v10234_v16  ;;  %v10448_v51 = vpop.f32.mrf.mxu1 }
 0x2bd   :  { %13526 = vst [vmem:[#allocation300_spill] sm:$0xff] %v10448_v51  ;;  %v4287_v63 = vsub.f32 %v10420_v2, %v13527_v42  ;;  %v13528_v42 = vld [vmem:[#allocation28_spill] sm:$0xff]  ;;  %v13536_v51 = vld [vmem:[#allocation13_spill] sm:$0xff] }
 0x2be   :  { %4257 = vmatmul.mubr.f32.gmra.mxu0 %v4256_v18 }
 0x2bf   :  { %4734 = vmatmul.mubr.f32.gmra.mxu1 %v10277_v6  ;;  %4267 = vmatprep.mubr.f32.mxu0 %v4266_v13  ;;  %v4288_v7 = vand.u32 4294901760, %v4287_v63  ;;  %v13529_v63 = vand.u32 4294901760, %v13528_v42 }
 0x2c0   :  { %4740 = vmatprep.mubr.f32.mxu1 %v10279_v4  ;;  %v3332_v8 = vpop.f32.mrf.mxu0 }
 0x2c1   :  { %v3333_v25 = vadd.f32 %v3332_v8, %v9592_v3  ;;  %v3637_v37 = vpop.f32.mrf.mxu1  ;;  %v13530_v8 = vld [vmem:[#allocation40_spill] sm:$0xff] }
 0x2c2   :  { %4273 = vmatmul.mubr.f32.gmra.mxu0 %v4272_v22  ;;  %v10456_v16 = vadd.f32 %v3637_v37, %v3317_v11  ;;  %v10458_v18 = vpop.f32.mrf.mxu0  ;;  %v13531_v37 = vand.u32 4294901760, %v13530_v8  ;;  %v13539_v8 = vld [vmem:[#allocation15_spill] sm:$0xff] }
 0x2c3   :  { %4742 = vmatmul.mubr.f32.gmra.mxu1 %v10298_v14  ;;  %4283 = vmatprep.mubr.f32.mxu0 %v4282_v41  ;;  %v10461_v61 = vpop.f32.mrf.mxu1  ;;  %v13551_v14 = vld [vmem:[#allocation33_spill] sm:$0xff] }
 0x2c4   :  { %4748 = vmatprep.mubr.f32.mxu1 %v10318_v46  ;;  %v13537_v46 = vand.u32 4294901760, %v13536_v51  ;;  %v13544_v51 = vld [vmem:[#allocation20_spill] sm:$0xff] }
 0x2c6   :  { %4289 = vmatmul.mubr.f32.gmra.mxu0 %v4288_v7  ;;  %v3340_v13 = vpop.f32.mrf.mxu0  ;;  %v13532_v7 = vld [vmem:[#allocation136_spill] sm:$0xff] }
 0x2c7   :  { %4750 = vmatmul.mubr.f32.gmra.mxu1 %v10346_v38  ;;  %4926 = vmatprep.mubr.f32.mxu0 %v9527_v28  ;;  %v3341_v3 = vadd.f32 %v3340_v13, %v9636_v55  ;;  %v3645_v22 = vpop.f32.mrf.mxu1  ;;  %v13534_v13 = vld [vmem:[#allocation192_spill] sm:$0xff] }
 0x2c8   :  { %4756 = vmatprep.mubr.f32.mxu1 %v10352_v57  ;;  %v10468_v11 = vadd.f32 %v3645_v22, %v3325_v48  ;;  %v10470_v34 = vpop.f32.mrf.mxu0  ;;  %v13533_v48 = vand.u32 4294901760, %v13532_v7  ;;  %v13535_v22 = vld [vmem:[#allocation21_spill] sm:$0xff] }
 0x2c9   :  { %v10472_v41 = vpop.f32.mrf.mxu1 }
 0x2ca   :  { %4929 = vmatmul.mubr.f32.vlgmr.msra.gmra.mxu0 %v9538_v27 }
 0x2cb   :  { %4758 = vmatmul.mubr.f32.gmra.mxu1 %v10376_v56  ;;  %5569 = vmatpush1.msra.mxu0 %v13529_v63  ;;  %v13538_v56 = vld [vmem:[#allocation180_spill] sm:$0xff] }
 0x2cc   :  { %5573 = vmatprep.subr.mxu0 %v13531_v37  ;;  %4764 = vmatprep.mubr.f32.mxu1 %v10383_v15  ;;  %v3348_v55 = vpop.f32.mrf.mxu0  ;;  %v13540_v37 = vand.u32 4294901760, %v13539_v8 }
 0x2cd   :  { %5577 = vmatpush1.msra.mxu0 %v13533_v48  ;;  %4936 = vmatprep.mubr.f32.mxu0 %v13534_v13  ;;  %v3349_v57 = vadd.f32 %v3348_v55, %v13535_v22  ;;  %v3653_v38 = vpop.f32.mrf.mxu1  ;;  %v13541_v48 = vld [vmem:[#allocation17_spill] sm:$0xff] }
 0x2ce   :  { %5581 = vmatprep.subr.mxu0 %v13537_v46  ;;  %4939 = vmatmul.mubr.f32.gmra.mxu0 %v13538_v56  ;;  %v10488_v42 = vadd.f32 %v3653_v38, %v3333_v25  ;;  %v10490_v63 = vpop.f32.mrf.mxu0  ;;  %v13542_v15 = vand.u32 4294901760, %v13541_v48  ;;  %v13543_v55 = vld [vmem:[#allocation181_spill] sm:$0xff]  ;;  %v13545_v46 = vand.u32 4294901760, %v13544_v51  ;;  %v13546_v38 = vand.u32 4294901760, %v9527_v28  ;;  %v13554_v51 = vld [vmem:[#allocation12_spill] sm:$0xff] }
 0x2cf   :  { %4766 = vmatmul.mubr.f32.gmra.mxu1 %v10403_v9  ;;  %5585 = vmatpush1.msra.mxu0 %v13540_v37  ;;  %v10495_v7 = vpop.f32.mrf.mxu1  ;;  %v13547_v25 = vld [vmem:[#allocation57_spill] sm:$0xff]  ;;  %v13549_v9 = vld [vmem:[#allocation102_spill] sm:$0xff]  ;;  %v13550_v37 = vand.u32 4294901760, %v9538_v27  ;;  %v13552_v48 = vand.u32 4294901760, %v13551_v14  ;;  %v13560_v27 = vand.u32 4294901760, %v13559_v35  ;;  %v13568_v35 = vand.u32 4294901760, %v13538_v56 }
 0x2d0   :  { %5589 = vmatprep.subr.mxu0 %v13542_v15  ;;  %4946 = vmatprep.mubr.f32.mxu0 %v13543_v55  ;;  %v13548_v22 = vand.u32 4294901760, %v13547_v25  ;;  %v13553_v15 = vld [vmem:[#allocation43_spill] sm:$0xff]  ;;  %v13561_v14 = vld [vmem:[#allocation29_spill] sm:$0xff]  ;;  %v13578_v56 = vand.u32 4294901760, %v13577_v29  ;;  %v13587_v29 = vand.u32 4294901760, %v13549_v9 }
 0x2d1   :  { %5593 = vmatpush1.msra.mxu0 %v13545_v46  ;;  %5276 = vmatprep.mubr.f32.mxu1 %v13546_v38  ;;  %v13555_v46 = vld [vmem:[#allocation34_spill] sm:$0xff] }
 0x2d2   :  { %5597 = vmatprep.subr.mxu0 %v13548_v22  ;;  %4949 = vmatmul.mubr.f32.gmra.mxu0 %v13549_v9  ;;  %v3356_v8 = vpop.f32.mrf.mxu0  ;;  %v13556_v28 = vand.u32 4294901760, %v13555_v46  ;;  %v13558_v22 = vld [vmem:[#allocation19_spill] sm:$0xff] }
 0x2d3   :  { %5280 = vmatmul.mubr.f32.vlgmr.msra.gmra.mxu1 %v13550_v37  ;;  %5601 = vmatpush1.msra.mxu0 %v13552_v48  ;;  %v3357_v4 = vadd.f32 %v3356_v8, %v13553_v15  ;;  %v3661_v6 = vpop.f32.mrf.mxu1  ;;  %v13562_v8 = vld [vmem:[#allocation36_spill] sm:$0xff]  ;;  %v13563_v48 = vand.u32 4294901760, %v13534_v13  ;;  %v13564_v15 = vld [vmem:[#allocation69_spill] sm:$0xff] }
 0x2d4   :  { %5954 = vmatpush1.msra.mxu1 %v13554_v51  ;;  %5605 = vmatprep.subr.mxu0 %v13556_v28  ;;  %v10515_v38 = vadd.f32 %v3661_v6, %v3341_v3  ;;  %v10517_v25 = vpop.f32.mrf.mxu0  ;;  %v13565_v51 = vand.u32 4294901760, %v13564_v15  ;;  %v13566_v6 = vld [vmem:[#allocation24_spill] sm:$0xff]  ;;  %v13567_v3 = vld [vmem:[#allocation197_spill] sm:$0xff]  ;;  %v13569_v28 = vld [vmem:[#allocation147_spill] sm:$0xff] }
 0x2d5   :  { %13557 = vst [vmem:[#allocation28_spill] sm:$0xff] %v10517_v25  ;;  %5956 = vmatprep.subr.mxu1 %v13558_v22  ;;  %5609 = vmatpush1.msra.mxu0 %v13560_v27  ;;  %v10522_v37 = vpop.f32.mrf.mxu1  ;;  %v13570_v22 = vand.u32 4294901760, %v13569_v28  ;;  %v13571_v27 = vld [vmem:[#allocation55_spill] sm:$0xff]  ;;  %v13573_v13 = vld [vmem:[#allocation52_spill] sm:$0xff]  ;;  %v13596_v25 = vld [vmem:[#allocation58_spill] sm:$0xff] }
 0x2d6   :  { %5958 = vmatpush1.msra.mxu1 %v13561_v14  ;;  %4956 = vmatprep.mubr.f32.mxu0 %v13562_v8  ;;  %v13580_v28 = vld [vmem:[#allocation139_spill] sm:$0xff]  ;;  %v13597_v9 = vand.u32 4294901760, %v13596_v25  ;;  %v13606_v25 = vand.u32 4294901760, %v13567_v3 }
 0x2d7   :  { %5288 = vmatprep.mubr.f32.mxu1 %v13563_v48  ;;  %5613 = vmatprep.subr.mxu0 %v13565_v51  ;;  %v13574_v48 = vand.u32 4294901760, %v13573_v13 }
 0x2d8   :  { %5960 = vmatprep.subr.mxu1 %v13566_v6  ;;  %4959 = vmatmul.mubr.f32.gmra.mxu0 %v13567_v3  ;;  %v3364_v46 = vpop.f32.mrf.mxu0  ;;  %v13576_v6 = vld [vmem:[#allocation48_spill] sm:$0xff] }
 0x2d9   :  { %5292 = vmatmul.mubr.f32.gmra.mxu1 %v13568_v35  ;;  %5617 = vmatpush1.msra.mxu0 %v13570_v22  ;;  %v3365_v14 = vadd.f32 %v3364_v46, %v13571_v27  ;;  %v3669_v1 = vpop.f32.mrf.mxu1  ;;  %v13581_v46 = vld [vmem:[#allocation200_spill] sm:$0xff]  ;;  %v13583_v22 = vld [vmem:[#allocation78_spill] sm:$0xff] }
 0x2da   :  { %5962 = vmatpush1.msra.mxu1 %v13572_v20  ;;  %5621 = vmatprep.subr.mxu0 %v13574_v48  ;;  %v10540_v15 = vadd.f32 %v3669_v1, %v3349_v57  ;;  %v10542_v51 = vpop.f32.mrf.mxu0  ;;  %v13582_v20 = vand.u32 4294901760, %v13543_v55  ;;  %v13584_v27 = vand.u32 4294901760, %v13583_v22  ;;  %v13585_v57 = vld [vmem:[#allocation50_spill] sm:$0xff]  ;;  %v13592_v55 = vld [vmem:[#allocation152_spill] sm:$0xff] }
 0x2db   :  { %13575 = vst [vmem:[#allocation40_spill] sm:$0xff] %v10542_v51  ;;  %5964 = vmatprep.subr.mxu1 %v13576_v6  ;;  %5625 = vmatpush1.msra.mxu0 %v13578_v56  ;;  %v10547_v35 = vpop.f32.mrf.mxu1  ;;  %v13586_v1 = vld [vmem:[#allocation202_spill] sm:$0xff]  ;;  %v13590_v56 = vld [vmem:[#allocation220_spill] sm:$0xff] }
 0x2dc   :  { %13579 = vst [vmem:[#allocation136_spill] sm:$0xff] %v10547_v35  ;;  %5966 = vmatpush1.msra.mxu1 %v13580_v28  ;;  %4966 = vmatprep.mubr.f32.mxu0 %v13581_v46  ;;  %v13588_v48 = vld [vmem:[#allocation82_spill] sm:$0xff] }
 0x2dd   :  { %5300 = vmatprep.mubr.f32.mxu1 %v13582_v20  ;;  %5629 = vmatprep.subr.mxu0 %v13584_v27  ;;  %v13589_v6 = vand.u32 4294901760, %v13588_v48  ;;  %v13591_v51 = vld [vmem:[#allocation142_spill] sm:$0xff]  ;;  %v13593_v20 = vand.u32 4294901760, %v13592_v55  ;;  %v13599_v48 = vld [vmem:[#allocation143_spill] sm:$0xff] }
 0x2de   :  { %5968 = vmatprep.subr.mxu1 %v13585_v57  ;;  %4969 = vmatmul.mubr.f32.gmra.mxu0 %v13586_v1  ;;  %v3372_v13 = vpop.f32.mrf.mxu0  ;;  %v13595_v57 = vld [vmem:[#allocation56_spill] sm:$0xff]  ;;  %v13615_v35 = vld [vmem:[#allocation94_spill] sm:$0xff] }
 0x2df   :  { %5304 = vmatmul.mubr.f32.gmra.mxu1 %v13587_v29  ;;  %5633 = vmatpush1.msra.mxu0 %v13589_v6  ;;  %v3373_v28 = vadd.f32 %v3372_v13, %v13590_v56  ;;  %v3677_v12 = vpop.f32.mrf.mxu1  ;;  %v13600_v13 = vld [vmem:[#allocation206_spill] sm:$0xff]  ;;  %v13602_v6 = vld [vmem:[#allocation155_spill] sm:$0xff]  ;;  %v13616_v3 = vand.u32 4294901760, %v13615_v35  ;;  %v13623_v35 = vld [vmem:[#allocation213_spill] sm:$0xff] }
 0x2e0   :  { %5970 = vmatpush1.msra.mxu1 %v13591_v51  ;;  %5637 = vmatprep.subr.mxu0 %v13593_v20  ;;  %v10565_v22 = vadd.f32 %v3677_v12, %v3357_v4  ;;  %v10567_v27 = vpop.f32.mrf.mxu0  ;;  %v13601_v51 = vand.u32 4294901760, %v13562_v8  ;;  %v13603_v56 = vand.u32 4294901760, %v13602_v6  ;;  %v13604_v12 = vld [vmem:[#allocation60_spill] sm:$0xff]  ;;  %v13605_v4 = vld [vmem:[#allocation207_spill] sm:$0xff] }
 0x2e1   :  { %13594 = vst [vmem:[#allocation192_spill] sm:$0xff] %v10567_v27  ;;  %5972 = vmatprep.subr.mxu1 %v13595_v57  ;;  %5641 = vmatpush1.msra.mxu0 %v13597_v9  ;;  %v10572_v29 = vpop.f32.mrf.mxu1  ;;  %v13607_v20 = vld [vmem:[#allocation156_spill] sm:$0xff]  ;;  %v13609_v9 = vld [vmem:[#allocation67_spill] sm:$0xff] }
 0x2e2   :  { %13598 = vst [vmem:[#allocation21_spill] sm:$0xff] %v10572_v29  ;;  %5974 = vmatpush1.msra.mxu1 %v13599_v48  ;;  %4976 = vmatprep.mubr.f32.mxu0 %v13600_v13  ;;  %v13608_v57 = vand.u32 4294901760, %v13607_v20  ;;  %v13610_v29 = vld [vmem:[#allocation39_spill] sm:$0xff]  ;;  %v13611_v8 = vld [vmem:[#allocation64_spill] sm:$0xff]  ;;  %v13617_v20 = vld [vmem:[#allocation65_spill] sm:$0xff] }
 0x2e3   :  { %5312 = vmatprep.mubr.f32.mxu1 %v13601_v51  ;;  %5645 = vmatprep.subr.mxu0 %v13603_v56  ;;  %v13612_v51 = vand.u32 4294901760, %v13611_v8 }
 0x2e4   :  { %5976 = vmatprep.subr.mxu1 %v13604_v12  ;;  %4979 = vmatmul.mubr.f32.gmra.mxu0 %v13605_v4  ;;  %v3380_v55 = vpop.f32.mrf.mxu0  ;;  %v13614_v12 = vld [vmem:[#allocation30_spill] sm:$0xff] }
 0x2e5   :  { %5316 = vmatmul.mubr.f32.gmra.mxu1 %v13606_v25  ;;  %5649 = vmatpush1.msra.mxu0 %v13608_v57  ;;  %v3381_v48 = vadd.f32 %v3380_v55, %v13609_v9  ;;  %v3685_v27 = vpop.f32.mrf.mxu1  ;;  %v13618_v55 = vld [vmem:[#allocation212_spill] sm:$0xff]  ;;  %v13620_v9 = vld [vmem:[#allocation98_spill] sm:$0xff] }
 0x2e6   :  { %5978 = vmatpush1.msra.mxu1 %v13610_v29  ;;  %5653 = vmatprep.subr.mxu0 %v13612_v51  ;;  %v10590_v6 = vadd.f32 %v3685_v27, %v3365_v14  ;;  %v10592_v56 = vpop.f32.mrf.mxu0  ;;  %v13619_v29 = vand.u32 4294901760, %v13581_v46  ;;  %v13621_v14 = vand.u32 4294901760, %v13620_v9  ;;  %v13622_v51 = vld [vmem:[#allocation46_spill] sm:$0xff] }
 0x2e7   :  { %13613 = vst [vmem:[#allocation13_spill] sm:$0xff] %v10592_v56  ;;  %5980 = vmatprep.subr.mxu1 %v13614_v12  ;;  %5657 = vmatpush1.msra.mxu0 %v13616_v3  ;;  %v10597_v25 = vpop.f32.mrf.mxu1  ;;  %v13626_v56 = vld [vmem:[#allocation72_spill] sm:$0xff]  ;;  %v13629_v9 = vld [vmem:[#allocation70_spill] sm:$0xff] }
 0x2e8   :  { %5982 = vmatpush1.msra.mxu1 %v13617_v20  ;;  %4986 = vmatprep.mubr.f32.mxu0 %v13618_v55  ;;  %v3388_v57 = vpop.f32.mrf.mxu0  ;;  %v13625_v20 = vand.u32 4294901760, %v13586_v1  ;;  %v13627_v46 = vand.u32 4294901760, %v13626_v56  ;;  %v13636_v56 = vld [vmem:[#allocation218_spill] sm:$0xff] }
 0x2e9   :  { %5324 = vmatprep.mubr.f32.mxu1 %v13619_v29  ;;  %5661 = vmatprep.subr.mxu0 %v13621_v14  ;;  %v3389_v27 = vadd.f32 %v3388_v57, %v9921_v47  ;;  %v3693_v8 = vpop.f32.mrf.mxu1  ;;  %v13630_v47 = vld [vmem:[#allocation83_spill] sm:$0xff] }
 0x2ea   :  { %5984 = vmatprep.subr.mxu1 %v13622_v51  ;;  %4989 = vmatmul.mubr.f32.gmra.mxu0 %v13623_v35  ;;  %v10608_v12 = vadd.f32 %v3693_v8, %v3373_v28  ;;  %v10610_v3 = vpop.f32.mrf.mxu0  ;;  %v13631_v57 = vand.u32 4294901760, %v13630_v47  ;;  %v13632_v28 = vld [vmem:[#allocation95_spill] sm:$0xff]  ;;  %v13634_v51 = vld [vmem:[#allocation237_spill] sm:$0xff] }
 0x2eb   :  { %13624 = vst [vmem:[#allocation180_spill] sm:$0xff] %v10610_v3  ;;  %5328 = vmatmul.mubr.f32.gmra.mxu1 %v13625_v20  ;;  %5665 = vmatpush1.msra.mxu0 %v13627_v46  ;;  %v10616_v29 = vpop.f32.mrf.mxu1  ;;  %v13633_v8 = vand.u32 4294901760, %v13632_v28  ;;  %v13635_v20 = vld [vmem:[#allocation73_spill] sm:$0xff]  ;;  %v13640_v47 = vld [vmem:[#allocation163_spill] sm:$0xff] }
 0x2ec   :  { %13628 = vst [vmem:[#allocation15_spill] sm:$0xff] %v10616_v29  ;;  %5986 = vmatpush1.msra.mxu1 %v13629_v9  ;;  %5669 = vmatprep.subr.mxu0 %v13631_v57  ;;  %v3396_v14 = vpop.f32.mrf.mxu0  ;;  %v13639_v9 = vand.u32 4294901760, %v13600_v13  ;;  %v13641_v57 = vand.u32 4294901760, %v13640_v47  ;;  %v13643_v28 = vld [vmem:[#allocation61_spill] sm:$0xff]  ;;  %v13649_v47 = vld [vmem:[#allocation118_spill] sm:$0xff] }
 0x2ed   :  { %5988 = vmatprep.subr.mxu1 %v13390_v0  ;;  %5673 = vmatpush1.msra.mxu0 %v13633_v8  ;;  %v3397_v3 = vadd.f32 %v3396_v14, %v13634_v51  ;;  %v3701_v1 = vpop.f32.mrf.mxu1  ;;  %v13644_v14 = vld [vmem:[#allocation219_spill] sm:$0xff]  ;;  %v13645_v51 = vand.u32 4294901760, %v13605_v4 }
 0x2ee   :  { %5990 = vmatpush1.msra.mxu1 %v13635_v20  ;;  %4996 = vmatprep.mubr.f32.mxu0 %v13636_v56  ;;  %v10627_v46 = vadd.f32 %v3701_v1, %v3381_v48  ;;  %v10629_v29 = vpop.f32.mrf.mxu0  ;;  %v13646_v48 = vld [vmem:[#allocation103_spill] sm:$0xff] }
 0x2ef   :  { %13638 = vst [vmem:[#allocation181_spill] sm:$0xff] %v10629_v29  ;;  %5336 = vmatprep.mubr.f32.mxu1 %v13639_v9  ;;  %5677 = vmatprep.subr.mxu0 %v13641_v57  ;;  %v10635_v0 = vpop.f32.mrf.mxu1  ;;  %v13647_v1 = vand.u32 4294901760, %v13646_v48  ;;  %v13648_v9 = vld [vmem:[#allocation86_spill] sm:$0xff]  ;;  %v13650_v57 = vand.u32 4294901760, %v13649_v47 }
 0x2f0   :  { %13637 = vst [vmem:[#allocation17_spill] sm:$0xff] %v10627_v46  ;;  %13642 = vst [vmem:[#allocation20_spill] sm:$0xff] %v10635_v0  ;;  %5992 = vmatprep.subr.mxu1 %v13643_v28  ;;  %4999 = vmatmul.mubr.f32.gmra.mxu0 %v13644_v14  ;;  %v3404_v8 = vpop.f32.mrf.mxu0  ;;  %v13652_v0 = vld [vmem:[#allocation66_spill] sm:$0xff]  ;;  %v13653_v46 = vld [vmem:[#allocation91_spill] sm:$0xff] }
 0x2f1   :  { %5340 = vmatmul.mubr.f32.gmra.mxu1 %v13645_v51  ;;  %5681 = vmatpush1.msra.mxu0 %v13647_v1  ;;  %v3405_v20 = vadd.f32 %v3404_v8, %v10027_v23  ;;  %v3709_v13 = vpop.f32.mrf.mxu1  ;;  %v13654_v4 = vand.u32 4294901760, %v13653_v46  ;;  %v13655_v48 = vld [vmem:[#allocation62_spill] sm:$0xff]  ;;  %v13656_v23 = vld [vmem:[#allocation224_spill] sm:$0xff]  ;;  %v13657_v1 = vand.u32 4294901760, %v13618_v55  ;;  %v13661_v46 = vld [vmem:[#allocation225_spill] sm:$0xff] }
 0x2f2   :  { %5994 = vmatpush1.msra.mxu1 %v13648_v9  ;;  %5685 = vmatprep.subr.mxu0 %v13650_v57  ;;  %v10647_v29 = vadd.f32 %v3709_v13, %v3389_v27  ;;  %v10649_v28 = vpop.f32.mrf.mxu0  ;;  %v13658_v9 = vld [vmem:[#allocation88_spill] sm:$0xff] }
 0x2f3   :  { %13651 = vst [vmem:[#allocation57_spill] sm:$0xff] %v10649_v28  ;;  %5996 = vmatprep.subr.mxu1 %v13652_v0  ;;  %5689 = vmatpush1.msra.mxu0 %v13654_v4  ;;  %v10654_v51 = vpop.f32.mrf.mxu1  ;;  %v13659_v27 = vand.u32 4294901760, %v13658_v9  ;;  %v13660_v0 = vld [vmem:[#allocation85_spill] sm:$0xff]  ;;  %v13667_v9 = vld [vmem:[#allocation75_spill] sm:$0xff] }
 0x2f4   :  { %5998 = vmatpush1.msra.mxu1 %v13655_v48  ;;  %5006 = vmatprep.mubr.f32.mxu0 %v13656_v23  ;;  %v3412_v8 = vpop.f32.mrf.mxu0  ;;  %v13663_v48 = vand.u32 4294901760, %v13623_v35  ;;  %v13664_v28 = vld [vmem:[#allocation101_spill] sm:$0xff] }
 0x2f5   :  { %5348 = vmatprep.mubr.f32.mxu1 %v13657_v1  ;;  %5713 = vmatprep.subr.mxu0 %v13659_v27  ;;  %v3413_v13 = vadd.f32 %v3412_v8, %v10070_v53  ;;  %v3717_v47 = vpop.f32.mrf.mxu1  ;;  %v13665_v55 = vand.u32 4294901760, %v13664_v28  ;;  %v13668_v53 = vld [vmem:[#allocation170_spill] sm:$0xff] }
 0x2f6   :  { %6000 = vmatprep.subr.mxu1 %v13660_v0  ;;  %5009 = vmatmul.mubr.f32.gmra.mxu0 %v13661_v46  ;;  %v10665_v57 = vadd.f32 %v3717_v47, %v3397_v3  ;;  %v10667_v4 = vpop.f32.mrf.mxu0  ;;  %v13669_v8 = vand.u32 4294901760, %v13668_v53  ;;  %v13670_v0 = vld [vmem:[#allocation89_spill] sm:$0xff]  ;;  %v13671_v3 = vld [vmem:[#allocation171_spill] sm:$0xff]  ;;  %v13673_v28 = vld [vmem:[#allocation230_spill] sm:$0xff] }
 0x2f7   :  { %13662 = vst [vmem:[#allocation102_spill] sm:$0xff] %v10667_v4  ;;  %5352 = vmatmul.mubr.f32.gmra.mxu1 %v13663_v48  ;;  %5717 = vmatpush2.msra.mxu0 %v13665_v55  ;;  %v10673_v1 = vpop.f32.mrf.mxu1  ;;  %v13672_v47 = vand.u32 4294901760, %v13671_v3  ;;  %v13676_v53 = vld [vmem:[#allocation172_spill] sm:$0xff]  ;;  %v13679_v3 = vld [vmem:[#allocation93_spill] sm:$0xff] }
 0x2f8   :  { %13666 = vst [vmem:[#allocation33_spill] sm:$0xff] %v10673_v1  ;;  %6002 = vmatpush1.msra.mxu1 %v13667_v9  ;;  %5721 = vmatprep.subr.mxu0 %v13669_v8  ;;  %v3420_v27 = vpop.f32.mrf.mxu0  ;;  %v13675_v9 = vand.u32 4294901760, %v13636_v56  ;;  %v13677_v8 = vand.u32 4294901760, %v13676_v53  ;;  %v13685_v53 = vld [vmem:[#allocation3_spill] sm:$0xff] }
 0x2f9   :  { %6004 = vmatprep.subr.mxu1 %v13670_v0  ;;  %5725 = vmatpush2.msra.mxu0 %v13672_v47  ;;  %v3421_v4 = vadd.f32 %v3420_v27, %v10105_v44  ;;  %v3725_v35 = vpop.f32.mrf.mxu1  ;;  %v13680_v44 = vld [vmem:[#allocation231_spill] sm:$0xff] }
 0x2fa   :  { %6006 = vmatpush1.msra.mxu1 %v13425_v36  ;;  %5016 = vmatprep.mubr.f32.mxu0 %v13673_v28  ;;  %v10684_v48 = vadd.f32 %v3725_v35, %v3405_v20  ;;  %v10686_v55 = vpop.f32.mrf.mxu0  ;;  %v13681_v36 = vand.u32 4294901760, %v13644_v14  ;;  %v13682_v20 = vld [vmem:[#allocation175_spill] sm:$0xff] }
 0x2fb   :  { %13674 = vst [vmem:[#allocation43_spill] sm:$0xff] %v10686_v55  ;;  %5360 = vmatprep.mubr.f32.mxu1 %v13675_v9  ;;  %5729 = vmatprep.subr.mxu0 %v13677_v8  ;;  %v10692_v0 = vpop.f32.mrf.mxu1  ;;  %v13683_v47 = vand.u32 4294901760, %v13682_v20  ;;  %v13684_v9 = vld [vmem:[#allocation104_spill] sm:$0xff]  ;;  %v13686_v8 = vand.u32 4294901760, %v13685_v53  ;;  %v13689_v1 = vld [vmem:[#allocation99_spill] sm:$0xff] }
 0x2fc   :  { %13678 = vst [vmem:[#allocation12_spill] sm:$0xff] %v10692_v0  ;;  %6008 = vmatprep.subr.mxu1 %v13679_v3  ;;  %5019 = vmatmul.mubr.f32.gmra.mxu0 %v13680_v44  ;;  %v3428_v27 = vpop.f32.mrf.mxu0  ;;  %v13688_v0 = vld [vmem:[#allocation76_spill] sm:$0xff]  ;;  %v13690_v14 = vand.u32 4294901760, %v13689_v1  ;;  %v13696_v1 = vld [vmem:[#allocation235_spill] sm:$0xff] }
 0x2fd   :  { %5364 = vmatmul.mubr.f32.gmra.mxu1 %v13681_v36  ;;  %5733 = vmatpush2.msra.mxu0 %v13683_v47  ;;  %v3429_v35 = vadd.f32 %v3428_v27, %v10144_v5  ;;  %v3733_v56 = vpop.f32.mrf.mxu1  ;;  %v13691_v20 = vld [vmem:[#allocation112_spill] sm:$0xff]  ;;  %v13692_v5 = vld [vmem:[#allocation234_spill] sm:$0xff]  ;;  %v13693_v47 = vand.u32 4294901760, %v13656_v23 }
 0x2fe   :  { %6010 = vmatpush1.msra.mxu1 %v13684_v9  ;;  %5737 = vmatprep.subr.mxu0 %v13686_v8  ;;  %v10704_v55 = vadd.f32 %v3733_v56, %v3413_v13  ;;  %v10706_v3 = vpop.f32.mrf.mxu0  ;;  %v13694_v9 = vld [vmem:[#allocation108_spill] sm:$0xff] }
 0x2ff   :  { %13687 = vst [vmem:[#allocation34_spill] sm:$0xff] %v10706_v3  ;;  %6012 = vmatprep.subr.mxu1 %v13688_v0  ;;  %5741 = vmatpush2.msra.mxu0 %v13690_v14  ;;  %v10711_v36 = vpop.f32.mrf.mxu1  ;;  %v13695_v13 = vand.u32 4294901760, %v13694_v9  ;;  %v13698_v14 = vand.u32 4294901760, %v13661_v46  ;;  %v13701_v9 = vld [vmem:[#allocation111_spill] sm:$0xff] }
 0x300   :  { %6014 = vmatpush1.msra.mxu1 %v13691_v20  ;;  %5026 = vmatprep.mubr.f32.mxu0 %v13692_v5  ;;  %v3436_v27 = vpop.f32.mrf.mxu0  ;;  %v13699_v20 = vld [vmem:[#allocation120_spill] sm:$0xff] }
 0x301   :  { %5372 = vmatprep.mubr.f32.mxu1 %v13693_v47  ;;  %5745 = vmatprep.subr.mxu0 %v13695_v13  ;;  %v3437_v56 = vadd.f32 %v3436_v27, %v10186_v50  ;;  %v3741_v53 = vpop.f32.mrf.mxu1  ;;  %v13700_v23 = vand.u32 4294901760, %v13699_v20  ;;  %v13702_v50 = vld [vmem:[#allocation126_spill] sm:$0xff]  ;;  %v13704_v13 = vld [vmem:[#allocation167_spill] sm:$0xff] }
 0x302   :  { %6036 = vmatprep.subr.mxu1 %v13445_v52  ;;  %5029 = vmatmul.mubr.f32.gmra.mxu0 %v13696_v1  ;;  %v10722_v0 = vadd.f32 %v3741_v53, %v3421_v4  ;;  %v10724_v8 = vpop.f32.mrf.mxu0  ;;  %v13703_v27 = vand.u32 4294901760, %v13702_v50  ;;  %v13705_v4 = vld [vmem:[#allocation127_spill] sm:$0xff]  ;;  %v13708_v20 = vld [vmem:[#allocation242_spill] sm:$0xff]  ;;  %v13711_v50 = vld [vmem:[#allocation124_spill] sm:$0xff] }
 0x303   :  { %13697 = vst [vmem:[#allocation19_spill] sm:$0xff] %v10724_v8  ;;  %5376 = vmatmul.mubr.f32.gmra.mxu1 %v13698_v14  ;;  %5749 = vmatpush2.msra.mxu0 %v13700_v23  ;;  %v10730_v47 = vpop.f32.mrf.mxu1  ;;  %v13706_v53 = vand.u32 4294901760, %v13705_v4  ;;  %v13707_v14 = vld [vmem:[#allocation117_spill] sm:$0xff]  ;;  %v13714_v4 = vld [vmem:[#allocation92_spill] sm:$0xff] }
 0x304   :  { %6038 = vmatpush2.msra.mxu1 %v13701_v9  ;;  %5753 = vmatprep.subr.mxu0 %v13703_v27  ;;  %v3444_v52 = vpop.f32.mrf.mxu0  ;;  %v13710_v9 = vand.u32 4294901760, %v13673_v28  ;;  %v13716_v28 = vand.u32 4294901760, %v13692_v5 }
 0x305   :  { %6040 = vmatprep.subr.mxu1 %v13704_v13  ;;  %5757 = vmatpush2.msra.mxu0 %v13706_v53  ;;  %v3445_v8 = vadd.f32 %v3444_v52, %v10223_v45  ;;  %v3749_v46 = vpop.f32.mrf.mxu1  ;;  %v13712_v13 = vld [vmem:[#allocation243_spill] sm:$0xff]  ;;  %v13713_v45 = vand.u32 4294901760, %v13680_v44  ;;  %v13715_v53 = vld [vmem:[#allocation245_spill] sm:$0xff] }
 0x306   :  { %6042 = vmatpush2.msra.mxu1 %v13707_v14  ;;  %5036 = vmatprep.mubr.f32.mxu0 %v13708_v20  ;;  %v10741_v23 = vadd.f32 %v3749_v46, %v3429_v35  ;;  %v10743_v3 = vpop.f32.mrf.mxu0 }
 0x307   :  { %13709 = vst [vmem:[#allocation63_spill] sm:$0xff] %v10743_v3  ;;  %5384 = vmatprep.mubr.f32.mxu1 %v13710_v9  ;;  %6044 = vmatprep.subr.mxu1 %v13711_v50  ;;  %v10748_v27 = vpop.f32.mrf.mxu1  ;;  %v13718_v50 = vld [vmem:[#allocation173_spill] sm:$0xff] }
 0x308   :  { %5039 = vmatmul.mubr.f32.gmra.mxu0 %v13712_v13  ;;  %5388 = vmatmul.mubr.f32.gmra.mxu1 %v13713_v45  ;;  %v3452_v52 = vpop.f32.mrf.mxu0  ;;  %v13719_v45 = vld [vmem:[#allocation176_spill] sm:$0xff] }
 0x309   :  { %6046 = vmatpush2.msra.mxu1 %v13714_v4  ;;  %5046 = vmatprep.mubr.f32.mxu0 %v13715_v53  ;;  %v3453_v35 = vadd.f32 %v3452_v52, %v10258_v19  ;;  %v3757_v46 = vpop.f32.mrf.mxu1  ;;  %v13720_v4 = vld [vmem:[#allocation249_spill] sm:$0xff]  ;;  %v13721_v19 = vand.u32 4294901760, %v13696_v1  ;;  %v13727_v1 = vld [vmem:[#allocation100_spill] sm:$0xff] }
 0x30a   :  { %6048 = vmatprep.subr.mxu1 %v13471_v17  ;;  %5396 = vmatprep.mubr.f32.mxu1 %v13716_v28  ;;  %v10759_v14 = vadd.f32 %v3757_v46, %v3437_v56  ;;  %v10761_v9 = vpop.f32.mrf.mxu0  ;;  %v13722_v17 = vld [vmem:[#allocation250_spill] sm:$0xff]  ;;  %v13723_v52 = vld [vmem:[#allocation177_spill] sm:$0xff]  ;;  %v13724_v46 = vand.u32 4294901760, %v13708_v20 }
 0x30b   :  { %13717 = vst [vmem:[#allocation29_spill] sm:$0xff] %v10761_v9  ;;  %6050 = vmatpush2.msra.mxu1 %v13718_v50  ;;  %v10764_v44 = vpop.f32.mrf.mxu1 }
 0x30c   :  { %6052 = vmatprep.subr.mxu1 %v13719_v45  ;;  %5049 = vmatmul.mubr.f32.gmra.mxu0 %v13720_v4  ;;  %v3460_v3 = vpop.f32.mrf.mxu0 }
 0x30d   :  { %5400 = vmatmul.mubr.f32.gmra.mxu1 %v13721_v19  ;;  %5056 = vmatprep.mubr.f32.mxu0 %v13722_v17  ;;  %v3461_v5 = vadd.f32 %v3460_v3, %v10292_v62  ;;  %v3765_v56 = vpop.f32.mrf.mxu1  ;;  %v13728_v19 = vld [vmem:[#allocation253_spill] sm:$0xff]  ;;  %v13729_v62 = vand.u32 4294901760, %v13712_v13  ;;  %v13735_v13 = vand.u32 4294901760, %v13720_v4 }
 0x30e   :  { %6054 = vmatpush2.msra.mxu1 %v13723_v52  ;;  %5408 = vmatprep.mubr.f32.mxu1 %v13724_v46  ;;  %v10775_v28 = vadd.f32 %v3765_v56, %v3445_v8  ;;  %v10777_v50 = vpop.f32.mrf.mxu0  ;;  %v13730_v3 = vld [vmem:[#allocation81_spill] sm:$0xff]  ;;  %v13731_v56 = vand.u32 4294901760, %v13715_v53  ;;  %v13737_v53 = vand.u32 4294901760, %v13722_v17  ;;  %v13741_v4 = vand.u32 4294901760, %v13728_v19 }
 0x30f   :  { %13725 = vst [vmem:[#allocation36_spill] sm:$0xff] %v10777_v50  ;;  %6056 = vmatprep.subr.mxu1 %v13483_v43  ;;  %v10780_v45 = vpop.f32.mrf.mxu1  ;;  %v13743_v17 = vand.u32 4294901760, %v13730_v3 }
 0x310   :  { %13726 = vst [vmem:[#allocation69_spill] sm:$0xff] %v10780_v45  ;;  %6058 = vmatpush2.msra.mxu1 %v13727_v1  ;;  %5059 = vmatmul.mubr.f32.gmra.mxu0 %v13728_v19  ;;  %v3468_v9 = vpop.f32.mrf.mxu0  ;;  %v13734_v1 = vld [vmem:[#allocation258_spill] sm:$0xff] }
 0x311   :  { %5412 = vmatmul.mubr.f32.gmra.mxu1 %v13729_v62  ;;  %5066 = vmatprep.mubr.f32.mxu0 %v13730_v3  ;;  %v3469_v20 = vadd.f32 %v3468_v9, %v10326_v39  ;;  %v3773_v8 = vpop.f32.mrf.mxu1  ;;  %v13736_v62 = vld [vmem:[#allocation259_spill] sm:$0xff]  ;;  %v13747_v19 = vand.u32 4294901760, %v13734_v1 }
 0x312   :  { %5420 = vmatprep.mubr.f32.mxu1 %v13731_v56  ;;  %v10790_v52 = vadd.f32 %v3773_v8, %v3453_v35  ;;  %v10792_v43 = vpop.f32.mrf.mxu0  ;;  %v13749_v3 = vand.u32 4294901760, %v13736_v62 }
 0x313   :  { %13732 = vst [vmem:[#allocation24_spill] sm:$0xff] %v10792_v43  ;;  %v10794_v46 = vpop.f32.mrf.mxu1  ;;  %v13740_v43 = vld [vmem:[#allocation264_spill] sm:$0xff] }
 0x314   :  { %13733 = vst [vmem:[#allocation197_spill] sm:$0xff] %v10794_v46  ;;  %5069 = vmatmul.mubr.f32.gmra.mxu0 %v13734_v1  ;;  %v3476_v50 = vpop.f32.mrf.mxu0  ;;  %v13753_v1 = vand.u32 4294901760, %v13740_v43 }
 0x315   :  { %5424 = vmatmul.mubr.f32.gmra.mxu1 %v13735_v13  ;;  %5076 = vmatprep.mubr.f32.mxu0 %v13736_v62  ;;  %v3477_v39 = vadd.f32 %v3476_v50, %v10360_v31  ;;  %v3781_v9 = vpop.f32.mrf.mxu1  ;;  %v13742_v13 = vld [vmem:[#allocation9_spill] sm:$0xff] }
 0x316   :  { %5432 = vmatprep.mubr.f32.mxu1 %v13737_v53  ;;  %v10803_v35 = vadd.f32 %v3781_v9, %v3461_v5  ;;  %v10805_v8 = vpop.f32.mrf.mxu0  ;;  %v13746_v53 = vld [vmem:[#allocation269_spill] sm:$0xff]  ;;  %v13755_v62 = vand.u32 4294901760, %v13742_v13 }
 0x317   :  { %13738 = vst [vmem:[#allocation147_spill] sm:$0xff] %v10805_v8  ;;  %v10807_v56 = vpop.f32.mrf.mxu1 }
 0x318   :  { %13739 = vst [vmem:[#allocation55_spill] sm:$0xff] %v10807_v56  ;;  %5079 = vmatmul.mubr.f32.gmra.mxu0 %v13740_v43  ;;  %v3922_v46 = vpop.f32.mrf.mxu0  ;;  %v13760_v43 = vld [vmem:[#allocation280_spill] sm:$0xff] }
 0x319   :  { %5436 = vmatmul.mubr.f32.gmra.mxu1 %v13741_v4  ;;  %5086 = vmatprep.mubr.f32.mxu0 %v13742_v13  ;;  %v3789_v45 = vpop.f32.mrf.mxu1  ;;  %v3923_v31 = vadd.f32 %v3922_v46, %v10390_v33  ;;  %v13748_v4 = vld [vmem:[#allocation271_spill] sm:$0xff] }
 0x31a   :  { %5444 = vmatprep.mubr.f32.mxu1 %v13743_v17  ;;  %v10816_v5 = vadd.f32 %v3789_v45, %v3469_v20  ;;  %v10818_v50 = vpop.f32.mrf.mxu0  ;;  %v13752_v17 = vld [vmem:[#allocation276_spill] sm:$0xff] }
 0x31b   :  { %13744 = vst [vmem:[#allocation45_spill] sm:$0xff] %v10818_v50  ;;  %v10820_v9 = vpop.f32.mrf.mxu1 }
 0x31c   :  { %13745 = vst [vmem:[#allocation52_spill] sm:$0xff] %v10820_v9  ;;  %5089 = vmatmul.mubr.f32.gmra.mxu0 %v13746_v53  ;;  %v3938_v8 = vpop.f32.mrf.mxu0 }
 0x31d   :  { %5448 = vmatmul.mubr.f32.gmra.mxu1 %v13747_v19  ;;  %5096 = vmatprep.mubr.f32.mxu0 %v13748_v4  ;;  %v3797_v56 = vpop.f32.mrf.mxu1  ;;  %v3939_v33 = vadd.f32 %v3938_v8, %v10422_v59  ;;  %v13754_v19 = vld [vmem:[#allocation277_spill] sm:$0xff] }
 0x31e   :  { %5456 = vmatprep.mubr.f32.mxu1 %v13749_v3  ;;  %v10829_v45 = vadd.f32 %v3797_v56, %v3477_v39  ;;  %v10831_v20 = vpop.f32.mrf.mxu0  ;;  %v13758_v3 = vld [vmem:[#allocation279_spill] sm:$0xff] }
 0x31f   :  { %13750 = vst [vmem:[#allocation48_spill] sm:$0xff] %v10831_v20  ;;  %v10833_v46 = vpop.f32.mrf.mxu1 }
 0x320   :  { %13751 = vst [vmem:[#allocation74_spill] sm:$0xff] %v10833_v46  ;;  %5099 = vmatmul.mubr.f32.gmra.mxu0 %v13752_v17  ;;  %v3954_v50 = vpop.f32.mrf.mxu0  ;;  %v13759_v46 = vand.u32 4294901760, %v13746_v53  ;;  %v13765_v53 = vand.u32 4294901760, %v13752_v17 }
 0x321   :  { %5460 = vmatmul.mubr.f32.gmra.mxu1 %v13753_v1  ;;  %5106 = vmatprep.mubr.f32.mxu0 %v13754_v19  ;;  %v3955_v9 = vadd.f32 %v3954_v50, %v10444_v30  ;;  %v4583_v59 = vpop.f32.mrf.mxu1  ;;  %v13761_v1 = vand.u32 4294901760, %v13748_v4  ;;  %v13767_v4 = vld [vmem:[#allocation25_spill] sm:$0xff] }
 0x322   :  { %5468 = vmatprep.mubr.f32.mxu1 %v13755_v62  ;;  %v10842_v39 = vadd.f32 %v4583_v59, %v3923_v31  ;;  %v10844_v8 = vpop.f32.mrf.mxu0  ;;  %v13762_v31 = vld [vmem:[#allocation11_spill] sm:$0xff]  ;;  %v13763_v59 = vld [vmem:[#allocation14_spill] sm:$0xff] }
 0x323   :  { %13756 = vst [vmem:[#allocation139_spill] sm:$0xff] %v10844_v8  ;;  %v10846_v56 = vpop.f32.mrf.mxu1  ;;  %v1283_v62 = vadd.f32 %v13763_v59, %v13762_v31  ;;  %v13771_v59 = vld [vmem:[#allocation128_spill] sm:$0xff] }
 0x324   :  { %13757 = vst [vmem:[#allocation200_spill] sm:$0xff] %v10846_v56  ;;  %5109 = vmatmul.mubr.f32.gmra.mxu0 %v13758_v3 }
 0x325   :  { %5472 = vmatmul.mubr.f32.gmra.mxu1 %v13759_v46  ;;  %5116 = vmatprep.mubr.f32.mxu0 %v13760_v43 }
 0x326   :  { %5480 = vmatprep.mubr.f32.mxu1 %v13761_v1  ;;  %v3970_v30 = vpop.f32.mrf.mxu0  ;;  %v2020_v1 = vadd.f32 %v13767_v4, %v1283_v62  ;;  %v13773_v62 = vld [vmem:[#allocation184_spill] sm:$0xff] }
 0x327   :  { %v3971_v13 = vadd.f32 %v3970_v30, %v10456_v16  ;;  %v4591_v50 = vpop.f32.mrf.mxu1  ;;  %v13768_v16 = vand.u32 4294901760, %v13754_v19  ;;  %v13769_v30 = vld [vmem:[#allocation157_spill] sm:$0xff]  ;;  %v13774_v19 = vand.u32 4294901760, %v13760_v43 }
 0x328   :  { %5119 = vmatmul.mubr.f32.gmra.mxu0 %v10309_v21  ;;  %v10858_v56 = vadd.f32 %v4591_v50, %v3939_v33  ;;  %v3972_v8 = vpop.f32.mrf.mxu0  ;;  %v2413_v20 = vadd.f32 %v13769_v30, %v2020_v1  ;;  %v13770_v33 = vand.u32 4294901760, %v13758_v3  ;;  %v13775_v3 = vld [vmem:[#allocation8_spill] sm:$0xff] }
 0x329   :  { %5484 = vmatmul.mubr.f32.gmra.mxu1 %v13765_v53  ;;  %5126 = vmatprep.mubr.f32.mxu0 %v10312_v24  ;;  %v10863_v46 = vpop.f32.mrf.mxu1  ;;  %v13772_v53 = vld [vmem:[#allocation123_spill] sm:$0xff] }
 0x32a   :  { %13764 = vst [vmem:[#allocation78_spill] sm:$0xff] %v10858_v56  ;;  %13766 = vst [vmem:[#allocation50_spill] sm:$0xff] %v10863_v46  ;;  %5492 = vmatprep.mubr.f32.mxu1 %v13768_v16  ;;  %v1299_v56 = vadd.f32 %v13772_v53, %v13771_v59  ;;  %v2790_v4 = vadd.f32 %v13773_v62, %v2413_v20  ;;  %v13777_v20 = vld [vmem:[#allocation162_spill] sm:$0xff] }
 0x32b   :  { %v13779_v53 = vld [vmem:[#allocation42_spill] sm:$0xff] }
 0x32c   :  { %5129 = vmatmul.mubr.f32.gmra.mxu0 %v10337_v49  ;;  %v3986_v31 = vpop.f32.mrf.mxu0  ;;  %v3319_v46 = vadd.f32 %v10424_v40, %v2790_v4  ;;  %v13780_v40 = vld [vmem:[#allocation125_spill] sm:$0xff]  ;;  %v13781_v4 = vld [vmem:[#allocation191_spill] sm:$0xff] }
 0x32d   :  { %5496 = vmatmul.mubr.f32.gmra.mxu1 %v13770_v33  ;;  %5136 = vmatprep.mubr.f32.mxu0 %v10350_v10  ;;  %v3987_v17 = vadd.f32 %v3986_v31, %v10468_v11  ;;  %v4599_v50 = vpop.f32.mrf.mxu1  ;;  %v2028_v33 = vadd.f32 %v13775_v3, %v1299_v56  ;;  %v13776_v11 = vand.u32 4294901760, %v10309_v21  ;;  %v1315_v62 = vadd.f32 %v13780_v40, %v13779_v53  ;;  %v13788_v53 = vld [vmem:[#allocation10_spill] sm:$0xff] }
 0x32e   :  { %5504 = vmatprep.mubr.f32.mxu1 %v13774_v19  ;;  %v10879_v1 = vadd.f32 %v4599_v50, %v3955_v9  ;;  %v3988_v16 = vpop.f32.mrf.mxu0  ;;  %v3640_v43 = vadd.f32 %v10461_v61, %v3319_v46  ;;  %v13778_v9 = vand.u32 4294901760, %v10312_v24  ;;  %v13782_v61 = vand.u32 4294901760, %v10337_v49  ;;  %v13783_v46 = vld [vmem:[#allocation129_spill] sm:$0xff] }
 0x32f   :  { %v10881_v30 = vpop.f32.mrf.mxu1  ;;  %v2423_v31 = vadd.f32 %v13777_v20, %v2028_v33  ;;  %v13784_v20 = vand.u32 4294901760, %v10350_v10  ;;  %v13789_v10 = vld [vmem:[#allocation31_spill] sm:$0xff] }
 0x330   :  { %5139 = vmatmul.mubr.f32.gmra.mxu0 %v10374_v60  ;;  %v3973_v21 = vadd.f32 %v3972_v8, %v3640_v43  ;;  %v13786_v43 = vand.u32 4294901760, %v10374_v60  ;;  %v1331_v40 = vadd.f32 %v13789_v10, %v13788_v53  ;;  %v13792_v60 = vld [vmem:[#allocation41_spill] sm:$0xff]  ;;  %v13800_v10 = vld [vmem:[#allocation196_spill] sm:$0xff] }
 0x331   :  { %5508 = vmatmul.mubr.f32.gmra.mxu1 %v13776_v11  ;;  %5146 = vmatprep.mubr.f32.mxu0 %v10381_v58  ;;  %v2802_v19 = vadd.f32 %v13781_v4, %v2423_v31 }
 0x332   :  { %5516 = vmatprep.mubr.f32.mxu1 %v13778_v9  ;;  %v4002_v50 = vpop.f32.mrf.mxu0  ;;  %v13785_v9 = vld [vmem:[#allocation182_spill] sm:$0xff] }
 0x333   :  { %v4003_v59 = vadd.f32 %v4002_v50, %v10488_v42  ;;  %v4607_v56 = vpop.f32.mrf.mxu1  ;;  %v2036_v42 = vadd.f32 %v13783_v46, %v1315_v62  ;;  %v3327_v11 = vadd.f32 %v10446_v32, %v2802_v19  ;;  %v13787_v50 = vld [vmem:[#allocation169_spill] sm:$0xff]  ;;  %v13790_v62 = vld [vmem:[#allocation194_spill] sm:$0xff]  ;;  %v13791_v19 = vand.u32 4294901760, %v10381_v58 }
 0x334   :  { %5149 = vmatmul.mubr.f32.gmra.mxu0 %v10401_v26  ;;  %v10898_v3 = vadd.f32 %v4607_v56, %v3971_v13  ;;  %v4004_v33 = vpop.f32.mrf.mxu0  ;;  %v2044_v46 = vadd.f32 %v13792_v60, %v1331_v40  ;;  %v13796_v58 = vld [vmem:[#allocation189_spill] sm:$0xff] }
 0x335   :  { %5520 = vmatmul.mubr.f32.gmra.mxu1 %v13782_v61  ;;  %5156 = vmatprep.mubr.f32.mxu0 %v10411_v54  ;;  %v4609_v24 = vpop.f32.mrf.mxu1  ;;  %v2433_v8 = vadd.f32 %v13785_v9, %v2036_v42  ;;  %v3648_v13 = vadd.f32 %v10472_v41, %v3327_v11  ;;  %v13793_v11 = vld [vmem:[#allocation183_spill] sm:$0xff]  ;;  %v13795_v9 = vld [vmem:[#allocation186_spill] sm:$0xff] }
 0x336   :  { %5528 = vmatprep.mubr.f32.mxu1 %v13784_v20  ;;  %v10907_v31 = vadd.f32 %v4609_v24, %v3973_v21  ;;  %v13794_v20 = vand.u32 4294901760, %v10401_v26  ;;  %v13801_v26 = vld [vmem:[#allocation188_spill] sm:$0xff] }
 0x337   :  { %v2814_v4 = vadd.f32 %v13790_v62, %v2433_v8  ;;  %v3989_v41 = vadd.f32 %v3988_v16, %v3648_v13  ;;  %v2443_v8 = vadd.f32 %v13796_v58, %v2044_v46  ;;  %v13797_v16 = vand.u32 4294901760, %v10411_v54  ;;  %v13803_v54 = vld [vmem:[#allocation190_spill] sm:$0xff] }
 0x338   :  { %5159 = vmatmul.mubr.f32.gmra.mxu0 %v10420_v2  ;;  %v4018_v49 = vpop.f32.mrf.mxu0 }
 0x339   :  { %5532 = vmatmul.mubr.f32.gmra.mxu1 %v13786_v43  ;;  %5759 = vmatprep.mubr.f32.mxu0 %v13787_v50  ;;  %v4019_v56 = vadd.f32 %v4018_v49, %v10515_v38  ;;  %v4615_v32 = vpop.f32.mrf.mxu1  ;;  %v3335_v42 = vadd.f32 %v10458_v18, %v2814_v4  ;;  %v13798_v43 = vld [vmem:[#allocation47_spill] sm:$0xff]  ;;  %v2826_v40 = vadd.f32 %v13800_v10, %v2443_v8  ;;  %v13811_v10 = vld [vmem:[#allocation49_spill] sm:$0xff] }
 0x33a   :  { %5540 = vmatprep.mubr.f32.mxu1 %v13791_v19  ;;  %v10921_v21 = vadd.f32 %v4615_v32, %v3987_v17  ;;  %v4020_v61 = vpop.f32.mrf.mxu0  ;;  %v13799_v32 = vld [vmem:[#allocation16_spill] sm:$0xff] }
 0x33b   :  { %v4617_v24 = vpop.f32.mrf.mxu1  ;;  %v3656_v17 = vadd.f32 %v10495_v7, %v3335_v42  ;;  %v1347_v53 = vadd.f32 %v13799_v32, %v13798_v43  ;;  %v13802_v7 = vand.u32 4294901760, %v10420_v2  ;;  %v3343_v60 = vadd.f32 %v10470_v34, %v2826_v40  ;;  %v13805_v42 = vld [vmem:[#allocation133_spill] sm:$0xff]  ;;  %v13807_v2 = vld [vmem:[#allocation195_spill] sm:$0xff] }
 0x33c   :  { %5761 = vmatmul.mubr.f32.vlgmr.msra.gmra.mxu0 %v13793_v11  ;;  %v10926_v38 = vadd.f32 %v4617_v24, %v3989_v41  ;;  %v13804_v24 = vld [vmem:[#allocation18_spill] sm:$0xff]  ;;  %v13809_v34 = vld [vmem:[#allocation23_spill] sm:$0xff] }
 0x33d   :  { %5544 = vmatmul.mubr.f32.gmra.mxu1 %v13794_v20  ;;  %5767 = vmatprep.mubr.f32.mxu0 %v13795_v9  ;;  %v4005_v62 = vadd.f32 %v4004_v33, %v3656_v17  ;;  %v13806_v33 = vld [vmem:[#allocation193_spill] sm:$0xff] }
 0x33e   :  { %5552 = vmatprep.mubr.f32.mxu1 %v13797_v16  ;;  %v4034_v13 = vpop.f32.mrf.mxu0  ;;  %v13808_v16 = vld [vmem:[#allocation132_spill] sm:$0xff] }
 0x33f   :  { %v4035_v49 = vadd.f32 %v4034_v13, %v10540_v15  ;;  %v4623_v18 = vpop.f32.mrf.mxu1  ;;  %v2052_v15 = vadd.f32 %v13804_v24, %v1347_v53  ;;  %v1363_v13 = vadd.f32 %v13809_v34, %v13808_v16 }
 0x340   :  { %5769 = vmatmul.mubr.f32.gmra.mxu0 %v13801_v26  ;;  %v10940_v4 = vadd.f32 %v4623_v18, %v4003_v59  ;;  %v4036_v19 = vpop.f32.mrf.mxu0  ;;  %v3664_v59 = vadd.f32 %v10522_v37, %v3343_v60 }
 0x341   :  { %5556 = vmatmul.mubr.f32.gmra.mxu1 %v13802_v7  ;;  %5775 = vmatprep.mubr.f32.mxu0 %v13803_v54  ;;  %v4625_v41 = vpop.f32.mrf.mxu1  ;;  %v2453_v20 = vadd.f32 %v13805_v42, %v2052_v15  ;;  %v2060_v40 = vadd.f32 %v13811_v10, %v1363_v13  ;;  %v13813_v7 = vld [vmem:[#allocation198_spill] sm:$0xff]  ;;  %v13816_v42 = vld [vmem:[#allocation137_spill] sm:$0xff]  ;;  %v13820_v13 = vld [vmem:[#allocation203_spill] sm:$0xff] }
 0x342   :  { %6060 = vmatprep.mubr.f32.mxu1 %v13787_v50  ;;  %v10948_v46 = vadd.f32 %v4625_v41, %v4005_v62  ;;  %v13810_v50 = vld [vmem:[#allocation204_spill] sm:$0xff]  ;;  %v4021_v43 = vadd.f32 %v4020_v61, %v3664_v59  ;;  %v13812_v62 = vld [vmem:[#allocation119_spill] sm:$0xff]  ;;  %v13814_v41 = vld [vmem:[#allocation110_spill] sm:$0xff] }
 0x343   :  { %v2838_v18 = vadd.f32 %v13810_v50, %v2453_v20  ;;  %v2463_v24 = vadd.f32 %v13814_v41, %v2060_v40  ;;  %v13818_v59 = vld [vmem:[#allocation210_spill] sm:$0xff]  ;;  %v13821_v50 = vld [vmem:[#allocation59_spill] sm:$0xff]  ;;  %v13824_v40 = vld [vmem:[#allocation37_spill] sm:$0xff] }
 0x344   :  { %5777 = vmatmul.mubr.f32.gmra.mxu0 %v13806_v33  ;;  %v4050_v58 = vpop.f32.mrf.mxu0  ;;  %v13823_v10 = vld [vmem:[#allocation51_spill] sm:$0xff]  ;;  %v13826_v41 = vld [vmem:[#allocation21_spill] sm:$0xff] }
 0x345   :  { %6062 = vmatmul.mubr.f32.vlgmr.msra.gmra.mxu1 %v13793_v11  ;;  %5783 = vmatprep.mubr.f32.mxu0 %v13807_v2  ;;  %v4051_v8 = vadd.f32 %v4050_v58, %v10565_v22  ;;  %v4631_v17 = vpop.f32.mrf.mxu1  ;;  %v3351_v11 = vadd.f32 %v10490_v63, %v2838_v18  ;;  %v13817_v63 = vld [vmem:[#allocation22_spill] sm:$0xff]  ;;  %v2850_v58 = vadd.f32 %v13818_v59, %v2463_v24 }
 0x346   :  { %6068 = vmatprep.mubr.f32.mxu1 %v13795_v9  ;;  %v10960_v32 = vadd.f32 %v4631_v17, %v4019_v56  ;;  %v4052_v37 = vpop.f32.mrf.mxu0  ;;  %v13815_v9 = vld [vmem:[#allocation136_spill] sm:$0xff]  ;;  %v1379_v20 = vadd.f32 %v13817_v63, %v13816_v42  ;;  %v13819_v17 = vld [vmem:[#allocation199_spill] sm:$0xff]  ;;  %v13830_v63 = vld [vmem:[#allocation217_spill] sm:$0xff] }
 0x347   :  { %v4633_v53 = vpop.f32.mrf.mxu1  ;;  %v3672_v61 = vadd.f32 %v13815_v9, %v3351_v11  ;;  %v1395_v11 = vadd.f32 %v13824_v40, %v13823_v10  ;;  %v13827_v9 = vld [vmem:[#allocation205_spill] sm:$0xff]  ;;  %v13834_v10 = vld [vmem:[#allocation40_spill] sm:$0xff] }
 0x348   :  { %5785 = vmatmul.mubr.f32.gmra.mxu0 %v13812_v62  ;;  %v10965_v22 = vadd.f32 %v4633_v53, %v4021_v43  ;;  %v2068_v18 = vadd.f32 %v13821_v50, %v1379_v20  ;;  %v13831_v50 = vld [vmem:[#allocation35_spill] sm:$0xff] }
 0x349   :  { %6070 = vmatmul.mubr.f32.gmra.mxu1 %v13801_v26  ;;  %5791 = vmatprep.mubr.f32.mxu0 %v13813_v7  ;;  %v4037_v26 = vadd.f32 %v4036_v19, %v3672_v61  ;;  %v13825_v19 = vld [vmem:[#allocation201_spill] sm:$0xff]  ;;  %v13828_v61 = vld [vmem:[#allocation208_spill] sm:$0xff] }
 0x34a   :  { %6076 = vmatprep.mubr.f32.mxu1 %v13803_v54  ;;  %v4066_v56 = vpop.f32.mrf.mxu0 }
 0x34b   :  { %v4067_v15 = vadd.f32 %v4066_v56, %v10590_v6  ;;  %v4639_v60 = vpop.f32.mrf.mxu1  ;;  %v13822_v6 = vld [vmem:[#allocation28_spill] sm:$0xff] }
 0x34c   :  { %5793 = vmatmul.mubr.f32.gmra.mxu0 %v13819_v17  ;;  %v10977_v16 = vadd.f32 %v4639_v60, %v4035_v49  ;;  %v4068_v34 = vpop.f32.mrf.mxu0  ;;  %v3359_v43 = vadd.f32 %v13822_v6, %v2850_v58  ;;  %v2473_v49 = vadd.f32 %v13825_v19, %v2068_v18  ;;  %v13832_v18 = vld [vmem:[#allocation27_spill] sm:$0xff] }
 0x34d   :  { %6078 = vmatmul.mubr.f32.gmra.mxu1 %v13806_v33  ;;  %5799 = vmatprep.mubr.f32.mxu0 %v13820_v13  ;;  %v4641_v54 = vpop.f32.mrf.mxu1  ;;  %v1411_v6 = vadd.f32 %v13832_v18, %v13831_v50  ;;  %v13844_v18 = vld [vmem:[#allocation216_spill] sm:$0xff] }
 0x34e   :  { %6084 = vmatprep.mubr.f32.mxu1 %v13807_v2  ;;  %v10984_v53 = vadd.f32 %v4641_v54, %v4037_v26  ;;  %v3680_v24 = vadd.f32 %v13826_v41, %v3359_v43  ;;  %v13829_v2 = vld [vmem:[#allocation68_spill] sm:$0xff]  ;;  %v2862_v20 = vadd.f32 %v13830_v63, %v2473_v49 }
 0x34f   :  { %v2076_v42 = vadd.f32 %v13829_v2, %v1395_v11  ;;  %v13836_v11 = vld [vmem:[#allocation214_spill] sm:$0xff] }
 0x350   :  { %5801 = vmatmul.mubr.f32.gmra.mxu0 %v13827_v9  ;;  %v4082_v33 = vpop.f32.mrf.mxu0  ;;  %v4053_v59 = vadd.f32 %v4052_v37, %v3680_v24  ;;  %v3367_v40 = vadd.f32 %v13834_v10, %v2862_v20  ;;  %v13837_v37 = vld [vmem:[#allocation151_spill] sm:$0xff] }
 0x351   :  { %6086 = vmatmul.mubr.f32.gmra.mxu1 %v13812_v62  ;;  %5807 = vmatprep.mubr.f32.mxu0 %v13828_v61  ;;  %v4083_v56 = vadd.f32 %v4082_v33, %v10608_v12  ;;  %v4647_v60 = vpop.f32.mrf.mxu1  ;;  %v13833_v62 = vld [vmem:[#allocation209_spill] sm:$0xff]  ;;  %v13835_v12 = vld [vmem:[#allocation211_spill] sm:$0xff]  ;;  %v13839_v33 = vld [vmem:[#allocation148_spill] sm:$0xff] }
 0x352   :  { %6092 = vmatprep.mubr.f32.mxu1 %v13813_v7  ;;  %v10997_v58 = vadd.f32 %v4647_v60, %v4051_v8  ;;  %v4084_v26 = vpop.f32.mrf.mxu0  ;;  %v2483_v43 = vadd.f32 %v13833_v62, %v2076_v42  ;;  %v2084_v8 = vadd.f32 %v13837_v37, %v1411_v6  ;;  %v13838_v7 = vld [vmem:[#allocation222_spill] sm:$0xff]  ;;  %v3688_v41 = vadd.f32 %v10597_v25, %v3367_v40  ;;  %v13840_v60 = vld [vmem:[#allocation44_spill] sm:$0xff]  ;;  %v13841_v42 = vld [vmem:[#allocation17_spill] sm:$0xff] }
 0x353   :  { %v4649_v54 = vpop.f32.mrf.mxu1  ;;  %v1427_v2 = vadd.f32 %v13840_v60, %v13839_v33  ;;  %v13845_v25 = vld [vmem:[#allocation79_spill] sm:$0xff]  ;;  %v13847_v37 = vld [vmem:[#allocation229_spill] sm:$0xff] }
 0x354   :  { %5809 = vmatmul.mubr.f32.gmra.mxu0 %v13835_v12  ;;  %v11004_v19 = vadd.f32 %v4649_v54, %v4053_v59  ;;  %v2874_v49 = vadd.f32 %v13838_v7, %v2483_v43  ;;  %v13842_v59 = vld [vmem:[#allocation215_spill] sm:$0xff]  ;;  %v4069_v6 = vadd.f32 %v4068_v34, %v3688_v41  ;;  %v13849_v34 = vld [vmem:[#allocation77_spill] sm:$0xff] }
 0x355   :  { %6094 = vmatmul.mubr.f32.gmra.mxu1 %v13819_v17  ;;  %5815 = vmatprep.mubr.f32.mxu0 %v13836_v11  ;;  %v2493_v54 = vadd.f32 %v13842_v59, %v2084_v8  ;;  %v13843_v17 = vld [vmem:[#allocation192_spill] sm:$0xff]  ;;  %v13846_v10 = vld [vmem:[#allocation71_spill] sm:$0xff]  ;;  %v13852_v59 = vld [vmem:[#allocation13_spill] sm:$0xff] }
 0x356   :  { %6100 = vmatprep.mubr.f32.mxu1 %v13820_v13  ;;  %v4098_v24 = vpop.f32.mrf.mxu0  ;;  %v4655_v20 = vpop.f32.mrf.mxu1  ;;  %v3375_v50 = vadd.f32 %v13843_v17, %v2874_v49  ;;  %v2092_v40 = vadd.f32 %v13846_v10, %v1427_v2  ;;  %v13853_v2 = vld [vmem:[#allocation223_spill] sm:$0xff] }
 0x357   :  { %v4099_v63 = vadd.f32 %v4098_v24, %v13841_v42  ;;  %v11018_v62 = vadd.f32 %v4655_v20, %v4067_v15  ;;  %v2886_v7 = vadd.f32 %v13847_v37, %v2493_v54  ;;  %v13848_v24 = vld [vmem:[#allocation15_spill] sm:$0xff]  ;;  %v13850_v15 = vld [vmem:[#allocation54_spill] sm:$0xff]  ;;  %v13851_v42 = vld [vmem:[#allocation221_spill] sm:$0xff] }
 0x358   :  { %5817 = vmatmul.mubr.f32.gmra.mxu0 %v13844_v18  ;;  %v4100_v43 = vpop.f32.mrf.mxu0  ;;  %v4657_v13 = vpop.f32.mrf.mxu1  ;;  %v3696_v33 = vadd.f32 %v13848_v24, %v3375_v50  ;;  %v1443_v41 = vadd.f32 %v13850_v15, %v13849_v34  ;;  %v2503_v20 = vadd.f32 %v13851_v42, %v2092_v40  ;;  %v13857_v24 = vld [vmem:[#allocation53_spill] sm:$0xff] }
 0x359   :  { %6102 = vmatmul.mubr.f32.gmra.mxu1 %v13827_v9  ;;  %5823 = vmatprep.mubr.f32.mxu0 %v13845_v25  ;;  %v11026_v8 = vadd.f32 %v4657_v13, %v4069_v6  ;;  %v3383_v17 = vadd.f32 %v13852_v59, %v2886_v7  ;;  %v13856_v13 = vld [vmem:[#allocation160_spill] sm:$0xff] }
 0x35a   :  { %6108 = vmatprep.mubr.f32.mxu1 %v13828_v61  ;;  %v4114_v49 = vpop.f32.mrf.mxu0  ;;  %v4085_v54 = vadd.f32 %v4084_v26, %v3696_v33  ;;  %v13855_v61 = vld [vmem:[#allocation226_spill] sm:$0xff]  ;;  %v2100_v37 = vadd.f32 %v13856_v13, %v1443_v41  ;;  %v13859_v26 = vld [vmem:[#allocation116_spill] sm:$0xff]  ;;  %v13863_v41 = vld [vmem:[#allocation227_spill] sm:$0xff] }
 0x35b   :  { %v4115_v60 = vadd.f32 %v4114_v49, %v10647_v29  ;;  %v4663_v9 = vpop.f32.mrf.mxu1  ;;  %v2898_v29 = vadd.f32 %v13857_v24, %v2503_v20  ;;  %v13858_v49 = vld [vmem:[#allocation20_spill] sm:$0xff] }
 0x35c   :  { %5825 = vmatmul.mubr.f32.gmra.mxu0 %v13853_v2  ;;  %v11034_v10 = vadd.f32 %v4663_v9, %v4083_v56  ;;  %v4116_v50 = vpop.f32.mrf.mxu0  ;;  %v3704_v34 = vadd.f32 %v13858_v49, %v3383_v17  ;;  %v13860_v56 = vld [vmem:[#allocation90_spill] sm:$0xff]  ;;  %v13861_v9 = vld [vmem:[#allocation228_spill] sm:$0xff] }
 0x35d   :  { %6110 = vmatmul.mubr.f32.gmra.mxu1 %v13835_v12  ;;  %5831 = vmatprep.mubr.f32.mxu0 %v13855_v61  ;;  %v4665_v6 = vpop.f32.mrf.mxu1  ;;  %v1459_v33 = vadd.f32 %v13860_v56, %v13859_v26  ;;  %v2513_v42 = vadd.f32 %v13861_v9, %v2100_v37  ;;  %v13862_v59 = vld [vmem:[#allocation180_spill] sm:$0xff]  ;;  %v13869_v56 = vld [vmem:[#allocation178_spill] sm:$0xff]  ;;  %v13870_v9 = vld [vmem:[#allocation181_spill] sm:$0xff] }
 0x35e   :  { %13854 = vst [vmem:[#allocation202_spill] sm:$0xff] %v11034_v10  ;;  %6116 = vmatprep.mubr.f32.mxu1 %v13836_v11  ;;  %v11042_v40 = vadd.f32 %v4665_v6, %v4085_v54  ;;  %v4130_v7 = vpop.f32.mrf.mxu0  ;;  %v3391_v10 = vadd.f32 %v13862_v59, %v2898_v29  ;;  %v4101_v20 = vadd.f32 %v4100_v43, %v3704_v34  ;;  %v13864_v11 = vld [vmem:[#allocation232_spill] sm:$0xff]  ;;  %v13867_v43 = vld [vmem:[#allocation122_spill] sm:$0xff] }
 0x35f   :  { %v4131_v15 = vadd.f32 %v4130_v7, %v10665_v57  ;;  %v4671_v12 = vpop.f32.mrf.mxu1  ;;  %v13865_v6 = vld [vmem:[#allocation164_spill] sm:$0xff] }
 0x360   :  { %5833 = vmatmul.mubr.f32.gmra.mxu0 %v13863_v41  ;;  %v11050_v13 = vadd.f32 %v4671_v12, %v4099_v63  ;;  %v4132_v17 = vpop.f32.mrf.mxu0  ;;  %v2108_v24 = vadd.f32 %v13865_v6, %v1459_v33  ;;  %v13866_v49 = vld [vmem:[#allocation240_spill] sm:$0xff]  ;;  %v3712_v7 = vadd.f32 %v10654_v51, %v3391_v10  ;;  %v13871_v33 = vld [vmem:[#allocation233_spill] sm:$0xff] }
 0x361   :  { %6118 = vmatmul.mubr.f32.gmra.mxu1 %v13844_v18  ;;  %5839 = vmatprep.mubr.f32.mxu0 %v13864_v11  ;;  %v4673_v54 = vpop.f32.mrf.mxu1  ;;  %v2910_v57 = vadd.f32 %v13866_v49, %v2513_v42  ;;  %v13868_v63 = vld [vmem:[#allocation80_spill] sm:$0xff]  ;;  %v13875_v49 = vld [vmem:[#allocation247_spill] sm:$0xff] }
 0x362   :  { %6124 = vmatprep.mubr.f32.mxu1 %v13845_v25  ;;  %v11058_v37 = vadd.f32 %v4673_v54, %v4101_v20  ;;  %v4146_v29 = vpop.f32.mrf.mxu0  ;;  %v1475_v34 = vadd.f32 %v13868_v63, %v13867_v43  ;;  %v2523_v12 = vadd.f32 %v13869_v56, %v2108_v24  ;;  %v4117_v42 = vadd.f32 %v4116_v50, %v3712_v7  ;;  %v13873_v25 = vld [vmem:[#allocation236_spill] sm:$0xff]  ;;  %v13877_v50 = vld [vmem:[#allocation134_spill] sm:$0xff] }
 0x363   :  { %v4147_v26 = vadd.f32 %v4146_v29, %v10684_v48  ;;  %v4679_v18 = vpop.f32.mrf.mxu1  ;;  %v3399_v59 = vadd.f32 %v13870_v9, %v2910_v57  ;;  %v13874_v20 = vld [vmem:[#allocation168_spill] sm:$0xff]  ;;  %v13876_v29 = vld [vmem:[#allocation33_spill] sm:$0xff] }
 0x364   :  { %5841 = vmatmul.mubr.f32.gmra.mxu0 %v13871_v33  ;;  %v11066_v6 = vadd.f32 %v4679_v18, %v4115_v60  ;;  %v4148_v51 = vpop.f32.mrf.mxu0  ;;  %v2116_v54 = vadd.f32 %v13874_v20, %v1475_v34  ;;  %v2922_v48 = vadd.f32 %v13875_v49, %v2523_v12  ;;  %v13878_v60 = vld [vmem:[#allocation87_spill] sm:$0xff]  ;;  %v13880_v9 = vld [vmem:[#allocation57_spill] sm:$0xff]  ;;  %v13881_v34 = vld [vmem:[#allocation238_spill] sm:$0xff] }
 0x365   :  { %6126 = vmatmul.mubr.f32.gmra.mxu1 %v13853_v2  ;;  %5847 = vmatprep.mubr.f32.mxu0 %v13873_v25  ;;  %v4681_v10 = vpop.f32.mrf.mxu1  ;;  %v3720_v43 = vadd.f32 %v13876_v29, %v3399_v59  ;;  %v1491_v7 = vadd.f32 %v13878_v60, %v13877_v50  ;;  %v13879_v18 = vld [vmem:[#allocation239_spill] sm:$0xff]  ;;  %v13885_v29 = vld [vmem:[#allocation256_spill] sm:$0xff] }
 0x366   :  { %13872 = vst [vmem:[#allocation82_spill] sm:$0xff] %v11066_v6  ;;  %6132 = vmatprep.mubr.f32.mxu1 %v13855_v61  ;;  %v11074_v24 = vadd.f32 %v4681_v10, %v4117_v42  ;;  %v4162_v57 = vpop.f32.mrf.mxu0  ;;  %v2533_v56 = vadd.f32 %v13879_v18, %v2116_v54  ;;  %v3407_v6 = vadd.f32 %v13880_v9, %v2922_v48  ;;  %v13883_v61 = vld [vmem:[#allocation241_spill] sm:$0xff]  ;;  %v13890_v9 = vld [vmem:[#allocation102_spill] sm:$0xff] }
 0x367   :  { %v4163_v63 = vadd.f32 %v4162_v57, %v10704_v55  ;;  %v4687_v2 = vpop.f32.mrf.mxu1  ;;  %v4133_v12 = vadd.f32 %v4132_v17, %v3720_v43  ;;  %v13884_v10 = vld [vmem:[#allocation109_spill] sm:$0xff]  ;;  %v13886_v57 = vld [vmem:[#allocation12_spill] sm:$0xff] }
 0x368   :  { %5849 = vmatmul.mubr.f32.gmra.mxu0 %v13881_v34  ;;  %v11082_v20 = vadd.f32 %v4687_v2, %v4131_v15  ;;  %v4164_v59 = vpop.f32.mrf.mxu0  ;;  %v2124_v49 = vadd.f32 %v13884_v10, %v1491_v7  ;;  %v2934_v55 = vadd.f32 %v13885_v29, %v2533_v56  ;;  %v3728_v50 = vadd.f32 %v13886_v57, %v3407_v6  ;;  %v13887_v17 = vld [vmem:[#allocation141_spill] sm:$0xff]  ;;  %v13888_v15 = vld [vmem:[#allocation84_spill] sm:$0xff]  ;;  %v13889_v2 = vld [vmem:[#allocation246_spill] sm:$0xff] }
 0x369   :  { %6134 = vmatmul.mubr.f32.gmra.mxu1 %v13863_v41  ;;  %5855 = vmatprep.mubr.f32.mxu0 %v13883_v61  ;;  %v4689_v42 = vpop.f32.mrf.mxu1  ;;  %v1507_v43 = vadd.f32 %v13888_v15, %v13887_v17  ;;  %v13891_v7 = vld [vmem:[#allocation244_spill] sm:$0xff]  ;;  %v13894_v57 = vld [vmem:[#allocation261_spill] sm:$0xff] }
 0x36a   :  { %13882 = vst [vmem:[#allocation220_spill] sm:$0xff] %v11082_v20  ;;  %6140 = vmatprep.mubr.f32.mxu1 %v13864_v11  ;;  %v11090_v54 = vadd.f32 %v4689_v42, %v4133_v12  ;;  %v4178_v48 = vpop.f32.mrf.mxu0  ;;  %v2543_v18 = vadd.f32 %v13889_v2, %v2124_v49  ;;  %v3415_v20 = vadd.f32 %v13890_v9, %v2934_v55  ;;  %v13892_v11 = vld [vmem:[#allocation159_spill] sm:$0xff]  ;;  %v13893_v42 = vld [vmem:[#allocation96_spill] sm:$0xff] }
 0x36b   :  { %v4179_v60 = vadd.f32 %v4178_v48, %v10722_v0  ;;  %v4695_v41 = vpop.f32.mrf.mxu1  ;;  %v4149_v56 = vadd.f32 %v4148_v51, %v3728_v50  ;;  %v2132_v29 = vadd.f32 %v13893_v42, %v1507_v43  ;;  %v13895_v51 = vld [vmem:[#allocation146_spill] sm:$0xff]  ;;  %v13897_v15 = vld [vmem:[#allocation252_spill] sm:$0xff]  ;;  %v13898_v2 = vld [vmem:[#allocation43_spill] sm:$0xff] }
 0x36c   :  { %5857 = vmatmul.mubr.f32.gmra.mxu0 %v13891_v7  ;;  %v11098_v10 = vadd.f32 %v4695_v41, %v4147_v26  ;;  %v4180_v6 = vpop.f32.mrf.mxu0  ;;  %v2946_v0 = vadd.f32 %v13894_v57, %v2543_v18  ;;  %v3736_v48 = vadd.f32 %v10711_v36, %v3415_v20  ;;  %v13896_v26 = vld [vmem:[#allocation121_spill] sm:$0xff]  ;;  %v13899_v43 = vld [vmem:[#allocation248_spill] sm:$0xff] }
 0x36d   :  { %6142 = vmatmul.mubr.f32.gmra.mxu1 %v13871_v33  ;;  %5863 = vmatprep.mubr.f32.mxu0 %v13892_v11  ;;  %v4697_v12 = vpop.f32.mrf.mxu1  ;;  %v1523_v50 = vadd.f32 %v13896_v26, %v13895_v51  ;;  %v2553_v41 = vadd.f32 %v13897_v15, %v2132_v29  ;;  %v13902_v57 = vld [vmem:[#allocation265_spill] sm:$0xff]  ;;  %v13906_v15 = vld [vmem:[#allocation34_spill] sm:$0xff] }
 0x36e   :  { %6148 = vmatprep.mubr.f32.mxu1 %v13873_v25  ;;  %v11106_v49 = vadd.f32 %v4697_v12, %v4149_v56  ;;  %v4194_v55 = vpop.f32.mrf.mxu0  ;;  %v3423_v9 = vadd.f32 %v13898_v2, %v2946_v0  ;;  %v4165_v18 = vadd.f32 %v4164_v59, %v3736_v48  ;;  %v13900_v25 = vld [vmem:[#allocation251_spill] sm:$0xff]  ;;  %v13903_v59 = vld [vmem:[#allocation154_spill] sm:$0xff]  ;;  %v13905_v26 = vld [vmem:[#allocation257_spill] sm:$0xff] }
 0x36f   :  { %v4195_v17 = vadd.f32 %v4194_v55, %v10741_v23  ;;  %v4703_v33 = vpop.f32.mrf.mxu1  ;;  %v13901_v56 = vld [vmem:[#allocation115_spill] sm:$0xff]  ;;  %v2958_v23 = vadd.f32 %v13902_v57, %v2553_v41  ;;  %v13910_v57 = vld [vmem:[#allocation97_spill] sm:$0xff] }
 0x370   :  { %5865 = vmatmul.mubr.f32.gmra.mxu0 %v13899_v43  ;;  %v11114_v42 = vadd.f32 %v4703_v33, %v4163_v63  ;;  %v4196_v36 = vpop.f32.mrf.mxu0  ;;  %v2140_v12 = vadd.f32 %v13901_v56, %v1523_v50  ;;  %v3744_v55 = vadd.f32 %v10730_v47, %v3423_v9  ;;  %v13904_v63 = vld [vmem:[#allocation174_spill] sm:$0xff] }
 0x371   :  { %6150 = vmatmul.mubr.f32.gmra.mxu1 %v13881_v34  ;;  %5871 = vmatprep.mubr.f32.mxu0 %v13900_v25  ;;  %v4705_v20 = vpop.f32.mrf.mxu1  ;;  %v1539_v48 = vadd.f32 %v13904_v63, %v13903_v59  ;;  %v3431_v2 = vadd.f32 %v13906_v15, %v2958_v23  ;;  %v13907_v50 = vld [vmem:[#allocation254_spill] sm:$0xff]  ;;  %v13913_v63 = vld [vmem:[#allocation263_spill] sm:$0xff] }
 0x372   :  { %6156 = vmatprep.mubr.f32.mxu1 %v13883_v61  ;;  %v11122_v29 = vadd.f32 %v4705_v20, %v4165_v18  ;;  %v4210_v0 = vpop.f32.mrf.mxu0  ;;  %v2563_v33 = vadd.f32 %v13905_v26, %v2140_v12  ;;  %v4181_v41 = vadd.f32 %v4180_v6, %v3744_v55  ;;  %v13908_v61 = vld [vmem:[#allocation255_spill] sm:$0xff]  ;;  %v13911_v6 = vld [vmem:[#allocation161_spill] sm:$0xff] }
 0x373   :  { %v4211_v51 = vadd.f32 %v4210_v0, %v10759_v14  ;;  %v4711_v34 = vpop.f32.mrf.mxu1  ;;  %v13909_v18 = vld [vmem:[#allocation131_spill] sm:$0xff]  ;;  %v3752_v0 = vadd.f32 %v10748_v27, %v3431_v2 }
 0x374   :  { %5873 = vmatmul.mubr.f32.gmra.mxu0 %v13907_v50  ;;  %v11130_v56 = vadd.f32 %v4711_v34, %v4179_v60  ;;  %v4212_v47 = vpop.f32.mrf.mxu0  ;;  %v2148_v20 = vadd.f32 %v13909_v18, %v1539_v48  ;;  %v2970_v14 = vadd.f32 %v13910_v57, %v2563_v33  ;;  %v13912_v60 = vld [vmem:[#allocation106_spill] sm:$0xff]  ;;  %v13914_v26 = vld [vmem:[#allocation19_spill] sm:$0xff]  ;;  %v13915_v48 = vld [vmem:[#allocation260_spill] sm:$0xff] }
 0x375   :  { %6158 = vmatmul.mubr.f32.gmra.mxu1 %v13891_v7  ;;  %5879 = vmatprep.mubr.f32.mxu0 %v13908_v61  ;;  %v4713_v9 = vpop.f32.mrf.mxu1  ;;  %v1555_v55 = vadd.f32 %v13912_v60, %v13911_v6  ;;  %v4197_v33 = vadd.f32 %v4196_v36, %v3752_v0  ;;  %v13918_v57 = vld [vmem:[#allocation275_spill] sm:$0xff]  ;;  %v13920_v36 = vld [vmem:[#allocation166_spill] sm:$0xff]  ;;  %v13922_v60 = vld [vmem:[#allocation268_spill] sm:$0xff] }
 0x376   :  { %6164 = vmatprep.mubr.f32.mxu1 %v13892_v11  ;;  %v11138_v12 = vadd.f32 %v4713_v9, %v4181_v41  ;;  %v4226_v23 = vpop.f32.mrf.mxu0  ;;  %v2573_v34 = vadd.f32 %v13913_v63, %v2148_v20  ;;  %v3439_v15 = vadd.f32 %v13914_v26, %v2970_v14  ;;  %v13916_v11 = vld [vmem:[#allocation262_spill] sm:$0xff]  ;;  %v13923_v63 = vld [vmem:[#allocation63_spill] sm:$0xff] }
 0x377   :  { %v4227_v59 = vadd.f32 %v4226_v23, %v10775_v28  ;;  %v4719_v7 = vpop.f32.mrf.mxu1  ;;  %v13917_v41 = vld [vmem:[#allocation138_spill] sm:$0xff] }
 0x378   :  { %5881 = vmatmul.mubr.f32.gmra.mxu0 %v13915_v48  ;;  %v11146_v18 = vadd.f32 %v4719_v7, %v4195_v17  ;;  %v4228_v27 = vpop.f32.mrf.mxu0  ;;  %v2156_v9 = vadd.f32 %v13917_v41, %v1555_v55  ;;  %v2982_v28 = vadd.f32 %v13918_v57, %v2573_v34  ;;  %v3760_v23 = vadd.f32 %v10764_v44, %v3439_v15  ;;  %v13921_v17 = vld [vmem:[#allocation130_spill] sm:$0xff]  ;;  %v13928_v57 = vld [vmem:[#allocation281_spill] sm:$0xff] }
 0x379   :  { %6166 = vmatmul.mubr.f32.gmra.mxu1 %v13899_v43  ;;  %5887 = vmatprep.mubr.f32.mxu0 %v13916_v11  ;;  %v4721_v2 = vpop.f32.mrf.mxu1  ;;  %v1571_v0 = vadd.f32 %v13921_v17, %v13920_v36  ;;  %v13924_v55 = vld [vmem:[#allocation266_spill] sm:$0xff] }
 0x37a   :  { %6172 = vmatprep.mubr.f32.mxu1 %v13900_v25  ;;  %v11154_v20 = vadd.f32 %v4721_v2, %v4197_v33  ;;  %v4242_v14 = vpop.f32.mrf.mxu0  ;;  %v2583_v7 = vadd.f32 %v13922_v60, %v2156_v9  ;;  %v3447_v26 = vadd.f32 %v13923_v63, %v2982_v28  ;;  %v4213_v34 = vadd.f32 %v4212_v47, %v3760_v23  ;;  %v13926_v25 = vld [vmem:[#allocation267_spill] sm:$0xff]  ;;  %v13927_v33 = vld [vmem:[#allocation140_spill] sm:$0xff]  ;;  %v13931_v47 = vld [vmem:[#allocation185_spill] sm:$0xff] }
 0x37b   :  { %v4243_v6 = vadd.f32 %v4242_v14, %v10790_v52  ;;  %v4727_v43 = vpop.f32.mrf.mxu1  ;;  %v2164_v2 = vadd.f32 %v13927_v33, %v1571_v0  ;;  %v13929_v14 = vld [vmem:[#allocation69_spill] sm:$0xff]  ;;  %v13935_v0 = vld [vmem:[#allocation270_spill] sm:$0xff] }
 0x37c   :  { %13919 = vst [vmem:[#allocation142_spill] sm:$0xff] %v11154_v20  ;;  %5889 = vmatmul.mubr.f32.gmra.mxu0 %v13924_v55  ;;  %v11162_v41 = vadd.f32 %v4727_v43, %v4211_v51  ;;  %v4244_v44 = vpop.f32.mrf.mxu0  ;;  %v2994_v52 = vadd.f32 %v13928_v57, %v2583_v7  ;;  %v3768_v36 = vadd.f32 %v13929_v14, %v3447_v26  ;;  %v13932_v51 = vld [vmem:[#allocation135_spill] sm:$0xff]  ;;  %v13933_v43 = vld [vmem:[#allocation273_spill] sm:$0xff]  ;;  %v13939_v57 = vld [vmem:[#allocation272_spill] sm:$0xff] }
 0x37d   :  { %6174 = vmatmul.mubr.f32.gmra.mxu1 %v13907_v50  ;;  %5895 = vmatprep.mubr.f32.mxu0 %v13926_v25  ;;  %v4729_v15 = vpop.f32.mrf.mxu1  ;;  %v1587_v23 = vadd.f32 %v13932_v51, %v13931_v47  ;;  %v2593_v60 = vadd.f32 %v13933_v43, %v2164_v2  ;;  %v13934_v63 = vld [vmem:[#allocation29_spill] sm:$0xff]  ;;  %v13941_v47 = vld [vmem:[#allocation286_spill] sm:$0xff] }
 0x37e   :  { %13925 = vst [vmem:[#allocation152_spill] sm:$0xff] %v11162_v41  ;;  %6180 = vmatprep.mubr.f32.mxu1 %v13908_v61  ;;  %v11170_v9 = vadd.f32 %v4729_v15, %v4213_v34  ;;  %v4258_v28 = vpop.f32.mrf.mxu0  ;;  %v3455_v41 = vadd.f32 %v13934_v63, %v2994_v52  ;;  %v4229_v7 = vadd.f32 %v4228_v27, %v3768_v36  ;;  %v13937_v61 = vld [vmem:[#allocation113_spill] sm:$0xff]  ;;  %v13938_v34 = vld [vmem:[#allocation107_spill] sm:$0xff] }
 0x37f   :  { %v4259_v17 = vadd.f32 %v4258_v28, %v10803_v35  ;;  %v4735_v50 = vpop.f32.mrf.mxu1  ;;  %v1251_v15 = vadd.f32 %v13938_v34, %v13937_v61  ;;  %v13940_v35 = vld [vmem:[#allocation26_spill] sm:$0xff]  ;;  %v3006_v2 = vadd.f32 %v13941_v47, %v2593_v60  ;;  %v13942_v51 = vld [vmem:[#allocation197_spill] sm:$0xff]  ;;  %v13950_v47 = vld [vmem:[#allocation36_spill] sm:$0xff] }
 0x380   :  { %13930 = vst [vmem:[#allocation56_spill] sm:$0xff] %v11170_v9  ;;  %5897 = vmatmul.mubr.f32.gmra.mxu0 %v13935_v0  ;;  %v11178_v33 = vadd.f32 %v4735_v50, %v4227_v59  ;;  %v4260_v26 = vpop.f32.mrf.mxu0  ;;  %v2172_v28 = vadd.f32 %v13940_v35, %v1587_v23  ;;  %v3776_v52 = vadd.f32 %v13942_v51, %v3455_v41  ;;  %v13944_v36 = vld [vmem:[#allocation105_spill] sm:$0xff]  ;;  %v13945_v50 = vld [vmem:[#allocation4_spill] sm:$0xff]  ;;  %v13948_v34 = vld [vmem:[#allocation38_spill] sm:$0xff] }
 0x381   :  { %6182 = vmatmul.mubr.f32.gmra.mxu1 %v13915_v48  ;;  %5903 = vmatprep.mubr.f32.mxu0 %v13939_v57  ;;  %v4737_v14 = vpop.f32.mrf.mxu1  ;;  %v1235_v43 = vadd.f32 %v13945_v50, %v13944_v36  ;;  %v13946_v63 = vld [vmem:[#allocation5_spill] sm:$0xff]  ;;  %v13947_v48 = vld [vmem:[#allocation187_spill] sm:$0xff]  ;;  %v13949_v35 = vld [vmem:[#allocation278_spill] sm:$0xff]  ;;  %v3463_v41 = vadd.f32 %v13950_v47, %v3006_v2 }
 0x382   :  { %13936 = vst [vmem:[#allocation58_spill] sm:$0xff] %v11178_v33  ;;  %6188 = vmatprep.mubr.f32.mxu1 %v13916_v11  ;;  %v11188_v27 = vadd.f32 %v4737_v14, %v4229_v7  ;;  %v4274_v59 = vpop.f32.mrf.mxu0  ;;  %v2004_v61 = vadd.f32 %v13946_v63, %v1251_v15  ;;  %v1603_v33 = vadd.f32 %v13948_v34, %v13947_v48  ;;  %v13951_v51 = vld [vmem:[#allocation179_spill] sm:$0xff]  ;;  %v13954_v50 = vld [vmem:[#allocation6_spill] sm:$0xff]  ;;  %v13956_v20 = vld [vmem:[#allocation145_spill] sm:$0xff] }
 0x383   :  { %v4275_v9 = vadd.f32 %v4274_v59, %v10816_v5  ;;  %v4743_v23 = vpop.f32.mrf.mxu1  ;;  %v2603_v60 = vadd.f32 %v13949_v35, %v2172_v28  ;;  %v4245_v11 = vadd.f32 %v4244_v44, %v3776_v52  ;;  %v13955_v15 = vld [vmem:[#allocation114_spill] sm:$0xff]  ;;  %v13958_v59 = vld [vmem:[#allocation149_spill] sm:$0xff]  ;;  %v13960_v44 = vld [vmem:[#allocation55_spill] sm:$0xff] }
 0x384   :  { %13943 = vst [vmem:[#allocation143_spill] sm:$0xff] %v11188_v27  ;;  %5905 = vmatmul.mubr.f32.gmra.mxu0 %v13951_v51  ;;  %v11199_v7 = vadd.f32 %v4743_v23, %v4243_v6  ;;  %v4276_v14 = vpop.f32.mrf.mxu0  ;;  %v13953_v27 = vld [vmem:[#allocation7_spill] sm:$0xff]  ;;  %v1267_v63 = vadd.f32 %v13955_v15, %v13954_v50  ;;  %v2393_v48 = vadd.f32 %v13956_v20, %v2004_v61  ;;  %v13957_v5 = vld [vmem:[#allocation274_spill] sm:$0xff]  ;;  %v13959_v34 = vld [vmem:[#allocation289_spill] sm:$0xff] }
 0x385   :  { %v1996_v36 = vadd.f32 %v13953_v27, %v1235_v43  ;;  %6190 = vmatmul.mubr.f32.gmra.mxu1 %v13924_v55  ;;  %5911 = vmatprep.mubr.f32.mxu0 %v13957_v5  ;;  %v4745_v28 = vpop.f32.mrf.mxu1  ;;  %v2180_v2 = vadd.f32 %v13958_v59, %v1603_v33  ;;  %v3018_v35 = vadd.f32 %v13959_v34, %v2603_v60  ;;  %v13961_v43 = vld [vmem:[#allocation32_spill] sm:$0xff]  ;;  %v13963_v61 = vld [vmem:[#allocation158_spill] sm:$0xff] }
 0x386   :  { %13952 = vst [vmem:[#allocation206_spill] sm:$0xff] %v11199_v7  ;;  %v3784_v6 = vadd.f32 %v13960_v44, %v3463_v41  ;;  %6196 = vmatprep.mubr.f32.mxu1 %v13926_v25  ;;  %v11211_v52 = vadd.f32 %v4745_v28, %v4245_v11  ;;  %v4290_v27 = vpop.f32.mrf.mxu0  ;;  %v2012_v23 = vadd.f32 %v13961_v43, %v1267_v63  ;;  %v13962_v47 = vld [vmem:[#allocation144_spill] sm:$0xff]  ;;  %v13966_v34 = vld [vmem:[#allocation282_spill] sm:$0xff] }
 0x387   :  { %v2383_v20 = vadd.f32 %v13962_v47, %v1996_v36  ;;  %v2766_v55 = vadd.f32 %v13963_v61, %v2393_v48  ;;  %v4291_v50 = vadd.f32 %v4290_v27, %v10829_v45  ;;  %v4751_v15 = vpop.f32.mrf.mxu1  ;;  %v13964_v7 = vld [vmem:[#allocation284_spill] sm:$0xff]  ;;  %v13967_v28 = vld [vmem:[#allocation150_spill] sm:$0xff]  ;;  %v13969_v36 = vld [vmem:[#allocation283_spill] sm:$0xff] }
 0x388   :  { %v2613_v33 = vadd.f32 %v13964_v7, %v2180_v2  ;;  %v13965_v59 = vld [vmem:[#allocation24_spill] sm:$0xff]  ;;  %5913 = vmatmul.mubr.f32.gmra.mxu0 %v13966_v34  ;;  %v4261_v41 = vadd.f32 %v4260_v26, %v3784_v6  ;;  %v11220_v25 = vadd.f32 %v4751_v15, %v4259_v17  ;;  %v4292_v11 = vpop.f32.mrf.mxu0  ;;  %v2403_v44 = vadd.f32 %v13967_v28, %v2012_v23  ;;  %v13970_v48 = vld [vmem:[#allocation153_spill] sm:$0xff]  ;;  %v13974_v61 = vld [vmem:[#allocation299_spill] sm:$0xff] }
 0x389   :  { %v3471_v60 = vadd.f32 %v13965_v59, %v3018_v35  ;;  %v13968_v63 = vld [vmem:[#allocation292_spill] sm:$0xff]  ;;  %6198 = vmatmul.mubr.f32.gmra.mxu1 %v13935_v0  ;;  %5919 = vmatprep.mubr.f32.mxu0 %v13969_v36  ;;  %v4753_v45 = vpop.f32.mrf.mxu1  ;;  %v2754_v27 = vadd.f32 %v13970_v48, %v2383_v20  ;;  %v13971_v7 = vld [vmem:[#allocation293_spill] sm:$0xff] }
 0x38a   :  { %v3303_v43 = vadd.f32 %v13968_v63, %v2766_v55  ;;  %v3030_v2 = vadd.f32 %v13971_v7, %v2613_v33  ;;  %v13972_v35 = vld [vmem:[#allocation52_spill] sm:$0xff]  ;;  %6204 = vmatprep.mubr.f32.mxu1 %v13939_v57  ;;  %v11230_v17 = vadd.f32 %v4753_v45, %v4261_v41  ;;  %v4930_v26 = vpop.f32.mrf.mxu0  ;;  %v13973_v6 = vld [vmem:[#allocation165_spill] sm:$0xff]  ;;  %v13976_v63 = vld [vmem:[#allocation147_spill] sm:$0xff] }
 0x38b   :  { %v3792_v47 = vadd.f32 %v13972_v35, %v3471_v60  ;;  %v2778_v23 = vadd.f32 %v13973_v6, %v2403_v44  ;;  %v4759_v15 = vpop.f32.mrf.mxu1  ;;  %v4931_v0 = vadd.f32 %v4930_v26, %v10842_v39  ;;  %v13975_v59 = vld [vmem:[#allocation288_spill] sm:$0xff]  ;;  %v13977_v48 = vld [vmem:[#allocation285_spill] sm:$0xff]  ;;  %v13980_v44 = vld [vmem:[#allocation287_spill] sm:$0xff] }
 0x38c   :  { %v3624_v55 = vadd.f32 %v13974_v61, %v3303_v43  ;;  %v3295_v28 = vadd.f32 %v13975_v59, %v2754_v27  ;;  %v3479_v20 = vadd.f32 %v13976_v63, %v3030_v2  ;;  %5921 = vmatmul.mubr.f32.gmra.mxu0 %v13977_v48  ;;  %v11238_v60 = vadd.f32 %v4759_v15, %v4275_v9  ;;  %v4932_v57 = vpop.f32.mrf.mxu0  ;;  %v13978_v41 = vld [vmem:[#allocation296_spill] sm:$0xff]  ;;  %v13981_v39 = vld [vmem:[#allocation297_spill] sm:$0xff]  ;;  %v13982_v27 = vld [vmem:[#allocation74_spill] sm:$0xff] }
 0x38d   :  { %v4277_v33 = vadd.f32 %v4276_v14, %v3792_v47  ;;  %v3311_v45 = vadd.f32 %v13978_v41, %v2778_v23  ;;  %v13979_v7 = vld [vmem:[#allocation48_spill] sm:$0xff]  ;;  %6206 = vmatmul.mubr.f32.gmra.mxu1 %v13951_v51  ;;  %5927 = vmatprep.mubr.f32.mxu0 %v13980_v44  ;;  %v4761_v43 = vpop.f32.mrf.mxu1  ;;  %v13984_v61 = vld [vmem:[#allocation50_spill] sm:$0xff]  ;;  %v13986_v51 = vld [vmem:[#allocation45_spill] sm:$0xff] }
 0x38e   :  { %v3941_v35 = vadd.f32 %v13979_v7, %v3624_v55  ;;  %v3616_v26 = vadd.f32 %v13981_v39, %v3295_v28  ;;  %v3800_v6 = vadd.f32 %v13982_v27, %v3479_v20  ;;  %6212 = vmatprep.mubr.f32.mxu1 %v13957_v5  ;;  %v4940_v9 = vpop.f32.mrf.mxu0  ;;  %v13983_v14 = vld [vmem:[#allocation300_spill] sm:$0xff]  ;;  %v13985_v55 = vld [vmem:[#allocation78_spill] sm:$0xff]  ;;  %v13988_v39 = vld [vmem:[#allocation139_spill] sm:$0xff] }
 0x38f   :  { %v11247_v2 = vadd.f32 %v4761_v43, %v4277_v33  ;;  %v3632_v47 = vadd.f32 %v13983_v14, %v3311_v45  ;;  %v4767_v15 = vpop.f32.mrf.mxu1  ;;  %v4941_v59 = vadd.f32 %v4940_v9, %v13985_v55  ;;  %v13987_v41 = vld [vmem:[#allocation290_spill] sm:$0xff]  ;;  %v13989_v33 = vld [vmem:[#allocation291_spill] sm:$0xff] }
 0x390   :  { %v4594_v23 = vadd.f32 %v13984_v61, %v3941_v35  ;;  %v3925_v63 = vadd.f32 %v13986_v51, %v3616_v26  ;;  %5929 = vmatmul.mubr.f32.gmra.mxu0 %v13987_v41  ;;  %v4293_v7 = vadd.f32 %v4292_v11, %v3800_v6  ;;  %v11254_v28 = vadd.f32 %v4767_v15, %v4291_v50  ;;  %v4942_v20 = vpop.f32.mrf.mxu0  ;;  %v13990_v35 = vld [vmem:[#allocation200_spill] sm:$0xff]  ;;  %v13991_v14 = vld [vmem:[#allocation294_spill] sm:$0xff] }
 0x391   :  { %v3957_v5 = vadd.f32 %v13988_v39, %v3632_v47  ;;  %6214 = vmatmul.mubr.f32.gmra.mxu1 %v13966_v34  ;;  %5935 = vmatprep.mubr.f32.mxu0 %v13989_v33  ;;  %v4769_v45 = vpop.f32.mrf.mxu1 }
 0x392   :  { %v4943_v43 = vadd.f32 %v4942_v20, %v4594_v23  ;;  %v4586_v27 = vadd.f32 %v13990_v35, %v3925_v63  ;;  %6220 = vmatprep.mubr.f32.mxu1 %v13969_v36  ;;  %v11261_v9 = vadd.f32 %v4769_v45, %v4293_v7  ;;  %v4950_v26 = vpop.f32.mrf.mxu0  ;;  %v13992_v23 = vld [vmem:[#allocation295_spill] sm:$0xff] }
 0x393   :  { %v4602_v11 = vadd.f32 %v10881_v30, %v3957_v5  ;;  %v4951_v50 = vadd.f32 %v4950_v26, %v10879_v1  ;;  %v5281_v6 = vpop.f32.mrf.mxu1  ;;  %v13993_v30 = vld [vmem:[#allocation298_spill] sm:$0xff] }
 0x394   :  { %5937 = vmatmul.mubr.f32.gmra.mxu0 %v13991_v14  ;;  %v4933_v47 = vadd.f32 %v4932_v57, %v4586_v27  ;;  %v11266_v34 = vadd.f32 %v5281_v6, %v4931_v0  ;;  %v4952_v61 = vpop.f32.mrf.mxu0 }
 0x395   :  { %6222 = vmatmul.mubr.f32.gmra.mxu1 %v13977_v48  ;;  %5943 = vmatprep.mubr.f32.mxu0 %v13992_v23  ;;  %v4953_v15 = vadd.f32 %v4952_v61, %v4602_v11  ;;  %v5283_v36 = vpop.f32.mrf.mxu1 }
 0x396   :  { %6228 = vmatprep.mubr.f32.mxu1 %v13980_v44  ;;  %v11271_v55 = vadd.f32 %v5283_v36, %v4933_v47 }
 0x398   :  { %5945 = vmatmul.mubr.f32.gmra.mxu0 %v13993_v30  ;;  %v4960_v1 = vpop.f32.mrf.mxu0 }
 0x399   :  { %6230 = vmatmul.mubr.f32.gmra.mxu1 %v13987_v41  ;;  %v4961_v57 = vadd.f32 %v4960_v1, %v10898_v3  ;;  %v5293_v0 = vpop.f32.mrf.mxu1 }
 0x39a   :  { %6236 = vmatprep.mubr.f32.mxu1 %v13989_v33  ;;  %v11277_v51 = vadd.f32 %v5293_v0, %v4941_v59  ;;  %v4962_v48 = vpop.f32.mrf.mxu0 }
 0x39b   :  { %v4963_v63 = vadd.f32 %v4962_v48, %v10907_v31  ;;  %v5295_v7 = vpop.f32.mrf.mxu1 }
 0x39c   :  { %v11280_v20 = vadd.f32 %v5295_v7, %v4943_v43 }
 0x39d   :  { %6238 = vmatmul.mubr.f32.gmra.mxu1 %v13991_v14 }
 0x39e   :  { %6244 = vmatprep.mubr.f32.mxu1 %v13992_v23  ;;  %v4970_v44 = vpop.f32.mrf.mxu0 }
 0x39f   :  { %v4971_v41 = vadd.f32 %v4970_v44, %v10921_v21  ;;  %v5305_v39 = vpop.f32.mrf.mxu1 }
 0x3a0   :  { %v11285_v3 = vadd.f32 %v5305_v39, %v4951_v50  ;;  %v4972_v5 = vpop.f32.mrf.mxu0 }
 0x3a1   :  { %6246 = vmatmul.mubr.f32.gmra.mxu1 %v13993_v30  ;;  %v4973_v59 = vadd.f32 %v4972_v5, %v10926_v38  ;;  %v5307_v33 = vpop.f32.mrf.mxu1 }
 0x3a2   :  { %v11289_v31 = vadd.f32 %v5307_v33, %v4953_v15 }
 0x3a4   :  { %v4980_v45 = vpop.f32.mrf.mxu0 }
 0x3a5   :  { %v4981_v43 = vadd.f32 %v4980_v45, %v10940_v4  ;;  %v5317_v35 = vpop.f32.mrf.mxu1 }
 0x3a6   :  { %v11292_v27 = vadd.f32 %v5317_v35, %v4961_v57  ;;  %v4982_v26 = vpop.f32.mrf.mxu0 }
 0x3a7   :  { %v4983_v21 = vadd.f32 %v4982_v26, %v10948_v46  ;;  %v5319_v11 = vpop.f32.mrf.mxu1 }
 0x3a8   :  { %v11295_v50 = vadd.f32 %v5319_v11, %v4963_v63  ;;  %v13994_v11 = vld [vmem:[#allocation202_spill] sm:$0xff] }
 0x3aa   :  { %v4990_v6 = vpop.f32.mrf.mxu0 }
 0x3ab   :  { %v4991_v14 = vadd.f32 %v4990_v6, %v10960_v32  ;;  %v5329_v47 = vpop.f32.mrf.mxu1 }
 0x3ac   :  { %v11298_v38 = vadd.f32 %v5329_v47, %v4971_v41  ;;  %v4992_v61 = vpop.f32.mrf.mxu0 }
 0x3ad   :  { %v4993_v23 = vadd.f32 %v4992_v61, %v10965_v22  ;;  %v5331_v15 = vpop.f32.mrf.mxu1 }
 0x3ae   :  { %v11301_v4 = vadd.f32 %v5331_v15, %v4973_v59 }
 0x3b0   :  { %v5000_v36 = vpop.f32.mrf.mxu0 }
 0x3b1   :  { %v5001_v30 = vadd.f32 %v5000_v36, %v10977_v16  ;;  %v5341_v1 = vpop.f32.mrf.mxu1 }
 0x3b2   :  { %v11304_v46 = vadd.f32 %v5341_v1, %v4981_v43  ;;  %v5002_v57 = vpop.f32.mrf.mxu0 }
 0x3b3   :  { %v5003_v0 = vadd.f32 %v5002_v57, %v10984_v53  ;;  %v5343_v48 = vpop.f32.mrf.mxu1 }
 0x3b4   :  { %v11307_v32 = vadd.f32 %v5343_v48, %v4983_v21 }
 0x3b6   :  { %v5010_v63 = vpop.f32.mrf.mxu0 }
 0x3b7   :  { %v5011_v7 = vadd.f32 %v5010_v63, %v10997_v58  ;;  %v5353_v44 = vpop.f32.mrf.mxu1 }
 0x3b8   :  { %v11310_v22 = vadd.f32 %v5353_v44, %v4991_v14  ;;  %v5012_v41 = vpop.f32.mrf.mxu0 }
 0x3b9   :  { %v5013_v39 = vadd.f32 %v5012_v41, %v11004_v19  ;;  %v5355_v5 = vpop.f32.mrf.mxu1 }
 0x3ba   :  { %v11313_v16 = vadd.f32 %v5355_v5, %v4993_v23 }
 0x3bc   :  { %v5020_v59 = vpop.f32.mrf.mxu0 }
 0x3bd   :  { %v5021_v33 = vadd.f32 %v5020_v59, %v11018_v62  ;;  %v5365_v45 = vpop.f32.mrf.mxu1 }
 0x3be   :  { %v11316_v53 = vadd.f32 %v5365_v45, %v5001_v30  ;;  %v5022_v43 = vpop.f32.mrf.mxu0 }
 0x3bf   :  { %v5023_v35 = vadd.f32 %v5022_v43, %v11026_v8  ;;  %v5367_v26 = vpop.f32.mrf.mxu1 }
 0x3c0   :  { %v11319_v58 = vadd.f32 %v5367_v26, %v5003_v0 }
 0x3c2   :  { %v5030_v21 = vpop.f32.mrf.mxu0 }
 0x3c3   :  { %v5031_v6 = vadd.f32 %v5030_v21, %v13994_v11  ;;  %v5377_v14 = vpop.f32.mrf.mxu1 }
 0x3c4   :  { %v11322_v19 = vadd.f32 %v5377_v14, %v5011_v7  ;;  %v5032_v47 = vpop.f32.mrf.mxu0  ;;  %v13995_v7 = vld [vmem:[#allocation82_spill] sm:$0xff] }
 0x3c5   :  { %v5033_v61 = vadd.f32 %v5032_v47, %v11042_v40  ;;  %v5379_v23 = vpop.f32.mrf.mxu1 }
 0x3c6   :  { %v11325_v62 = vadd.f32 %v5379_v23, %v5013_v39 }
 0x3c8   :  { %v5040_v15 = vpop.f32.mrf.mxu0  ;;  %v5389_v36 = vpop.f32.mrf.mxu1 }
 0x3c9   :  { %v5041_v30 = vadd.f32 %v5040_v15, %v11050_v13  ;;  %v11328_v8 = vadd.f32 %v5389_v36, %v5021_v33  ;;  %v13996_v33 = vld [vmem:[#allocation220_spill] sm:$0xff] }
 0x3ca   :  { %v5042_v1 = vpop.f32.mrf.mxu0  ;;  %v5391_v57 = vpop.f32.mrf.mxu1 }
 0x3cb   :  { %v5043_v0 = vadd.f32 %v5042_v1, %v11058_v37  ;;  %v11331_v48 = vadd.f32 %v5391_v57, %v5023_v35 }
 0x3cc   :  { %v5050_v63 = vpop.f32.mrf.mxu0 }
 0x3cd   :  { %v5051_v44 = vadd.f32 %v5050_v63, %v13995_v7  ;;  %v5401_v41 = vpop.f32.mrf.mxu1 }
 0x3ce   :  { %v11334_v40 = vadd.f32 %v5401_v41, %v5031_v6  ;;  %v5052_v39 = vpop.f32.mrf.mxu0 }
 0x3cf   :  { %v5053_v5 = vadd.f32 %v5052_v39, %v11074_v24  ;;  %v5403_v59 = vpop.f32.mrf.mxu1 }
 0x3d0   :  { %v11337_v45 = vadd.f32 %v5403_v59, %v5033_v61  ;;  %v5060_v13 = vpop.f32.mrf.mxu0 }
 0x3d1   :  { %v5061_v43 = vadd.f32 %v5060_v13, %v13996_v33  ;;  %v5413_v26 = vpop.f32.mrf.mxu1 }
 0x3d2   :  { %v11340_v21 = vadd.f32 %v5413_v26, %v5041_v30  ;;  %v5062_v37 = vpop.f32.mrf.mxu0 }
 0x3d3   :  { %v5063_v35 = vadd.f32 %v5062_v37, %v11090_v54  ;;  %v5415_v11 = vpop.f32.mrf.mxu1 }
 0x3d4   :  { %v11343_v14 = vadd.f32 %v5415_v11, %v5043_v0  ;;  %v5070_v6 = vpop.f32.mrf.mxu0  ;;  %v13997_v11 = vld [vmem:[#allocation142_spill] sm:$0xff] }
 0x3d5   :  { %v5071_v47 = vadd.f32 %v5070_v6, %v11098_v10  ;;  %v5425_v23 = vpop.f32.mrf.mxu1 }
 0x3d6   :  { %v11346_v24 = vadd.f32 %v5425_v23, %v5051_v44  ;;  %v5072_v61 = vpop.f32.mrf.mxu0 }
 0x3d7   :  { %v5073_v15 = vadd.f32 %v5072_v61, %v11106_v49  ;;  %v5427_v36 = vpop.f32.mrf.mxu1  ;;  %v13998_v61 = vld [vmem:[#allocation152_spill] sm:$0xff] }
 0x3d8   :  { %v11349_v1 = vadd.f32 %v5427_v36, %v5053_v5  ;;  %v5080_v30 = vpop.f32.mrf.mxu0 }
 0x3d9   :  { %v5081_v57 = vadd.f32 %v5080_v30, %v11114_v42  ;;  %v5437_v63 = vpop.f32.mrf.mxu1 }
 0x3da   :  { %v11352_v54 = vadd.f32 %v5437_v63, %v5061_v43  ;;  %v5082_v0 = vpop.f32.mrf.mxu0  ;;  %v13999_v63 = vld [vmem:[#allocation56_spill] sm:$0xff] }
 0x3db   :  { %v5083_v7 = vadd.f32 %v5082_v0, %v11122_v29  ;;  %v5439_v41 = vpop.f32.mrf.mxu1 }
 0x3dc   :  { %v11355_v10 = vadd.f32 %v5439_v41, %v5063_v35  ;;  %v5090_v44 = vpop.f32.mrf.mxu0 }
 0x3dd   :  { %v5091_v39 = vadd.f32 %v5090_v44, %v11130_v56  ;;  %v5449_v59 = vpop.f32.mrf.mxu1  ;;  %v14000_v44 = vld [vmem:[#allocation58_spill] sm:$0xff] }
 0x3de   :  { %v11358_v49 = vadd.f32 %v5449_v59, %v5071_v47  ;;  %v5092_v5 = vpop.f32.mrf.mxu0 }
 0x3df   :  { %v5093_v13 = vadd.f32 %v5092_v5, %v11138_v12  ;;  %v5451_v33 = vpop.f32.mrf.mxu1 }
 0x3e0   :  { %v11361_v42 = vadd.f32 %v5451_v33, %v5073_v15  ;;  %v5100_v43 = vpop.f32.mrf.mxu0 }
 0x3e1   :  { %v5101_v26 = vadd.f32 %v5100_v43, %v11146_v18  ;;  %v5461_v37 = vpop.f32.mrf.mxu1  ;;  %v14001_v43 = vld [vmem:[#allocation143_spill] sm:$0xff] }
 0x3e2   :  { %v11364_v29 = vadd.f32 %v5461_v37, %v5081_v57  ;;  %v5102_v35 = vpop.f32.mrf.mxu0 }
 0x3e3   :  { %v5103_v6 = vadd.f32 %v5102_v35, %v13997_v11  ;;  %v5463_v23 = vpop.f32.mrf.mxu1 }
 0x3e4   :  { %v11367_v56 = vadd.f32 %v5463_v23, %v5083_v7  ;;  %v5110_v47 = vpop.f32.mrf.mxu0  ;;  %v14002_v23 = vld [vmem:[#allocation206_spill] sm:$0xff] }
 0x3e5   :  { %v5111_v36 = vadd.f32 %v5110_v47, %v13998_v61  ;;  %v5473_v30 = vpop.f32.mrf.mxu1 }
 0x3e6   :  { %v11370_v12 = vadd.f32 %v5473_v30, %v5091_v39  ;;  %v5112_v15 = vpop.f32.mrf.mxu0 }
 0x3e7   :  { %v5113_v0 = vadd.f32 %v5112_v15, %v13999_v63  ;;  %v5475_v41 = vpop.f32.mrf.mxu1 }
 0x3e8   :  { %v11373_v18 = vadd.f32 %v5475_v41, %v5093_v13  ;;  %v5120_v57 = vpop.f32.mrf.mxu0 }
 0x3e9   :  { %v5121_v59 = vadd.f32 %v5120_v57, %v14000_v44  ;;  %v5485_v5 = vpop.f32.mrf.mxu1 }
 0x3ea   :  { %v11376_v33 = vadd.f32 %v5485_v5, %v5101_v26  ;;  %v5122_v7 = vpop.f32.mrf.mxu0 }
 0x3eb   :  { %v5123_v37 = vadd.f32 %v5122_v7, %v14001_v43  ;;  %v5487_v35 = vpop.f32.mrf.mxu1 }
 0x3ec   :  { %v11379_v11 = vadd.f32 %v5487_v35, %v5103_v6  ;;  %v5130_v39 = vpop.f32.mrf.mxu0 }
 0x3ed   :  { %v5131_v47 = vadd.f32 %v5130_v39, %v14002_v23  ;;  %v5497_v61 = vpop.f32.mrf.mxu1 }
 0x3ee   :  { %v11382_v30 = vadd.f32 %v5497_v61, %v5111_v36  ;;  %v5132_v13 = vpop.f32.mrf.mxu0 }
 0x3ef   :  { %v5133_v15 = vadd.f32 %v5132_v13, %v11211_v52  ;;  %v5499_v63 = vpop.f32.mrf.mxu1 }
 0x3f0   :  { %v11385_v41 = vadd.f32 %v5499_v63, %v5113_v0  ;;  %v5140_v26 = vpop.f32.mrf.mxu0 }
 0x3f1   :  { %v5141_v57 = vadd.f32 %v5140_v26, %v11220_v25  ;;  %v5509_v44 = vpop.f32.mrf.mxu1 }
 0x3f2   :  { %v11388_v5 = vadd.f32 %v5509_v44, %v5121_v59  ;;  %v5142_v6 = vpop.f32.mrf.mxu0 }
 0x3f3   :  { %v5143_v7 = vadd.f32 %v5142_v6, %v11230_v17  ;;  %v5511_v43 = vpop.f32.mrf.mxu1 }
 0x3f4   :  { %v11391_v35 = vadd.f32 %v5511_v43, %v5123_v37  ;;  %v5150_v36 = vpop.f32.mrf.mxu0 }
 0x3f5   :  { %v5151_v39 = vadd.f32 %v5150_v36, %v11238_v60  ;;  %v5521_v23 = vpop.f32.mrf.mxu1 }
 0x3f6   :  { %v11394_v52 = vadd.f32 %v5521_v23, %v5131_v47  ;;  %v5152_v0 = vpop.f32.mrf.mxu0 }
 0x3f7   :  { %v5153_v61 = vadd.f32 %v5152_v0, %v11247_v2  ;;  %v5523_v13 = vpop.f32.mrf.mxu1 }
 0x3f8   :  { %v11397_v25 = vadd.f32 %v5523_v13, %v5133_v15  ;;  %v5160_v59 = vpop.f32.mrf.mxu0 }
 0x3f9   :  { %v5161_v63 = vadd.f32 %v5160_v59, %v11254_v28  ;;  %v5533_v26 = vpop.f32.mrf.mxu1 }
 0x3fa   :  { %v11400_v17 = vadd.f32 %v5533_v26, %v5141_v57  ;;  %v5162_v37 = vpop.f32.mrf.mxu0 }
 0x3fb   :  { %v5163_v44 = vadd.f32 %v5162_v37, %v11261_v9  ;;  %v5535_v6 = vpop.f32.mrf.mxu1 }
 0x3fc   :  { %v11403_v60 = vadd.f32 %v5535_v6, %v5143_v7  ;;  %v5762_v47 = vpop.f32.mrf.mxu0 }
 0x3fd   :  { %v5545_v43 = vpop.f32.mrf.mxu1  ;;  %v5763_v26 = vadd.f32 %v5762_v47, %v11266_v34 }
 0x3fe   :  { %14003 = vst [vmem:[#allocation155_spill] sm:$0xff] %v11403_v60  ;;  %v11405_v36 = vadd.f32 %v5545_v43, %v5151_v39  ;;  %v5764_v2 = vpop.f32.mrf.mxu0 }
 0x3ff   :  { %v5547_v23 = vpop.f32.mrf.mxu1  ;;  %v5765_v6 = vadd.f32 %v5764_v2, %v11271_v55 }
 0x400   :  { %14004 = vst [vmem:[#allocation60_spill] sm:$0xff] %v11405_v36  ;;  %v11407_v15 = vadd.f32 %v5547_v23, %v5153_v61  ;;  %v5770_v0 = vpop.f32.mrf.mxu0 }
 0x401   :  { %v5557_v13 = vpop.f32.mrf.mxu1  ;;  %v5771_v61 = vadd.f32 %v5770_v0, %v11277_v51 }
 0x402   :  { %14005 = vst [vmem:[#allocation207_spill] sm:$0xff] %v11407_v15  ;;  %v11409_v28 = vadd.f32 %v5557_v13, %v5161_v63  ;;  %v5772_v57 = vpop.f32.mrf.mxu0 }
 0x403   :  { %v5559_v59 = vpop.f32.mrf.mxu1  ;;  %v5773_v13 = vadd.f32 %v5772_v57, %v11280_v20 }
 0x404   :  { %v11412_v9 = vadd.f32 %v5559_v59, %v5163_v44  ;;  %v5778_v7 = vpop.f32.mrf.mxu0 }
 0x405   :  { %v6063_v37 = vpop.f32.mrf.mxu1  ;;  %v5779_v55 = vadd.f32 %v5778_v7, %v11285_v3 }
 0x406   :  { %v6064_v39 = vadd.f32 %v6063_v37, %v5763_v26  ;;  %v5780_v43 = vpop.f32.mrf.mxu0 }
 0x407   :  { %v6065_v36 = vpop.f32.mrf.mxu1  ;;  %v5781_v20 = vadd.f32 %v5780_v43, %v11289_v31 }
 0x408   :  { %v6252_v23 = vmax.f32 %v6064_v39, 0.0  ;;  %v6066_v15 = vadd.f32 %v6065_v36, %v5765_v6  ;;  %v5786_v60 = vpop.f32.mrf.mxu0 }
 0x409   :  { %v6071_v63 = vpop.f32.mrf.mxu1  ;;  %v5787_v3 = vadd.f32 %v5786_v60, %v11292_v27 }
 0x40a   :  { %6300 = vst [vmem:[%s11632_s3] sm:$0xff] %v6252_v23  ;;  %v6253_v34 = vmax.f32 %v6066_v15, 0.0  ;;  %v6072_v44 = vadd.f32 %v6071_v63, %v5771_v61  ;;  %v5788_v47 = vpop.f32.mrf.mxu0 }
 0x40b   :  { %v6073_v59 = vpop.f32.mrf.mxu1  ;;  %v5789_v31 = vadd.f32 %v5788_v47, %v11295_v50 }
 0x40c   :  { %6301 = vst.msk [vmem:[%s11632_s3 + $0x8] sm:$0xff] %vm27_vm0, %v6253_v34  ;;  %v6254_v51 = vmax.f32 %v6072_v44, 0.0  ;;  %v6074_v36 = vadd.f32 %v6073_v59, %v5773_v13  ;;  %v5794_v2 = vpop.f32.mrf.mxu0 }
 0x40d   :  { %v6079_v0 = vpop.f32.mrf.mxu1  ;;  %v5795_v27 = vadd.f32 %v5794_v2, %v11298_v38 }
 0x40e   :  { %6302 = vst [vmem:[%s11632_s3 + $0x10] sm:$0xff] %v6254_v51  ;;  %v6255_v15 = vmax.f32 %v6074_v36, 0.0  ;;  %v6080_v57 = vadd.f32 %v6079_v0, %v5779_v55  ;;  %v5796_v26 = vpop.f32.mrf.mxu0 }
 0x40f   :  { %v6081_v37 = vpop.f32.mrf.mxu1  ;;  %v5797_v50 = vadd.f32 %v5796_v26, %v11301_v4 }
 0x410   :  { %6303 = vst.msk [vmem:[%s11632_s3 + $0x18] sm:$0xff] %vm27_vm0, %v6255_v15  ;;  %v6256_v7 = vmax.f32 %v6080_v57, 0.0  ;;  %v6082_v6 = vadd.f32 %v6081_v37, %v5781_v20  ;;  %v5802_v39 = vpop.f32.mrf.mxu0 }
 0x411   :  { %v6087_v61 = vpop.f32.mrf.mxu1  ;;  %v5803_v38 = vadd.f32 %v5802_v39, %v11304_v46 }
 0x412   :  { %6304 = vst [vmem:[%s11632_s3 + $0x20] sm:$0xff] %v6256_v7  ;;  %v6257_v43 = vmax.f32 %v6082_v6, 0.0  ;;  %v6088_v23 = vadd.f32 %v6087_v61, %v5787_v3  ;;  %v5804_v63 = vpop.f32.mrf.mxu0 }
 0x413   :  { %v6089_v13 = vpop.f32.mrf.mxu1  ;;  %v5805_v4 = vadd.f32 %v5804_v63, %v11307_v32 }
 0x414   :  { %6305 = vst.msk [vmem:[%s11632_s3 + $0x28] sm:$0xff] %vm27_vm0, %v6257_v43  ;;  %v6258_v60 = vmax.f32 %v6088_v23, 0.0  ;;  %v6090_v34 = vadd.f32 %v6089_v13, %v5789_v31  ;;  %v5810_v44 = vpop.f32.mrf.mxu0 }
 0x415   :  { %v6095_v59 = vpop.f32.mrf.mxu1  ;;  %v5811_v46 = vadd.f32 %v5810_v44, %v11310_v22 }
 0x416   :  { %6306 = vst [vmem:[%s11632_s3 + $0x30] sm:$0xff] %v6258_v60  ;;  %v6259_v47 = vmax.f32 %v6090_v34, 0.0  ;;  %v6096_v55 = vadd.f32 %v6095_v59, %v5795_v27  ;;  %v5812_v51 = vpop.f32.mrf.mxu0 }
 0x417   :  { %v6097_v36 = vpop.f32.mrf.mxu1  ;;  %v5813_v32 = vadd.f32 %v5812_v51, %v11313_v16 }
 0x418   :  { %6307 = vst.msk [vmem:[%s11632_s3 + $0x38] sm:$0xff] %vm27_vm0, %v6259_v47  ;;  %v6260_v2 = vmax.f32 %v6096_v55, 0.0  ;;  %v6098_v0 = vadd.f32 %v6097_v36, %v5797_v50  ;;  %v5818_v20 = vpop.f32.mrf.mxu0 }
 0x419   :  { %v6103_v15 = vpop.f32.mrf.mxu1  ;;  %v5819_v22 = vadd.f32 %v5818_v20, %v11316_v53 }
 0x41a   :  { %6308 = vst [vmem:[%s11632_s3 + $0x40] sm:$0xff] %v6260_v2  ;;  %v6261_v57 = vmax.f32 %v6098_v0, 0.0  ;;  %v6104_v26 = vadd.f32 %v6103_v15, %v5803_v38  ;;  %v5820_v37 = vpop.f32.mrf.mxu0 }
 0x41b   :  { %v6105_v3 = vpop.f32.mrf.mxu1  ;;  %v5821_v16 = vadd.f32 %v5820_v37, %v11319_v58 }
 0x41c   :  { %6309 = vst.msk [vmem:[%s11632_s3 + $0x48] sm:$0xff] %vm27_vm0, %v6261_v57  ;;  %v6262_v7 = vmax.f32 %v6104_v26, 0.0  ;;  %v6106_v6 = vadd.f32 %v6105_v3, %v5805_v4  ;;  %v5826_v39 = vpop.f32.mrf.mxu0 }
 0x41d   :  { %v6111_v61 = vpop.f32.mrf.mxu1  ;;  %v5827_v53 = vadd.f32 %v5826_v39, %v11322_v19 }
 0x41e   :  { %6310 = vst [vmem:[%s11632_s3 + $0x50] sm:$0xff] %v6262_v7  ;;  %v6263_v31 = vmax.f32 %v6106_v6, 0.0  ;;  %v6112_v43 = vadd.f32 %v6111_v61, %v5811_v46  ;;  %v5828_v23 = vpop.f32.mrf.mxu0 }
 0x41f   :  { %v6113_v63 = vpop.f32.mrf.mxu1  ;;  %v5829_v58 = vadd.f32 %v5828_v23, %v11325_v62 }
 0x420   :  { %6311 = vst.msk [vmem:[%s11632_s3 + $0x58] sm:$0xff] %vm27_vm0, %v6263_v31  ;;  %v6264_v13 = vmax.f32 %v6112_v43, 0.0  ;;  %v6114_v27 = vadd.f32 %v6113_v63, %v5813_v32  ;;  %v5834_v60 = vpop.f32.mrf.mxu0 }
 0x421   :  { %v6119_v34 = vpop.f32.mrf.mxu1  ;;  %v5835_v19 = vadd.f32 %v5834_v60, %v11328_v8 }
 0x422   :  { %6312 = vst [vmem:[%s11632_s3 + $0x60] sm:$0xff] %v6264_v13  ;;  %v6265_v44 = vmax.f32 %v6114_v27, 0.0  ;;  %v6120_v59 = vadd.f32 %v6119_v34, %v5819_v22  ;;  %v5836_v50 = vpop.f32.mrf.mxu0 }
 0x423   :  { %v6121_v47 = vpop.f32.mrf.mxu1  ;;  %v5837_v62 = vadd.f32 %v5836_v50, %v11331_v48 }
 0x424   :  { %6313 = vst.msk [vmem:[%s11632_s3 + $0x68] sm:$0xff] %vm27_vm0, %v6265_v44  ;;  %v6266_v55 = vmax.f32 %v6120_v59, 0.0  ;;  %v6122_v51 = vadd.f32 %v6121_v47, %v5821_v16  ;;  %v5842_v36 = vpop.f32.mrf.mxu0 }
 0x425   :  { %v6127_v38 = vpop.f32.mrf.mxu1  ;;  %v5843_v8 = vadd.f32 %v5842_v36, %v11334_v40 }
 0x426   :  { %6314 = vst [vmem:[%s11632_s3 + $0x70] sm:$0xff] %v6266_v55  ;;  %v6267_v2 = vmax.f32 %v6122_v51, 0.0  ;;  %v6128_v0 = vadd.f32 %v6127_v38, %v5827_v53  ;;  %v5844_v20 = vpop.f32.mrf.mxu0 }
 0x427   :  { %v6129_v15 = vpop.f32.mrf.mxu1  ;;  %v5845_v48 = vadd.f32 %v5844_v20, %v11337_v45 }
 0x428   :  { %6315 = vst.msk [vmem:[%s11632_s3 + $0x78] sm:$0xff] %vm27_vm0, %v6267_v2  ;;  %v6268_v4 = vmax.f32 %v6128_v0, 0.0  ;;  %v6130_v57 = vadd.f32 %v6129_v15, %v5829_v58  ;;  %v5850_v26 = vpop.f32.mrf.mxu0 }
 0x429   :  { %v6135_v37 = vpop.f32.mrf.mxu1  ;;  %v5851_v40 = vadd.f32 %v5850_v26, %v11340_v21 }
 0x42a   :  { %6316 = vst [vmem:[%s11632_s3 + $0x80] sm:$0xff] %v6268_v4  ;;  %v6269_v3 = vmax.f32 %v6130_v57, 0.0  ;;  %v6136_v46 = vadd.f32 %v6135_v37, %v5835_v19  ;;  %v5852_v7 = vpop.f32.mrf.mxu0 }
 0x42b   :  { %v6137_v6 = vpop.f32.mrf.mxu1  ;;  %v5853_v45 = vadd.f32 %v5852_v7, %v11343_v14 }
 0x42c   :  { %6317 = vst.msk [vmem:[%s11632_s3 + $0x88] sm:$0xff] %vm27_vm0, %v6269_v3  ;;  %v6270_v39 = vmax.f32 %v6136_v46, 0.0  ;;  %v6138_v61 = vadd.f32 %v6137_v6, %v5837_v62  ;;  %v5858_v32 = vpop.f32.mrf.mxu0 }
 0x42d   :  { %v6143_v31 = vpop.f32.mrf.mxu1  ;;  %v5859_v21 = vadd.f32 %v5858_v32, %v11346_v24 }
 0x42e   :  { %6318 = vst [vmem:[%s11632_s3 + $0x90] sm:$0xff] %v6270_v39  ;;  %v6271_v43 = vmax.f32 %v6138_v61, 0.0  ;;  %v6144_v23 = vadd.f32 %v6143_v31, %v5843_v8  ;;  %v5860_v63 = vpop.f32.mrf.mxu0 }
 0x42f   :  { %v6145_v22 = vpop.f32.mrf.mxu1  ;;  %v5861_v14 = vadd.f32 %v5860_v63, %v11349_v1 }
 0x430   :  { %6319 = vst.msk [vmem:[%s11632_s3 + $0x98] sm:$0xff] %vm27_vm0, %v6271_v43  ;;  %v6272_v13 = vmax.f32 %v6144_v23, 0.0  ;;  %v6146_v27 = vadd.f32 %v6145_v22, %v5845_v48  ;;  %v5866_v60 = vpop.f32.mrf.mxu0 }
 0x431   :  { %v6151_v34 = vpop.f32.mrf.mxu1  ;;  %v5867_v24 = vadd.f32 %v5866_v60, %v11352_v54 }
 0x432   :  { %6320 = vst [vmem:[%s11632_s3 + $0xa0] sm:$0xff] %v6272_v13  ;;  %v6273_v16 = vmax.f32 %v6146_v27, 0.0  ;;  %v6152_v44 = vadd.f32 %v6151_v34, %v5851_v40  ;;  %v5868_v59 = vpop.f32.mrf.mxu0 }
 0x433   :  { %v6153_v50 = vpop.f32.mrf.mxu1  ;;  %v5869_v1 = vadd.f32 %v5868_v59, %v11355_v10 }
 0x434   :  { %6321 = vst.msk [vmem:[%s11632_s3 + $0xa8] sm:$0xff] %vm27_vm0, %v6273_v16  ;;  %v6274_v47 = vmax.f32 %v6152_v44, 0.0  ;;  %v6154_v53 = vadd.f32 %v6153_v50, %v5853_v45  ;;  %v5874_v55 = vpop.f32.mrf.mxu0 }
 0x435   :  { %v6159_v51 = vpop.f32.mrf.mxu1  ;;  %v5875_v54 = vadd.f32 %v5874_v55, %v11358_v49 }
 0x436   :  { %6322 = vst [vmem:[%s11632_s3 + $0xb0] sm:$0xff] %v6274_v47  ;;  %v6275_v36 = vmax.f32 %v6154_v53, 0.0  ;;  %v6160_v38 = vadd.f32 %v6159_v51, %v5859_v21  ;;  %v5876_v58 = vpop.f32.mrf.mxu0 }
 0x437   :  { %v6161_v2 = vpop.f32.mrf.mxu1  ;;  %v5877_v10 = vadd.f32 %v5876_v58, %v11361_v42 }
 0x438   :  { %6323 = vst.msk [vmem:[%s11632_s3 + $0xb8] sm:$0xff] %vm27_vm0, %v6275_v36  ;;  %v6276_v0 = vmax.f32 %v6160_v38, 0.0  ;;  %v6162_v20 = vadd.f32 %v6161_v2, %v5861_v14  ;;  %v5882_v15 = vpop.f32.mrf.mxu0 }
 0x439   :  { %v6167_v19 = vpop.f32.mrf.mxu1  ;;  %v5883_v49 = vadd.f32 %v5882_v15, %v11364_v29 }
 0x43a   :  { %6324 = vst [vmem:[%s11632_s3 + $0xc0] sm:$0xff] %v6276_v0  ;;  %v6277_v4 = vmax.f32 %v6162_v20, 0.0  ;;  %v6168_v57 = vadd.f32 %v6167_v19, %v5867_v24  ;;  %v5884_v26 = vpop.f32.mrf.mxu0 }
 0x43b   :  { %v6169_v37 = vpop.f32.mrf.mxu1  ;;  %v5885_v42 = vadd.f32 %v5884_v26, %v11367_v56 }
 0x43c   :  { %6325 = vst.msk [vmem:[%s11632_s3 + $0xc8] sm:$0xff] %vm27_vm0, %v6277_v4  ;;  %v6278_v62 = vmax.f32 %v6168_v57, 0.0  ;;  %v6170_v3 = vadd.f32 %v6169_v37, %v5869_v1  ;;  %v5890_v46 = vpop.f32.mrf.mxu0 }
 0x43d   :  { %v6175_v7 = vpop.f32.mrf.mxu1  ;;  %v5891_v29 = vadd.f32 %v5890_v46, %v11370_v12 }
 0x43e   :  { %6326 = vst [vmem:[%s11632_s3 + $0xd0] sm:$0xff] %v6278_v62  ;;  %v6279_v6 = vmax.f32 %v6170_v3, 0.0  ;;  %v6176_v8 = vadd.f32 %v6175_v7, %v5875_v54  ;;  %v5892_v39 = vpop.f32.mrf.mxu0 }
 0x43f   :  { %v6177_v61 = vpop.f32.mrf.mxu1  ;;  %v5893_v56 = vadd.f32 %v5892_v39, %v11373_v18 }
 0x440   :  { %6327 = vst.msk [vmem:[%s11632_s3 + $0xd8] sm:$0xff] %vm27_vm0, %v6279_v6  ;;  %v6280_v32 = vmax.f32 %v6176_v8, 0.0  ;;  %v6178_v31 = vadd.f32 %v6177_v61, %v5877_v10  ;;  %v5898_v48 = vpop.f32.mrf.mxu0 }
 0x441   :  { %v6183_v43 = vpop.f32.mrf.mxu1  ;;  %v5899_v12 = vadd.f32 %v5898_v48, %v11376_v33 }
 0x442   :  { %6328 = vst [vmem:[%s11632_s3 + $0xe0] sm:$0xff] %v6280_v32  ;;  %v6281_v23 = vmax.f32 %v6178_v31, 0.0  ;;  %v6184_v63 = vadd.f32 %v6183_v43, %v5883_v49  ;;  %v5900_v22 = vpop.f32.mrf.mxu0  ;;  %v14006_v43 = vld [vmem:[#allocation155_spill] sm:$0xff] }
 0x443   :  { %v6185_v40 = vpop.f32.mrf.mxu1  ;;  %v5901_v18 = vadd.f32 %v5900_v22, %v11379_v11 }
 0x444   :  { %6329 = vst.msk [vmem:[%s11632_s3 + $0xe8] sm:$0xff] %vm27_vm0, %v6281_v23  ;;  %v6282_v13 = vmax.f32 %v6184_v63, 0.0  ;;  %v6186_v27 = vadd.f32 %v6185_v40, %v5885_v42  ;;  %v5906_v60 = vpop.f32.mrf.mxu0  ;;  %v14007_v40 = vld [vmem:[#allocation60_spill] sm:$0xff] }
 0x445   :  { %v6191_v34 = vpop.f32.mrf.mxu1  ;;  %v5907_v33 = vadd.f32 %v5906_v60, %v11382_v30  ;;  %v14008_v60 = vld [vmem:[#allocation207_spill] sm:$0xff] }
 0x446   :  { %6330 = vst [vmem:[%s11632_s3 + $0xf0] sm:$0xff] %v6282_v13  ;;  %v6283_v45 = vmax.f32 %v6186_v27, 0.0  ;;  %v6192_v16 = vadd.f32 %v6191_v34, %v5891_v29  ;;  %v5908_v44 = vpop.f32.mrf.mxu0 }
 0x447   :  { %v6193_v59 = vpop.f32.mrf.mxu1  ;;  %v5909_v11 = vadd.f32 %v5908_v44, %v11385_v41 }
 0x448   :  { %6331 = vst.msk [vmem:[%s11632_s3 + $0xf8] sm:$0xff] %vm27_vm0, %v6283_v45  ;;  %v6284_v50 = vmax.f32 %v6192_v16, 0.0  ;;  %v6194_v21 = vadd.f32 %v6193_v59, %v5893_v56  ;;  %v5914_v47 = vpop.f32.mrf.mxu0 }
 0x449   :  { %v6199_v53 = vpop.f32.mrf.mxu1  ;;  %v5915_v30 = vadd.f32 %v5914_v47, %v11388_v5 }
 0x44a   :  { %6332 = vst [vmem:[%s11632_s3 + $0x100] sm:$0xff] %v6284_v50  ;;  %v6285_v55 = vmax.f32 %v6194_v21, 0.0  ;;  %v6200_v51 = vadd.f32 %v6199_v53, %v5899_v12  ;;  %v5916_v14 = vpop.f32.mrf.mxu0 }
 0x44b   :  { %v6201_v36 = vpop.f32.mrf.mxu1  ;;  %v5917_v41 = vadd.f32 %v5916_v14, %v11391_v35 }
 0x44c   :  { %6333 = vst.msk [vmem:[%s11632_s3 + $0x108] sm:$0xff] %vm27_vm0, %v6285_v55  ;;  %v6286_v38 = vmax.f32 %v6200_v51, 0.0  ;;  %v6202_v58 = vadd.f32 %v6201_v36, %v5901_v18  ;;  %v5922_v2 = vpop.f32.mrf.mxu0 }
 0x44d   :  { %v6207_v24 = vpop.f32.mrf.mxu1  ;;  %v5923_v5 = vadd.f32 %v5922_v2, %v11394_v52 }
 0x44e   :  { %6334 = vst [vmem:[%s11632_s3 + $0x110] sm:$0xff] %v6286_v38  ;;  %v6287_v0 = vmax.f32 %v6202_v58, 0.0  ;;  %v6208_v20 = vadd.f32 %v6207_v24, %v5907_v33  ;;  %v5924_v15 = vpop.f32.mrf.mxu0 }
 0x44f   :  { %v6209_v19 = vpop.f32.mrf.mxu1  ;;  %v5925_v35 = vadd.f32 %v5924_v15, %v11397_v25 }
 0x450   :  { %6335 = vst.msk [vmem:[%s11632_s3 + $0x118] sm:$0xff] %vm27_vm0, %v6287_v0  ;;  %v6288_v1 = vmax.f32 %v6208_v20, 0.0  ;;  %v6210_v4 = vadd.f32 %v6209_v19, %v5909_v11  ;;  %v5930_v57 = vpop.f32.mrf.mxu0 }
 0x451   :  { %v6215_v26 = vpop.f32.mrf.mxu1  ;;  %v5931_v52 = vadd.f32 %v5930_v57, %v11400_v17 }
 0x452   :  { %6336 = vst [vmem:[%s11632_s3 + $0x120] sm:$0xff] %v6288_v1  ;;  %v6289_v37 = vmax.f32 %v6210_v4, 0.0  ;;  %v6216_v54 = vadd.f32 %v6215_v26, %v5915_v30  ;;  %v5932_v62 = vpop.f32.mrf.mxu0 }
 0x453   :  { %v6217_v3 = vpop.f32.mrf.mxu1  ;;  %v5933_v25 = vadd.f32 %v5932_v62, %v14006_v43 }
 0x454   :  { %6337 = vst.msk [vmem:[%s11632_s3 + $0x128] sm:$0xff] %vm27_vm0, %v6289_v37  ;;  %v6290_v46 = vmax.f32 %v6216_v54, 0.0  ;;  %v6218_v7 = vadd.f32 %v6217_v3, %v5917_v41  ;;  %v5938_v10 = vpop.f32.mrf.mxu0 }
 0x455   :  { %v6223_v6 = vpop.f32.mrf.mxu1  ;;  %v5939_v17 = vadd.f32 %v5938_v10, %v14007_v40 }
 0x456   :  { %6338 = vst [vmem:[%s11632_s3 + $0x130] sm:$0xff] %v6290_v46  ;;  %v6291_v8 = vmax.f32 %v6218_v7, 0.0  ;;  %v6224_v39 = vadd.f32 %v6223_v6, %v5923_v5  ;;  %v5940_v61 = vpop.f32.mrf.mxu0 }
 0x457   :  { %v6225_v49 = vpop.f32.mrf.mxu1  ;;  %v5941_v34 = vadd.f32 %v5940_v61, %v14008_v60 }
 0x458   :  { %6339 = vst.msk [vmem:[%s11632_s3 + $0x138] sm:$0xff] %vm27_vm0, %v6291_v8  ;;  %v6292_v32 = vmax.f32 %v6224_v39, 0.0  ;;  %v6226_v31 = vadd.f32 %v6225_v49, %v5925_v35  ;;  %v5946_v63 = vpop.f32.mrf.mxu0 }
 0x459   :  { %v6231_v48 = vpop.f32.mrf.mxu1  ;;  %v5947_v59 = vadd.f32 %v5946_v63, %v11409_v28 }
 0x45a   :  { %6340 = vst [vmem:[%s11632_s3 + $0x140] sm:$0xff] %v6292_v32  ;;  %v6293_v42 = vmax.f32 %v6226_v31, 0.0  ;;  %v6232_v23 = vadd.f32 %v6231_v48, %v5931_v52  ;;  %v5948_v16 = vpop.f32.mrf.mxu0 }
 0x45b   :  { %v6233_v22 = vpop.f32.mrf.mxu1  ;;  %v5949_v47 = vadd.f32 %v5948_v16, %v11412_v9 }
 0x45c   :  { %6341 = vst.msk [vmem:[%s11632_s3 + $0x148] sm:$0xff] %vm27_vm0, %v6293_v42  ;;  %v6294_v29 = vmax.f32 %v6232_v23, 0.0  ;;  %v6234_v13 = vadd.f32 %v6233_v22, %v5933_v25 }
 0x45d   :  { %v6239_v27 = vpop.f32.mrf.mxu1 }
 0x45e   :  { %6342 = vst [vmem:[%s11632_s3 + $0x150] sm:$0xff] %v6294_v29  ;;  %v6295_v56 = vmax.f32 %v6234_v13, 0.0  ;;  %v6240_v45 = vadd.f32 %v6239_v27, %v5939_v17 }
 0x45f   :  { %v6241_v44 = vpop.f32.mrf.mxu1 }
 0x460   :  { %6343 = vst.msk [vmem:[%s11632_s3 + $0x158] sm:$0xff] %vm27_vm0, %v6295_v56  ;;  %v6296_v12 = vmax.f32 %v6240_v45, 0.0  ;;  %v6242_v50 = vadd.f32 %v6241_v44, %v5941_v34 }
 0x461   :  { %v6247_v21 = vpop.f32.mrf.mxu1 }
 0x462   :  { %6344 = vst [vmem:[%s11632_s3 + $0x160] sm:$0xff] %v6296_v12  ;;  %v6297_v53 = vmax.f32 %v6242_v50, 0.0  ;;  %v6248_v18 = vadd.f32 %v6247_v21, %v5947_v59 }
 0x463   :  { %v6249_v55 = vpop.f32.mrf.mxu1 }
 0x464   :  { %6345 = vst.msk [vmem:[%s11632_s3 + $0x168] sm:$0xff] %vm27_vm0, %v6297_v53  ;;  %v6298_v28 = vmax.f32 %v6248_v18, 0.0  ;;  %v6250_v51 = vadd.f32 %v6249_v55, %v5949_v47 }
 0x466   :  { %6346 = vst [vmem:[%s11632_s3 + $0x170] sm:$0xff] %v6298_v28  ;;  %v6299_v14 = vmax.f32 %v6250_v51, 0.0 }
 0x468   :  { %6347 = vst.msk [vmem:[%s11632_s3 + $0x178] sm:$0xff] %vm27_vm0, %v6299_v14 }

</bundles_post_ra>
